<compile_context>
chip_gen: v5e
topology: v5e:2x2
jax: 0.10.0
libtpu: 0.0.40
codegen_flags: <defaults>
</compile_context>

<pallas_src>
import math
from functools import partial

import jax
import jax.numpy as jnp
from jax import lax
from jax.experimental import pallas as pl
from jax.experimental.pallas import tpu as pltpu


def _softplus(x):
    # matches torch.nn.functional.softplus (threshold=20)
    return jnp.where(x > 20.0, x, jnp.log1p(jnp.exp(jnp.minimum(x, 20.0))))


def _largest_tile(n, cap):
    """Largest t <= cap with n % t == 0 and (t % 8 == 0 or t == n)."""
    if n <= cap:
        return n
    for t in range(cap, 0, -1):
        if n % t == 0 and t % 8 == 0:
            return t
    for t in range(cap, 0, -1):
        if n % t == 0:
            return t
    return n


# ---------------- Kernel 1: ln_1 + in_proj (two lane-dense outputs) ----------------
def ln_inproj_kernel(x_ref, g_ref, b_ref, wx_ref, wz_ref, xo_ref, zo_ref):
    x = x_ref[...]                                            # (TM, C) f32
    mu = jnp.mean(x, axis=-1, keepdims=True)
    var = jnp.mean((x - mu) ** 2, axis=-1, keepdims=True)
    xn = (x - mu) * lax.rsqrt(var + 1e-6)
    xn = (xn * g_ref[...] + b_ref[...]).astype(wx_ref.dtype)
    xo_ref[...] = jnp.dot(xn, wx_ref[...],
                          preferred_element_type=jnp.float32).astype(xo_ref.dtype)
    zo_ref[...] = jnp.dot(xn, wz_ref[...],
                          preferred_element_type=jnp.float32).astype(zo_ref.dtype)


# ---------------- Kernel 2: depthwise 3x3 conv + SiLU (halo handled in-kernel) -----
def dwconv_silu_kernel(x_ref, w_ref, b_ref, out_ref):
    x = x_ref[0].astype(jnp.float32)                          # (H, W, CB)
    w = w_ref[...]                                            # (3, 3, CB)

    def shift_h(v, d):                                        # out[i] = v[i+d], zero pad
        if d == 0:
            return v
        z = jnp.zeros((1,) + v.shape[1:], v.dtype)
        return (jnp.concatenate([v[1:], z], axis=0) if d > 0
                else jnp.concatenate([z, v[:-1]], axis=0))

    def shift_w(v, d):
        if d == 0:
            return v
        z = jnp.zeros((v.shape[0], 1, v.shape[2]), v.dtype)
        return (jnp.concatenate([v[:, 1:], z], axis=1) if d > 0
                else jnp.concatenate([z, v[:, :-1]], axis=1))

    acc = jnp.zeros(x.shape, jnp.float32)
    for kh in range(3):
        for kw in range(3):
            acc = acc + shift_w(shift_h(x, kh - 1), kw - 1) * w[kh, kw][None, None, :]
    acc = acc + b_ref[...][None]                              # (1,1,CB) broadcast
    out_ref[...] = (acc * jax.nn.sigmoid(acc)).astype(out_ref.dtype)[None]


# ---------------- Kernel 3: selective scan, grid (B, 2 dirs, L-chunks) -------------
def ss_scan_kernel(xs_ref, wd_ref, wbc_ref, dtb_ref, at_ref, dd_ref, out_ref,
                   h_s, delta_s, bc_s, *, chunk, reverse):
    # xs_ref/out_ref:(LT,Din)  wd:(Din,Din)bf16  wbc:(Din,2N)bf16
    # dtb:(1,Din) at:(N,Din)=A^T dd:(1,Din) f32
    # h_s:(N,Din) f32 scratch, persists across the L-chunk grid axis.
    n_state = at_ref.shape[0]
    LT = out_ref.shape[0]
    n_chunks = LT // chunk

    @pl.when(pl.program_id(2) == 0)                           # new (b, dir): reset state
    def _():
        h_s[...] = jnp.zeros(h_s.shape, h_s.dtype)

    xk = xs_ref[...]                                          # (LT, Din) bf16
    # fused dt projection: dt = xk @ (x_proj[:R].T @ dt_proj.T), bf16 MXU, f32 acc
    dt = jnp.dot(xk, wd_ref[...], preferred_element_type=jnp.float32)
    delta_s[...] = _softplus(dt + dtb_ref[...])               # (LT, Din)
    # B/C projection, columns [0:N]=B, [N:2N]=C
    bc_s[...] = jnp.dot(xk, wbc_ref[...], preferred_element_type=jnp.float32)

    a_t = at_ref[...]                                         # (N, Din)
    d_skip = dd_ref[...]                                      # (1, Din)

    def chunk_body(c, h):
        cc = (n_chunks - 1 - c) if reverse else c
        base = pl.multiple_of(cc * chunk, chunk)
        d_ch = delta_s[pl.ds(base, chunk), :]                 # (CH, Din)
        bc_ch = bc_s[pl.ds(base, chunk), :].T                 # (2N, CH)
        x_ch = xs_ref[pl.ds(base, chunk), :].astype(jnp.float32)
        du_ch = d_ch * x_ch                                   # delta*u (no scratch)
        # exp hoisted off the serial critical path (EUP pipelines per chunk)
        dA_all = jnp.exp(d_ch[:, None, :] * a_t[None, :, :])  # (CH, N, Din)
        order = range(chunk - 1, -1, -1) if reverse else range(chunk)
        ys = [None] * chunk
        for i in order:                                       # unrolled recurrence
            h = dA_all[i] * h + bc_ch[:n_state, i:i + 1] * du_ch[i:i + 1, :]
            ys[i] = jnp.sum(bc_ch[n_state:, i:i + 1] * h, axis=0, keepdims=True)
        out_ref[pl.ds(base, chunk), :] = (jnp.concatenate(ys, axis=0)
                                          + d_skip * x_ch).astype(out_ref.dtype)
        return h

    h_s[...] = lax.fori_loop(0, n_chunks, chunk_body, h_s[...])


# ---------------- Kernel 4: merge + out_norm + gate + out_proj + residual ----------
def combine_gate_outproj_kernel(yhf_ref, yhr_ref, ywf_ref, ywr_ref, z_ref,
                                g_ref, b_ref, w_ref, inp_ref, out_ref):
    y = (yhf_ref[...].astype(jnp.float32) + yhr_ref[...].astype(jnp.float32)
         + ywf_ref[...].astype(jnp.float32) + ywr_ref[...].astype(jnp.float32))
    mu = jnp.mean(y, axis=-1, keepdims=True)
    var = jnp.mean((y - mu) ** 2, axis=-1, keepdims=True)
    yn = (y - mu) * lax.rsqrt(var + 1e-5) * g_ref[...] + b_ref[...]
    z = z_ref[...].astype(jnp.float32)
    gated = yn * (z * jax.nn.sigmoid(z))
    out_ref[...] = inp_ref[...] + jnp.dot(gated.astype(w_ref.dtype), w_ref[...],
                                          preferred_element_type=jnp.float32)


# ---------------- Wrapper ----------------
def vss_block_forward(x, p):
    B, H, W, C = x.shape
    d_inner = p['in_proj_w'].shape[1] // 2
    d_state = p['A_logs'].shape[2]
    R = p['dt_proj_w'].shape[2]
    L = H * W
    M = B * L
    f32, bf16 = jnp.float32, jnp.bfloat16

    x_flat = x.reshape(M, C)

    # ---- K1: ln_1 + in_proj, split weights host-side -> two lane-dense outputs ----
    TM = min(M, 1024)
    grid_m = pl.cdiv(M, TM)
    w_x = p['in_proj_w'][:, :d_inner].astype(bf16)
    w_z = p['in_proj_w'][:, d_inner:].astype(bf16)
    x_half, z_half = pl.pallas_call(
        ln_inproj_kernel,
        out_shape=(jax.ShapeDtypeStruct((M, d_inner), bf16),
                   jax.ShapeDtypeStruct((M, d_inner), bf16)),
        grid=(grid_m,),
        in_specs=[pl.BlockSpec((TM, C), lambda i: (i, 0)),
                  pl.BlockSpec((1, C), lambda i: (0, 0)),
                  pl.BlockSpec((1, C), lambda i: (0, 0)),
                  pl.BlockSpec((C, d_inner), lambda i: (0, 0)),
                  pl.BlockSpec((C, d_inner), lambda i: (0, 0))],
        out_specs=[pl.BlockSpec((TM, d_inner), lambda i: (i, 0)),
                   pl.BlockSpec((TM, d_inner), lambda i: (i, 0))],
        compiler_params=pltpu.CompilerParams(dimension_semantics=("parallel",)),
    )(x_flat, p['ln1_g'], p['ln1_b'], w_x, w_z)

    # ---- K2: depthwise conv 3x3 + SiLU (no host pad, channel-tiled) ----
    CB = min(d_inner, 128)
    n_cb = pl.cdiv(d_inner, CB)
    x_in = x_half.reshape(B, H, W, d_inner)                   # free reshape
    x_act = pl.pallas_call(
        dwconv_silu_kernel,
        out_shape=jax.ShapeDtypeStruct((B, H, W, d_inner), bf16),
        grid=(B, n_cb),
        in_specs=[pl.BlockSpec((1, H, W, CB), lambda b, c: (b, 0, 0, c)),
                  pl.BlockSpec((3, 3, CB), lambda b, c: (0, 0, c)),
                  pl.BlockSpec((1, CB), lambda b, c: (0, c))],
        out_specs=pl.BlockSpec((1, H, W, CB), lambda b, c: (b, 0, 0, c)),
        compiler_params=pltpu.CompilerParams(
            dimension_semantics=("parallel", "parallel"),
            vmem_limit_bytes=48 * 1024 * 1024),
    )(x_in, p['conv_w'], p['conv_b'])
    # TODO(synk): tile H (with halo rows) for very large H*W to bound per-step VMEM further.

    # ---- scan inputs: only HW and WH copies materialized (reversed dirs are
    #      handled by a statically-reversed kernel variant, no flips in XLA) ----
    x_hw = x_act.reshape(B, L, d_inner)
    x_wh = jnp.transpose(x_act, (0, 2, 1, 3)).reshape(B, L, d_inner)
    xs = jnp.stack([x_hw, x_wh], axis=1)                      # (B, 2, L, Din) bf16

    # host-side weight relayout / fusion (cheap, once per call under jit)
    w_delta = jnp.einsum('krd,kir->kdi', p['x_proj_w'][:, :R, :],
                         p['dt_proj_w']).astype(bf16)         # (K, Din, Din)
    w_bc = jnp.transpose(p['x_proj_w'][:, R:, :], (0, 2, 1)).astype(bf16)  # (K,Din,2N)
    a_t = -jnp.exp(jnp.transpose(p['A_logs'], (0, 2, 1)))     # (K, N, Din)

    LT = _largest_tile(L, 512)                                # L-chunk per grid step
    n_lt = L // LT
    CH = 1
    for c in (16, 8, 4, 2):
        if LT % c == 0:
            CH = c
            break

    def scan_call(reverse):
        if reverse:
            io_map = lambda b, k, l: (b, k, n_lt - 1 - l, 0)  # walk slabs back-to-front
            pr_map = lambda b, k, l: (k + 2, 0, 0)            # params for dirs 2,3
        else:
            io_map = lambda b, k, l: (b, k, l, 0)
            pr_map = lambda b, k, l: (k, 0, 0)
        return pl.pallas_call(
            partial(ss_scan_kernel, chunk=CH, reverse=reverse),
            out_shape=jax.ShapeDtypeStruct((B, 2, L, d_inner), bf16),
            grid=(B, 2, n_lt),
            in_specs=[pl.BlockSpec((None, None, LT, d_inner), io_map),
                      pl.BlockSpec((None, d_inner, d_inner), pr_map),
                      pl.BlockSpec((None, d_inner, 2 * d_state), pr_map),
                      pl.BlockSpec((None, 1, d_inner), pr_map),
                      pl.BlockSpec((None, d_state, d_inner), pr_map),
                      pl.BlockSpec((None, 1, d_inner), pr_map)],
            out_specs=pl.BlockSpec((None, None, LT, d_inner), io_map),
            scratch_shapes=[pltpu.VMEM((d_state, d_inner), jnp.float32),   # h (persists)
                            pltpu.VMEM((LT, d_inner), jnp.float32),        # delta
                            pltpu.VMEM((LT, 2 * d_state), jnp.float32)],   # [B | C]
            compiler_params=pltpu.CompilerParams(
                dimension_semantics=("parallel", "parallel", "arbitrary"),
                vmem_limit_bytes=32 * 1024 * 1024),
        )

    args = (xs, w_delta, w_bc, p['dt_proj_b'], a_t, p['Ds'])
    out_fwd = scan_call(False)(*args)    # dirs 0 (HW), 1 (WH)
    out_rev = scan_call(True)(*args)     # dirs 2, 3 -- written already un-flipped

    # undo only the WH permutation (layout plumbing in XLA; HW dirs are fed directly)
    # TODO(synk): the WH<->HW transpose has no rectangular BlockSpec equivalent.
    y_wh_f = jnp.transpose(out_fwd[:, 1].reshape(B, W, H, d_inner),
                           (0, 2, 1, 3)).reshape(B, L, d_inner)
    y_wh_r = jnp.transpose(out_rev[:, 1].reshape(B, W, H, d_inner),
                           (0, 2, 1, 3)).reshape(B, L, d_inner)

    # ---- K4: merge + out_norm + gate + out_proj + residual ----
    TL = _largest_tile(L, 1024)
    n_tl = L // TL
    out = pl.pallas_call(
        combine_gate_outproj_kernel,
        out_shape=jax.ShapeDtypeStruct((B, L, C), f32),
        grid=(B, n_tl),
        in_specs=[pl.BlockSpec((None, None, TL, d_inner), lambda b, l: (b, 0, l, 0)),
                  pl.BlockSpec((None, None, TL, d_inner), lambda b, l: (b, 0, l, 0)),
                  pl.BlockSpec((None, TL, d_inner), lambda b, l: (b, l, 0)),
                  pl.BlockSpec((None, TL, d_inner), lambda b, l: (b, l, 0)),
                  pl.BlockSpec((None, TL, d_inner), lambda b, l: (b, l, 0)),
                  pl.BlockSpec((1, d_inner), lambda b, l: (0, 0)),
                  pl.BlockSpec((1, d_inner), lambda b, l: (0, 0)),
                  pl.BlockSpec((d_inner, C), lambda b, l: (0, 0)),
                  pl.BlockSpec((None, TL, C), lambda b, l: (b, l, 0))],
        out_specs=pl.BlockSpec((None, TL, C), lambda b, l: (b, l, 0)),
        compiler_params=pltpu.CompilerParams(
            dimension_semantics=("parallel", "parallel")),
    )(out_fwd, out_rev, y_wh_f, y_wh_r,
      z_half.reshape(B, L, d_inner),
      p['out_norm_g'], p['out_norm_b'], p['out_proj_w'].astype(bf16),
      x.reshape(B, L, C))

    return out.reshape(B, H, W, C)


# ---------------- Pure-JAX reference (for validation) ----------------
def vss_block_reference(x, p):
    B, H, W, C = x.shape
    d_inner = p['in_proj_w'].shape[1] // 2
    d_state = p['A_logs'].shape[2]
    dt_rank = p['dt_proj_w'].shape[2]
    L = H * W

    mu = x.mean(-1, keepdims=True)
    var = ((x - mu) ** 2).mean(-1, keepdims=True)
    xn = (x - mu) / jnp.sqrt(var + 1e-6) * p['ln1_g'].reshape(-1) + p['ln1_b'].reshape(-1)
    xz = xn @ p['in_proj_w']
    xi, z = xz[..., :d_inner], xz[..., d_inner:]

    xp = jnp.pad(xi, ((0, 0), (1, 1), (1, 1), (0, 0)))
    conv = jnp.zeros_like(xi)
    for kh in range(3):
        for kw in range(3):
            conv = conv + xp[:, kh:kh + H, kw:kw + W, :] * p['conv_w'][kh, kw]
    conv = conv + p['conv_b'].reshape(-1)
    xa = conv * jax.nn.sigmoid(conv)

    x_hw = xa.reshape(B, L, d_inner)
    x_wh = jnp.transpose(xa, (0, 2, 1, 3)).reshape(B, L, d_inner)
    xs = jnp.stack([x_hw, x_wh, x_hw[:, ::-1], x_wh[:, ::-1]], axis=1)

    outs = []
    for k in range(4):
        xk = xs[:, k]
        x_dbl = jnp.einsum('bld,cd->blc', xk, p['x_proj_w'][k])
        dtr = x_dbl[..., :dt_rank]
        Bs = x_dbl[..., dt_rank:dt_rank + d_state]
        Cs = x_dbl[..., dt_rank + d_state:]
        dt = jnp.einsum('blr,dr->bld', dtr, p['dt_proj_w'][k])
        delta = _softplus(dt + p['dt_proj_b'][k].reshape(-1))
        A = -jnp.exp(p['A_logs'][k])
        Dk = p['Ds'][k].reshape(-1)

        def step(h, inp):
            d_l, u_l, b_l, c_l = inp
            dA = jnp.exp(d_l[..., None] * A[None])
            h = dA * h + (d_l * u_l)[..., None] * b_l[:, None, :]
            y = jnp.sum(h * c_l[:, None, :], axis=-1) + Dk * u_l
            return h, y

        h0 = jnp.zeros((B, d_inner, d_state), jnp.float32)
        _, ys = lax.scan(step, h0, (jnp.moveaxis(delta, 1, 0), jnp.moveaxis(xk, 1, 0),
                                    jnp.moveaxis(Bs, 1, 0), jnp.moveaxis(Cs, 1, 0)))
        outs.append(jnp.moveaxis(ys, 0, 1))

    y0, y1, y2, y3 = outs
    inv0 = y2[:, ::-1]
    wh = jnp.transpose(y1.reshape(B, W, H, d_inner), (0, 2, 1, 3)).reshape(B, L, d_inner)
    invwh = jnp.transpose(y3[:, ::-1].reshape(B, W, H, d_inner), (0, 2, 1, 3)).reshape(B, L, d_inner)
    ysum = y0 + inv0 + wh + invwh

    mu2 = ysum.mean(-1, keepdims=True)
    var2 = ((ysum - mu2) ** 2).mean(-1, keepdims=True)
    yn = (ysum - mu2) / jnp.sqrt(var2 + 1e-5) * p['out_norm_g'].reshape(-1) + p['out_norm_b'].reshape(-1)
    zf = z.reshape(B, L, d_inner)
    gated = yn * (zf * jax.nn.sigmoid(zf))
    out = x + (gated @ p['out_proj_w']).reshape(B, H, W, C)
    return out


# ---------------- Deterministic parameter init (shapes per SS2D.__init__) ----------------
def init_params(key, d_model, d_state=16, d_conv=3, expand=2):
    d_inner = int(expand * d_model)
    dt_rank = math.ceil(d_model / 16)
    K = 4
    ks = jax.random.split(key, 8)
    p = {}
    p['ln1_g'] = jnp.ones((1, d_model), jnp.float32)
    p['ln1_b'] = jnp.zeros((1, d_model), jnp.float32)
    p['in_proj_w'] = jax.random.normal(ks[0], (d_model, 2 * d_inner), jnp.float32) * 0.1
    p['conv_w'] = jax.random.normal(ks[1], (d_conv, d_conv, d_inner), jnp.float32) * 0.2
    p['conv_b'] = jax.random.normal(ks[2], (1, d_inner), jnp.float32) * 0.05
    p['x_proj_w'] = jax.random.normal(ks[3], (K, dt_rank + 2 * d_state, d_inner), jnp.float32) * 0.1
    dt_std = dt_rank ** -0.5
    p['dt_proj_w'] = jax.random.uniform(ks[4], (K, d_inner, dt_rank), jnp.float32, -dt_std, dt_std)
    dt = jnp.exp(jax.random.uniform(ks[5], (K, 1, d_inner), jnp.float32)
                 * (math.log(0.1) - math.log(0.001)) + math.log(0.001))
    dt = jnp.clip(dt, 1e-4, None)
    p['dt_proj_b'] = dt + jnp.log(-jnp.expm1(-dt))            # inverse-softplus init
    A = jnp.arange(1, d_state + 1, dtype=jnp.float32)
    p['A_logs'] = jnp.log(jnp.broadcast_to(A[None, None, :], (K, d_inner, d_state)))
    p['Ds'] = jnp.ones((K, 1, d_inner), jnp.float32)
    p['out_norm_g'] = jnp.ones((1, d_inner), jnp.float32)
    p['out_norm_b'] = jnp.zeros((1, d_inner), jnp.float32)
    p['out_proj_w'] = jax.random.normal(ks[6], (d_inner, d_model), jnp.float32) * 0.1
    return p


if __name__ == "__main__":
    key = jax.random.PRNGKey(0)
    kx, kp = jax.random.split(key)
    B, H, W, C = 2, 8, 8, 4            # hidden_dim = 4 -> d_inner = 8, d_state = 16, dt_rank = 1
    x = jax.random.normal(kx, (B, H, W, C), jnp.float32)
    params = init_params(kp, C)

    out = jax.jit(vss_block_forward)(x, params)
    out = jax.block_until_ready(out)
    assert out.shape == (B, H, W, C) and out.dtype == jnp.float32

    ref = jax.block_until_ready(vss_block_reference(x, params))
    assert jnp.allclose(out, ref, rtol=3e-2, atol=3e-2), float(jnp.max(jnp.abs(out - ref)))

    print("KERNEL_OK")
</pallas_src>

<mosaic_0001>
module attributes {stable_mosaic.version = 11 : i64} {
  func.func @ln_inproj_kernel(%arg0: i32, %arg1: memref<128x4xf32, #tpu.memory_space<vmem>>, %arg2: memref<1x4xf32, #tpu.memory_space<vmem>>, %arg3: memref<1x4xf32, #tpu.memory_space<vmem>>, %arg4: memref<4x8xbf16, #tpu.memory_space<vmem>>, %arg5: memref<4x8xbf16, #tpu.memory_space<vmem>>, %arg6: memref<128x8xbf16, #tpu.memory_space<vmem>>, %arg7: memref<128x8xbf16, #tpu.memory_space<vmem>>) attributes {dimension_semantics = [#tpu.dimension_semantics<parallel>], iteration_bounds = array<i64: 1>, scalar_prefetch = 0 : i64, scratch_operands = 0 : i64, tpu.core_type = #tpu.core_type<tc>, window_params = [{transform_indices = @transform_0, window_bounds = array<i64: 128, 4>}, {pipeline_mode = #tpu.pipeline_mode<synchronous>, transform_indices = @transform_1, window_bounds = array<i64: 1, 4>}, {pipeline_mode = #tpu.pipeline_mode<synchronous>, transform_indices = @transform_2, window_bounds = array<i64: 1, 4>}, {pipeline_mode = #tpu.pipeline_mode<synchronous>, transform_indices = @transform_3, window_bounds = array<i64: 4, 8>}, {pipeline_mode = #tpu.pipeline_mode<synchronous>, transform_indices = @transform_4, window_bounds = array<i64: 4, 8>}, {transform_indices = @transform_5, window_bounds = array<i64: 128, 8>}, {transform_indices = @transform_6, window_bounds = array<i64: 128, 8>}]} {
    %c0 = arith.constant 0 : index
    %c0_0 = arith.constant 0 : index
    %0 = vector.load %arg1[%c0, %c0_0] : memref<128x4xf32, #tpu.memory_space<vmem>>, vector<128x4xf32>
    %cst = arith.constant dense<0.000000e+00> : vector<128xf32>
    %1 = vector.multi_reduction <add>, %0, %cst [1] : vector<128x4xf32> to vector<128xf32>
    %2 = vector.shape_cast %1 : vector<128xf32> to vector<128x1xf32>
    %cst_1 = arith.constant 4.000000e+00 : f32
    %3 = vector.broadcast %cst_1 : f32 to vector<128x1xf32>
    %4 = arith.divf %2, %3 : vector<128x1xf32>
    %5 = vector.broadcast %4 : vector<128x1xf32> to vector<128x4xf32>
    %6 = arith.subf %0, %5 : vector<128x4xf32>
    %7 = arith.mulf %6, %6 : vector<128x4xf32>
    %cst_2 = arith.constant dense<0.000000e+00> : vector<128xf32>
    %8 = vector.multi_reduction <add>, %7, %cst_2 [1] : vector<128x4xf32> to vector<128xf32>
    %9 = vector.shape_cast %8 : vector<128xf32> to vector<128x1xf32>
    %cst_3 = arith.constant 4.000000e+00 : f32
    %10 = vector.broadcast %cst_3 : f32 to vector<128x1xf32>
    %11 = arith.divf %9, %10 : vector<128x1xf32>
    %12 = vector.broadcast %4 : vector<128x1xf32> to vector<128x4xf32>
    %13 = arith.subf %0, %12 : vector<128x4xf32>
    %cst_4 = arith.constant 9.99999997E-7 : f32
    %14 = vector.broadcast %cst_4 : f32 to vector<128x1xf32>
    %15 = arith.addf %11, %14 : vector<128x1xf32>
    %16 = math.rsqrt %15 : vector<128x1xf32>
    %17 = vector.broadcast %16 : vector<128x1xf32> to vector<128x4xf32>
    %18 = arith.mulf %13, %17 : vector<128x4xf32>
    %c0_5 = arith.constant 0 : index
    %c0_6 = arith.constant 0 : index
    %19 = vector.load %arg2[%c0_5, %c0_6] : memref<1x4xf32, #tpu.memory_space<vmem>>, vector<1x4xf32>
    %20 = vector.broadcast %19 : vector<1x4xf32> to vector<128x4xf32>
    %21 = arith.mulf %18, %20 : vector<128x4xf32>
    %c0_7 = arith.constant 0 : index
    %c0_8 = arith.constant 0 : index
    %22 = vector.load %arg3[%c0_7, %c0_8] : memref<1x4xf32, #tpu.memory_space<vmem>>, vector<1x4xf32>
    %23 = vector.broadcast %22 : vector<1x4xf32> to vector<128x4xf32>
    %24 = arith.addf %21, %23 : vector<128x4xf32>
    %25 = arith.truncf %24 : vector<128x4xf32> to vector<128x4xbf16>
    %c0_9 = arith.constant 0 : index
    %c0_10 = arith.constant 0 : index
    %26 = vector.load %arg4[%c0_9, %c0_10] : memref<4x8xbf16, #tpu.memory_space<vmem>>, vector<4x8xbf16>
    %cst_11 = arith.constant dense<0.000000e+00> : vector<128x8xf32>
    %27 = tpu.matmul %25, %26, %cst_11 {dimension_numbers = #tpu.dot_dimension_numbers<[1], [0], [0], [1], [0, 0, 1, 1], [], []>} : vector<128x4xbf16>, vector<4x8xbf16>, vector<128x8xf32> -> vector<128x8xf32>
    %28 = arith.truncf %27 : vector<128x8xf32> to vector<128x8xbf16>
    %c0_12 = arith.constant 0 : index
    %c0_13 = arith.constant 0 : index
    %29 = vector.load %arg6[%c0_12, %c0_13] : memref<128x8xbf16, #tpu.memory_space<vmem>>, vector<128x8xbf16>
    tpu.vector_store %arg6[%c0_12, %c0_13], %28 {strides = array<i32>} : memref<128x8xbf16, #tpu.memory_space<vmem>>, vector<128x8xbf16>,
    %c0_14 = arith.constant 0 : index
    %c0_15 = arith.constant 0 : index
    %30 = vector.load %arg5[%c0_14, %c0_15] : memref<4x8xbf16, #tpu.memory_space<vmem>>, vector<4x8xbf16>
    %cst_16 = arith.constant dense<0.000000e+00> : vector<128x8xf32>
    %31 = tpu.matmul %25, %30, %cst_16 {dimension_numbers = #tpu.dot_dimension_numbers<[1], [0], [0], [1], [0, 0, 1, 1], [], []>} : vector<128x4xbf16>, vector<4x8xbf16>, vector<128x8xf32> -> vector<128x8xf32>
    %32 = arith.truncf %31 : vector<128x8xf32> to vector<128x8xbf16>
    %c0_17 = arith.constant 0 : index
    %c0_18 = arith.constant 0 : index
    %33 = vector.load %arg7[%c0_17, %c0_18] : memref<128x8xbf16, #tpu.memory_space<vmem>>, vector<128x8xbf16>
    tpu.vector_store %arg7[%c0_17, %c0_18], %32 {strides = array<i32>} : memref<128x8xbf16, #tpu.memory_space<vmem>>, vector<128x8xbf16>,
    return
  }
  func.func @transform_0(%arg0: i32) -> (i32, i32) {
    %c0_i32 = arith.constant 0 : i32
    %c0_i32_0 = arith.constant 0 : i32
    return %arg0, %c0_i32 : i32, i32
  }
  func.func @transform_1(%arg0: i32) -> (i32, i32) {
    %c0_i32 = arith.constant 0 : i32
    %c0_i32_0 = arith.constant 0 : i32
    %c0_i32_1 = arith.constant 0 : i32
    return %c0_i32, %c0_i32_0 : i32, i32
  }
  func.func @transform_2(%arg0: i32) -> (i32, i32) {
    %c0_i32 = arith.constant 0 : i32
    %c0_i32_0 = arith.constant 0 : i32
    %c0_i32_1 = arith.constant 0 : i32
    return %c0_i32, %c0_i32_0 : i32, i32
  }
  func.func @transform_3(%arg0: i32) -> (i32, i32) {
    %c0_i32 = arith.constant 0 : i32
    %c0_i32_0 = arith.constant 0 : i32
    %c0_i32_1 = arith.constant 0 : i32
    return %c0_i32, %c0_i32_0 : i32, i32
  }
  func.func @transform_4(%arg0: i32) -> (i32, i32) {
    %c0_i32 = arith.constant 0 : i32
    %c0_i32_0 = arith.constant 0 : i32
    %c0_i32_1 = arith.constant 0 : i32
    return %c0_i32, %c0_i32_0 : i32, i32
  }
  func.func @transform_5(%arg0: i32) -> (i32, i32) {
    %c0_i32 = arith.constant 0 : i32
    %c0_i32_0 = arith.constant 0 : i32
    return %arg0, %c0_i32 : i32, i32
  }
  func.func @transform_6(%arg0: i32) -> (i32, i32) {
    %c0_i32 = arith.constant 0 : i32
    %c0_i32_0 = arith.constant 0 : i32
    return %arg0, %c0_i32 : i32, i32
  }
}

module attributes {stable_mosaic.version = 11 : i64} {
  func.func @dwconv_silu_kernel(%arg0: i32, %arg1: i32, %arg2: memref<1x8x8x8xbf16, #tpu.memory_space<vmem>>, %arg3: memref<3x3x8xf32, #tpu.memory_space<vmem>>, %arg4: memref<1x8xf32, #tpu.memory_space<vmem>>, %arg5: memref<1x8x8x8xbf16, #tpu.memory_space<vmem>>) attributes {dimension_semantics = [#tpu.dimension_semantics<parallel>, #tpu.dimension_semantics<parallel>], iteration_bounds = array<i64: 2, 1>, scalar_prefetch = 0 : i64, scratch_operands = 0 : i64, tpu.core_type = #tpu.core_type<tc>, window_params = [{transform_indices = @transform_0, window_bounds = array<i64: 1, 8, 8, 8>}, {transform_indices = @transform_1, window_bounds = array<i64: 3, 3, 8>}, {transform_indices = @transform_2, window_bounds = array<i64: 1, 8>}, {transform_indices = @transform_3, window_bounds = array<i64: 1, 8, 8, 8>}]} {
    %c0 = arith.constant 0 : index
    %c0_0 = arith.constant 0 : index
    %c0_1 = arith.constant 0 : index
    %c0_2 = arith.constant 0 : index
    %0 = vector.load %arg2[%c0, %c0_0, %c0_1, %c0_2] : memref<1x8x8x8xbf16, #tpu.memory_space<vmem>>, vector<1x8x8x8xbf16>
    %1 = vector.shape_cast %0 : vector<1x8x8x8xbf16> to vector<8x8x8xbf16>
    %2 = arith.extf %1 : vector<8x8x8xbf16> to vector<8x8x8xf32>
    %c0_3 = arith.constant 0 : index
    %c0_4 = arith.constant 0 : index
    %c0_5 = arith.constant 0 : index
    %3 = vector.load %arg3[%c0_3, %c0_4, %c0_5] : memref<3x3x8xf32, #tpu.memory_space<vmem>>, vector<3x3x8xf32>
    %cst = arith.constant 0.000000e+00 : f32
    %4 = vector.broadcast %cst : f32 to vector<8x8x8xf32>
    %cst_6 = arith.constant 0.000000e+00 : f32
    %5 = vector.broadcast %cst_6 : f32 to vector<1x8x8xf32>
    %6 = vector.extract_strided_slice %2 {offsets = [0, 0, 0], sizes = [7, 8, 8], strides = [1, 1, 1]} : vector<8x8x8xf32> to vector<7x8x8xf32>
    %7 = tpu.concatenate %5, %6 in 0 : vector<1x8x8xf32>, vector<7x8x8xf32> -> vector<8x8x8xf32>
    %cst_7 = arith.constant 0.000000e+00 : f32
    %8 = vector.broadcast %cst_7 : f32 to vector<8x1x8xf32>
    %9 = vector.extract_strided_slice %7 {offsets = [0, 0, 0], sizes = [8, 7, 8], strides = [1, 1, 1]} : vector<8x8x8xf32> to vector<8x7x8xf32>
    %10 = tpu.concatenate %8, %9 in 1 : vector<8x1x8xf32>, vector<8x7x8xf32> -> vector<8x8x8xf32>
    %11 = vector.extract_strided_slice %3 {offsets = [0, 0, 0], sizes = [1, 1, 8], strides = [1, 1, 1]} : vector<3x3x8xf32> to vector<1x1x8xf32>
    %12 = vector.shape_cast %11 : vector<1x1x8xf32> to vector<8xf32>
    %13 = vector.shape_cast %12 : vector<8xf32> to vector<1x1x8xf32>
    %14 = vector.broadcast %13 : vector<1x1x8xf32> to vector<8x8x8xf32>
    %15 = arith.mulf %10, %14 : vector<8x8x8xf32>
    %16 = arith.addf %4, %15 : vector<8x8x8xf32>
    %cst_8 = arith.constant 0.000000e+00 : f32
    %17 = vector.broadcast %cst_8 : f32 to vector<1x8x8xf32>
    %18 = vector.extract_strided_slice %2 {offsets = [0, 0, 0], sizes = [7, 8, 8], strides = [1, 1, 1]} : vector<8x8x8xf32> to vector<7x8x8xf32>
    %19 = tpu.concatenate %17, %18 in 0 : vector<1x8x8xf32>, vector<7x8x8xf32> -> vector<8x8x8xf32>
    %20 = vector.extract_strided_slice %3 {offsets = [0, 1, 0], sizes = [1, 1, 8], strides = [1, 1, 1]} : vector<3x3x8xf32> to vector<1x1x8xf32>
    %21 = vector.shape_cast %20 : vector<1x1x8xf32> to vector<8xf32>
    %22 = vector.shape_cast %21 : vector<8xf32> to vector<1x1x8xf32>
    %23 = vector.broadcast %22 : vector<1x1x8xf32> to vector<8x8x8xf32>
    %24 = arith.mulf %19, %23 : vector<8x8x8xf32>
    %25 = arith.addf %16, %24 : vector<8x8x8xf32>
    %cst_9 = arith.constant 0.000000e+00 : f32
    %26 = vector.broadcast %cst_9 : f32 to vector<1x8x8xf32>
    %27 = vector.extract_strided_slice %2 {offsets = [0, 0, 0], sizes = [7, 8, 8], strides = [1, 1, 1]} : vector<8x8x8xf32> to vector<7x8x8xf32>
    %28 = tpu.concatenate %26, %27 in 0 : vector<1x8x8xf32>, vector<7x8x8xf32> -> vector<8x8x8xf32>
    %cst_10 = arith.constant 0.000000e+00 : f32
    %29 = vector.broadcast %cst_10 : f32 to vector<8x1x8xf32>
    %30 = vector.extract_strided_slice %28 {offsets = [0, 1, 0], sizes = [8, 7, 8], strides = [1, 1, 1]} : vector<8x8x8xf32> to vector<8x7x8xf32>
    %31 = tpu.concatenate %30, %29 in 1 : vector<8x7x8xf32>, vector<8x1x8xf32> -> vector<8x8x8xf32>
    %32 = vector.extract_strided_slice %3 {offsets = [0, 2, 0], sizes = [1, 1, 8], strides = [1, 1, 1]} : vector<3x3x8xf32> to vector<1x1x8xf32>
    %33 = vector.shape_cast %32 : vector<1x1x8xf32> to vector<8xf32>
    %34 = vector.shape_cast %33 : vector<8xf32> to vector<1x1x8xf32>
    %35 = vector.broadcast %34 : vector<1x1x8xf32> to vector<8x8x8xf32>
    %36 = arith.mulf %31, %35 : vector<8x8x8xf32>
    %37 = arith.addf %25, %36 : vector<8x8x8xf32>
    %cst_11 = arith.constant 0.000000e+00 : f32
    %38 = vector.broadcast %cst_11 : f32 to vector<8x1x8xf32>
    %39 = vector.extract_strided_slice %2 {offsets = [0, 0, 0], sizes = [8, 7, 8], strides = [1, 1, 1]} : vector<8x8x8xf32> to vector<8x7x8xf32>
    %40 = tpu.concatenate %38, %39 in 1 : vector<8x1x8xf32>, vector<8x7x8xf32> -> vector<8x8x8xf32>
    %41 = vector.extract_strided_slice %3 {offsets = [1, 0, 0], sizes = [1, 1, 8], strides = [1, 1, 1]} : vector<3x3x8xf32> to vector<1x1x8xf32>
    %42 = vector.shape_cast %41 : vector<1x1x8xf32> to vector<8xf32>
    %43 = vector.shape_cast %42 : vector<8xf32> to vector<1x1x8xf32>
    %44 = vector.broadcast %43 : vector<1x1x8xf32> to vector<8x8x8xf32>
    %45 = arith.mulf %40, %44 : vector<8x8x8xf32>
    %46 = arith.addf %37, %45 : vector<8x8x8xf32>
    %47 = vector.extract_strided_slice %3 {offsets = [1, 1, 0], sizes = [1, 1, 8], strides = [1, 1, 1]} : vector<3x3x8xf32> to vector<1x1x8xf32>
    %48 = vector.shape_cast %47 : vector<1x1x8xf32> to vector<8xf32>
    %49 = vector.shape_cast %48 : vector<8xf32> to vector<1x1x8xf32>
    %50 = vector.broadcast %49 : vector<1x1x8xf32> to vector<8x8x8xf32>
    %51 = arith.mulf %2, %50 : vector<8x8x8xf32>
    %52 = arith.addf %46, %51 : vector<8x8x8xf32>
    %cst_12 = arith.constant 0.000000e+00 : f32
    %53 = vector.broadcast %cst_12 : f32 to vector<8x1x8xf32>
    %54 = vector.extract_strided_slice %2 {offsets = [0, 1, 0], sizes = [8, 7, 8], strides = [1, 1, 1]} : vector<8x8x8xf32> to vector<8x7x8xf32>
    %55 = tpu.concatenate %54, %53 in 1 : vector<8x7x8xf32>, vector<8x1x8xf32> -> vector<8x8x8xf32>
    %56 = vector.extract_strided_slice %3 {offsets = [1, 2, 0], sizes = [1, 1, 8], strides = [1, 1, 1]} : vector<3x3x8xf32> to vector<1x1x8xf32>
    %57 = vector.shape_cast %56 : vector<1x1x8xf32> to vector<8xf32>
    %58 = vector.shape_cast %57 : vector<8xf32> to vector<1x1x8xf32>
    %59 = vector.broadcast %58 : vector<1x1x8xf32> to vector<8x8x8xf32>
    %60 = arith.mulf %55, %59 : vector<8x8x8xf32>
    %61 = arith.addf %52, %60 : vector<8x8x8xf32>
    %cst_13 = arith.constant 0.000000e+00 : f32
    %62 = vector.broadcast %cst_13 : f32 to vector<1x8x8xf32>
    %63 = vector.extract_strided_slice %2 {offsets = [1, 0, 0], sizes = [7, 8, 8], strides = [1, 1, 1]} : vector<8x8x8xf32> to vector<7x8x8xf32>
    %64 = tpu.concatenate %63, %62 in 0 : vector<7x8x8xf32>, vector<1x8x8xf32> -> vector<8x8x8xf32>
    %cst_14 = arith.constant 0.000000e+00 : f32
    %65 = vector.broadcast %cst_14 : f32 to vector<8x1x8xf32>
    %66 = vector.extract_strided_slice %64 {offsets = [0, 0, 0], sizes = [8, 7, 8], strides = [1, 1, 1]} : vector<8x8x8xf32> to vector<8x7x8xf32>
    %67 = tpu.concatenate %65, %66 in 1 : vector<8x1x8xf32>, vector<8x7x8xf32> -> vector<8x8x8xf32>
    %68 = vector.extract_strided_slice %3 {offsets = [2, 0, 0], sizes = [1, 1, 8], strides = [1, 1, 1]} : vector<3x3x8xf32> to vector<1x1x8xf32>
    %69 = vector.shape_cast %68 : vector<1x1x8xf32> to vector<8xf32>
    %70 = vector.shape_cast %69 : vector<8xf32> to vector<1x1x8xf32>
    %71 = vector.broadcast %70 : vector<1x1x8xf32> to vector<8x8x8xf32>
    %72 = arith.mulf %67, %71 : vector<8x8x8xf32>
    %73 = arith.addf %61, %72 : vector<8x8x8xf32>
    %cst_15 = arith.constant 0.000000e+00 : f32
    %74 = vector.broadcast %cst_15 : f32 to vector<1x8x8xf32>
    %75 = vector.extract_strided_slice %2 {offsets = [1, 0, 0], sizes = [7, 8, 8], strides = [1, 1, 1]} : vector<8x8x8xf32> to vector<7x8x8xf32>
    %76 = tpu.concatenate %75, %74 in 0 : vector<7x8x8xf32>, vector<1x8x8xf32> -> vector<8x8x8xf32>
    %77 = vector.extract_strided_slice %3 {offsets = [2, 1, 0], sizes = [1, 1, 8], strides = [1, 1, 1]} : vector<3x3x8xf32> to vector<1x1x8xf32>
    %78 = vector.shape_cast %77 : vector<1x1x8xf32> to vector<8xf32>
    %79 = vector.shape_cast %78 : vector<8xf32> to vector<1x1x8xf32>
    %80 = vector.broadcast %79 : vector<1x1x8xf32> to vector<8x8x8xf32>
    %81 = arith.mulf %76, %80 : vector<8x8x8xf32>
    %82 = arith.addf %73, %81 : vector<8x8x8xf32>
    %cst_16 = arith.constant 0.000000e+00 : f32
    %83 = vector.broadcast %cst_16 : f32 to vector<1x8x8xf32>
    %84 = vector.extract_strided_slice %2 {offsets = [1, 0, 0], sizes = [7, 8, 8], strides = [1, 1, 1]} : vector<8x8x8xf32> to vector<7x8x8xf32>
    %85 = tpu.concatenate %84, %83 in 0 : vector<7x8x8xf32>, vector<1x8x8xf32> -> vector<8x8x8xf32>
    %cst_17 = arith.constant 0.000000e+00 : f32
    %86 = vector.broadcast %cst_17 : f32 to vector<8x1x8xf32>
    %87 = vector.extract_strided_slice %85 {offsets = [0, 1, 0], sizes = [8, 7, 8], strides = [1, 1, 1]} : vector<8x8x8xf32> to vector<8x7x8xf32>
    %88 = tpu.concatenate %87, %86 in 1 : vector<8x7x8xf32>, vector<8x1x8xf32> -> vector<8x8x8xf32>
    %89 = vector.extract_strided_slice %3 {offsets = [2, 2, 0], sizes = [1, 1, 8], strides = [1, 1, 1]} : vector<3x3x8xf32> to vector<1x1x8xf32>
    %90 = vector.shape_cast %89 : vector<1x1x8xf32> to vector<8xf32>
    %91 = vector.shape_cast %90 : vector<8xf32> to vector<1x1x8xf32>
    %92 = vector.broadcast %91 : vector<1x1x8xf32> to vector<8x8x8xf32>
    %93 = arith.mulf %88, %92 : vector<8x8x8xf32>
    %94 = arith.addf %82, %93 : vector<8x8x8xf32>
    %c0_18 = arith.constant 0 : index
    %c0_19 = arith.constant 0 : index
    %95 = vector.load %arg4[%c0_18, %c0_19] : memref<1x8xf32, #tpu.memory_space<vmem>>, vector<1x8xf32>
    %96 = vector.shape_cast %95 : vector<1x8xf32> to vector<1x1x8xf32>
    %97 = vector.broadcast %96 : vector<1x1x8xf32> to vector<8x8x8xf32>
    %98 = arith.addf %94, %97 : vector<8x8x8xf32>
    %99 = arith.negf %98 : vector<8x8x8xf32>
    %100 = math.exp %99 : vector<8x8x8xf32>
    %cst_20 = arith.constant 1.000000e+00 : f32
    %101 = vector.broadcast %cst_20 : f32 to vector<8x8x8xf32>
    %102 = arith.addf %101, %100 : vector<8x8x8xf32>
    %103 = arith.divf %101, %102 : vector<8x8x8xf32>
    %104 = arith.mulf %98, %103 : vector<8x8x8xf32>
    %105 = arith.truncf %104 : vector<8x8x8xf32> to vector<8x8x8xbf16>
    %106 = vector.shape_cast %105 : vector<8x8x8xbf16> to vector<1x8x8x8xbf16>
    %c0_21 = arith.constant 0 : index
    %c0_22 = arith.constant 0 : index
    %c0_23 = arith.constant 0 : index
    %c0_24 = arith.constant 0 : index
    %107 = vector.load %arg5[%c0_21, %c0_22, %c0_23, %c0_24] : memref<1x8x8x8xbf16, #tpu.memory_space<vmem>>, vector<1x8x8x8xbf16>
    tpu.vector_store %arg5[%c0_21, %c0_22, %c0_23, %c0_24], %106 {strides = array<i32>} : memref<1x8x8x8xbf16, #tpu.memory_space<vmem>>, vector<1x8x8x8xbf16>,
    return
  }
  func.func @transform_0(%arg0: i32, %arg1: i32) -> (i32, i32, i32, i32) {
    %c0_i32 = arith.constant 0 : i32
    %c0_i32_0 = arith.constant 0 : i32
    %c0_i32_1 = arith.constant 0 : i32
    return %arg0, %c0_i32, %c0_i32_0, %arg1 : i32, i32, i32, i32
  }
  func.func @transform_1(%arg0: i32, %arg1: i32) -> (i32, i32, i32) {
    %c0_i32 = arith.constant 0 : i32
    %c0_i32_0 = arith.constant 0 : i32
    %c0_i32_1 = arith.constant 0 : i32
    return %c0_i32, %c0_i32_0, %arg1 : i32, i32, i32
  }
  func.func @transform_2(%arg0: i32, %arg1: i32) -> (i32, i32) {
    %c0_i32 = arith.constant 0 : i32
    %c0_i32_0 = arith.constant 0 : i32
    return %c0_i32, %arg1 : i32, i32
  }
  func.func @transform_3(%arg0: i32, %arg1: i32) -> (i32, i32, i32, i32) {
    %c0_i32 = arith.constant 0 : i32
    %c0_i32_0 = arith.constant 0 : i32
    %c0_i32_1 = arith.constant 0 : i32
    return %arg0, %c0_i32, %c0_i32_0, %arg1 : i32, i32, i32, i32
  }
}

module attributes {stable_mosaic.version = 11 : i64} {
  func.func @ss_scan_kernel(%arg0: i32, %arg1: i32, %arg2: i32, %arg3: memref<1x1x64x8xbf16, #tpu.memory_space<vmem>>, %arg4: memref<1x8x8xbf16, #tpu.memory_space<vmem>>, %arg5: memref<1x8x32xbf16, #tpu.memory_space<vmem>>, %arg6: memref<1x1x8xf32, #tpu.memory_space<vmem>>, %arg7: memref<1x16x8xf32, #tpu.memory_space<vmem>>, %arg8: memref<1x1x8xf32, #tpu.memory_space<vmem>>, %arg9: memref<1x1x64x8xbf16, #tpu.memory_space<vmem>>, %arg10: memref<16x8xf32, #tpu.memory_space<vmem>>, %arg11: memref<64x8xf32, #tpu.memory_space<vmem>>, %arg12: memref<64x32xf32, #tpu.memory_space<vmem>>) attributes {dimension_semantics = [#tpu.dimension_semantics<parallel>, #tpu.dimension_semantics<parallel>, #tpu.dimension_semantics<arbitrary>], iteration_bounds = array<i64: 2, 2, 1>, scalar_prefetch = 0 : i64, scratch_operands = 3 : i64, tpu.core_type = #tpu.core_type<tc>, window_params = [{transform_indices = @transform_0, window_bounds = array<i64: 1, 1, 64, 8>}, {transform_indices = @transform_1, window_bounds = array<i64: 1, 8, 8>}, {transform_indices = @transform_2, window_bounds = array<i64: 1, 8, 32>}, {transform_indices = @transform_3, window_bounds = array<i64: 1, 1, 8>}, {transform_indices = @transform_4, window_bounds = array<i64: 1, 16, 8>}, {transform_indices = @transform_5, window_bounds = array<i64: 1, 1, 8>}, {transform_indices = @transform_6, window_bounds = array<i64: 1, 1, 64, 8>}]} {
    %c0_i32 = arith.constant 0 : i32
    %0 = arith.cmpi eq, %arg2, %c0_i32 : i32
    %1 = arith.extui %0 : i1 to i32
    %c0_i32_0 = arith.constant 0 : i32
    %2 = arith.cmpi ne, %1, %c0_i32_0 : i32
    scf.if %2 {
      %cst_32 = arith.constant 0.000000e+00 : f32
      %32 = vector.broadcast %cst_32 : f32 to vector<16x8xf32>
      %c0_33 = arith.constant 0 : index
      %c0_34 = arith.constant 0 : index
      %33 = vector.load %arg10[%c0_33, %c0_34] : memref<16x8xf32, #tpu.memory_space<vmem>>, vector<16x8xf32>
      tpu.vector_store %arg10[%c0_33, %c0_34], %32 {strides = array<i32>} : memref<16x8xf32, #tpu.memory_space<vmem>>, vector<16x8xf32>,
    } else {
    }
    %c0 = arith.constant 0 : index
    %c0_1 = arith.constant 0 : index
    %c0_2 = arith.constant 0 : index
    %c0_3 = arith.constant 0 : index
    %3 = vector.load %arg3[%c0, %c0_1, %c0_2, %c0_3] : memref<1x1x64x8xbf16, #tpu.memory_space<vmem>>, vector<1x1x64x8xbf16>
    %4 = vector.shape_cast %3 : vector<1x1x64x8xbf16> to vector<64x8xbf16>
    %c0_4 = arith.constant 0 : index
    %c0_5 = arith.constant 0 : index
    %c0_6 = arith.constant 0 : index
    %5 = vector.load %arg4[%c0_4, %c0_5, %c0_6] : memref<1x8x8xbf16, #tpu.memory_space<vmem>>, vector<1x8x8xbf16>
    %6 = vector.shape_cast %5 : vector<1x8x8xbf16> to vector<8x8xbf16>
    %cst = arith.constant dense<0.000000e+00> : vector<64x8xf32>
    %7 = tpu.matmul %4, %6, %cst {dimension_numbers = #tpu.dot_dimension_numbers<[1], [0], [0], [1], [0, 0, 1, 1], [], []>} : vector<64x8xbf16>, vector<8x8xbf16>, vector<64x8xf32> -> vector<64x8xf32>
    %c0_7 = arith.constant 0 : index
    %c0_8 = arith.constant 0 : index
    %c0_9 = arith.constant 0 : index
    %8 = vector.load %arg6[%c0_7, %c0_8, %c0_9] : memref<1x1x8xf32, #tpu.memory_space<vmem>>, vector<1x1x8xf32>
    %9 = vector.shape_cast %8 : vector<1x1x8xf32> to vector<1x8xf32>
    %10 = vector.broadcast %9 : vector<1x8xf32> to vector<64x8xf32>
    %11 = arith.addf %7, %10 : vector<64x8xf32>
    %cst_10 = arith.constant 2.000000e+01 : f32
    %12 = vector.broadcast %cst_10 : f32 to vector<64x8xf32>
    %13 = arith.cmpf ogt, %11, %12 : vector<64x8xf32>
    %cst_11 = arith.constant 2.000000e+01 : f32
    %14 = vector.broadcast %cst_11 : f32 to vector<64x8xf32>
    %15 = arith.minimumf %11, %14 : vector<64x8xf32>
    %16 = math.exp %15 : vector<64x8xf32>
    %17 = math.log1p %16 : vector<64x8xf32>
    %18 = arith.select %13, %11, %17 : vector<64x8xi1>, vector<64x8xf32>
    %c0_12 = arith.constant 0 : index
    %c0_13 = arith.constant 0 : index
    %19 = vector.load %arg11[%c0_12, %c0_13] : memref<64x8xf32, #tpu.memory_space<vmem>>, vector<64x8xf32>
    tpu.vector_store %arg11[%c0_12, %c0_13], %18 {strides = array<i32>} : memref<64x8xf32, #tpu.memory_space<vmem>>, vector<64x8xf32>,
    %c0_14 = arith.constant 0 : index
    %c0_15 = arith.constant 0 : index
    %c0_16 = arith.constant 0 : index
    %20 = vector.load %arg5[%c0_14, %c0_15, %c0_16] : memref<1x8x32xbf16, #tpu.memory_space<vmem>>, vector<1x8x32xbf16>
    %21 = vector.shape_cast %20 : vector<1x8x32xbf16> to vector<8x32xbf16>
    %cst_17 = arith.constant dense<0.000000e+00> : vector<64x32xf32>
    %22 = tpu.matmul %4, %21, %cst_17 {dimension_numbers = #tpu.dot_dimension_numbers<[1], [0], [0], [1], [0, 0, 1, 1], [], []>} : vector<64x8xbf16>, vector<8x32xbf16>, vector<64x32xf32> -> vector<64x32xf32>
    %c0_18 = arith.constant 0 : index
    %c0_19 = arith.constant 0 : index
    %23 = vector.load %arg12[%c0_18, %c0_19] : memref<64x32xf32, #tpu.memory_space<vmem>>, vector<64x32xf32>
    tpu.vector_store %arg12[%c0_18, %c0_19], %22 {strides = array<i32>} : memref<64x32xf32, #tpu.memory_space<vmem>>, vector<64x32xf32>,
    %c0_20 = arith.constant 0 : index
    %c0_21 = arith.constant 0 : index
    %c0_22 = arith.constant 0 : index
    %24 = vector.load %arg7[%c0_20, %c0_21, %c0_22] : memref<1x16x8xf32, #tpu.memory_space<vmem>>, vector<1x16x8xf32>
    %25 = vector.shape_cast %24 : vector<1x16x8xf32> to vector<16x8xf32>
    %c0_23 = arith.constant 0 : index
    %c0_24 = arith.constant 0 : index
    %c0_25 = arith.constant 0 : index
    %26 = vector.load %arg8[%c0_23, %c0_24, %c0_25] : memref<1x1x8xf32, #tpu.memory_space<vmem>>, vector<1x1x8xf32>
    %27 = vector.shape_cast %26 : vector<1x1x8xf32> to vector<1x8xf32>
    %c0_26 = arith.constant 0 : index
    %c0_27 = arith.constant 0 : index
    %28 = vector.load %arg10[%c0_26, %c0_27] : memref<16x8xf32, #tpu.memory_space<vmem>>, vector<16x8xf32>
    %c0_i32_28 = arith.constant 0 : i32
    %c4_i32 = arith.constant 4 : i32
    %29 = arith.addi %c0_i32_28, %c4_i32 : i32
    %c1_i32 = arith.constant 1 : i32
    %30 = scf.for %arg13 = %c0_i32_28 to %29 step %c1_i32 iter_args(%arg14 = %28) -> (vector<16x8xf32>)  : i32 {
      %c3_i32 = arith.constant 3 : i32
      %32 = arith.subi %c3_i32, %arg13 : i32
      %c16_i32 = arith.constant 16 : i32
      %33 = arith.muli %32, %c16_i32 : i32
      %34 = tpu.assume_multiple %33, 16 : i32
      %35 = arith.index_cast %34 : i32 to index
      %c0_32 = arith.constant 0 : index
      %36 = vector.load %arg11[%35, %c0_32] : memref<64x8xf32, #tpu.memory_space<vmem>>, vector<16x8xf32>
      %37 = arith.index_cast %34 : i32 to index
      %c0_33 = arith.constant 0 : index
      %38 = vector.load %arg12[%37, %c0_33] : memref<64x32xf32, #tpu.memory_space<vmem>>, vector<16x32xf32>
      %39 = tpu.transpose %38, [1, 0] : vector<16x32xf32> -> vector<32x16xf32>
      %c0_34 = arith.constant 0 : index
      %c0_35 = arith.constant 0 : index
      %40 = arith.index_cast %34 : i32 to index
      %c0_36 = arith.constant 0 : index
      %41 = vector.load %arg3[%c0_34, %c0_35, %40, %c0_36] : memref<1x1x64x8xbf16, #tpu.memory_space<vmem>>, vector<1x1x16x8xbf16>
      %42 = vector.shape_cast %41 : vector<1x1x16x8xbf16> to vector<16x8xbf16>
      %43 = arith.extf %42 : vector<16x8xbf16> to vector<16x8xf32>
      %44 = arith.mulf %36, %43 : vector<16x8xf32>
      %45 = vector.shape_cast %36 : vector<16x8xf32> to vector<16x1x8xf32>
      %46 = vector.shape_cast %25 : vector<16x8xf32> to vector<1x16x8xf32>
      %47 = vector.broadcast %45 : vector<16x1x8xf32> to vector<16x16x8xf32>
      %48 = vector.broadcast %46 : vector<1x16x8xf32> to vector<16x16x8xf32>
      %49 = arith.mulf %47, %48 : vector<16x16x8xf32>
      %50 = math.exp %49 : vector<16x16x8xf32>
      %51 = vector.extract_strided_slice %50 {offsets = [15, 0, 0], sizes = [1, 16, 8], strides = [1, 1, 1]} : vector<16x16x8xf32> to vector<1x16x8xf32>
      %52 = vector.shape_cast %51 : vector<1x16x8xf32> to vector<16x8xf32>
      %53 = arith.mulf %52, %arg14 : vector<16x8xf32>
      %54 = vector.extract_strided_slice %39 {offsets = [0, 15], sizes = [16, 1], strides = [1, 1]} : vector<32x16xf32> to vector<16x1xf32>
      %55 = vector.extract_strided_slice %44 {offsets = [15, 0], sizes = [1, 8], strides = [1, 1]} : vector<16x8xf32> to vector<1x8xf32>
      %56 = vector.broadcast %54 : vector<16x1xf32> to vector<16x8xf32>
      %57 = vector.broadcast %55 : vector<1x8xf32> to vector<16x8xf32>
      %58 = arith.mulf %56, %57 : vector<16x8xf32>
      %59 = arith.addf %53, %58 : vector<16x8xf32>
      %60 = vector.extract_strided_slice %39 {offsets = [16, 15], sizes = [16, 1], strides = [1, 1]} : vector<32x16xf32> to vector<16x1xf32>
      %61 = vector.broadcast %60 : vector<16x1xf32> to vector<16x8xf32>
      %62 = arith.mulf %61, %59 : vector<16x8xf32>
      %cst_37 = arith.constant dense<0.000000e+00> : vector<8xf32>
      %63 = vector.multi_reduction <add>, %62, %cst_37 [0] : vector<16x8xf32> to vector<8xf32>
      %64 = vector.shape_cast %63 : vector<8xf32> to vector<1x8xf32>
      %65 = vector.extract_strided_slice %50 {offsets = [14, 0, 0], sizes = [1, 16, 8], strides = [1, 1, 1]} : vector<16x16x8xf32> to vector<1x16x8xf32>
      %66 = vector.shape_cast %65 : vector<1x16x8xf32> to vector<16x8xf32>
      %67 = arith.mulf %66, %59 : vector<16x8xf32>
      %68 = vector.extract_strided_slice %39 {offsets = [0, 14], sizes = [16, 1], strides = [1, 1]} : vector<32x16xf32> to vector<16x1xf32>
      %69 = vector.extract_strided_slice %44 {offsets = [14, 0], sizes = [1, 8], strides = [1, 1]} : vector<16x8xf32> to vector<1x8xf32>
      %70 = vector.broadcast %68 : vector<16x1xf32> to vector<16x8xf32>
      %71 = vector.broadcast %69 : vector<1x8xf32> to vector<16x8xf32>
      %72 = arith.mulf %70, %71 : vector<16x8xf32>
      %73 = arith.addf %67, %72 : vector<16x8xf32>
      %74 = vector.extract_strided_slice %39 {offsets = [16, 14], sizes = [16, 1], strides = [1, 1]} : vector<32x16xf32> to vector<16x1xf32>
      %75 = vector.broadcast %74 : vector<16x1xf32> to vector<16x8xf32>
      %76 = arith.mulf %75, %73 : vector<16x8xf32>
      %cst_38 = arith.constant dense<0.000000e+00> : vector<8xf32>
      %77 = vector.multi_reduction <add>, %76, %cst_38 [0] : vector<16x8xf32> to vector<8xf32>
      %78 = vector.shape_cast %77 : vector<8xf32> to vector<1x8xf32>
      %79 = vector.extract_strided_slice %50 {offsets = [13, 0, 0], sizes = [1, 16, 8], strides = [1, 1, 1]} : vector<16x16x8xf32> to vector<1x16x8xf32>
      %80 = vector.shape_cast %79 : vector<1x16x8xf32> to vector<16x8xf32>
      %81 = arith.mulf %80, %73 : vector<16x8xf32>
      %82 = vector.extract_strided_slice %39 {offsets = [0, 13], sizes = [16, 1], strides = [1, 1]} : vector<32x16xf32> to vector<16x1xf32>
      %83 = vector.extract_strided_slice %44 {offsets = [13, 0], sizes = [1, 8], strides = [1, 1]} : vector<16x8xf32> to vector<1x8xf32>
      %84 = vector.broadcast %82 : vector<16x1xf32> to vector<16x8xf32>
      %85 = vector.broadcast %83 : vector<1x8xf32> to vector<16x8xf32>
      %86 = arith.mulf %84, %85 : vector<16x8xf32>
      %87 = arith.addf %81, %86 : vector<16x8xf32>
      %88 = vector.extract_strided_slice %39 {offsets = [16, 13], sizes = [16, 1], strides = [1, 1]} : vector<32x16xf32> to vector<16x1xf32>
      %89 = vector.broadcast %88 : vector<16x1xf32> to vector<16x8xf32>
      %90 = arith.mulf %89, %87 : vector<16x8xf32>
      %cst_39 = arith.constant dense<0.000000e+00> : vector<8xf32>
      %91 = vector.multi_reduction <add>, %90, %cst_39 [0] : vector<16x8xf32> to vector<8xf32>
      %92 = vector.shape_cast %91 : vector<8xf32> to vector<1x8xf32>
      %93 = vector.extract_strided_slice %50 {offsets = [12, 0, 0], sizes = [1, 16, 8], strides = [1, 1, 1]} : vector<16x16x8xf32> to vector<1x16x8xf32>
      %94 = vector.shape_cast %93 : vector<1x16x8xf32> to vector<16x8xf32>
      %95 = arith.mulf %94, %87 : vector<16x8xf32>
      %96 = vector.extract_strided_slice %39 {offsets = [0, 12], sizes = [16, 1], strides = [1, 1]} : vector<32x16xf32> to vector<16x1xf32>
      %97 = vector.extract_strided_slice %44 {offsets = [12, 0], sizes = [1, 8], strides = [1, 1]} : vector<16x8xf32> to vector<1x8xf32>
      %98 = vector.broadcast %96 : vector<16x1xf32> to vector<16x8xf32>
      %99 = vector.broadcast %97 : vector<1x8xf32> to vector<16x8xf32>
      %100 = arith.mulf %98, %99 : vector<16x8xf32>
      %101 = arith.addf %95, %100 : vector<16x8xf32>
      %102 = vector.extract_strided_slice %39 {offsets = [16, 12], sizes = [16, 1], strides = [1, 1]} : vector<32x16xf32> to vector<16x1xf32>
      %103 = vector.broadcast %102 : vector<16x1xf32> to vector<16x8xf32>
      %104 = arith.mulf %103, %101 : vector<16x8xf32>
      %cst_40 = arith.constant dense<0.000000e+00> : vector<8xf32>
      %105 = vector.multi_reduction <add>, %104, %cst_40 [0] : vector<16x8xf32> to vector<8xf32>
      %106 = vector.shape_cast %105 : vector<8xf32> to vector<1x8xf32>
      %107 = vector.extract_strided_slice %50 {offsets = [11, 0, 0], sizes = [1, 16, 8], strides = [1, 1, 1]} : vector<16x16x8xf32> to vector<1x16x8xf32>
      %108 = vector.shape_cast %107 : vector<1x16x8xf32> to vector<16x8xf32>
      %109 = arith.mulf %108, %101 : vector<16x8xf32>
      %110 = vector.extract_strided_slice %39 {offsets = [0, 11], sizes = [16, 1], strides = [1, 1]} : vector<32x16xf32> to vector<16x1xf32>
      %111 = vector.extract_strided_slice %44 {offsets = [11, 0], sizes = [1, 8], strides = [1, 1]} : vector<16x8xf32> to vector<1x8xf32>
      %112 = vector.broadcast %110 : vector<16x1xf32> to vector<16x8xf32>
      %113 = vector.broadcast %111 : vector<1x8xf32> to vector<16x8xf32>
      %114 = arith.mulf %112, %113 : vector<16x8xf32>
      %115 = arith.addf %109, %114 : vector<16x8xf32>
      %116 = vector.extract_strided_slice %39 {offsets = [16, 11], sizes = [16, 1], strides = [1, 1]} : vector<32x16xf32> to vector<16x1xf32>
      %117 = vector.broadcast %116 : vector<16x1xf32> to vector<16x8xf32>
      %118 = arith.mulf %117, %115 : vector<16x8xf32>
      %cst_41 = arith.constant dense<0.000000e+00> : vector<8xf32>
      %119 = vector.multi_reduction <add>, %118, %cst_41 [0] : vector<16x8xf32> to vector<8xf32>
      %120 = vector.shape_cast %119 : vector<8xf32> to vector<1x8xf32>
      %121 = vector.extract_strided_slice %50 {offsets = [10, 0, 0], sizes = [1, 16, 8], strides = [1, 1, 1]} : vector<16x16x8xf32> to vector<1x16x8xf32>
      %122 = vector.shape_cast %121 : vector<1x16x8xf32> to vector<16x8xf32>
      %123 = arith.mulf %122, %115 : vector<16x8xf32>
      %124 = vector.extract_strided_slice %39 {offsets = [0, 10], sizes = [16, 1], strides = [1, 1]} : vector<32x16xf32> to vector<16x1xf32>
      %125 = vector.extract_strided_slice %44 {offsets = [10, 0], sizes = [1, 8], strides = [1, 1]} : vector<16x8xf32> to vector<1x8xf32>
      %126 = vector.broadcast %124 : vector<16x1xf32> to vector<16x8xf32>
      %127 = vector.broadcast %125 : vector<1x8xf32> to vector<16x8xf32>
      %128 = arith.mulf %126, %127 : vector<16x8xf32>
      %129 = arith.addf %123, %128 : vector<16x8xf32>
      %130 = vector.extract_strided_slice %39 {offsets = [16, 10], sizes = [16, 1], strides = [1, 1]} : vector<32x16xf32> to vector<16x1xf32>
      %131 = vector.broadcast %130 : vector<16x1xf32> to vector<16x8xf32>
      %132 = arith.mulf %131, %129 : vector<16x8xf32>
      %cst_42 = arith.constant dense<0.000000e+00> : vector<8xf32>
      %133 = vector.multi_reduction <add>, %132, %cst_42 [0] : vector<16x8xf32> to vector<8xf32>
      %134 = vector.shape_cast %133 : vector<8xf32> to vector<1x8xf32>
      %135 = vector.extract_strided_slice %50 {offsets = [9, 0, 0], sizes = [1, 16, 8], strides = [1, 1, 1]} : vector<16x16x8xf32> to vector<1x16x8xf32>
      %136 = vector.shape_cast %135 : vector<1x16x8xf32> to vector<16x8xf32>
      %137 = arith.mulf %136, %129 : vector<16x8xf32>
      %138 = vector.extract_strided_slice %39 {offsets = [0, 9], sizes = [16, 1], strides = [1, 1]} : vector<32x16xf32> to vector<16x1xf32>
      %139 = vector.extract_strided_slice %44 {offsets = [9, 0], sizes = [1, 8], strides = [1, 1]} : vector<16x8xf32> to vector<1x8xf32>
      %140 = vector.broadcast %138 : vector<16x1xf32> to vector<16x8xf32>
      %141 = vector.broadcast %139 : vector<1x8xf32> to vector<16x8xf32>
      %142 = arith.mulf %140, %141 : vector<16x8xf32>
      %143 = arith.addf %137, %142 : vector<16x8xf32>
      %144 = vector.extract_strided_slice %39 {offsets = [16, 9], sizes = [16, 1], strides = [1, 1]} : vector<32x16xf32> to vector<16x1xf32>
      %145 = vector.broadcast %144 : vector<16x1xf32> to vector<16x8xf32>
      %146 = arith.mulf %145, %143 : vector<16x8xf32>
      %cst_43 = arith.constant dense<0.000000e+00> : vector<8xf32>
      %147 = vector.multi_reduction <add>, %146, %cst_43 [0] : vector<16x8xf32> to vector<8xf32>
      %148 = vector.shape_cast %147 : vector<8xf32> to vector<1x8xf32>
      %149 = vector.extract_strided_slice %50 {offsets = [8, 0, 0], sizes = [1, 16, 8], strides = [1, 1, 1]} : vector<16x16x8xf32> to vector<1x16x8xf32>
      %150 = vector.shape_cast %149 : vector<1x16x8xf32> to vector<16x8xf32>
      %151 = arith.mulf %150, %143 : vector<16x8xf32>
      %152 = vector.extract_strided_slice %39 {offsets = [0, 8], sizes = [16, 1], strides = [1, 1]} : vector<32x16xf32> to vector<16x1xf32>
      %153 = vector.extract_strided_slice %44 {offsets = [8, 0], sizes = [1, 8], strides = [1, 1]} : vector<16x8xf32> to vector<1x8xf32>
      %154 = vector.broadcast %152 : vector<16x1xf32> to vector<16x8xf32>
      %155 = vector.broadcast %153 : vector<1x8xf32> to vector<16x8xf32>
      %156 = arith.mulf %154, %155 : vector<16x8xf32>
      %157 = arith.addf %151, %156 : vector<16x8xf32>
      %158 = vector.extract_strided_slice %39 {offsets = [16, 8], sizes = [16, 1], strides = [1, 1]} : vector<32x16xf32> to vector<16x1xf32>
      %159 = vector.broadcast %158 : vector<16x1xf32> to vector<16x8xf32>
      %160 = arith.mulf %159, %157 : vector<16x8xf32>
      %cst_44 = arith.constant dense<0.000000e+00> : vector<8xf32>
      %161 = vector.multi_reduction <add>, %160, %cst_44 [0] : vector<16x8xf32> to vector<8xf32>
      %162 = vector.shape_cast %161 : vector<8xf32> to vector<1x8xf32>
      %163 = vector.extract_strided_slice %50 {offsets = [7, 0, 0], sizes = [1, 16, 8], strides = [1, 1, 1]} : vector<16x16x8xf32> to vector<1x16x8xf32>
      %164 = vector.shape_cast %163 : vector<1x16x8xf32> to vector<16x8xf32>
      %165 = arith.mulf %164, %157 : vector<16x8xf32>
      %166 = vector.extract_strided_slice %39 {offsets = [0, 7], sizes = [16, 1], strides = [1, 1]} : vector<32x16xf32> to vector<16x1xf32>
      %167 = vector.extract_strided_slice %44 {offsets = [7, 0], sizes = [1, 8], strides = [1, 1]} : vector<16x8xf32> to vector<1x8xf32>
      %168 = vector.broadcast %166 : vector<16x1xf32> to vector<16x8xf32>
      %169 = vector.broadcast %167 : vector<1x8xf32> to vector<16x8xf32>
      %170 = arith.mulf %168, %169 : vector<16x8xf32>
      %171 = arith.addf %165, %170 : vector<16x8xf32>
      %172 = vector.extract_strided_slice %39 {offsets = [16, 7], sizes = [16, 1], strides = [1, 1]} : vector<32x16xf32> to vector<16x1xf32>
      %173 = vector.broadcast %172 : vector<16x1xf32> to vector<16x8xf32>
      %174 = arith.mulf %173, %171 : vector<16x8xf32>
      %cst_45 = arith.constant dense<0.000000e+00> : vector<8xf32>
      %175 = vector.multi_reduction <add>, %174, %cst_45 [0] : vector<16x8xf32> to vector<8xf32>
      %176 = vector.shape_cast %175 : vector<8xf32> to vector<1x8xf32>
      %177 = vector.extract_strided_slice %50 {offsets = [6, 0, 0], sizes = [1, 16, 8], strides = [1, 1, 1]} : vector<16x16x8xf32> to vector<1x16x8xf32>
      %178 = vector.shape_cast %177 : vector<1x16x8xf32> to vector<16x8xf32>
      %179 = arith.mulf %178, %171 : vector<16x8xf32>
      %180 = vector.extract_strided_slice %39 {offsets = [0, 6], sizes = [16, 1], strides = [1, 1]} : vector<32x16xf32> to vector<16x1xf32>
      %181 = vector.extract_strided_slice %44 {offsets = [6, 0], sizes = [1, 8], strides = [1, 1]} : vector<16x8xf32> to vector<1x8xf32>
      %182 = vector.broadcast %180 : vector<16x1xf32> to vector<16x8xf32>
      %183 = vector.broadcast %181 : vector<1x8xf32> to vector<16x8xf32>
      %184 = arith.mulf %182, %183 : vector<16x8xf32>
      %185 = arith.addf %179, %184 : vector<16x8xf32>
      %186 = vector.extract_strided_slice %39 {offsets = [16, 6], sizes = [16, 1], strides = [1, 1]} : vector<32x16xf32> to vector<16x1xf32>
      %187 = vector.broadcast %186 : vector<16x1xf32> to vector<16x8xf32>
      %188 = arith.mulf %187, %185 : vector<16x8xf32>
      %cst_46 = arith.constant dense<0.000000e+00> : vector<8xf32>
      %189 = vector.multi_reduction <add>, %188, %cst_46 [0] : vector<16x8xf32> to vector<8xf32>
      %190 = vector.shape_cast %189 : vector<8xf32> to vector<1x8xf32>
      %191 = vector.extract_strided_slice %50 {offsets = [5, 0, 0], sizes = [1, 16, 8], strides = [1, 1, 1]} : vector<16x16x8xf32> to vector<1x16x8xf32>
      %192 = vector.shape_cast %191 : vector<1x16x8xf32> to vector<16x8xf32>
      %193 = arith.mulf %192, %185 : vector<16x8xf32>
      %194 = vector.extract_strided_slice %39 {offsets = [0, 5], sizes = [16, 1], strides = [1, 1]} : vector<32x16xf32> to vector<16x1xf32>
      %195 = vector.extract_strided_slice %44 {offsets = [5, 0], sizes = [1, 8], strides = [1, 1]} : vector<16x8xf32> to vector<1x8xf32>
      %196 = vector.broadcast %194 : vector<16x1xf32> to vector<16x8xf32>
      %197 = vector.broadcast %195 : vector<1x8xf32> to vector<16x8xf32>
      %198 = arith.mulf %196, %197 : vector<16x8xf32>
      %199 = arith.addf %193, %198 : vector<16x8xf32>
      %200 = vector.extract_strided_slice %39 {offsets = [16, 5], sizes = [16, 1], strides = [1, 1]} : vector<32x16xf32> to vector<16x1xf32>
      %201 = vector.broadcast %200 : vector<16x1xf32> to vector<16x8xf32>
      %202 = arith.mulf %201, %199 : vector<16x8xf32>
      %cst_47 = arith.constant dense<0.000000e+00> : vector<8xf32>
      %203 = vector.multi_reduction <add>, %202, %cst_47 [0] : vector<16x8xf32> to vector<8xf32>
      %204 = vector.shape_cast %203 : vector<8xf32> to vector<1x8xf32>
      %205 = vector.extract_strided_slice %50 {offsets = [4, 0, 0], sizes = [1, 16, 8], strides = [1, 1, 1]} : vector<16x16x8xf32> to vector<1x16x8xf32>
      %206 = vector.shape_cast %205 : vector<1x16x8xf32> to vector<16x8xf32>
      %207 = arith.mulf %206, %199 : vector<16x8xf32>
      %208 = vector.extract_strided_slice %39 {offsets = [0, 4], sizes = [16, 1], strides = [1, 1]} : vector<32x16xf32> to vector<16x1xf32>
      %209 = vector.extract_strided_slice %44 {offsets = [4, 0], sizes = [1, 8], strides = [1, 1]} : vector<16x8xf32> to vector<1x8xf32>
      %210 = vector.broadcast %208 : vector<16x1xf32> to vector<16x8xf32>
      %211 = vector.broadcast %209 : vector<1x8xf32> to vector<16x8xf32>
      %212 = arith.mulf %210, %211 : vector<16x8xf32>
      %213 = arith.addf %207, %212 : vector<16x8xf32>
      %214 = vector.extract_strided_slice %39 {offsets = [16, 4], sizes = [16, 1], strides = [1, 1]} : vector<32x16xf32> to vector<16x1xf32>
      %215 = vector.broadcast %214 : vector<16x1xf32> to vector<16x8xf32>
      %216 = arith.mulf %215, %213 : vector<16x8xf32>
      %cst_48 = arith.constant dense<0.000000e+00> : vector<8xf32>
      %217 = vector.multi_reduction <add>, %216, %cst_48 [0] : vector<16x8xf32> to vector<8xf32>
      %218 = vector.shape_cast %217 : vector<8xf32> to vector<1x8xf32>
      %219 = vector.extract_strided_slice %50 {offsets = [3, 0, 0], sizes = [1, 16, 8], strides = [1, 1, 1]} : vector<16x16x8xf32> to vector<1x16x8xf32>
      %220 = vector.shape_cast %219 : vector<1x16x8xf32> to vector<16x8xf32>
      %221 = arith.mulf %220, %213 : vector<16x8xf32>
      %222 = vector.extract_strided_slice %39 {offsets = [0, 3], sizes = [16, 1], strides = [1, 1]} : vector<32x16xf32> to vector<16x1xf32>
      %223 = vector.extract_strided_slice %44 {offsets = [3, 0], sizes = [1, 8], strides = [1, 1]} : vector<16x8xf32> to vector<1x8xf32>
      %224 = vector.broadcast %222 : vector<16x1xf32> to vector<16x8xf32>
      %225 = vector.broadcast %223 : vector<1x8xf32> to vector<16x8xf32>
      %226 = arith.mulf %224, %225 : vector<16x8xf32>
      %227 = arith.addf %221, %226 : vector<16x8xf32>
      %228 = vector.extract_strided_slice %39 {offsets = [16, 3], sizes = [16, 1], strides = [1, 1]} : vector<32x16xf32> to vector<16x1xf32>
      %229 = vector.broadcast %228 : vector<16x1xf32> to vector<16x8xf32>
      %230 = arith.mulf %229, %227 : vector<16x8xf32>
      %cst_49 = arith.constant dense<0.000000e+00> : vector<8xf32>
      %231 = vector.multi_reduction <add>, %230, %cst_49 [0] : vector<16x8xf32> to vector<8xf32>
      %232 = vector.shape_cast %231 : vector<8xf32> to vector<1x8xf32>
      %233 = vector.extract_strided_slice %50 {offsets = [2, 0, 0], sizes = [1, 16, 8], strides = [1, 1, 1]} : vector<16x16x8xf32> to vector<1x16x8xf32>
      %234 = vector.shape_cast %233 : vector<1x16x8xf32> to vector<16x8xf32>
      %235 = arith.mulf %234, %227 : vector<16x8xf32>
      %236 = vector.extract_strided_slice %39 {offsets = [0, 2], sizes = [16, 1], strides = [1, 1]} : vector<32x16xf32> to vector<16x1xf32>
      %237 = vector.extract_strided_slice %44 {offsets = [2, 0], sizes = [1, 8], strides = [1, 1]} : vector<16x8xf32> to vector<1x8xf32>
      %238 = vector.broadcast %236 : vector<16x1xf32> to vector<16x8xf32>
      %239 = vector.broadcast %237 : vector<1x8xf32> to vector<16x8xf32>
      %240 = arith.mulf %238, %239 : vector<16x8xf32>
      %241 = arith.addf %235, %240 : vector<16x8xf32>
      %242 = vector.extract_strided_slice %39 {offsets = [16, 2], sizes = [16, 1], strides = [1, 1]} : vector<32x16xf32> to vector<16x1xf32>
      %243 = vector.broadcast %242 : vector<16x1xf32> to vector<16x8xf32>
      %244 = arith.mulf %243, %241 : vector<16x8xf32>
      %cst_50 = arith.constant dense<0.000000e+00> : vector<8xf32>
      %245 = vector.multi_reduction <add>, %244, %cst_50 [0] : vector<16x8xf32> to vector<8xf32>
      %246 = vector.shape_cast %245 : vector<8xf32> to vector<1x8xf32>
      %247 = vector.extract_strided_slice %50 {offsets = [1, 0, 0], sizes = [1, 16, 8], strides = [1, 1, 1]} : vector<16x16x8xf32> to vector<1x16x8xf32>
      %248 = vector.shape_cast %247 : vector<1x16x8xf32> to vector<16x8xf32>
      %249 = arith.mulf %248, %241 : vector<16x8xf32>
      %250 = vector.extract_strided_slice %39 {offsets = [0, 1], sizes = [16, 1], strides = [1, 1]} : vector<32x16xf32> to vector<16x1xf32>
      %251 = vector.extract_strided_slice %44 {offsets = [1, 0], sizes = [1, 8], strides = [1, 1]} : vector<16x8xf32> to vector<1x8xf32>
      %252 = vector.broadcast %250 : vector<16x1xf32> to vector<16x8xf32>
      %253 = vector.broadcast %251 : vector<1x8xf32> to vector<16x8xf32>
      %254 = arith.mulf %252, %253 : vector<16x8xf32>
      %255 = arith.addf %249, %254 : vector<16x8xf32>
      %256 = vector.extract_strided_slice %39 {offsets = [16, 1], sizes = [16, 1], strides = [1, 1]} : vector<32x16xf32> to vector<16x1xf32>
      %257 = vector.broadcast %256 : vector<16x1xf32> to vector<16x8xf32>
      %258 = arith.mulf %257, %255 : vector<16x8xf32>
      %cst_51 = arith.constant dense<0.000000e+00> : vector<8xf32>
      %259 = vector.multi_reduction <add>, %258, %cst_51 [0] : vector<16x8xf32> to vector<8xf32>
      %260 = vector.shape_cast %259 : vector<8xf32> to vector<1x8xf32>
      %261 = vector.extract_strided_slice %50 {offsets = [0, 0, 0], sizes = [1, 16, 8], strides = [1, 1, 1]} : vector<16x16x8xf32> to vector<1x16x8xf32>
      %262 = vector.shape_cast %261 : vector<1x16x8xf32> to vector<16x8xf32>
      %263 = arith.mulf %262, %255 : vector<16x8xf32>
      %264 = vector.extract_strided_slice %39 {offsets = [0, 0], sizes = [16, 1], strides = [1, 1]} : vector<32x16xf32> to vector<16x1xf32>
      %265 = vector.extract_strided_slice %44 {offsets = [0, 0], sizes = [1, 8], strides = [1, 1]} : vector<16x8xf32> to vector<1x8xf32>
      %266 = vector.broadcast %264 : vector<16x1xf32> to vector<16x8xf32>
      %267 = vector.broadcast %265 : vector<1x8xf32> to vector<16x8xf32>
      %268 = arith.mulf %266, %267 : vector<16x8xf32>
      %269 = arith.addf %263, %268 : vector<16x8xf32>
      %270 = vector.extract_strided_slice %39 {offsets = [16, 0], sizes = [16, 1], strides = [1, 1]} : vector<32x16xf32> to vector<16x1xf32>
      %271 = vector.broadcast %270 : vector<16x1xf32> to vector<16x8xf32>
      %272 = arith.mulf %271, %269 : vector<16x8xf32>
      %cst_52 = arith.constant dense<0.000000e+00> : vector<8xf32>
      %273 = vector.multi_reduction <add>, %272, %cst_52 [0] : vector<16x8xf32> to vector<8xf32>
      %274 = vector.shape_cast %273 : vector<8xf32> to vector<1x8xf32>
      %275 = tpu.concatenate %274, %260, %246, %232, %218, %204, %190, %176, %162, %148, %134, %120, %106, %92, %78, %64 in 0 : vector<1x8xf32>, vector<1x8xf32>, vector<1x8xf32>, vector<1x8xf32>, vector<1x8xf32>, vector<1x8xf32>, vector<1x8xf32>, vector<1x8xf32>, vector<1x8xf32>, vector<1x8xf32>, vector<1x8xf32>, vector<1x8xf32>, vector<1x8xf32>, vector<1x8xf32>, vector<1x8xf32>, vector<1x8xf32> -> vector<16x8xf32>
      %276 = vector.broadcast %27 : vector<1x8xf32> to vector<16x8xf32>
      %277 = arith.mulf %276, %43 : vector<16x8xf32>
      %278 = arith.addf %275, %277 : vector<16x8xf32>
      %279 = arith.truncf %278 : vector<16x8xf32> to vector<16x8xbf16>
      %c0_53 = arith.constant 0 : index
      %c0_54 = arith.constant 0 : index
      %280 = arith.index_cast %34 : i32 to index
      %c0_55 = arith.constant 0 : index
      %281 = vector.load %arg9[%c0_53, %c0_54, %280, %c0_55] : memref<1x1x64x8xbf16, #tpu.memory_space<vmem>>, vector<1x1x16x8xbf16>
      %282 = vector.shape_cast %281 : vector<1x1x16x8xbf16> to vector<16x8xbf16>
      %283 = vector.shape_cast %279 : vector<16x8xbf16> to vector<1x1x16x8xbf16>
      tpu.vector_store %arg9[%c0_53, %c0_54, %280, %c0_55], %283 {strides = array<i32>} : memref<1x1x64x8xbf16, #tpu.memory_space<vmem>>, vector<1x1x16x8xbf16>,
      scf.yield %269 : vector<16x8xf32>
    }
    %c4_i32_29 = arith.constant 4 : i32
    %c0_30 = arith.constant 0 : index
    %c0_31 = arith.constant 0 : index
    %31 = vector.load %arg10[%c0_30, %c0_31] : memref<16x8xf32, #tpu.memory_space<vmem>>, vector<16x8xf32>
    tpu.vector_store %arg10[%c0_30, %c0_31], %30 {strides = array<i32>} : memref<16x8xf32, #tpu.memory_space<vmem>>, vector<16x8xf32>,
    return
  }
  func.func @transform_0(%arg0: i32, %arg1: i32, %arg2: i32) -> (i32, i32, i32, i32) {
    %c0_i32 = arith.constant 0 : i32
    %0 = arith.subi %c0_i32, %arg2 : i32
    %c0_i32_0 = arith.constant 0 : i32
    %c0_i32_1 = arith.constant 0 : i32
    return %arg0, %arg1, %0, %c0_i32_0 : i32, i32, i32, i32
  }
  func.func @transform_1(%arg0: i32, %arg1: i32, %arg2: i32) -> (i32, i32, i32) {
    %c2_i32 = arith.constant 2 : i32
    %0 = arith.addi %arg1, %c2_i32 : i32
    %c0_i32 = arith.constant 0 : i32
    %c0_i32_0 = arith.constant 0 : i32
    %c0_i32_1 = arith.constant 0 : i32
    return %0, %c0_i32, %c0_i32_0 : i32, i32, i32
  }
  func.func @transform_2(%arg0: i32, %arg1: i32, %arg2: i32) -> (i32, i32, i32) {
    %c2_i32 = arith.constant 2 : i32
    %0 = arith.addi %arg1, %c2_i32 : i32
    %c0_i32 = arith.constant 0 : i32
    %c0_i32_0 = arith.constant 0 : i32
    %c0_i32_1 = arith.constant 0 : i32
    return %0, %c0_i32, %c0_i32_0 : i32, i32, i32
  }
  func.func @transform_3(%arg0: i32, %arg1: i32, %arg2: i32) -> (i32, i32, i32) {
    %c2_i32 = arith.constant 2 : i32
    %0 = arith.addi %arg1, %c2_i32 : i32
    %c0_i32 = arith.constant 0 : i32
    %c0_i32_0 = arith.constant 0 : i32
    %c0_i32_1 = arith.constant 0 : i32
    return %0, %c0_i32, %c0_i32_0 : i32, i32, i32
  }
  func.func @transform_4(%arg0: i32, %arg1: i32, %arg2: i32) -> (i32, i32, i32) {
    %c2_i32 = arith.constant 2 : i32
    %0 = arith.addi %arg1, %c2_i32 : i32
    %c0_i32 = arith.constant 0 : i32
    %c0_i32_0 = arith.constant 0 : i32
    %c0_i32_1 = arith.constant 0 : i32
    return %0, %c0_i32, %c0_i32_0 : i32, i32, i32
  }
  func.func @transform_5(%arg0: i32, %arg1: i32, %arg2: i32) -> (i32, i32, i32) {
    %c2_i32 = arith.constant 2 : i32
    %0 = arith.addi %arg1, %c2_i32 : i32
    %c0_i32 = arith.constant 0 : i32
    %c0_i32_0 = arith.constant 0 : i32
    %c0_i32_1 = arith.constant 0 : i32
    return %0, %c0_i32, %c0_i32_0 : i32, i32, i32
  }
  func.func @transform_6(%arg0: i32, %arg1: i32, %arg2: i32) -> (i32, i32, i32, i32) {
    %c0_i32 = arith.constant 0 : i32
    %0 = arith.subi %c0_i32, %arg2 : i32
    %c0_i32_0 = arith.constant 0 : i32
    %c0_i32_1 = arith.constant 0 : i32
    return %arg0, %arg1, %0, %c0_i32_0 : i32, i32, i32, i32
  }
}

module attributes {stable_mosaic.version = 11 : i64} {
  func.func @ss_scan_kernel(%arg0: i32, %arg1: i32, %arg2: i32, %arg3: memref<1x1x64x8xbf16, #tpu.memory_space<vmem>>, %arg4: memref<1x8x8xbf16, #tpu.memory_space<vmem>>, %arg5: memref<1x8x32xbf16, #tpu.memory_space<vmem>>, %arg6: memref<1x1x8xf32, #tpu.memory_space<vmem>>, %arg7: memref<1x16x8xf32, #tpu.memory_space<vmem>>, %arg8: memref<1x1x8xf32, #tpu.memory_space<vmem>>, %arg9: memref<1x1x64x8xbf16, #tpu.memory_space<vmem>>, %arg10: memref<16x8xf32, #tpu.memory_space<vmem>>, %arg11: memref<64x8xf32, #tpu.memory_space<vmem>>, %arg12: memref<64x32xf32, #tpu.memory_space<vmem>>) attributes {dimension_semantics = [#tpu.dimension_semantics<parallel>, #tpu.dimension_semantics<parallel>, #tpu.dimension_semantics<arbitrary>], iteration_bounds = array<i64: 2, 2, 1>, scalar_prefetch = 0 : i64, scratch_operands = 3 : i64, tpu.core_type = #tpu.core_type<tc>, window_params = [{transform_indices = @transform_0, window_bounds = array<i64: 1, 1, 64, 8>}, {transform_indices = @transform_1, window_bounds = array<i64: 1, 8, 8>}, {transform_indices = @transform_2, window_bounds = array<i64: 1, 8, 32>}, {transform_indices = @transform_3, window_bounds = array<i64: 1, 1, 8>}, {transform_indices = @transform_4, window_bounds = array<i64: 1, 16, 8>}, {transform_indices = @transform_5, window_bounds = array<i64: 1, 1, 8>}, {transform_indices = @transform_6, window_bounds = array<i64: 1, 1, 64, 8>}]} {
    %c0_i32 = arith.constant 0 : i32
    %0 = arith.cmpi eq, %arg2, %c0_i32 : i32
    %1 = arith.extui %0 : i1 to i32
    %c0_i32_0 = arith.constant 0 : i32
    %2 = arith.cmpi ne, %1, %c0_i32_0 : i32
    scf.if %2 {
      %cst_32 = arith.constant 0.000000e+00 : f32
      %32 = vector.broadcast %cst_32 : f32 to vector<16x8xf32>
      %c0_33 = arith.constant 0 : index
      %c0_34 = arith.constant 0 : index
      %33 = vector.load %arg10[%c0_33, %c0_34] : memref<16x8xf32, #tpu.memory_space<vmem>>, vector<16x8xf32>
      tpu.vector_store %arg10[%c0_33, %c0_34], %32 {strides = array<i32>} : memref<16x8xf32, #tpu.memory_space<vmem>>, vector<16x8xf32>,
    } else {
    }
    %c0 = arith.constant 0 : index
    %c0_1 = arith.constant 0 : index
    %c0_2 = arith.constant 0 : index
    %c0_3 = arith.constant 0 : index
    %3 = vector.load %arg3[%c0, %c0_1, %c0_2, %c0_3] : memref<1x1x64x8xbf16, #tpu.memory_space<vmem>>, vector<1x1x64x8xbf16>
    %4 = vector.shape_cast %3 : vector<1x1x64x8xbf16> to vector<64x8xbf16>
    %c0_4 = arith.constant 0 : index
    %c0_5 = arith.constant 0 : index
    %c0_6 = arith.constant 0 : index
    %5 = vector.load %arg4[%c0_4, %c0_5, %c0_6] : memref<1x8x8xbf16, #tpu.memory_space<vmem>>, vector<1x8x8xbf16>
    %6 = vector.shape_cast %5 : vector<1x8x8xbf16> to vector<8x8xbf16>
    %cst = arith.constant dense<0.000000e+00> : vector<64x8xf32>
    %7 = tpu.matmul %4, %6, %cst {dimension_numbers = #tpu.dot_dimension_numbers<[1], [0], [0], [1], [0, 0, 1, 1], [], []>} : vector<64x8xbf16>, vector<8x8xbf16>, vector<64x8xf32> -> vector<64x8xf32>
    %c0_7 = arith.constant 0 : index
    %c0_8 = arith.constant 0 : index
    %c0_9 = arith.constant 0 : index
    %8 = vector.load %arg6[%c0_7, %c0_8, %c0_9] : memref<1x1x8xf32, #tpu.memory_space<vmem>>, vector<1x1x8xf32>
    %9 = vector.shape_cast %8 : vector<1x1x8xf32> to vector<1x8xf32>
    %10 = vector.broadcast %9 : vector<1x8xf32> to vector<64x8xf32>
    %11 = arith.addf %7, %10 : vector<64x8xf32>
    %cst_10 = arith.constant 2.000000e+01 : f32
    %12 = vector.broadcast %cst_10 : f32 to vector<64x8xf32>
    %13 = arith.cmpf ogt, %11, %12 : vector<64x8xf32>
    %cst_11 = arith.constant 2.000000e+01 : f32
    %14 = vector.broadcast %cst_11 : f32 to vector<64x8xf32>
    %15 = arith.minimumf %11, %14 : vector<64x8xf32>
    %16 = math.exp %15 : vector<64x8xf32>
    %17 = math.log1p %16 : vector<64x8xf32>
    %18 = arith.select %13, %11, %17 : vector<64x8xi1>, vector<64x8xf32>
    %c0_12 = arith.constant 0 : index
    %c0_13 = arith.constant 0 : index
    %19 = vector.load %arg11[%c0_12, %c0_13] : memref<64x8xf32, #tpu.memory_space<vmem>>, vector<64x8xf32>
    tpu.vector_store %arg11[%c0_12, %c0_13], %18 {strides = array<i32>} : memref<64x8xf32, #tpu.memory_space<vmem>>, vector<64x8xf32>,
    %c0_14 = arith.constant 0 : index
    %c0_15 = arith.constant 0 : index
    %c0_16 = arith.constant 0 : index
    %20 = vector.load %arg5[%c0_14, %c0_15, %c0_16] : memref<1x8x32xbf16, #tpu.memory_space<vmem>>, vector<1x8x32xbf16>
    %21 = vector.shape_cast %20 : vector<1x8x32xbf16> to vector<8x32xbf16>
    %cst_17 = arith.constant dense<0.000000e+00> : vector<64x32xf32>
    %22 = tpu.matmul %4, %21, %cst_17 {dimension_numbers = #tpu.dot_dimension_numbers<[1], [0], [0], [1], [0, 0, 1, 1], [], []>} : vector<64x8xbf16>, vector<8x32xbf16>, vector<64x32xf32> -> vector<64x32xf32>
    %c0_18 = arith.constant 0 : index
    %c0_19 = arith.constant 0 : index
    %23 = vector.load %arg12[%c0_18, %c0_19] : memref<64x32xf32, #tpu.memory_space<vmem>>, vector<64x32xf32>
    tpu.vector_store %arg12[%c0_18, %c0_19], %22 {strides = array<i32>} : memref<64x32xf32, #tpu.memory_space<vmem>>, vector<64x32xf32>,
    %c0_20 = arith.constant 0 : index
    %c0_21 = arith.constant 0 : index
    %c0_22 = arith.constant 0 : index
    %24 = vector.load %arg7[%c0_20, %c0_21, %c0_22] : memref<1x16x8xf32, #tpu.memory_space<vmem>>, vector<1x16x8xf32>
    %25 = vector.shape_cast %24 : vector<1x16x8xf32> to vector<16x8xf32>
    %c0_23 = arith.constant 0 : index
    %c0_24 = arith.constant 0 : index
    %c0_25 = arith.constant 0 : index
    %26 = vector.load %arg8[%c0_23, %c0_24, %c0_25] : memref<1x1x8xf32, #tpu.memory_space<vmem>>, vector<1x1x8xf32>
    %27 = vector.shape_cast %26 : vector<1x1x8xf32> to vector<1x8xf32>
    %c0_26 = arith.constant 0 : index
    %c0_27 = arith.constant 0 : index
    %28 = vector.load %arg10[%c0_26, %c0_27] : memref<16x8xf32, #tpu.memory_space<vmem>>, vector<16x8xf32>
    %c0_i32_28 = arith.constant 0 : i32
    %c4_i32 = arith.constant 4 : i32
    %29 = arith.addi %c0_i32_28, %c4_i32 : i32
    %c1_i32 = arith.constant 1 : i32
    %30 = scf.for %arg13 = %c0_i32_28 to %29 step %c1_i32 iter_args(%arg14 = %28) -> (vector<16x8xf32>)  : i32 {
      %c16_i32 = arith.constant 16 : i32
      %32 = arith.muli %arg13, %c16_i32 : i32
      %33 = tpu.assume_multiple %32, 16 : i32
      %34 = arith.index_cast %33 : i32 to index
      %c0_32 = arith.constant 0 : index
      %35 = vector.load %arg11[%34, %c0_32] : memref<64x8xf32, #tpu.memory_space<vmem>>, vector<16x8xf32>
      %36 = arith.index_cast %33 : i32 to index
      %c0_33 = arith.constant 0 : index
      %37 = vector.load %arg12[%36, %c0_33] : memref<64x32xf32, #tpu.memory_space<vmem>>, vector<16x32xf32>
      %38 = tpu.transpose %37, [1, 0] : vector<16x32xf32> -> vector<32x16xf32>
      %c0_34 = arith.constant 0 : index
      %c0_35 = arith.constant 0 : index
      %39 = arith.index_cast %33 : i32 to index
      %c0_36 = arith.constant 0 : index
      %40 = vector.load %arg3[%c0_34, %c0_35, %39, %c0_36] : memref<1x1x64x8xbf16, #tpu.memory_space<vmem>>, vector<1x1x16x8xbf16>
      %41 = vector.shape_cast %40 : vector<1x1x16x8xbf16> to vector<16x8xbf16>
      %42 = arith.extf %41 : vector<16x8xbf16> to vector<16x8xf32>
      %43 = arith.mulf %35, %42 : vector<16x8xf32>
      %44 = vector.shape_cast %35 : vector<16x8xf32> to vector<16x1x8xf32>
      %45 = vector.shape_cast %25 : vector<16x8xf32> to vector<1x16x8xf32>
      %46 = vector.broadcast %44 : vector<16x1x8xf32> to vector<16x16x8xf32>
      %47 = vector.broadcast %45 : vector<1x16x8xf32> to vector<16x16x8xf32>
      %48 = arith.mulf %46, %47 : vector<16x16x8xf32>
      %49 = math.exp %48 : vector<16x16x8xf32>
      %50 = vector.extract_strided_slice %49 {offsets = [0, 0, 0], sizes = [1, 16, 8], strides = [1, 1, 1]} : vector<16x16x8xf32> to vector<1x16x8xf32>
      %51 = vector.shape_cast %50 : vector<1x16x8xf32> to vector<16x8xf32>
      %52 = arith.mulf %51, %arg14 : vector<16x8xf32>
      %53 = vector.extract_strided_slice %38 {offsets = [0, 0], sizes = [16, 1], strides = [1, 1]} : vector<32x16xf32> to vector<16x1xf32>
      %54 = vector.extract_strided_slice %43 {offsets = [0, 0], sizes = [1, 8], strides = [1, 1]} : vector<16x8xf32> to vector<1x8xf32>
      %55 = vector.broadcast %53 : vector<16x1xf32> to vector<16x8xf32>
      %56 = vector.broadcast %54 : vector<1x8xf32> to vector<16x8xf32>
      %57 = arith.mulf %55, %56 : vector<16x8xf32>
      %58 = arith.addf %52, %57 : vector<16x8xf32>
      %59 = vector.extract_strided_slice %38 {offsets = [16, 0], sizes = [16, 1], strides = [1, 1]} : vector<32x16xf32> to vector<16x1xf32>
      %60 = vector.broadcast %59 : vector<16x1xf32> to vector<16x8xf32>
      %61 = arith.mulf %60, %58 : vector<16x8xf32>
      %cst_37 = arith.constant dense<0.000000e+00> : vector<8xf32>
      %62 = vector.multi_reduction <add>, %61, %cst_37 [0] : vector<16x8xf32> to vector<8xf32>
      %63 = vector.shape_cast %62 : vector<8xf32> to vector<1x8xf32>
      %64 = vector.extract_strided_slice %49 {offsets = [1, 0, 0], sizes = [1, 16, 8], strides = [1, 1, 1]} : vector<16x16x8xf32> to vector<1x16x8xf32>
      %65 = vector.shape_cast %64 : vector<1x16x8xf32> to vector<16x8xf32>
      %66 = arith.mulf %65, %58 : vector<16x8xf32>
      %67 = vector.extract_strided_slice %38 {offsets = [0, 1], sizes = [16, 1], strides = [1, 1]} : vector<32x16xf32> to vector<16x1xf32>
      %68 = vector.extract_strided_slice %43 {offsets = [1, 0], sizes = [1, 8], strides = [1, 1]} : vector<16x8xf32> to vector<1x8xf32>
      %69 = vector.broadcast %67 : vector<16x1xf32> to vector<16x8xf32>
      %70 = vector.broadcast %68 : vector<1x8xf32> to vector<16x8xf32>
      %71 = arith.mulf %69, %70 : vector<16x8xf32>
      %72 = arith.addf %66, %71 : vector<16x8xf32>
      %73 = vector.extract_strided_slice %38 {offsets = [16, 1], sizes = [16, 1], strides = [1, 1]} : vector<32x16xf32> to vector<16x1xf32>
      %74 = vector.broadcast %73 : vector<16x1xf32> to vector<16x8xf32>
      %75 = arith.mulf %74, %72 : vector<16x8xf32>
      %cst_38 = arith.constant dense<0.000000e+00> : vector<8xf32>
      %76 = vector.multi_reduction <add>, %75, %cst_38 [0] : vector<16x8xf32> to vector<8xf32>
      %77 = vector.shape_cast %76 : vector<8xf32> to vector<1x8xf32>
      %78 = vector.extract_strided_slice %49 {offsets = [2, 0, 0], sizes = [1, 16, 8], strides = [1, 1, 1]} : vector<16x16x8xf32> to vector<1x16x8xf32>
      %79 = vector.shape_cast %78 : vector<1x16x8xf32> to vector<16x8xf32>
      %80 = arith.mulf %79, %72 : vector<16x8xf32>
      %81 = vector.extract_strided_slice %38 {offsets = [0, 2], sizes = [16, 1], strides = [1, 1]} : vector<32x16xf32> to vector<16x1xf32>
      %82 = vector.extract_strided_slice %43 {offsets = [2, 0], sizes = [1, 8], strides = [1, 1]} : vector<16x8xf32> to vector<1x8xf32>
      %83 = vector.broadcast %81 : vector<16x1xf32> to vector<16x8xf32>
      %84 = vector.broadcast %82 : vector<1x8xf32> to vector<16x8xf32>
      %85 = arith.mulf %83, %84 : vector<16x8xf32>
      %86 = arith.addf %80, %85 : vector<16x8xf32>
      %87 = vector.extract_strided_slice %38 {offsets = [16, 2], sizes = [16, 1], strides = [1, 1]} : vector<32x16xf32> to vector<16x1xf32>
      %88 = vector.broadcast %87 : vector<16x1xf32> to vector<16x8xf32>
      %89 = arith.mulf %88, %86 : vector<16x8xf32>
      %cst_39 = arith.constant dense<0.000000e+00> : vector<8xf32>
      %90 = vector.multi_reduction <add>, %89, %cst_39 [0] : vector<16x8xf32> to vector<8xf32>
      %91 = vector.shape_cast %90 : vector<8xf32> to vector<1x8xf32>
      %92 = vector.extract_strided_slice %49 {offsets = [3, 0, 0], sizes = [1, 16, 8], strides = [1, 1, 1]} : vector<16x16x8xf32> to vector<1x16x8xf32>
      %93 = vector.shape_cast %92 : vector<1x16x8xf32> to vector<16x8xf32>
      %94 = arith.mulf %93, %86 : vector<16x8xf32>
      %95 = vector.extract_strided_slice %38 {offsets = [0, 3], sizes = [16, 1], strides = [1, 1]} : vector<32x16xf32> to vector<16x1xf32>
      %96 = vector.extract_strided_slice %43 {offsets = [3, 0], sizes = [1, 8], strides = [1, 1]} : vector<16x8xf32> to vector<1x8xf32>
      %97 = vector.broadcast %95 : vector<16x1xf32> to vector<16x8xf32>
      %98 = vector.broadcast %96 : vector<1x8xf32> to vector<16x8xf32>
      %99 = arith.mulf %97, %98 : vector<16x8xf32>
      %100 = arith.addf %94, %99 : vector<16x8xf32>
      %101 = vector.extract_strided_slice %38 {offsets = [16, 3], sizes = [16, 1], strides = [1, 1]} : vector<32x16xf32> to vector<16x1xf32>
      %102 = vector.broadcast %101 : vector<16x1xf32> to vector<16x8xf32>
      %103 = arith.mulf %102, %100 : vector<16x8xf32>
      %cst_40 = arith.constant dense<0.000000e+00> : vector<8xf32>
      %104 = vector.multi_reduction <add>, %103, %cst_40 [0] : vector<16x8xf32> to vector<8xf32>
      %105 = vector.shape_cast %104 : vector<8xf32> to vector<1x8xf32>
      %106 = vector.extract_strided_slice %49 {offsets = [4, 0, 0], sizes = [1, 16, 8], strides = [1, 1, 1]} : vector<16x16x8xf32> to vector<1x16x8xf32>
      %107 = vector.shape_cast %106 : vector<1x16x8xf32> to vector<16x8xf32>
      %108 = arith.mulf %107, %100 : vector<16x8xf32>
      %109 = vector.extract_strided_slice %38 {offsets = [0, 4], sizes = [16, 1], strides = [1, 1]} : vector<32x16xf32> to vector<16x1xf32>
      %110 = vector.extract_strided_slice %43 {offsets = [4, 0], sizes = [1, 8], strides = [1, 1]} : vector<16x8xf32> to vector<1x8xf32>
      %111 = vector.broadcast %109 : vector<16x1xf32> to vector<16x8xf32>
      %112 = vector.broadcast %110 : vector<1x8xf32> to vector<16x8xf32>
      %113 = arith.mulf %111, %112 : vector<16x8xf32>
      %114 = arith.addf %108, %113 : vector<16x8xf32>
      %115 = vector.extract_strided_slice %38 {offsets = [16, 4], sizes = [16, 1], strides = [1, 1]} : vector<32x16xf32> to vector<16x1xf32>
      %116 = vector.broadcast %115 : vector<16x1xf32> to vector<16x8xf32>
      %117 = arith.mulf %116, %114 : vector<16x8xf32>
      %cst_41 = arith.constant dense<0.000000e+00> : vector<8xf32>
      %118 = vector.multi_reduction <add>, %117, %cst_41 [0] : vector<16x8xf32> to vector<8xf32>
      %119 = vector.shape_cast %118 : vector<8xf32> to vector<1x8xf32>
      %120 = vector.extract_strided_slice %49 {offsets = [5, 0, 0], sizes = [1, 16, 8], strides = [1, 1, 1]} : vector<16x16x8xf32> to vector<1x16x8xf32>
      %121 = vector.shape_cast %120 : vector<1x16x8xf32> to vector<16x8xf32>
      %122 = arith.mulf %121, %114 : vector<16x8xf32>
      %123 = vector.extract_strided_slice %38 {offsets = [0, 5], sizes = [16, 1], strides = [1, 1]} : vector<32x16xf32> to vector<16x1xf32>
      %124 = vector.extract_strided_slice %43 {offsets = [5, 0], sizes = [1, 8], strides = [1, 1]} : vector<16x8xf32> to vector<1x8xf32>
      %125 = vector.broadcast %123 : vector<16x1xf32> to vector<16x8xf32>
      %126 = vector.broadcast %124 : vector<1x8xf32> to vector<16x8xf32>
      %127 = arith.mulf %125, %126 : vector<16x8xf32>
      %128 = arith.addf %122, %127 : vector<16x8xf32>
      %129 = vector.extract_strided_slice %38 {offsets = [16, 5], sizes = [16, 1], strides = [1, 1]} : vector<32x16xf32> to vector<16x1xf32>
      %130 = vector.broadcast %129 : vector<16x1xf32> to vector<16x8xf32>
      %131 = arith.mulf %130, %128 : vector<16x8xf32>
      %cst_42 = arith.constant dense<0.000000e+00> : vector<8xf32>
      %132 = vector.multi_reduction <add>, %131, %cst_42 [0] : vector<16x8xf32> to vector<8xf32>
      %133 = vector.shape_cast %132 : vector<8xf32> to vector<1x8xf32>
      %134 = vector.extract_strided_slice %49 {offsets = [6, 0, 0], sizes = [1, 16, 8], strides = [1, 1, 1]} : vector<16x16x8xf32> to vector<1x16x8xf32>
      %135 = vector.shape_cast %134 : vector<1x16x8xf32> to vector<16x8xf32>
      %136 = arith.mulf %135, %128 : vector<16x8xf32>
      %137 = vector.extract_strided_slice %38 {offsets = [0, 6], sizes = [16, 1], strides = [1, 1]} : vector<32x16xf32> to vector<16x1xf32>
      %138 = vector.extract_strided_slice %43 {offsets = [6, 0], sizes = [1, 8], strides = [1, 1]} : vector<16x8xf32> to vector<1x8xf32>
      %139 = vector.broadcast %137 : vector<16x1xf32> to vector<16x8xf32>
      %140 = vector.broadcast %138 : vector<1x8xf32> to vector<16x8xf32>
      %141 = arith.mulf %139, %140 : vector<16x8xf32>
      %142 = arith.addf %136, %141 : vector<16x8xf32>
      %143 = vector.extract_strided_slice %38 {offsets = [16, 6], sizes = [16, 1], strides = [1, 1]} : vector<32x16xf32> to vector<16x1xf32>
      %144 = vector.broadcast %143 : vector<16x1xf32> to vector<16x8xf32>
      %145 = arith.mulf %144, %142 : vector<16x8xf32>
      %cst_43 = arith.constant dense<0.000000e+00> : vector<8xf32>
      %146 = vector.multi_reduction <add>, %145, %cst_43 [0] : vector<16x8xf32> to vector<8xf32>
      %147 = vector.shape_cast %146 : vector<8xf32> to vector<1x8xf32>
      %148 = vector.extract_strided_slice %49 {offsets = [7, 0, 0], sizes = [1, 16, 8], strides = [1, 1, 1]} : vector<16x16x8xf32> to vector<1x16x8xf32>
      %149 = vector.shape_cast %148 : vector<1x16x8xf32> to vector<16x8xf32>
      %150 = arith.mulf %149, %142 : vector<16x8xf32>
      %151 = vector.extract_strided_slice %38 {offsets = [0, 7], sizes = [16, 1], strides = [1, 1]} : vector<32x16xf32> to vector<16x1xf32>
      %152 = vector.extract_strided_slice %43 {offsets = [7, 0], sizes = [1, 8], strides = [1, 1]} : vector<16x8xf32> to vector<1x8xf32>
      %153 = vector.broadcast %151 : vector<16x1xf32> to vector<16x8xf32>
      %154 = vector.broadcast %152 : vector<1x8xf32> to vector<16x8xf32>
      %155 = arith.mulf %153, %154 : vector<16x8xf32>
      %156 = arith.addf %150, %155 : vector<16x8xf32>
      %157 = vector.extract_strided_slice %38 {offsets = [16, 7], sizes = [16, 1], strides = [1, 1]} : vector<32x16xf32> to vector<16x1xf32>
      %158 = vector.broadcast %157 : vector<16x1xf32> to vector<16x8xf32>
      %159 = arith.mulf %158, %156 : vector<16x8xf32>
      %cst_44 = arith.constant dense<0.000000e+00> : vector<8xf32>
      %160 = vector.multi_reduction <add>, %159, %cst_44 [0] : vector<16x8xf32> to vector<8xf32>
      %161 = vector.shape_cast %160 : vector<8xf32> to vector<1x8xf32>
      %162 = vector.extract_strided_slice %49 {offsets = [8, 0, 0], sizes = [1, 16, 8], strides = [1, 1, 1]} : vector<16x16x8xf32> to vector<1x16x8xf32>
      %163 = vector.shape_cast %162 : vector<1x16x8xf32> to vector<16x8xf32>
      %164 = arith.mulf %163, %156 : vector<16x8xf32>
      %165 = vector.extract_strided_slice %38 {offsets = [0, 8], sizes = [16, 1], strides = [1, 1]} : vector<32x16xf32> to vector<16x1xf32>
      %166 = vector.extract_strided_slice %43 {offsets = [8, 0], sizes = [1, 8], strides = [1, 1]} : vector<16x8xf32> to vector<1x8xf32>
      %167 = vector.broadcast %165 : vector<16x1xf32> to vector<16x8xf32>
      %168 = vector.broadcast %166 : vector<1x8xf32> to vector<16x8xf32>
      %169 = arith.mulf %167, %168 : vector<16x8xf32>
      %170 = arith.addf %164, %169 : vector<16x8xf32>
      %171 = vector.extract_strided_slice %38 {offsets = [16, 8], sizes = [16, 1], strides = [1, 1]} : vector<32x16xf32> to vector<16x1xf32>
      %172 = vector.broadcast %171 : vector<16x1xf32> to vector<16x8xf32>
      %173 = arith.mulf %172, %170 : vector<16x8xf32>
      %cst_45 = arith.constant dense<0.000000e+00> : vector<8xf32>
      %174 = vector.multi_reduction <add>, %173, %cst_45 [0] : vector<16x8xf32> to vector<8xf32>
      %175 = vector.shape_cast %174 : vector<8xf32> to vector<1x8xf32>
      %176 = vector.extract_strided_slice %49 {offsets = [9, 0, 0], sizes = [1, 16, 8], strides = [1, 1, 1]} : vector<16x16x8xf32> to vector<1x16x8xf32>
      %177 = vector.shape_cast %176 : vector<1x16x8xf32> to vector<16x8xf32>
      %178 = arith.mulf %177, %170 : vector<16x8xf32>
      %179 = vector.extract_strided_slice %38 {offsets = [0, 9], sizes = [16, 1], strides = [1, 1]} : vector<32x16xf32> to vector<16x1xf32>
      %180 = vector.extract_strided_slice %43 {offsets = [9, 0], sizes = [1, 8], strides = [1, 1]} : vector<16x8xf32> to vector<1x8xf32>
      %181 = vector.broadcast %179 : vector<16x1xf32> to vector<16x8xf32>
      %182 = vector.broadcast %180 : vector<1x8xf32> to vector<16x8xf32>
      %183 = arith.mulf %181, %182 : vector<16x8xf32>
      %184 = arith.addf %178, %183 : vector<16x8xf32>
      %185 = vector.extract_strided_slice %38 {offsets = [16, 9], sizes = [16, 1], strides = [1, 1]} : vector<32x16xf32> to vector<16x1xf32>
      %186 = vector.broadcast %185 : vector<16x1xf32> to vector<16x8xf32>
      %187 = arith.mulf %186, %184 : vector<16x8xf32>
      %cst_46 = arith.constant dense<0.000000e+00> : vector<8xf32>
      %188 = vector.multi_reduction <add>, %187, %cst_46 [0] : vector<16x8xf32> to vector<8xf32>
      %189 = vector.shape_cast %188 : vector<8xf32> to vector<1x8xf32>
      %190 = vector.extract_strided_slice %49 {offsets = [10, 0, 0], sizes = [1, 16, 8], strides = [1, 1, 1]} : vector<16x16x8xf32> to vector<1x16x8xf32>
      %191 = vector.shape_cast %190 : vector<1x16x8xf32> to vector<16x8xf32>
      %192 = arith.mulf %191, %184 : vector<16x8xf32>
      %193 = vector.extract_strided_slice %38 {offsets = [0, 10], sizes = [16, 1], strides = [1, 1]} : vector<32x16xf32> to vector<16x1xf32>
      %194 = vector.extract_strided_slice %43 {offsets = [10, 0], sizes = [1, 8], strides = [1, 1]} : vector<16x8xf32> to vector<1x8xf32>
      %195 = vector.broadcast %193 : vector<16x1xf32> to vector<16x8xf32>
      %196 = vector.broadcast %194 : vector<1x8xf32> to vector<16x8xf32>
      %197 = arith.mulf %195, %196 : vector<16x8xf32>
      %198 = arith.addf %192, %197 : vector<16x8xf32>
      %199 = vector.extract_strided_slice %38 {offsets = [16, 10], sizes = [16, 1], strides = [1, 1]} : vector<32x16xf32> to vector<16x1xf32>
      %200 = vector.broadcast %199 : vector<16x1xf32> to vector<16x8xf32>
      %201 = arith.mulf %200, %198 : vector<16x8xf32>
      %cst_47 = arith.constant dense<0.000000e+00> : vector<8xf32>
      %202 = vector.multi_reduction <add>, %201, %cst_47 [0] : vector<16x8xf32> to vector<8xf32>
      %203 = vector.shape_cast %202 : vector<8xf32> to vector<1x8xf32>
      %204 = vector.extract_strided_slice %49 {offsets = [11, 0, 0], sizes = [1, 16, 8], strides = [1, 1, 1]} : vector<16x16x8xf32> to vector<1x16x8xf32>
      %205 = vector.shape_cast %204 : vector<1x16x8xf32> to vector<16x8xf32>
      %206 = arith.mulf %205, %198 : vector<16x8xf32>
      %207 = vector.extract_strided_slice %38 {offsets = [0, 11], sizes = [16, 1], strides = [1, 1]} : vector<32x16xf32> to vector<16x1xf32>
      %208 = vector.extract_strided_slice %43 {offsets = [11, 0], sizes = [1, 8], strides = [1, 1]} : vector<16x8xf32> to vector<1x8xf32>
      %209 = vector.broadcast %207 : vector<16x1xf32> to vector<16x8xf32>
      %210 = vector.broadcast %208 : vector<1x8xf32> to vector<16x8xf32>
      %211 = arith.mulf %209, %210 : vector<16x8xf32>
      %212 = arith.addf %206, %211 : vector<16x8xf32>
      %213 = vector.extract_strided_slice %38 {offsets = [16, 11], sizes = [16, 1], strides = [1, 1]} : vector<32x16xf32> to vector<16x1xf32>
      %214 = vector.broadcast %213 : vector<16x1xf32> to vector<16x8xf32>
      %215 = arith.mulf %214, %212 : vector<16x8xf32>
      %cst_48 = arith.constant dense<0.000000e+00> : vector<8xf32>
      %216 = vector.multi_reduction <add>, %215, %cst_48 [0] : vector<16x8xf32> to vector<8xf32>
      %217 = vector.shape_cast %216 : vector<8xf32> to vector<1x8xf32>
      %218 = vector.extract_strided_slice %49 {offsets = [12, 0, 0], sizes = [1, 16, 8], strides = [1, 1, 1]} : vector<16x16x8xf32> to vector<1x16x8xf32>
      %219 = vector.shape_cast %218 : vector<1x16x8xf32> to vector<16x8xf32>
      %220 = arith.mulf %219, %212 : vector<16x8xf32>
      %221 = vector.extract_strided_slice %38 {offsets = [0, 12], sizes = [16, 1], strides = [1, 1]} : vector<32x16xf32> to vector<16x1xf32>
      %222 = vector.extract_strided_slice %43 {offsets = [12, 0], sizes = [1, 8], strides = [1, 1]} : vector<16x8xf32> to vector<1x8xf32>
      %223 = vector.broadcast %221 : vector<16x1xf32> to vector<16x8xf32>
      %224 = vector.broadcast %222 : vector<1x8xf32> to vector<16x8xf32>
      %225 = arith.mulf %223, %224 : vector<16x8xf32>
      %226 = arith.addf %220, %225 : vector<16x8xf32>
      %227 = vector.extract_strided_slice %38 {offsets = [16, 12], sizes = [16, 1], strides = [1, 1]} : vector<32x16xf32> to vector<16x1xf32>
      %228 = vector.broadcast %227 : vector<16x1xf32> to vector<16x8xf32>
      %229 = arith.mulf %228, %226 : vector<16x8xf32>
      %cst_49 = arith.constant dense<0.000000e+00> : vector<8xf32>
      %230 = vector.multi_reduction <add>, %229, %cst_49 [0] : vector<16x8xf32> to vector<8xf32>
      %231 = vector.shape_cast %230 : vector<8xf32> to vector<1x8xf32>
      %232 = vector.extract_strided_slice %49 {offsets = [13, 0, 0], sizes = [1, 16, 8], strides = [1, 1, 1]} : vector<16x16x8xf32> to vector<1x16x8xf32>
      %233 = vector.shape_cast %232 : vector<1x16x8xf32> to vector<16x8xf32>
      %234 = arith.mulf %233, %226 : vector<16x8xf32>
      %235 = vector.extract_strided_slice %38 {offsets = [0, 13], sizes = [16, 1], strides = [1, 1]} : vector<32x16xf32> to vector<16x1xf32>
      %236 = vector.extract_strided_slice %43 {offsets = [13, 0], sizes = [1, 8], strides = [1, 1]} : vector<16x8xf32> to vector<1x8xf32>
      %237 = vector.broadcast %235 : vector<16x1xf32> to vector<16x8xf32>
      %238 = vector.broadcast %236 : vector<1x8xf32> to vector<16x8xf32>
      %239 = arith.mulf %237, %238 : vector<16x8xf32>
      %240 = arith.addf %234, %239 : vector<16x8xf32>
      %241 = vector.extract_strided_slice %38 {offsets = [16, 13], sizes = [16, 1], strides = [1, 1]} : vector<32x16xf32> to vector<16x1xf32>
      %242 = vector.broadcast %241 : vector<16x1xf32> to vector<16x8xf32>
      %243 = arith.mulf %242, %240 : vector<16x8xf32>
      %cst_50 = arith.constant dense<0.000000e+00> : vector<8xf32>
      %244 = vector.multi_reduction <add>, %243, %cst_50 [0] : vector<16x8xf32> to vector<8xf32>
      %245 = vector.shape_cast %244 : vector<8xf32> to vector<1x8xf32>
      %246 = vector.extract_strided_slice %49 {offsets = [14, 0, 0], sizes = [1, 16, 8], strides = [1, 1, 1]} : vector<16x16x8xf32> to vector<1x16x8xf32>
      %247 = vector.shape_cast %246 : vector<1x16x8xf32> to vector<16x8xf32>
      %248 = arith.mulf %247, %240 : vector<16x8xf32>
      %249 = vector.extract_strided_slice %38 {offsets = [0, 14], sizes = [16, 1], strides = [1, 1]} : vector<32x16xf32> to vector<16x1xf32>
      %250 = vector.extract_strided_slice %43 {offsets = [14, 0], sizes = [1, 8], strides = [1, 1]} : vector<16x8xf32> to vector<1x8xf32>
      %251 = vector.broadcast %249 : vector<16x1xf32> to vector<16x8xf32>
      %252 = vector.broadcast %250 : vector<1x8xf32> to vector<16x8xf32>
      %253 = arith.mulf %251, %252 : vector<16x8xf32>
      %254 = arith.addf %248, %253 : vector<16x8xf32>
      %255 = vector.extract_strided_slice %38 {offsets = [16, 14], sizes = [16, 1], strides = [1, 1]} : vector<32x16xf32> to vector<16x1xf32>
      %256 = vector.broadcast %255 : vector<16x1xf32> to vector<16x8xf32>
      %257 = arith.mulf %256, %254 : vector<16x8xf32>
      %cst_51 = arith.constant dense<0.000000e+00> : vector<8xf32>
      %258 = vector.multi_reduction <add>, %257, %cst_51 [0] : vector<16x8xf32> to vector<8xf32>
      %259 = vector.shape_cast %258 : vector<8xf32> to vector<1x8xf32>
      %260 = vector.extract_strided_slice %49 {offsets = [15, 0, 0], sizes = [1, 16, 8], strides = [1, 1, 1]} : vector<16x16x8xf32> to vector<1x16x8xf32>
      %261 = vector.shape_cast %260 : vector<1x16x8xf32> to vector<16x8xf32>
      %262 = arith.mulf %261, %254 : vector<16x8xf32>
      %263 = vector.extract_strided_slice %38 {offsets = [0, 15], sizes = [16, 1], strides = [1, 1]} : vector<32x16xf32> to vector<16x1xf32>
      %264 = vector.extract_strided_slice %43 {offsets = [15, 0], sizes = [1, 8], strides = [1, 1]} : vector<16x8xf32> to vector<1x8xf32>
      %265 = vector.broadcast %263 : vector<16x1xf32> to vector<16x8xf32>
      %266 = vector.broadcast %264 : vector<1x8xf32> to vector<16x8xf32>
      %267 = arith.mulf %265, %266 : vector<16x8xf32>
      %268 = arith.addf %262, %267 : vector<16x8xf32>
      %269 = vector.extract_strided_slice %38 {offsets = [16, 15], sizes = [16, 1], strides = [1, 1]} : vector<32x16xf32> to vector<16x1xf32>
      %270 = vector.broadcast %269 : vector<16x1xf32> to vector<16x8xf32>
      %271 = arith.mulf %270, %268 : vector<16x8xf32>
      %cst_52 = arith.constant dense<0.000000e+00> : vector<8xf32>
      %272 = vector.multi_reduction <add>, %271, %cst_52 [0] : vector<16x8xf32> to vector<8xf32>
      %273 = vector.shape_cast %272 : vector<8xf32> to vector<1x8xf32>
      %274 = tpu.concatenate %63, %77, %91, %105, %119, %133, %147, %161, %175, %189, %203, %217, %231, %245, %259, %273 in 0 : vector<1x8xf32>, vector<1x8xf32>, vector<1x8xf32>, vector<1x8xf32>, vector<1x8xf32>, vector<1x8xf32>, vector<1x8xf32>, vector<1x8xf32>, vector<1x8xf32>, vector<1x8xf32>, vector<1x8xf32>, vector<1x8xf32>, vector<1x8xf32>, vector<1x8xf32>, vector<1x8xf32>, vector<1x8xf32> -> vector<16x8xf32>
      %275 = vector.broadcast %27 : vector<1x8xf32> to vector<16x8xf32>
      %276 = arith.mulf %275, %42 : vector<16x8xf32>
      %277 = arith.addf %274, %276 : vector<16x8xf32>
      %278 = arith.truncf %277 : vector<16x8xf32> to vector<16x8xbf16>
      %c0_53 = arith.constant 0 : index
      %c0_54 = arith.constant 0 : index
      %279 = arith.index_cast %33 : i32 to index
      %c0_55 = arith.constant 0 : index
      %280 = vector.load %arg9[%c0_53, %c0_54, %279, %c0_55] : memref<1x1x64x8xbf16, #tpu.memory_space<vmem>>, vector<1x1x16x8xbf16>
      %281 = vector.shape_cast %280 : vector<1x1x16x8xbf16> to vector<16x8xbf16>
      %282 = vector.shape_cast %278 : vector<16x8xbf16> to vector<1x1x16x8xbf16>
      tpu.vector_store %arg9[%c0_53, %c0_54, %279, %c0_55], %282 {strides = array<i32>} : memref<1x1x64x8xbf16, #tpu.memory_space<vmem>>, vector<1x1x16x8xbf16>,
      scf.yield %268 : vector<16x8xf32>
    }
    %c4_i32_29 = arith.constant 4 : i32
    %c0_30 = arith.constant 0 : index
    %c0_31 = arith.constant 0 : index
    %31 = vector.load %arg10[%c0_30, %c0_31] : memref<16x8xf32, #tpu.memory_space<vmem>>, vector<16x8xf32>
    tpu.vector_store %arg10[%c0_30, %c0_31], %30 {strides = array<i32>} : memref<16x8xf32, #tpu.memory_space<vmem>>, vector<16x8xf32>,
    return
  }
  func.func @transform_0(%arg0: i32, %arg1: i32, %arg2: i32) -> (i32, i32, i32, i32) {
    %c0_i32 = arith.constant 0 : i32
    %c0_i32_0 = arith.constant 0 : i32
    return %arg0, %arg1, %arg2, %c0_i32 : i32, i32, i32, i32
  }
  func.func @transform_1(%arg0: i32, %arg1: i32, %arg2: i32) -> (i32, i32, i32) {
    %c0_i32 = arith.constant 0 : i32
    %c0_i32_0 = arith.constant 0 : i32
    %c0_i32_1 = arith.constant 0 : i32
    return %arg1, %c0_i32, %c0_i32_0 : i32, i32, i32
  }
  func.func @transform_2(%arg0: i32, %arg1: i32, %arg2: i32) -> (i32, i32, i32) {
    %c0_i32 = arith.constant 0 : i32
    %c0_i32_0 = arith.constant 0 : i32
    %c0_i32_1 = arith.constant 0 : i32
    return %arg1, %c0_i32, %c0_i32_0 : i32, i32, i32
  }
  func.func @transform_3(%arg0: i32, %arg1: i32, %arg2: i32) -> (i32, i32, i32) {
    %c0_i32 = arith.constant 0 : i32
    %c0_i32_0 = arith.constant 0 : i32
    %c0_i32_1 = arith.constant 0 : i32
    return %arg1, %c0_i32, %c0_i32_0 : i32, i32, i32
  }
  func.func @transform_4(%arg0: i32, %arg1: i32, %arg2: i32) -> (i32, i32, i32) {
    %c0_i32 = arith.constant 0 : i32
    %c0_i32_0 = arith.constant 0 : i32
    %c0_i32_1 = arith.constant 0 : i32
    return %arg1, %c0_i32, %c0_i32_0 : i32, i32, i32
  }
  func.func @transform_5(%arg0: i32, %arg1: i32, %arg2: i32) -> (i32, i32, i32) {
    %c0_i32 = arith.constant 0 : i32
    %c0_i32_0 = arith.constant 0 : i32
    %c0_i32_1 = arith.constant 0 : i32
    return %arg1, %c0_i32, %c0_i32_0 : i32, i32, i32
  }
  func.func @transform_6(%arg0: i32, %arg1: i32, %arg2: i32) -> (i32, i32, i32, i32) {
    %c0_i32 = arith.constant 0 : i32
    %c0_i32_0 = arith.constant 0 : i32
    return %arg0, %arg1, %arg2, %c0_i32 : i32, i32, i32, i32
  }
}

module attributes {stable_mosaic.version = 11 : i64} {
  func.func @combine_gate_outproj_kernel(%arg0: i32, %arg1: i32, %arg2: memref<1x1x64x8xbf16, #tpu.memory_space<vmem>>, %arg3: memref<1x1x64x8xbf16, #tpu.memory_space<vmem>>, %arg4: memref<1x64x8xbf16, #tpu.memory_space<vmem>>, %arg5: memref<1x64x8xbf16, #tpu.memory_space<vmem>>, %arg6: memref<1x64x8xbf16, #tpu.memory_space<vmem>>, %arg7: memref<1x8xf32, #tpu.memory_space<vmem>>, %arg8: memref<1x8xf32, #tpu.memory_space<vmem>>, %arg9: memref<8x4xbf16, #tpu.memory_space<vmem>>, %arg10: memref<1x64x4xf32, #tpu.memory_space<vmem>>, %arg11: memref<1x64x4xf32, #tpu.memory_space<vmem>>) attributes {dimension_semantics = [#tpu.dimension_semantics<parallel>, #tpu.dimension_semantics<parallel>], iteration_bounds = array<i64: 2, 1>, scalar_prefetch = 0 : i64, scratch_operands = 0 : i64, tpu.core_type = #tpu.core_type<tc>, window_params = [{transform_indices = @transform_0, window_bounds = array<i64: 1, 1, 64, 8>}, {transform_indices = @transform_1, window_bounds = array<i64: 1, 1, 64, 8>}, {transform_indices = @transform_2, window_bounds = array<i64: 1, 64, 8>}, {transform_indices = @transform_3, window_bounds = array<i64: 1, 64, 8>}, {transform_indices = @transform_4, window_bounds = array<i64: 1, 64, 8>}, {pipeline_mode = #tpu.pipeline_mode<synchronous>, transform_indices = @transform_5, window_bounds = array<i64: 1, 8>}, {pipeline_mode = #tpu.pipeline_mode<synchronous>, transform_indices = @transform_6, window_bounds = array<i64: 1, 8>}, {pipeline_mode = #tpu.pipeline_mode<synchronous>, transform_indices = @transform_7, window_bounds = array<i64: 8, 4>}, {transform_indices = @transform_8, window_bounds = array<i64: 1, 64, 4>}, {transform_indices = @transform_9, window_bounds = array<i64: 1, 64, 4>}]} {
    %c0 = arith.constant 0 : index
    %c0_0 = arith.constant 0 : index
    %c0_1 = arith.constant 0 : index
    %c0_2 = arith.constant 0 : index
    %0 = vector.load %arg2[%c0, %c0_0, %c0_1, %c0_2] : memref<1x1x64x8xbf16, #tpu.memory_space<vmem>>, vector<1x1x64x8xbf16>
    %1 = vector.shape_cast %0 : vector<1x1x64x8xbf16> to vector<64x8xbf16>
    %2 = arith.extf %1 : vector<64x8xbf16> to vector<64x8xf32>
    %c0_3 = arith.constant 0 : index
    %c0_4 = arith.constant 0 : index
    %c0_5 = arith.constant 0 : index
    %c0_6 = arith.constant 0 : index
    %3 = vector.load %arg3[%c0_3, %c0_4, %c0_5, %c0_6] : memref<1x1x64x8xbf16, #tpu.memory_space<vmem>>, vector<1x1x64x8xbf16>
    %4 = vector.shape_cast %3 : vector<1x1x64x8xbf16> to vector<64x8xbf16>
    %5 = arith.extf %4 : vector<64x8xbf16> to vector<64x8xf32>
    %6 = arith.addf %2, %5 : vector<64x8xf32>
    %c0_7 = arith.constant 0 : index
    %c0_8 = arith.constant 0 : index
    %c0_9 = arith.constant 0 : index
    %7 = vector.load %arg4[%c0_7, %c0_8, %c0_9] : memref<1x64x8xbf16, #tpu.memory_space<vmem>>, vector<1x64x8xbf16>
    %8 = vector.shape_cast %7 : vector<1x64x8xbf16> to vector<64x8xbf16>
    %9 = arith.extf %8 : vector<64x8xbf16> to vector<64x8xf32>
    %10 = arith.addf %6, %9 : vector<64x8xf32>
    %c0_10 = arith.constant 0 : index
    %c0_11 = arith.constant 0 : index
    %c0_12 = arith.constant 0 : index
    %11 = vector.load %arg5[%c0_10, %c0_11, %c0_12] : memref<1x64x8xbf16, #tpu.memory_space<vmem>>, vector<1x64x8xbf16>
    %12 = vector.shape_cast %11 : vector<1x64x8xbf16> to vector<64x8xbf16>
    %13 = arith.extf %12 : vector<64x8xbf16> to vector<64x8xf32>
    %14 = arith.addf %10, %13 : vector<64x8xf32>
    %cst = arith.constant dense<0.000000e+00> : vector<64xf32>
    %15 = vector.multi_reduction <add>, %14, %cst [1] : vector<64x8xf32> to vector<64xf32>
    %16 = vector.shape_cast %15 : vector<64xf32> to vector<64x1xf32>
    %cst_13 = arith.constant 8.000000e+00 : f32
    %17 = vector.broadcast %cst_13 : f32 to vector<64x1xf32>
    %18 = arith.divf %16, %17 : vector<64x1xf32>
    %19 = vector.broadcast %18 : vector<64x1xf32> to vector<64x8xf32>
    %20 = arith.subf %14, %19 : vector<64x8xf32>
    %21 = arith.mulf %20, %20 : vector<64x8xf32>
    %cst_14 = arith.constant dense<0.000000e+00> : vector<64xf32>
    %22 = vector.multi_reduction <add>, %21, %cst_14 [1] : vector<64x8xf32> to vector<64xf32>
    %23 = vector.shape_cast %22 : vector<64xf32> to vector<64x1xf32>
    %cst_15 = arith.constant 8.000000e+00 : f32
    %24 = vector.broadcast %cst_15 : f32 to vector<64x1xf32>
    %25 = arith.divf %23, %24 : vector<64x1xf32>
    %26 = vector.broadcast %18 : vector<64x1xf32> to vector<64x8xf32>
    %27 = arith.subf %14, %26 : vector<64x8xf32>
    %cst_16 = arith.constant 9.99999974E-6 : f32
    %28 = vector.broadcast %cst_16 : f32 to vector<64x1xf32>
    %29 = arith.addf %25, %28 : vector<64x1xf32>
    %30 = math.rsqrt %29 : vector<64x1xf32>
    %31 = vector.broadcast %30 : vector<64x1xf32> to vector<64x8xf32>
    %32 = arith.mulf %27, %31 : vector<64x8xf32>
    %c0_17 = arith.constant 0 : index
    %c0_18 = arith.constant 0 : index
    %33 = vector.load %arg7[%c0_17, %c0_18] : memref<1x8xf32, #tpu.memory_space<vmem>>, vector<1x8xf32>
    %34 = vector.broadcast %33 : vector<1x8xf32> to vector<64x8xf32>
    %35 = arith.mulf %32, %34 : vector<64x8xf32>
    %c0_19 = arith.constant 0 : index
    %c0_20 = arith.constant 0 : index
    %36 = vector.load %arg8[%c0_19, %c0_20] : memref<1x8xf32, #tpu.memory_space<vmem>>, vector<1x8xf32>
    %37 = vector.broadcast %36 : vector<1x8xf32> to vector<64x8xf32>
    %38 = arith.addf %35, %37 : vector<64x8xf32>
    %c0_21 = arith.constant 0 : index
    %c0_22 = arith.constant 0 : index
    %c0_23 = arith.constant 0 : index
    %39 = vector.load %arg6[%c0_21, %c0_22, %c0_23] : memref<1x64x8xbf16, #tpu.memory_space<vmem>>, vector<1x64x8xbf16>
    %40 = vector.shape_cast %39 : vector<1x64x8xbf16> to vector<64x8xbf16>
    %41 = arith.extf %40 : vector<64x8xbf16> to vector<64x8xf32>
    %42 = arith.negf %41 : vector<64x8xf32>
    %43 = math.exp %42 : vector<64x8xf32>
    %cst_24 = arith.constant 1.000000e+00 : f32
    %44 = vector.broadcast %cst_24 : f32 to vector<64x8xf32>
    %45 = arith.addf %44, %43 : vector<64x8xf32>
    %46 = arith.divf %44, %45 : vector<64x8xf32>
    %47 = arith.mulf %41, %46 : vector<64x8xf32>
    %48 = arith.mulf %38, %47 : vector<64x8xf32>
    %c0_25 = arith.constant 0 : index
    %c0_26 = arith.constant 0 : index
    %c0_27 = arith.constant 0 : index
    %49 = vector.load %arg10[%c0_25, %c0_26, %c0_27] : memref<1x64x4xf32, #tpu.memory_space<vmem>>, vector<1x64x4xf32>
    %50 = vector.shape_cast %49 : vector<1x64x4xf32> to vector<64x4xf32>
    %51 = arith.truncf %48 : vector<64x8xf32> to vector<64x8xbf16>
    %c0_28 = arith.constant 0 : index
    %c0_29 = arith.constant 0 : index
    %52 = vector.load %arg9[%c0_28, %c0_29] : memref<8x4xbf16, #tpu.memory_space<vmem>>, vector<8x4xbf16>
    %cst_30 = arith.constant dense<0.000000e+00> : vector<64x4xf32>
    %53 = tpu.matmul %51, %52, %cst_30 {dimension_numbers = #tpu.dot_dimension_numbers<[1], [0], [0], [1], [0, 0, 1, 1], [], []>} : vector<64x8xbf16>, vector<8x4xbf16>, vector<64x4xf32> -> vector<64x4xf32>
    %54 = arith.addf %50, %53 : vector<64x4xf32>
    %c0_31 = arith.constant 0 : index
    %c0_32 = arith.constant 0 : index
    %c0_33 = arith.constant 0 : index
    %55 = vector.load %arg11[%c0_31, %c0_32, %c0_33] : memref<1x64x4xf32, #tpu.memory_space<vmem>>, vector<1x64x4xf32>
    %56 = vector.shape_cast %55 : vector<1x64x4xf32> to vector<64x4xf32>
    %57 = vector.shape_cast %54 : vector<64x4xf32> to vector<1x64x4xf32>
    tpu.vector_store %arg11[%c0_31, %c0_32, %c0_33], %57 {strides = array<i32>} : memref<1x64x4xf32, #tpu.memory_space<vmem>>, vector<1x64x4xf32>,
    return
  }
  func.func @transform_0(%arg0: i32, %arg1: i32) -> (i32, i32, i32, i32) {
    %c0_i32 = arith.constant 0 : i32
    %c0_i32_0 = arith.constant 0 : i32
    %c0_i32_1 = arith.constant 0 : i32
    return %arg0, %c0_i32, %arg1, %c0_i32_0 : i32, i32, i32, i32
  }
  func.func @transform_1(%arg0: i32, %arg1: i32) -> (i32, i32, i32, i32) {
    %c0_i32 = arith.constant 0 : i32
    %c0_i32_0 = arith.constant 0 : i32
    %c0_i32_1 = arith.constant 0 : i32
    return %arg0, %c0_i32, %arg1, %c0_i32_0 : i32, i32, i32, i32
  }
  func.func @transform_2(%arg0: i32, %arg1: i32) -> (i32, i32, i32) {
    %c0_i32 = arith.constant 0 : i32
    %c0_i32_0 = arith.constant 0 : i32
    return %arg0, %arg1, %c0_i32 : i32, i32, i32
  }
  func.func @transform_3(%arg0: i32, %arg1: i32) -> (i32, i32, i32) {
    %c0_i32 = arith.constant 0 : i32
    %c0_i32_0 = arith.constant 0 : i32
    return %arg0, %arg1, %c0_i32 : i32, i32, i32
  }
  func.func @transform_4(%arg0: i32, %arg1: i32) -> (i32, i32, i32) {
    %c0_i32 = arith.constant 0 : i32
    %c0_i32_0 = arith.constant 0 : i32
    return %arg0, %arg1, %c0_i32 : i32, i32, i32
  }
  func.func @transform_5(%arg0: i32, %arg1: i32) -> (i32, i32) {
    %c0_i32 = arith.constant 0 : i32
    %c0_i32_0 = arith.constant 0 : i32
    %c0_i32_1 = arith.constant 0 : i32
    return %c0_i32, %c0_i32_0 : i32, i32
  }
  func.func @transform_6(%arg0: i32, %arg1: i32) -> (i32, i32) {
    %c0_i32 = arith.constant 0 : i32
    %c0_i32_0 = arith.constant 0 : i32
    %c0_i32_1 = arith.constant 0 : i32
    return %c0_i32, %c0_i32_0 : i32, i32
  }
  func.func @transform_7(%arg0: i32, %arg1: i32) -> (i32, i32) {
    %c0_i32 = arith.constant 0 : i32
    %c0_i32_0 = arith.constant 0 : i32
    %c0_i32_1 = arith.constant 0 : i32
    return %c0_i32, %c0_i32_0 : i32, i32
  }
  func.func @transform_8(%arg0: i32, %arg1: i32) -> (i32, i32, i32) {
    %c0_i32 = arith.constant 0 : i32
    %c0_i32_0 = arith.constant 0 : i32
    return %arg0, %arg1, %c0_i32 : i32, i32, i32
  }
  func.func @transform_9(%arg0: i32, %arg1: i32) -> (i32, i32, i32) {
    %c0_i32 = arith.constant 0 : i32
    %c0_i32_0 = arith.constant 0 : i32
    return %arg0, %arg1, %c0_i32 : i32, i32, i32
  }
}

</mosaic_0001>

<bundles_post_ra>
// kernel: vss_block_forward.5
= control target key start
LH: loop header
LB: loop body
LE: loop exit
PB: predicated region body
PF: predicated region fallthrough
CT: control target
= control target key end

     0   :  { %vm39_vm0 = vcmask 31744   ;;  %v706_v28 = vmov 4.0   ;;  %vm472_vm2 = vcmask 1041408   ;;  %s1397_s0 = inlined_call_operand.vmem [shape: f32[128,4], index: 0, kind: input, shape index: {}]   ;;  %s1398_s1 = inlined_call_operand.vmem [shape: f32[1,4], index: 1, kind: input, shape index: {}]   ;;  %s1399_s2 = inlined_call_operand.vmem [shape: f32[1,4], index: 2, kind: input, shape index: {}]   ;;  %s1400_s3 = inlined_call_operand.vmem [shape: bf16[4,8], index: 3, kind: input, shape index: {}]   ;;  %s1401_s4 = inlined_call_operand.vmem [shape: bf16[4,8], index: 4, kind: input, shape index: {}]   ;;  %s1402_s5 = inlined_call_operand.vmem [shape: bf16[128,8], index: 5, kind: output, shape index: {0}]   ;;  %s1403_s6 = inlined_call_operand.vmem [shape: bf16[128,8], index: 6, kind: output, shape index: {1}]  }
   0x1   :  { %v31_v0 = vld [vmem:[%s1397_s0 + $0x40] sm:$0xff]  ;;  %v753_v2 = vld [vmem:[%s1397_s0 + $0x50] sm:$0xff]  ;;  %v32_v6 = vld [vmem:[%s1397_s0 + $0x48] sm:$0xff]  ;;  %672 = vrcp.f32 %v706_v28 }
   0x2   :  { %v748_v1 = vld [vmem:[%s1397_s0] sm:$0xff]  ;;  %v64_v3 = vsel %vm39_vm0, %v31_v0, 0.0  ;;  %v70_v5 = vsel %vm39_vm0, %v753_v2, 0.0  ;;  %v24_v7 = vld [vmem:[%s1397_s0 + $0x8] sm:$0xff]  ;;  %v34_v8 = vld [vmem:[%s1397_s0 + $0x58] sm:$0xff]  ;;  %v67_v9 = vsel %vm39_vm0, %v32_v6, 0.0 }
   0x3   :  { %v40_v4 = vsel %vm39_vm0, %v748_v1, 0.0  ;;  %65 = vadd.xlane.f32.xlu0 %v64_v3  ;;  %71 = vadd.xlane.f32.xlu2 %v70_v5  ;;  %v43_v10 = vsel %vm39_vm0, %v24_v7, 0.0  ;;  %v73_v11 = vsel %vm39_vm0, %v34_v8, 0.0  ;;  %v775_v12 = vld [vmem:[%s1397_s0 + $0x10] sm:$0xff]  ;;  %v780_v13 = vld [vmem:[%s1397_s0 + $0x18] sm:$0xff]  ;;  %v785_v14 = vld [vmem:[%s1397_s0 + $0x60] sm:$0xff] }
   0x4   :  { %41 = vadd.xlane.f32.xlu1 %v40_v4  ;;  %v46_v15 = vsel %vm39_vm0, %v775_v12, 0.0  ;;  %v49_v16 = vsel %vm39_vm0, %v780_v13, 0.0  ;;  %v76_v17 = vsel %vm39_vm0, %v785_v14, 0.0  ;;  %v796_v18 = vld [vmem:[%s1397_s0 + $0x68] sm:$0xff]  ;;  %v801_v19 = vld [vmem:[%s1397_s0 + $0x20] sm:$0xff]  ;;  %v817_v24 = vld [vmem:[%s1397_s0 + $0x78] sm:$0xff] }
   0x5   :  { %v806_v20 = vld [vmem:[%s1397_s0 + $0x28] sm:$0xff]  ;;  %v79_v21 = vsel %vm39_vm0, %v796_v18, 0.0  ;;  %v52_v22 = vsel %vm39_vm0, %v801_v19, 0.0  ;;  %v822_v25 = vld [vmem:[%s1397_s0 + $0x70] sm:$0xff]  ;;  %v85_v26 = vsel %vm39_vm0, %v817_v24, 0.0 }
   0x6   :  { %v55_v23 = vsel %vm39_vm0, %v806_v20, 0.0  ;;  %v82_v27 = vsel %vm39_vm0, %v822_v25, 0.0  ;;  %v842_v48 = vld [vmem:[%s1397_s0 + $0x30] sm:$0xff] }
   0x7   :  { %v673_v29 = vpop.eup %672  ;;  %v58_v53 = vsel %vm39_vm0, %v842_v48, 0.0 }
   0x8   :  { %v89_v30 = vmul.f32 4.0, %v673_v29  ;;  %vm93_vm1 = vweird.f32 %v673_v29 }
   0xa   :  { %v90_v31 = vsub.f32 1.0, %v89_v30 }
   0xb   :  { %68 = vadd.xlane.f32.xlu0 %v67_v9  ;;  %74 = vadd.xlane.f32.xlu2 %v73_v11 }
   0xc   :  { %44 = vadd.xlane.f32.xlu1 %v43_v10  ;;  %v91_v32 = vmul.f32 %v673_v29, %v90_v31 }
   0xe   :  { %v92_v33 = vadd.f32 %v673_v29, %v91_v32 }
  0x10   :  { %v828_v34 = vsel %vm93_vm1, %v673_v29, %v92_v33 }
  0x13   :  { %47 = vadd.xlane.f32.xlu0 %v46_v15  ;;  %77 = vadd.xlane.f32.xlu2 %v76_v17 }
  0x14   :  { %50 = vadd.xlane.f32.xlu1 %v49_v16 }
  0x1b   :  { %80 = vadd.xlane.f32.xlu0 %v79_v21  ;;  %56 = vadd.xlane.f32.xlu2 %v55_v23  ;;  %v890_v21 = vld [vmem:[%s1397_s0 + $0x38] sm:$0xff] }
  0x1c   :  { %53 = vadd.xlane.f32.xlu1 %v52_v22  ;;  %v61_v28 = vsel %vm39_vm0, %v890_v21, 0.0 }
  0x23   :  { %86 = vadd.xlane.f32.xlu0 %v85_v26  ;;  %83 = vadd.xlane.f32.xlu2 %v82_v27 }
  0x76   :  { %v66_v35 = vpop.xlane.xlu0 %65  ;;  %v72_v38 = vpop.xlane.xlu2 %71 }
  0x77   :  { %v42_v36 = vpop.xlane.xlu1 %41  ;;  %v103_v37 = vmul.f32 %v828_v34, %v66_v35  ;;  %v105_v49 = vmul.f32 %v828_v34, %v72_v38 }
  0x78   :  { %v95_v44 = vmul.f32 %v828_v34, %v42_v36 }
  0x79   :  { %v831_v39 = vsub.f32 %v31_v0, %v103_v37  ;;  %v862_v58 = vsub.f32 %v753_v2, %v105_v49 }
  0x7a   :  { %v853_v54 = vsub.f32 %v748_v1, %v95_v44 }
  0x7b   :  { %v135_v40 = vmul.f32 %v831_v39, %v831_v39  ;;  %v137_v2 = vmul.f32 %v862_v58, %v862_v58 }
  0x7c   :  { %v127_v1 = vmul.f32 %v853_v54, %v853_v54 }
  0x7d   :  { %v167_v41 = vsel %vm39_vm0, %v135_v40, 0.0 }
  0x7e   :  { %v69_v42 = vpop.xlane.xlu0 %68  ;;  %168 = vadd.xlane.f32.xlu0 %v167_v41  ;;  %v75_v47 = vpop.xlane.xlu2 %74 }
  0x7f   :  { %v45_v43 = vpop.xlane.xlu1 %44  ;;  %v104_v45 = vmul.f32 %v828_v34, %v69_v42  ;;  %v106_v50 = vmul.f32 %v828_v34, %v75_v47 }
  0x80   :  { %v96_v46 = vmul.f32 %v828_v34, %v45_v43 }
  0x81   :  { %v846_v51 = vsub.f32 %v32_v6, %v104_v45  ;;  %v855_v55 = vsub.f32 %v34_v8, %v106_v50  ;;  %v173_v8 = vsel %vm39_vm0, %v137_v2, 0.0 }
  0x82   :  { %v848_v52 = vsub.f32 %v24_v7, %v96_v46  ;;  %v143_v7 = vsel %vm39_vm0, %v127_v1, 0.0 }
  0x83   :  { %v136_v56 = vmul.f32 %v846_v51, %v846_v51  ;;  %v138_v0 = vmul.f32 %v855_v55, %v855_v55 }
  0x84   :  { %v128_v57 = vmul.f32 %v848_v52, %v848_v52 }
  0x85   :  { %v170_v59 = vsel %vm39_vm0, %v136_v56, 0.0  ;;  %v176_v6 = vsel %vm39_vm0, %v138_v0, 0.0  ;;  %v558_v56 = vld [vmem:[%s1401_s4] sm:$0x3] }
  0x86   :  { %v146_v60 = vsel %vm39_vm0, %v128_v57, 0.0  ;;  %59 = vadd.xlane.f32.xlu0 %v58_v53  ;;  %171 = vadd.xlane.f32.xlu1 %v170_v59  ;;  %v48_v61 = vpop.xlane.xlu0 %47  ;;  %v78_v63 = vpop.xlane.xlu2 %77  ;;  %v560_v59 = vsel %vm472_vm2, %v558_v56, 0 }
  0x87   :  { %v51_v62 = vpop.xlane.xlu1 %50  ;;  %147 = vadd.xlane.f32.xlu2 %v146_v60  ;;  %v107_v3 = vmul.f32 %v828_v34, %v78_v63  ;;  %v97_v15 = vmul.f32 %v828_v34, %v48_v61  ;;  %668 = vmatpush.bf16.msra.mxu3 %v560_v59 }
  0x88   :  { %v98_v4 = vmul.f32 %v828_v34, %v51_v62  ;;  %569 = vmatpush.bf16.msra.mxu1 %v560_v59 }
  0x89   :  { %v875_v5 = vsub.f32 %v785_v14, %v107_v3  ;;  %v896_v23 = vsub.f32 %v775_v12, %v97_v15 }
  0x8a   :  { %v881_v9 = vsub.f32 %v780_v13, %v98_v4 }
  0x8b   :  { %v139_v14 = vmul.f32 %v875_v5, %v875_v5 }
  0x8c   :  { %v130_v13 = vmul.f32 %v881_v9, %v881_v9 }
  0x8d   :  { %v179_v27 = vsel %vm39_vm0, %v139_v14, 0.0 }
  0x8e   :  { %177 = vadd.xlane.f32.xlu0 %v176_v6  ;;  %144 = vadd.xlane.f32.xlu1 %v143_v7  ;;  %v81_v10 = vpop.xlane.xlu0 %80  ;;  %v57_v16 = vpop.xlane.xlu2 %56  ;;  %v152_v29 = vsel %vm39_vm0, %v130_v13, 0.0 }
  0x8f   :  { %v54_v11 = vpop.xlane.xlu1 %53  ;;  %174 = vadd.xlane.f32.xlu2 %v173_v8  ;;  %v100_v17 = vmul.f32 %v828_v34, %v57_v16  ;;  %v108_v32 = vmul.f32 %v828_v34, %v81_v10 }
  0x90   :  { %v99_v22 = vmul.f32 %v828_v34, %v54_v11 }
  0x91   :  { %v899_v26 = vsub.f32 %v806_v20, %v100_v17  ;;  %v129_v20 = vmul.f32 %v896_v23, %v896_v23 }
  0x92   :  { %v906_v30 = vsub.f32 %v801_v19, %v99_v22  ;;  %v917_v19 = vsub.f32 %v796_v18, %v108_v32 }
  0x93   :  { %v132_v12 = vmul.f32 %v899_v26, %v899_v26  ;;  %v149_v37 = vsel %vm39_vm0, %v129_v20, 0.0 }
  0x94   :  { %v131_v35 = vmul.f32 %v906_v30, %v906_v30  ;;  %v140_v43 = vmul.f32 %v917_v19, %v917_v19 }
  0x95   :  { %v158_v36 = vsel %vm39_vm0, %v132_v12, 0.0 }
  0x96   :  { %180 = vadd.xlane.f32.xlu0 %v179_v27  ;;  %62 = vadd.xlane.f32.xlu1 %v61_v28  ;;  %v87_v31 = vpop.xlane.xlu0 %86  ;;  %v155_v40 = vsel %vm39_vm0, %v131_v35, 0.0  ;;  %v84_v41 = vpop.xlane.xlu2 %83 }
  0x97   :  { %153 = vadd.xlane.f32.xlu2 %v152_v29  ;;  %v110_v33 = vmul.f32 %v828_v34, %v87_v31  ;;  %v109_v42 = vmul.f32 %v828_v34, %v84_v41 }
  0x99   :  { %v922_v38 = vsub.f32 %v817_v24, %v110_v33  ;;  %v931_v44 = vsub.f32 %v822_v25, %v109_v42  ;;  %v182_v24 = vsel %vm39_vm0, %v140_v43, 0.0  ;;  %v447_v25 = vld [vmem:[%s1400_s3] sm:$0x3] }
  0x9a   :  { %v474_v57 = vsel %vm472_vm2, %v447_v25, 0 }
  0x9b   :  { %v142_v18 = vmul.f32 %v922_v38, %v922_v38  ;;  %v141_v46 = vmul.f32 %v931_v44, %v931_v44  ;;  %667 = vmatpush.bf16.msra.mxu2 %v474_v57  ;;  %483 = vmatpush.bf16.msra.mxu0 %v474_v57 }
  0x9d   :  { %v188_v45 = vsel %vm39_vm0, %v142_v18, 0.0  ;;  %v185_v47 = vsel %vm39_vm0, %v141_v46, 0.0 }
  0x9e   :  { %159 = vadd.xlane.f32.xlu0 %v158_v36  ;;  %150 = vadd.xlane.f32.xlu1 %v149_v37 }
  0x9f   :  { %156 = vadd.xlane.f32.xlu2 %v155_v40 }
  0xa6   :  { %183 = vadd.xlane.f32.xlu1 %v182_v24 }
  0xa7   :  { %189 = vadd.xlane.f32.xlu2 %v188_v45 }
  0xae   :  { %186 = vadd.xlane.f32.xlu1 %v185_v47 }
  0xf1   :  { %v169_v49 = vpop.xlane.xlu0 %168 }
  0xf2   :  { %v199_v50 = vmul.f32 %v169_v49, %v828_v34 }
  0xf4   :  { %v939_v53 = vadd.f32 1e-06, %v199_v50 }
  0xf6   :  { %674 = vrsqrt.f32 %v939_v53  ;;  %vm309_vm4 = vweird.f32 %v939_v53 }
  0xf9   :  { %v60_v60 = vpop.xlane.xlu0 %59  ;;  %v172_v61 = vpop.xlane.xlu1 %171 }
  0xfa   :  { %v101_v62 = vmul.f32 %v828_v34, %v60_v60  ;;  %v148_v63 = vpop.xlane.xlu2 %147  ;;  %v200_v0 = vmul.f32 %v172_v61, %v828_v34 }
  0xfb   :  { %v192_v1 = vmul.f32 %v148_v63, %v828_v34 }
  0xfc   :  { %v951_v3 = vpop.eup %674  ;;  %v954_v2 = vsub.f32 %v842_v48, %v101_v62  ;;  %v216_v4 = vadd.f32 1e-06, %v200_v0 }
  0xfd   :  { %v304_v6 = vmul.f32 %v951_v3, %v939_v53  ;;  %v958_v7 = vadd.f32 1e-06, %v192_v1  ;;  %vm310_vm3 = vweird.f32 %v951_v3 }
  0xfe   :  { %676 = vrsqrt.f32 %v216_v4  ;;  %v133_v8 = vmul.f32 %v954_v2, %v954_v2  ;;  %vm319_vm5 = vweird.f32 %v216_v4  ;;  %vm1006_vm7 = vmor %vm309_vm4, %vm310_vm3 }
  0xff   :  { %v305_v10 = vmul.f32 %v951_v3, %v304_v6  ;;  %678 = vrsqrt.f32 %v958_v7  ;;  %vm239_vm8 = vweird.f32 %v958_v7 }
 0x100   :  { %v161_v11 = vsel %vm39_vm0, %v133_v8, 0.0 }
 0x101   :  { %162 = vadd.xlane.f32.xlu0 %v161_v11  ;;  %v178_v15 = vpop.xlane.xlu0 %177  ;;  %v145_v48 = vpop.xlane.xlu1 %144  ;;  %v306_v13 = vmul.f32 0.5, %v305_v10 }
 0x102   :  { %v202_v16 = vmul.f32 %v178_v15, %v828_v34  ;;  %v175_v14 = vpop.xlane.xlu2 %174  ;;  %v191_v17 = vmul.f32 %v145_v48, %v828_v34 }
 0x103   :  { %v201_v22 = vmul.f32 %v175_v14, %v828_v34  ;;  %v307_v33 = vsub.f32 1.5, %v306_v13 }
 0x104   :  { %v968_v27 = vpop.eup %676  ;;  %v970_v28 = vadd.f32 1e-06, %v202_v16  ;;  %v972_v29 = vadd.f32 1e-06, %v191_v17 }
 0x105   :  { %v974_v31 = vpop.eup %678  ;;  %v314_v32 = vmul.f32 %v968_v27, %v216_v4  ;;  %v977_v12 = vadd.f32 1e-06, %v201_v22  ;;  %v308_v45 = vmul.f32 %v951_v3, %v307_v33  ;;  %vm320_vm6 = vweird.f32 %v968_v27 }
 0x106   :  { %v234_v20 = vmul.f32 %v974_v31, %v958_v7  ;;  %680 = vrsqrt.f32 %v970_v28  ;;  %vm240_vm9 = vweird.f32 %v974_v31  ;;  %vm1021_vm10 = vmor %vm319_vm5, %vm320_vm6  ;;  %vm339_vm11 = vweird.f32 %v970_v28 }
 0x107   :  { %v315_v35 = vmul.f32 %v968_v27, %v314_v32  ;;  %682 = vrsqrt.f32 %v977_v12  ;;  %v312_v0 = vsel %vm1006_vm7, %v951_v3, %v308_v45  ;;  %vm329_vm12 = vweird.f32 %v977_v12  ;;  %vm1043_vm13 = vmor %vm239_vm8, %vm240_vm9  ;;  %v1053_v32 = vld [vmem:[%s1398_s1] ss:$0 sm:$0xff] }
 0x108   :  { %v235_v36 = vmul.f32 %v974_v31, %v234_v20  ;;  %684 = vrsqrt.f32 %v972_v29  ;;  %v391_v16 = vmul.f32 %v312_v0, %v831_v39  ;;  %vm229_vm14 = vweird.f32 %v972_v29 }
 0x109   :  { %v316_v37 = vmul.f32 0.5, %v315_v35  ;;  %v181_v40 = vpop.xlane.xlu0 %180  ;;  %v63_v41 = vpop.xlane.xlu1 %62 }
 0x10a   :  { %v236_v42 = vmul.f32 0.5, %v235_v36  ;;  %v203_v43 = vmul.f32 %v181_v40, %v828_v34  ;;  %v154_v18 = vpop.xlane.xlu2 %153  ;;  %v102_v24 = vmul.f32 %v828_v34, %v63_v41 }
 0x10b   :  { %v317_v46 = vsub.f32 1.5, %v316_v37  ;;  %v194_v47 = vmul.f32 %v154_v18, %v828_v34  ;;  %v411_v18 = vmul.f32 %v1053_v32, %v391_v16 }
 0x10c   :  { %v991_v49 = vpop.eup %680  ;;  %v995_v50 = vadd.f32 1e-06, %v203_v43  ;;  %v237_v56 = vsub.f32 1.5, %v236_v42  ;;  %v1015_v63 = vsub.f32 %v890_v21, %v102_v24 }
 0x10d   :  { %v997_v25 = vpop.eup %682  ;;  %v318_v57 = vmul.f32 %v968_v27, %v317_v46  ;;  %v334_v59 = vmul.f32 %v991_v49, %v970_v28  ;;  %v1002_v60 = vadd.f32 1e-06, %v194_v47  ;;  %vm340_vm1 = vweird.f32 %v991_v49  ;;  %v1083_v47 = vld [vmem:[%s1399_s2] ss:$0 sm:$0xff] }
 0x10e   :  { %v1004_v61 = vpop.eup %684  ;;  %v324_v53 = vmul.f32 %v997_v25, %v977_v12  ;;  %686 = vrsqrt.f32 %v995_v50  ;;  %v238_v3 = vmul.f32 %v974_v31, %v237_v56  ;;  %vm330_vm2 = vweird.f32 %v997_v25  ;;  %vm1095_vm4 = vmor %vm339_vm11, %vm340_vm1 }
 0x10f   :  { %v335_v6 = vmul.f32 %v991_v49, %v334_v59  ;;  %v224_v8 = vmul.f32 %v1004_v61, %v972_v29  ;;  %v322_v21 = vsel %vm1021_vm10, %v968_v27, %v318_v57  ;;  %688 = vrsqrt.f32 %v1002_v60  ;;  %vm1104_vm5 = vmor %vm329_vm12, %vm330_vm2 }
 0x110   :  { %v325_v10 = vmul.f32 %v997_v25, %v324_v53  ;;  %v134_v27 = vmul.f32 %v1015_v63, %v1015_v63  ;;  %v392_v39 = vmul.f32 %v322_v21, %v846_v51  ;;  %vm230_vm15 = vweird.f32 %v1004_v61 }
 0x111   :  { %v336_v4 = vmul.f32 0.5, %v335_v6  ;;  %v225_v11 = vmul.f32 %v1004_v61, %v224_v8  ;;  %v160_v15 = vpop.xlane.xlu0 %159  ;;  %v151_v48 = vpop.xlane.xlu1 %150  ;;  %v242_v37 = vsel %vm1043_vm13, %v974_v31, %v238_v3  ;;  %vm231_vm3 = vmor %vm229_vm14, %vm230_vm15  ;;  %vm259_vm6 = vweird.f32 %v1002_v60 }
 0x112   :  { %v326_v17 = vmul.f32 0.5, %v325_v10  ;;  %v196_v13 = vmul.f32 %v160_v15, %v828_v34  ;;  %v157_v22 = vpop.xlane.xlu2 %156  ;;  %v193_v33 = vmul.f32 %v151_v48, %v828_v34  ;;  %v164_v36 = vsel %vm39_vm0, %v134_v27, 0.0 }
 0x113   :  { %v226_v20 = vmul.f32 0.5, %v225_v11  ;;  %v195_v7 = vmul.f32 %v157_v22, %v828_v34  ;;  %v337_v40 = vsub.f32 1.5, %v336_v4  ;;  %165 = vadd.xlane.f32.xlu1 %v164_v36  ;;  %v412_v46 = vmul.f32 %v1053_v32, %v392_v39 }
 0x114   :  { %v1060_v35 = vadd.f32 1e-06, %v196_v13  ;;  %v327_v41 = vsub.f32 1.5, %v326_v17  ;;  %v1066_v42 = vpop.eup %686  ;;  %v1077_v45 = vadd.f32 1e-06, %v193_v33  ;;  %v384_v56 = vmul.f32 %v242_v37, %v848_v52 }
 0x115   :  { %v227_v51 = vsub.f32 1.5, %v226_v20  ;;  %v1070_v43 = vadd.f32 1e-06, %v195_v7  ;;  %v1073_v24 = vpop.eup %688  ;;  %v338_v59 = vmul.f32 %v991_v49, %v337_v40  ;;  %v344_v28 = vmul.f32 %v1066_v42, %v995_v50 }
 0x116   :  { %690 = vrsqrt.f32 %v1060_v35  ;;  %v254_v57 = vmul.f32 %v1073_v24, %v1002_v60  ;;  %v328_v53 = vmul.f32 %v997_v25, %v327_v41  ;;  %v432_v21 = vadd.f32 %v1083_v47, %v412_v46 }
 0x117   :  { %v228_v31 = vmul.f32 %v1004_v61, %v227_v51  ;;  %692 = vrsqrt.f32 %v1070_v43  ;;  %v342_v11 = vsel %vm1095_vm4, %v991_v49, %v338_v59  ;;  %v345_v16 = vmul.f32 %v1066_v42, %v344_v28 }
 0x118   :  { %v255_v6 = vmul.f32 %v1073_v24, %v254_v57  ;;  %694 = vrsqrt.f32 %v1077_v45  ;;  %v332_v15 = vsel %vm1104_vm5, %v997_v25, %v328_v53  ;;  %v404_v13 = vmul.f32 %v1053_v32, %v384_v56 }
 0x119   :  { %v232_v52 = vsel %vm231_vm3, %v1004_v61, %v228_v31  ;;  %v184_v0 = vpop.xlane.xlu1 %183  ;;  %v431_v61 = vadd.f32 %v1083_v47, %v411_v18  ;;  %vm260_vm7 = vweird.f32 %v1073_v24  ;;  %v393_v39 = vmul.f32 %v332_v15, %v862_v58 }
 0x11a   :  { %v383_v1 = vmul.f32 %v232_v52, %v853_v54  ;;  %v190_v8 = vpop.xlane.xlu2 %189  ;;  %v256_v3 = vmul.f32 0.5, %v255_v6  ;;  %v204_v4 = vmul.f32 %v184_v0, %v828_v34  ;;  %v394_v33 = vmul.f32 %v342_v11, %v855_v55  ;;  %vm1149_vm8 = vmor %vm259_vm6, %vm260_vm7 }
 0x11b   :  { %v206_v12 = vmul.f32 %v190_v8, %v828_v34  ;;  %v443_v48 = vpack.c.bf16 %v432_v21, %v431_v61  ;;  %v346_v41 = vmul.f32 0.5, %v345_v16  ;;  %v424_v58 = vadd.f32 %v1083_v47, %v404_v13 }
 0x11c   :  { %v1116_v10 = vpop.eup %690  ;;  %v403_v54 = vmul.f32 %v1053_v32, %v383_v1  ;;  %v257_v14 = vsub.f32 1.5, %v256_v3  ;;  %v1127_v17 = vadd.f32 1e-06, %v204_v4  ;;  %vm249_vm9 = vweird.f32 %v1077_v45 }
 0x11d   :  { %v1130_v22 = vpop.eup %692  ;;  %v274_v49 = vmul.f32 %v1116_v10, %v1060_v35  ;;  %655 = vmatmul.msk.bf16.vlgmr.msra.gmra.mxu2 %vm39_vm0, %v443_v48  ;;  %663 = vmatmul.msk.bf16.vlgmr.msra.gmra.mxu3 %vm39_vm0, %v443_v48  ;;  %v1138_v25 = vadd.f32 1e-06, %v206_v12  ;;  %v413_v56 = vmul.f32 %v1053_v32, %v393_v39  ;;  %v414_v62 = vmul.f32 %v1053_v32, %v394_v33 }
 0x11e   :  { %v695_v27 = vpop.eup %694  ;;  %v264_v20 = vmul.f32 %v1130_v22, %v1070_v43  ;;  %v423_v7 = vadd.f32 %v1083_v47, %v403_v54  ;;  %v258_v36 = vmul.f32 %v1073_v24, %v257_v14  ;;  %696 = vrsqrt.f32 %v1127_v17 }
 0x11f   :  { %v244_v37 = vmul.f32 %v695_v27, %v1077_v45  ;;  %v275_v18 = vmul.f32 %v1116_v10, %v274_v49  ;;  %698 = vrsqrt.f32 %v1138_v25  ;;  %vm250_vm10 = vweird.f32 %v695_v27 }
 0x120   :  { %v265_v55 = vmul.f32 %v1130_v22, %v264_v20  ;;  %v439_v46 = vpack.c.bf16 %v424_v58, %v423_v7  ;;  %v262_v57 = vsel %vm1149_vm8, %v1073_v24, %v258_v36  ;;  %v347_v53 = vsub.f32 1.5, %v346_v41  ;;  %vm251_vm13 = vmor %vm249_vm9, %vm250_vm10 }
 0x121   :  { %v187_v40 = vpop.xlane.xlu1 %186  ;;  %v245_v31 = vmul.f32 %v695_v27, %v244_v37  ;;  %vm349_vm11 = vweird.f32 %v995_v50  ;;  %v276_v0 = vmul.f32 0.5, %v275_v18  ;;  %vm350_vm12 = vweird.f32 %v1066_v42 }
 0x122   :  { %v205_v60 = vmul.f32 %v187_v40, %v828_v34  ;;  %651 = vmatmul.msk.bf16.vlgmr.msra.gmra.mxu0 %vm39_vm0, %v439_v46  ;;  %659 = vmatmul.msk.bf16.vlgmr.msra.gmra.mxu1 %vm39_vm0, %v439_v46  ;;  %v386_v24 = vmul.f32 %v262_v57, %v881_v9  ;;  %v266_v28 = vmul.f32 0.5, %v265_v55  ;;  %v433_v6 = vadd.f32 %v1083_v47, %v413_v56  ;;  %vm1183_vm14 = vmor %vm349_vm11, %vm350_vm12 }
 0x123   :  { %v246_v59 = vmul.f32 0.5, %v245_v31  ;;  %v434_v12 = vadd.f32 %v1083_v47, %v414_v62  ;;  %v348_v3 = vmul.f32 %v1066_v42, %v347_v53  ;;  %v277_v45 = vsub.f32 1.5, %v276_v0 }
 0x124   :  { %v1167_v52 = vadd.f32 1e-06, %v205_v60  ;;  %v697_v1 = vpop.eup %696  ;;  %vm359_vm15 = vweird.f32 %v1127_v17  ;;  %v406_v48 = vmul.f32 %v1053_v32, %v386_v24  ;;  %v267_v16 = vsub.f32 1.5, %v266_v28 }
 0x125   :  { %v247_v29 = vsub.f32 1.5, %v246_v59  ;;  %v1175_v8 = vpop.eup %698  ;;  %v354_v21 = vmul.f32 %v697_v1, %v1127_v17  ;;  %vm360_vm1 = vweird.f32 %v697_v1  ;;  %v444_v50 = vpack.c.bf16 %v434_v12, %v433_v6 }
 0x126   :  { %700 = vrsqrt.f32 %v1167_v52  ;;  %v374_v15 = vmul.f32 %v1175_v8, %v1138_v25  ;;  %v352_v13 = vsel %vm1183_vm14, %v1066_v42, %v348_v3  ;;  %vm279_vm2 = vweird.f32 %v1060_v35  ;;  %vm361_vm6 = vmor %vm359_vm15, %vm360_vm1 }
 0x127   :  { %v248_v61 = vmul.f32 %v695_v27, %v247_v29  ;;  %v355_v54 = vmul.f32 %v697_v1, %v354_v21  ;;  %vm280_vm3 = vweird.f32 %v1116_v10  ;;  %vm269_vm4 = vweird.f32 %v1070_v43 }
 0x128   :  { %vm270_vm5 = vweird.f32 %v1130_v22  ;;  %v375_v42 = vmul.f32 %v1175_v8, %v374_v15  ;;  %v426_v33 = vadd.f32 %v1083_v47, %v406_v48  ;;  %v395_v43 = vmul.f32 %v352_v13, %v875_v5  ;;  %vm1214_vm7 = vmor %vm279_vm2, %vm280_vm3 }
 0x129   :  { %v252_v4 = vsel %vm251_vm13, %v695_v27, %v248_v61  ;;  %v356_v14 = vmul.f32 0.5, %v355_v54  ;;  %v278_v27 = vmul.f32 %v1116_v10, %v277_v45  ;;  %v268_v37 = vmul.f32 %v1130_v22, %v267_v16  ;;  %vm1219_vm8 = vmor %vm269_vm4, %vm270_vm5 }
 0x12a   :  { %v385_v11 = vmul.f32 %v252_v4, %v896_v23  ;;  %v376_v18 = vmul.f32 0.5, %v375_v42  ;;  %v415_v46 = vmul.f32 %v1053_v32, %v395_v43  ;;  %vm369_vm9 = vweird.f32 %v1167_v52 }
 0x12b   :  { %v357_v39 = vsub.f32 1.5, %v356_v14  ;;  %v282_v5 = vsel %vm1214_vm7, %v1116_v10, %v278_v27  ;;  %v272_v55 = vsel %vm1219_vm8, %v1130_v22, %v268_v37  ;;  %vm379_vm11 = vweird.f32 %v1138_v25 }
 0x12c   :  { %v405_v23 = vmul.f32 %v1053_v32, %v385_v11  ;;  %v701_v49 = vpop.eup %700  ;;  %v388_v57 = vmul.f32 %v282_v5, %v899_v26  ;;  %v377_v10 = vsub.f32 1.5, %v376_v18  ;;  %v435_v22 = vadd.f32 %v1083_v47, %v415_v46 }
 0x12d   :  { %656 = vmatmul.msk.bf16.gmra.mxu2 %vm39_vm0, %v444_v50  ;;  %664 = vmatmul.msk.bf16.gmra.mxu3 %vm39_vm0, %v444_v50  ;;  %v364_v20 = vmul.f32 %v701_v49, %v1167_v52  ;;  %v358_v17 = vmul.f32 %v697_v1, %v357_v39  ;;  %vm370_vm10 = vweird.f32 %v701_v49  ;;  %vm380_vm12 = vweird.f32 %v1175_v8 }
 0x12e   :  { %v425_v7 = vadd.f32 %v1083_v47, %v405_v23  ;;  %vm371_vm13 = vmor %vm369_vm9, %vm370_vm10  ;;  %v378_v0 = vmul.f32 %v1175_v8, %v377_v10  ;;  %v408_v52 = vmul.f32 %v1053_v32, %v388_v57 }
 0x12f   :  { %v365_v41 = vmul.f32 %v701_v49, %v364_v20  ;;  %v362_v58 = vsel %vm361_vm6, %v697_v1, %v358_v17  ;;  %vm381_vm14 = vmor %vm379_vm11, %vm380_vm12  ;;  %vm541_vm6 = vcmask 60416  }
 0x130   :  { %v440_v51 = vpack.c.bf16 %v426_v33, %v425_v7  ;;  %v396_v35 = vmul.f32 %v362_v58, %v917_v19  ;;  %v387_v19 = vmul.f32 %v272_v55, %v906_v30  ;;  %v382_v29 = vsel %vm381_vm14, %v1175_v8, %v378_v0 }
 0x131   :  { %v366_v31 = vmul.f32 0.5, %v365_v41  ;;  %v428_v1 = vadd.f32 %v1083_v47, %v408_v52  ;;  %v398_v28 = vmul.f32 %v382_v29, %v922_v38 }
 0x132   :  { %652 = vmatmul.msk.bf16.gmra.mxu0 %vm39_vm0, %v440_v51  ;;  %660 = vmatmul.msk.bf16.gmra.mxu1 %vm39_vm0, %v440_v51  ;;  %v416_v56 = vmul.f32 %v1053_v32, %v396_v35  ;;  %v407_v26 = vmul.f32 %v1053_v32, %v387_v19 }
 0x133   :  { %v367_v60 = vsub.f32 1.5, %v366_v31  ;;  %v418_v21 = vmul.f32 %v1053_v32, %v398_v28 }
 0x134   :  { %v436_v59 = vadd.f32 %v1083_v47, %v416_v56  ;;  %v427_v25 = vadd.f32 %v1083_v47, %v407_v26 }
 0x135   :  { %v368_v62 = vmul.f32 %v701_v49, %v367_v60  ;;  %v438_v8 = vadd.f32 %v1083_v47, %v418_v21 }
 0x136   :  { %v445_v53 = vpack.c.bf16 %v436_v59, %v435_v22  ;;  %v441_v6 = vpack.c.bf16 %v428_v1, %v427_v25 }
 0x137   :  { %v372_v30 = vsel %vm371_vm13, %v701_v49, %v368_v62 }
 0x138   :  { %v397_v24 = vmul.f32 %v372_v30, %v931_v44 }
 0x13a   :  { %v417_v61 = vmul.f32 %v1053_v32, %v397_v24 }
 0x13c   :  { %v437_v12 = vadd.f32 %v1083_v47, %v417_v61 }
 0x13d   :  { %657 = vmatmul.msk.bf16.gmra.mxu2 %vm39_vm0, %v445_v53  ;;  %665 = vmatmul.msk.bf16.gmra.mxu3 %vm39_vm0, %v445_v53 }
 0x13e   :  { %v446_v3 = vpack.c.bf16 %v438_v8, %v437_v12 }
 0x142   :  { %653 = vmatmul.msk.bf16.gmra.mxu0 %vm39_vm0, %v441_v6  ;;  %661 = vmatmul.msk.bf16.gmra.mxu1 %vm39_vm0, %v441_v6 }
 0x14d   :  { %658 = vmatmul.msk.bf16.gmra.mxu2 %vm39_vm0, %v446_v3  ;;  %666 = vmatmul.msk.bf16.gmra.mxu3 %vm39_vm0, %v446_v3 }
 0x174   :  { %v163_v44 = vpop.xlane.xlu0 %162 }
 0x175   :  { %v197_v38 = vmul.f32 %v163_v44, %v828_v34 }
 0x177   :  { %v213_v9 = vadd.f32 1e-06, %v197_v38 }
 0x179   :  { %702 = vrsqrt.f32 %v213_v9  ;;  %vm289_vm15 = vweird.f32 %v213_v9 }
 0x17f   :  { %v703_v45 = vpop.eup %702 }
 0x180   :  { %v284_v4 = vmul.f32 %v703_v45, %v213_v9  ;;  %vm290_vm1 = vweird.f32 %v703_v45 }
 0x181   :  { %vm291_vm2 = vmor %vm289_vm15, %vm290_vm1 }
 0x182   :  { %v285_v54 = vmul.f32 %v703_v45, %v284_v4 }
 0x184   :  { %v286_v16 = vmul.f32 0.5, %v285_v54 }
 0x186   :  { %v166_v11 = vpop.xlane.xlu1 %165  ;;  %v287_v14 = vsub.f32 1.5, %v286_v16 }
 0x187   :  { %v198_v15 = vmul.f32 %v166_v11, %v828_v34 }
 0x188   :  { %v288_v13 = vmul.f32 %v703_v45, %v287_v14 }
 0x189   :  { %v214_v48 = vadd.f32 1e-06, %v198_v15 }
 0x18a   :  { %v292_v27 = vsel %vm291_vm2, %v703_v45, %v288_v13 }
 0x18b   :  { %704 = vrsqrt.f32 %v214_v48  ;;  %v389_v20 = vmul.f32 %v292_v27, %v954_v2  ;;  %vm299_vm4 = vweird.f32 %v214_v48 }
 0x18d   :  { %v409_v43 = vmul.f32 %v1053_v32, %v389_v20 }
 0x18f   :  { %v429_v5 = vadd.f32 %v1083_v47, %v409_v43 }
 0x191   :  { %v705_v50 = vpop.eup %704 }
 0x192   :  { %v294_v23 = vmul.f32 %v705_v50, %v214_v48  ;;  %vm300_vm3 = vweird.f32 %v705_v50 }
 0x193   :  { %vm301_vm5 = vmor %vm299_vm4, %vm300_vm3 }
 0x194   :  { %v295_v49 = vmul.f32 %v705_v50, %v294_v23 }
 0x196   :  { %v296_v39 = vmul.f32 0.5, %v295_v49 }
 0x198   :  { %v297_v42 = vsub.f32 1.5, %v296_v39 }
 0x19a   :  { %v298_v7 = vmul.f32 %v705_v50, %v297_v42 }
 0x19c   :  { %v302_v34 = vsel %vm301_vm5, %v705_v50, %v298_v7 }
 0x19d   :  { %v390_v33 = vmul.f32 %v302_v34, %v1015_v63 }
 0x19f   :  { %v410_v36 = vmul.f32 %v1053_v32, %v390_v33  ;;  %v485_v51 = vpop.f32.mrf.mxu0  ;;  %v571_v58 = vpop.f32.mrf.mxu1 }
 0x1a0   :  { %v505_v37 = vpop.f32.mrf.mxu2  ;;  %v591_v17 = vpop.f32.mrf.mxu3  ;;  %v525_v18 = vpack.c.bf16 %v485_v51, %v485_v51  ;;  %v611_v35 = vpack.c.bf16 %v571_v58, %v571_v58 }
 0x1a1   :  { %v533_v40 = vpack.c.bf16 %v505_v37, %v505_v37  ;;  %v619_v41 = vpack.c.bf16 %v591_v17, %v591_v17  ;;  %v430_v2 = vadd.f32 %v1083_v47, %v410_v36 }
 0x1a2   :  { %542 = vst.msk [vmem:[%s1402_s5] sm:$0xf] %vm541_vm6, %v525_v18 }
 0x1a3   :  { %550 = vst.msk [vmem:[%s1402_s5 + $0x20] sm:$0xf] %vm541_vm6, %v533_v40  ;;  %v442_v63 = vpack.c.bf16 %v430_v2, %v429_v5 }
 0x1a4   :  { %635 = vst.msk [vmem:[%s1403_s6 + $0x20] sm:$0xf] %vm541_vm6, %v619_v41 }
 0x1a5   :  { %654 = vmatmul.msk.bf16.gmra.mxu0 %vm39_vm0, %v442_v63  ;;  %662 = vmatmul.msk.bf16.gmra.mxu1 %vm39_vm0, %v442_v63  ;;  %627 = vst.msk [vmem:[%s1403_s6] sm:$0xf] %vm541_vm6, %v611_v35 }
 0x1a7   :  { %v487_v46 = vpop.f32.mrf.mxu0  ;;  %v573_v60 = vpop.f32.mrf.mxu1 }
 0x1a8   :  { %v507_v32 = vpop.f32.mrf.mxu2  ;;  %v593_v47 = vpop.f32.mrf.mxu3  ;;  %v526_v56 = vpack.c.bf16 %v487_v46, %v487_v46  ;;  %v612_v57 = vpack.c.bf16 %v573_v60, %v573_v60 }
 0x1a9   :  { %v534_v31 = vpack.c.bf16 %v507_v32, %v507_v32  ;;  %v620_v55 = vpack.c.bf16 %v593_v47, %v593_v47 }
 0x1aa   :  { %543 = vst.msk [vmem:[%s1402_s5 + $0x4] sm:$0xf] %vm541_vm6, %v526_v56 }
 0x1ab   :  { %551 = vst.msk [vmem:[%s1402_s5 + $0x24] sm:$0xf] %vm541_vm6, %v534_v31 }
 0x1ac   :  { %636 = vst.msk [vmem:[%s1403_s6 + $0x24] sm:$0xf] %vm541_vm6, %v620_v55 }
 0x1ad   :  { %628 = vst.msk [vmem:[%s1403_s6 + $0x4] sm:$0xf] %vm541_vm6, %v612_v57 }
 0x1af   :  { %v490_v62 = vpop.f32.mrf.mxu0  ;;  %v576_v53 = vpop.f32.mrf.mxu1 }
 0x1b0   :  { %v510_v19 = vpop.f32.mrf.mxu2  ;;  %v596_v10 = vpop.f32.mrf.mxu3  ;;  %v527_v0 = vpack.c.bf16 %v490_v62, %v490_v62  ;;  %v613_v26 = vpack.c.bf16 %v576_v53, %v576_v53 }
 0x1b1   :  { %v535_v59 = vpack.c.bf16 %v510_v19, %v510_v19  ;;  %v621_v22 = vpack.c.bf16 %v596_v10, %v596_v10 }
 0x1b2   :  { %544 = vst.msk [vmem:[%s1402_s5 + $0x8] sm:$0xf] %vm541_vm6, %v527_v0 }
 0x1b3   :  { %552 = vst.msk [vmem:[%s1402_s5 + $0x28] sm:$0xf] %vm541_vm6, %v535_v59 }
 0x1b4   :  { %637 = vst.msk [vmem:[%s1403_s6 + $0x28] sm:$0xf] %vm541_vm6, %v621_v22 }
 0x1b5   :  { %629 = vst.msk [vmem:[%s1403_s6 + $0x8] sm:$0xf] %vm541_vm6, %v613_v26 }
 0x1b7   :  { %v492_v1 = vpop.f32.mrf.mxu0  ;;  %v578_v24 = vpop.f32.mrf.mxu1 }
 0x1b8   :  { %v512_v52 = vpop.f32.mrf.mxu2  ;;  %v598_v30 = vpop.f32.mrf.mxu3  ;;  %v528_v28 = vpack.c.bf16 %v492_v1, %v492_v1  ;;  %v614_v6 = vpack.c.bf16 %v578_v24, %v578_v24 }
 0x1b9   :  { %v536_v29 = vpack.c.bf16 %v512_v52, %v512_v52  ;;  %v622_v25 = vpack.c.bf16 %v598_v30, %v598_v30 }
 0x1ba   :  { %545 = vst.msk [vmem:[%s1402_s5 + $0xc] sm:$0xf] %vm541_vm6, %v528_v28 }
 0x1bb   :  { %553 = vst.msk [vmem:[%s1402_s5 + $0x2c] sm:$0xf] %vm541_vm6, %v536_v29 }
 0x1bc   :  { %638 = vst.msk [vmem:[%s1403_s6 + $0x2c] sm:$0xf] %vm541_vm6, %v622_v25 }
 0x1bd   :  { %630 = vst.msk [vmem:[%s1403_s6 + $0xc] sm:$0xf] %vm541_vm6, %v614_v6 }
 0x1bf   :  { %v495_v3 = vpop.f32.mrf.mxu0  ;;  %v581_v44 = vpop.f32.mrf.mxu1 }
 0x1c0   :  { %v515_v61 = vpop.f32.mrf.mxu2  ;;  %v601_v21 = vpop.f32.mrf.mxu3  ;;  %v529_v38 = vpack.c.bf16 %v495_v3, %v495_v3  ;;  %v615_v9 = vpack.c.bf16 %v581_v44, %v581_v44 }
 0x1c1   :  { %v537_v12 = vpack.c.bf16 %v515_v61, %v515_v61  ;;  %v623_v8 = vpack.c.bf16 %v601_v21, %v601_v21 }
 0x1c2   :  { %546 = vst.msk [vmem:[%s1402_s5 + $0x10] sm:$0xf] %vm541_vm6, %v529_v38 }
 0x1c3   :  { %554 = vst.msk [vmem:[%s1402_s5 + $0x30] sm:$0xf] %vm541_vm6, %v537_v12 }
 0x1c4   :  { %639 = vst.msk [vmem:[%s1403_s6 + $0x30] sm:$0xf] %vm541_vm6, %v623_v8 }
 0x1c5   :  { %631 = vst.msk [vmem:[%s1403_s6 + $0x10] sm:$0xf] %vm541_vm6, %v615_v9 }
 0x1c7   :  { %v497_v15 = vpop.f32.mrf.mxu0  ;;  %v583_v48 = vpop.f32.mrf.mxu1 }
 0x1c8   :  { %v517_v45 = vpop.f32.mrf.mxu2  ;;  %v603_v4 = vpop.f32.mrf.mxu3  ;;  %v530_v16 = vpack.c.bf16 %v497_v15, %v497_v15  ;;  %v616_v14 = vpack.c.bf16 %v583_v48, %v583_v48 }
 0x1c9   :  { %v538_v54 = vpack.c.bf16 %v517_v45, %v517_v45  ;;  %v624_v11 = vpack.c.bf16 %v603_v4, %v603_v4 }
 0x1ca   :  { %547 = vst.msk [vmem:[%s1402_s5 + $0x14] sm:$0xf] %vm541_vm6, %v530_v16 }
 0x1cb   :  { %555 = vst.msk [vmem:[%s1402_s5 + $0x34] sm:$0xf] %vm541_vm6, %v538_v54 }
 0x1cc   :  { %640 = vst.msk [vmem:[%s1403_s6 + $0x34] sm:$0xf] %vm541_vm6, %v624_v11 }
 0x1cd   :  { %632 = vst.msk [vmem:[%s1403_s6 + $0x14] sm:$0xf] %vm541_vm6, %v616_v14 }
 0x1d0   :  { %v520_v50 = vpop.f32.mrf.mxu2  ;;  %v606_v13 = vpop.f32.mrf.mxu3 }
 0x1d1   :  { %v539_v23 = vpack.c.bf16 %v520_v50, %v520_v50  ;;  %v625_v49 = vpack.c.bf16 %v606_v13, %v606_v13 }
 0x1d3   :  { %556 = vst.msk [vmem:[%s1402_s5 + $0x38] sm:$0xf] %vm541_vm6, %v539_v23 }
 0x1d4   :  { %641 = vst.msk [vmem:[%s1403_s6 + $0x38] sm:$0xf] %vm541_vm6, %v625_v49 }
 0x1d8   :  { %v522_v27 = vpop.f32.mrf.mxu2  ;;  %v608_v39 = vpop.f32.mrf.mxu3 }
 0x1d9   :  { %v540_v42 = vpack.c.bf16 %v522_v27, %v522_v27  ;;  %v626_v20 = vpack.c.bf16 %v608_v39, %v608_v39 }
 0x1db   :  { %557 = vst.msk [vmem:[%s1402_s5 + $0x3c] sm:$0xf] %vm541_vm6, %v540_v42 }
 0x1dc   :  { %642 = vst.msk [vmem:[%s1403_s6 + $0x3c] sm:$0xf] %vm541_vm6, %v626_v20 }
 0x222   :  { %v500_v7 = vpop.f32.mrf.mxu0  ;;  %v586_v34 = vpop.f32.mrf.mxu1 }
 0x223   :  { %v531_v33 = vpack.c.bf16 %v500_v7, %v500_v7  ;;  %v617_v43 = vpack.c.bf16 %v586_v34, %v586_v34 }
 0x225   :  { %548 = vst.msk [vmem:[%s1402_s5 + $0x18] sm:$0xf] %vm541_vm6, %v531_v33 }
 0x226   :  { %633 = vst.msk [vmem:[%s1403_s6 + $0x18] sm:$0xf] %vm541_vm6, %v617_v43 }
 0x22a   :  { %v502_v36 = vpop.f32.mrf.mxu0  ;;  %v588_v37 = vpop.f32.mrf.mxu1 }
 0x22b   :  { %v532_v17 = vpack.c.bf16 %v502_v36, %v502_v36  ;;  %v618_v40 = vpack.c.bf16 %v588_v37, %v588_v37 }
 0x22d   :  { %549 = vst.msk [vmem:[%s1402_s5 + $0x1c] sm:$0xf] %vm541_vm6, %v532_v17 }
 0x22e   :  { %634 = vst.msk [vmem:[%s1403_s6 + $0x1c] sm:$0xf] %vm541_vm6, %v618_v40 }

// kernel: vss_block_forward.6
= control target key start
LH: loop header
LB: loop body
LE: loop exit
PB: predicated region body
PF: predicated region fallthrough
CT: control target
= control target key end

     0   :  { %s915_s12 = smov 0   ;;  %s917_s13 = smov 0   ;;  %s1279_s0 = inlined_call_operand.vmem [shape: bf16[2,8,8,8], index: 0, kind: input, shape index: {}]   ;;  %s1280_s1 = inlined_call_operand.vmem [shape: f32[3,3,8], index: 1, kind: input, shape index: {}]   ;;  %s1281_s2 = inlined_call_operand.vmem [shape: f32[1,8], index: 2, kind: input, shape index: {}]   ;;  %s1282_s3 = inlined_call_operand.vmem [shape: bf16[2,8,8,8], index: 3, kind: output, shape index: {}]  }
   0x1   :  { %s919_s14 = smov 0  }
   0x2 LB: > { %s25_s15 = sadd.s32 1, %s888_s13  ;;  %p776_p0 = scmp.ge.s32.totalorder %s892_s14, 1  ;;  %s892_s14 = sphi %s919_s14, %s13_s14   ;;  %s888_s13 = sphi %s917_s13, %s1300_s13   ;;  %s884_s12 = sphi %s915_s12, %s1299_s12  }
   0x3   : > { %p27_p1 = scmp.ge.s32.totalorder %s25_s15, 2  ;;  %p173_p2 = scmp.lt.s32.totalorder %s892_s14, 3 }
   0x5   : > { %s1302_s15 = smov (%p27_p1, %s25_s15), 0  ;;  %p174_p3 = pnand %p776_p0, %p173_p2 }
   0x6   : > { %p210_p4 = scmp.lt.s32.totalorder (!%p174_p3), %s884_s12, 1 }
   0x7   : > { %177 = sbr.rel (%p174_p3) target bundleno = 125 (0x7d), region = 32 }
   0xc   : > { %v249_v0 = vld [vmem:[%s1280_s1] sm:$0x7]  ;;  %v894_v1 = vmov 0.0   ;;  %vm276_vm0 = vcmask 1040384   ;;  %s1304_s12 = smov (!%p210_p4, %s884_s12), 1  ;;  %vm335_vm1 = vcmask 1046528  }
   0xd   : > { %v260_v2 = vrot.slane %v894_v1, 7  ;;  %v936_v3 = vperm.slane %v249_v0, 0  ;;  %v938_v4 = vperm.slane %v249_v0, 1  ;;  %v319_v5 = vrot.slane %v894_v1, 1  ;;  %v250_v7 = vld [vmem:[%s1280_s1 + $0x4] sm:$0x7] }
   0xe   : > { %v942_v6 = vperm.slane %v249_v0, 2  ;;  %s791_s20 = sshll.u32 %s1304_s12, 5  ;;  %v251_v12 = vld [vmem:[%s1280_s1 + $0x8] sm:$0x7]  ;;  %v971_v17 = vperm.slane %v250_v7, 0  ;;  %v973_v21 = vperm.slane %v250_v7, 1 }
   0xf   : > { %v948_v8 = vsel %vm276_vm0, 0.0, %v260_v2  ;;  %v303_v9 = vmul.f32 0.0, %v938_v4  ;;  %v955_v11 = vsel %vm335_vm1, %v319_v5, 0.0  ;;  %s962_s23 = scalar_lea.vmem %s1279_s0, %s791_s20  ;;  %v975_v22 = vperm.slane %v250_v7, 2  ;;  %s1182_s30 = scalar_lea.vmem %s1282_s3, %s791_s20 }
  0x10   : > { %v286_v10 = vmul.f32 %v936_v3, %v948_v8  ;;  %v794_v13 = vld [vmem:[%s962_s23] sm:$0xff]   ;;  %v809_v14 = vld [vmem:[%s962_s23 + $0x8] sm:$0xff]   ;;  %v345_v16 = vmul.f32 %v942_v6, %v955_v11  ;;  %v977_v23 = vperm.slane %v251_v12, 0  ;;  %v979_v24 = vperm.slane %v251_v12, 1  ;;  %v986_v27 = vld [vmem:[%s962_s23 + $0x10] sm:$0xff]  }
  0x11   : > { %v795_v18 = vunpack.c.l.bf16 %v794_v13  ;;  %v796_v19 = vunpack.c.h.bf16 %v794_v13  ;;  %v799_v20 = vunpack.c.l.bf16 %v809_v14  ;;  %v981_v25 = vperm.slane %v251_v12, 2 }
  0x12   : > { %v311_v15 = vadd.f32 %v303_v9, %v286_v10  ;;  %v983_v26 = vunpack.c.h.bf16 %v809_v14  ;;  %v994_v39 = vunpack.c.l.bf16 %v986_v27  ;;  %vm650_vm7 = vcmask 60416  }
  0x13   : > { %v261_v28 = vrot.slane %v795_v18, 7  ;;  %v262_v29 = vrot.slane %v796_v19, 7  ;;  %v320_v30 = vrot.slane %v795_v18, 1  ;;  %v305_v31 = vmul.f32 %v796_v19, %v938_v4 }
  0x14   : > { %v321_v32 = vrot.slane %v796_v19, 1  ;;  %v353_v33 = vadd.f32 %v345_v16, %v311_v15  ;;  %v263_v34 = vrot.slane %v799_v20, 7  ;;  %v304_v38 = vmul.f32 %v795_v18, %v938_v4 }
  0x15   : > { %v278_v35 = vsel %vm276_vm0, 0.0, %v261_v28  ;;  %v279_v36 = vsel %vm276_vm0, 0.0, %v262_v29  ;;  %v337_v37 = vsel %vm335_vm1, %v320_v30, 0.0  ;;  %v383_v45 = vmul.f32 %v795_v18, %v973_v21 }
  0x16   : > { %v287_v40 = vmul.f32 %v936_v3, %v278_v35  ;;  %v288_v41 = vmul.f32 %v936_v3, %v279_v36  ;;  %v338_v42 = vsel %vm335_vm1, %v321_v32, 0.0  ;;  %v346_v43 = vmul.f32 %v942_v6, %v337_v37 }
  0x17   : > { %v366_v44 = vmul.f32 %v971_v17, %v278_v35  ;;  %v437_v46 = vmul.f32 %v796_v19, %v979_v24  ;;  %v347_v48 = vmul.f32 %v942_v6, %v338_v42  ;;  %v367_v49 = vmul.f32 %v971_v17, %v279_v36 }
  0x18   : > { %v313_v47 = vadd.f32 %v305_v31, %v288_v41  ;;  %v403_v50 = vmul.f32 %v975_v22, %v337_v37  ;;  %v280_v52 = vsel %vm276_vm0, 0.0, %v263_v34  ;;  %v306_v53 = vmul.f32 %v799_v20, %v938_v4  ;;  %v1030_v34 = vld [vmem:[%s1281_s2] ss:$0 sm:$0xff] }
  0x19   : > { %v374_v51 = vadd.f32 %v366_v44, %v353_v33  ;;  %v312_v54 = vadd.f32 %v304_v38, %v287_v40  ;;  %v404_v55 = vmul.f32 %v975_v22, %v338_v42  ;;  %v420_v56 = vmul.f32 %v977_v23, %v279_v36 }
  0x1a   : > { %v289_v57 = vmul.f32 %v936_v3, %v280_v52  ;;  %v322_v58 = vrot.slane %v799_v20, 1  ;;  %v454_v60 = vmul.f32 %v981_v25, %v338_v42  ;;  %v384_v62 = vmul.f32 %v796_v19, %v973_v21 }
  0x1b   : > { %v391_v59 = vadd.f32 %v383_v45, %v374_v51  ;;  %v354_v61 = vadd.f32 %v346_v43, %v312_v54  ;;  %v355_v63 = vadd.f32 %v347_v48, %v313_v47  ;;  %v368_v1 = vmul.f32 %v971_v17, %v280_v52 }
  0x1c   : > { %v339_v0 = vsel %vm335_vm1, %v322_v58, 0.0  ;;  %v264_v2 = vrot.slane %v983_v26, 7  ;;  %v314_v7 = vadd.f32 %v306_v53, %v289_v57  ;;  %v421_v12 = vmul.f32 %v977_v23, %v280_v52 }
  0x1d   : > { %v411_v5 = vadd.f32 %v403_v50, %v391_v59  ;;  %v348_v9 = vmul.f32 %v942_v6, %v339_v0  ;;  %v375_v10 = vadd.f32 %v367_v49, %v354_v61  ;;  %v438_v13 = vmul.f32 %v799_v20, %v979_v24 }
  0x1e   : > { %v281_v14 = vsel %vm276_vm0, 0.0, %v264_v2  ;;  %v323_v15 = vrot.slane %v983_v26, 1  ;;  %v307_v28 = vmul.f32 %v983_v26, %v938_v4  ;;  %v405_v29 = vmul.f32 %v975_v22, %v339_v0 }
  0x1f   : > { %v428_v16 = vadd.f32 %v420_v56, %v411_v5  ;;  %v392_v18 = vadd.f32 %v384_v62, %v375_v10  ;;  %v290_v19 = vmul.f32 %v936_v3, %v281_v14  ;;  %v376_v31 = vadd.f32 %v368_v1, %v355_v63 }
  0x20   : > { %v340_v30 = vsel %vm335_vm1, %v323_v15, 0.0  ;;  %v385_v32 = vmul.f32 %v799_v20, %v973_v21  ;;  %v356_v35 = vadd.f32 %v348_v9, %v314_v7  ;;  %v369_v37 = vmul.f32 %v971_v17, %v281_v14 }
  0x21   : > { %v445_v33 = vadd.f32 %v437_v46, %v428_v16  ;;  %v412_v36 = vadd.f32 %v404_v55, %v392_v18  ;;  %v455_v38 = vmul.f32 %v981_v25, %v339_v0  ;;  %v422_v41 = vmul.f32 %v977_v23, %v281_v14 }
  0x22   : > { %v393_v40 = vadd.f32 %v385_v32, %v376_v31  ;;  %v315_v44 = vadd.f32 %v307_v28, %v290_v19  ;;  %v349_v20 = vmul.f32 %v942_v6, %v340_v30  ;;  %v1037_v45 = vunpack.c.h.bf16 %v986_v27 }
  0x23   : > { %v462_v42 = vadd.f32 %v454_v60, %v445_v33  ;;  %v429_v43 = vadd.f32 %v421_v12, %v412_v36  ;;  %v439_v47 = vmul.f32 %v983_v26, %v979_v24  ;;  %v265_v48 = vrot.slane %v994_v39, 7  ;;  %v1053_v60 = vld [vmem:[%s962_s23 + $0x18] sm:$0xff]  }
  0x24   : > { %v413_v46 = vadd.f32 %v405_v29, %v393_v40  ;;  %v324_v51 = vrot.slane %v994_v39, 1  ;;  %v377_v52 = vadd.f32 %v369_v37, %v356_v35  ;;  %v406_v53 = vmul.f32 %v975_v22, %v340_v30 }
  0x25   : > { %v1043_v49 = vadd.f32 %v1030_v34, %v462_v42  ;;  %v446_v50 = vadd.f32 %v438_v13, %v429_v43  ;;  %v456_v27 = vmul.f32 %v981_v25, %v340_v30  ;;  %v386_v55 = vmul.f32 %v983_v26, %v973_v21 }
  0x26   : > { %v430_v54 = vadd.f32 %v422_v41, %v413_v46  ;;  %v357_v58 = vadd.f32 %v349_v20, %v315_v44  ;;  %v282_v59 = vsel %vm276_vm0, 0.0, %v265_v48  ;;  %v308_v62 = vmul.f32 %v994_v39, %v938_v4 }
  0x27   : > { %v781_v56 = vmul.f32 -1.442695, %v1043_v49  ;;  %v463_v57 = vadd.f32 %v455_v38, %v446_v50  ;;  %v370_v63 = vmul.f32 %v971_v17, %v282_v59  ;;  %v394_v0 = vadd.f32 %v386_v55, %v377_v52 }
  0x28   : > { %v447_v61 = vadd.f32 %v439_v47, %v430_v54  ;;  %v341_v26 = vsel %vm335_vm1, %v324_v51, 0.0  ;;  %v423_v2 = vmul.f32 %v977_v23, %v282_v59  ;;  %v291_v7 = vmul.f32 %v936_v3, %v282_v59 }
  0x29   : > { %838 = vpow2.f32 %v781_v56  ;;  %v1059_v1 = vadd.f32 %v1030_v34, %v463_v57  ;;  %v414_v9 = vadd.f32 %v406_v53, %v394_v0  ;;  %v440_v10 = vmul.f32 %v994_v39, %v979_v24 }
  0x2a   : > { %v464_v5 = vadd.f32 %v456_v27, %v447_v61  ;;  %v1067_v12 = vunpack.c.l.bf16 %v1053_v60  ;;  %v457_v14 = vmul.f32 %v981_v25, %v341_v26  ;;  %v266_v15 = vrot.slane %v1037_v45, 7 }
  0x2b   : > { %v782_v13 = vmul.f32 -1.442695, %v1059_v1  ;;  %v431_v18 = vadd.f32 %v423_v2, %v414_v9  ;;  %v325_v19 = vrot.slane %v1037_v45, 1  ;;  %v378_v28 = vadd.f32 %v370_v63, %v357_v58 }
  0x2c   : > { %v1073_v16 = vadd.f32 %v1030_v34, %v464_v5  ;;  %v407_v29 = vmul.f32 %v975_v22, %v341_v26  ;;  %v283_v30 = vsel %vm276_vm0, 0.0, %v266_v15  ;;  %v387_v31 = vmul.f32 %v994_v39, %v973_v21 }
  0x2d   : > { %840 = vpow2.f32 %v782_v13  ;;  %v316_v33 = vadd.f32 %v308_v62, %v291_v7  ;;  %v350_v35 = vmul.f32 %v942_v6, %v341_v26  ;;  %v448_v36 = vadd.f32 %v440_v10, %v431_v18 }
  0x2e   : > { %v783_v32 = vmul.f32 -1.442695, %v1073_v16  ;;  %v309_v38 = vmul.f32 %v1037_v45, %v938_v4  ;;  %v342_v40 = vsel %vm335_vm1, %v325_v19, 0.0  ;;  %v395_v41 = vadd.f32 %v387_v31, %v378_v28 }
  0x2f   : > { %v839_v37 = vpop.eup %838  ;;  %v465_v43 = vadd.f32 %v457_v14, %v448_v36  ;;  %v292_v44 = vmul.f32 %v936_v3, %v283_v30  ;;  %v424_v20 = vmul.f32 %v977_v23, %v283_v30  ;;  %v441_v46 = vmul.f32 %v1037_v45, %v979_v24 }
  0x30   : > { %v1085_v42 = vadd.f32 1.0, %v839_v37  ;;  %842 = vpow2.f32 %v783_v32  ;;  %v415_v39 = vadd.f32 %v407_v29, %v395_v41  ;;  %v267_v47 = vrot.slane %v1067_v12, 7 }
  0x31   : > { %v358_v48 = vadd.f32 %v350_v35, %v316_v33  ;;  %v351_v50 = vmul.f32 %v942_v6, %v342_v40  ;;  %v371_v51 = vmul.f32 %v971_v17, %v283_v30  ;;  %v1096_v53 = vadd.f32 %v1030_v34, %v465_v43 }
  0x32   : > { %844 = vrcp.f32 %v1085_v42  ;;  %v432_v54 = vadd.f32 %v424_v20, %v415_v39  ;;  %v458_v27 = vmul.f32 %v981_v25, %v342_v40  ;;  %v284_v55 = vsel %vm276_vm0, 0.0, %v267_v47 }
  0x33   : > { %v841_v52 = vpop.eup %840  ;;  %v523_v56 = vand.u32 2147483647, %v1085_v42  ;;  %v525_v57 = vand.u32 2147483648, %v1085_v42  ;;  %v317_v59 = vadd.f32 %v309_v38, %v292_v44  ;;  %v784_v61 = vmul.f32 -1.442695, %v1096_v53 }
  0x34   : > { %v1102_v58 = vadd.f32 1.0, %v841_v52  ;;  %v449_v62 = vadd.f32 %v441_v46, %v432_v54  ;;  %v293_v63 = vmul.f32 %v936_v3, %v284_v55  ;;  %v310_v0 = vmul.f32 %v1067_v12, %v938_v4 }
  0x35   : > { %v408_v5 = vmul.f32 %v975_v22, %v342_v40  ;;  %v326_v7 = vrot.slane %v1067_v12, 1  ;;  %vm519_vm2 = vweird.f32 %v1085_v42  ;;  %vm1116_vm3 = vcmp.eq.f32.partialorder %v523_v56, 8.507059e+37 }
  0x36   : > { %v843_v26 = vpop.eup %842  ;;  %846 = vrcp.f32 %v1102_v58  ;;  %v540_v2 = vand.u32 2147483648, %v1102_v58  ;;  %v538_v9 = vand.u32 2147483647, %v1102_v58  ;;  %v466_v13 = vadd.f32 %v458_v27, %v449_v62 }
  0x37   : > { %v1113_v10 = vadd.f32 1.0, %v843_v26  ;;  %848 = vpow2.f32 %v784_v61  ;;  %v526_v4 = vor.u32 1.1754944e-38, %v525_v57  ;;  %v359_v15 = vadd.f32 %v351_v50, %v317_v59 }
  0x38   : > { %v845_v14 = vpop.eup %844  ;;  %vm534_vm4 = vweird.f32 %v1102_v58  ;;  %v1123_v19 = vadd.f32 %v310_v0, %v293_v63  ;;  %v541_v28 = vor.u32 1.1754944e-38, %v540_v2  ;;  %v1126_v29 = vadd.f32 %v1030_v34, %v466_v13 }
  0x39   : > { %v515_v18 = vmul.f32 %v845_v14, %v1085_v42  ;;  %850 = vrcp.f32 %v1113_v10  ;;  %v343_v30 = vsel %vm335_vm1, %v326_v7, 0.0  ;;  %v372_v31 = vmul.f32 %v971_v17, %v284_v55 }
  0x3a   : > { %vm520_vm5 = vweird.f32 %v845_v14  ;;  %vm1130_vm6 = vcmp.eq.f32.partialorder %v538_v9, 8.507059e+37  ;;  %v379_v35 = vadd.f32 %v371_v51, %v358_v48  ;;  %v388_v36 = vmul.f32 %v1037_v45, %v973_v21 }
  0x3b   : > { %v516_v32 = vsub.f32 1.0, %v515_v18  ;;  %vm549_vm8 = vweird.f32 %v1113_v10  ;;  %v553_v38 = vand.u32 2147483647, %v1113_v10  ;;  %v555_v40 = vand.u32 2147483648, %v1113_v10  ;;  %vm1145_vm9 = vmor %vm519_vm2, %vm520_vm5 }
  0x3c   : > { %v847_v37 = vpop.eup %846  ;;  %v785_v41 = vmul.f32 -1.442695, %v1126_v29  ;;  %v352_v20 = vmul.f32 %v942_v6, %v343_v30  ;;  %v396_v46 = vadd.f32 %v388_v36, %v379_v35  ;;  %v1152_v48 = vmul.f32 %v975_v22, %v343_v30 }
  0x3d   : > { %v849_v43 = vpop.eup %848  ;;  %v517_v44 = vmul.f32 %v845_v14, %v516_v32  ;;  %v530_v39 = vmul.f32 %v847_v37, %v1102_v58  ;;  %v425_v50 = vmul.f32 %v977_v23, %v284_v55  ;;  %vm535_vm10 = vweird.f32 %v847_v37 }
  0x3e   : > { %v1149_v47 = vadd.f32 1.0, %v849_v43  ;;  %852 = vpow2.f32 %v785_v41  ;;  %v416_v6 = vadd.f32 %v408_v5, %v396_v46  ;;  %vm1156_vm11 = vcmp.eq.f32.partialorder %v553_v38, 8.507059e+37  ;;  %vm1170_vm13 = vmor %vm534_vm4, %vm535_vm10 }
  0x3f   : > { %v851_v51 = vpop.eup %850  ;;  %v518_v52 = vadd.f32 %v845_v14, %v517_v44  ;;  %v531_v54 = vsub.f32 1.0, %v530_v39  ;;  %v442_v56 = vmul.f32 %v1067_v12, %v979_v24  ;;  %v459_v59 = vmul.f32 %v981_v25, %v343_v30 }
  0x40   : > { %v545_v27 = vmul.f32 %v851_v51, %v1113_v10  ;;  %854 = vrcp.f32 %v1149_v47  ;;  %vm550_vm12 = vweird.f32 %v851_v51  ;;  %v433_v0 = vadd.f32 %v425_v50, %v416_v6 }
  0x41   : > { %v522_v55 = vsel %vm1145_vm9, %v845_v14, %v518_v52  ;;  %v532_v57 = vmul.f32 %v847_v37, %v531_v54  ;;  %v808_v26 = vunpack.c.h.bf16 %v1053_v60  ;;  %v556_v7 = vor.u32 1.1754944e-38, %v555_v40  ;;  %vm1190_vm14 = vmor %vm549_vm8, %vm550_vm12 }
  0x42   : > { %v527_v61 = vsel %vm1116_vm3, %v526_v4, %v522_v55  ;;  %v546_v63 = vsub.f32 1.0, %v545_v27  ;;  %v568_v9 = vand.u32 2147483647, %v1149_v47  ;;  %v570_v14 = vand.u32 2147483648, %v1149_v47 }
  0x43   : > { %v634_v2 = vmul.f32 %v527_v61, %v1043_v49  ;;  %v533_v5 = vadd.f32 %v847_v37, %v532_v57  ;;  %v450_v3 = vadd.f32 %v442_v56, %v433_v0  ;;  %v362_v4 = vrot.slane %v808_v26, 7 }
  0x44   : > { %v853_v13 = vpop.eup %852  ;;  %v547_v58 = vmul.f32 %v851_v51, %v546_v63  ;;  %v380_v32 = vadd.f32 %v372_v31, %v359_v15  ;;  %v389_v41 = vmul.f32 %v1067_v12, %v973_v21  ;;  %vm564_vm15 = vweird.f32 %v1149_v47 }
  0x45   : > { %v642_v60 = vpack.c.bf16 %v634_v2, %v634_v2  ;;  %v537_v49 = vsel %vm1170_vm13, %v847_v37, %v533_v5  ;;  %v1194_v30 = vadd.f32 1.0, %v853_v13  ;;  %v467_v40 = vadd.f32 %v459_v59, %v450_v3 }
  0x46   : > { %v855_v35 = vpop.eup %854  ;;  %v542_v36 = vsel %vm1130_vm6, %v541_v28, %v537_v49  ;;  %v548_v38 = vadd.f32 %v851_v51, %v547_v58  ;;  %v364_v15 = vsel %vm276_vm0, 0.0, %v362_v4  ;;  %v360_v28 = vadd.f32 %v352_v20, %v1123_v19 }
  0x47   : > { %651 = vst.msk [vmem:[%s1182_s30] sm:$0xf] %vm650_vm7, %v642_v60  ;;  %v635_v10 = vmul.f32 %v542_v36, %v1059_v1  ;;  %v560_v37 = vmul.f32 %v855_v35, %v1149_v47  ;;  %856 = vrcp.f32 %v1194_v30  ;;  %vm565_vm2 = vweird.f32 %v855_v35 }
  0x48   : > { %v552_v31 = vsel %vm1190_vm14, %v851_v51, %v548_v38  ;;  %v1213_v43 = vadd.f32 %v1030_v34, %v467_v40  ;;  %vm1216_vm3 = vcmp.eq.f32.partialorder %v568_v9, 8.507059e+37  ;;  %v571_v46 = vor.u32 1.1754944e-38, %v570_v14  ;;  %vm1227_vm0 = vmor %vm564_vm15, %vm565_vm2 }
  0x49   : > { %v643_v12 = vpack.c.bf16 %v635_v10, %v635_v10  ;;  %v557_v33 = vsel %vm1156_vm11, %v556_v7, %v552_v31  ;;  %v561_v1 = vsub.f32 1.0, %v560_v37  ;;  %v373_v45 = vmul.f32 %v971_v17, %v364_v15 }
  0x4a   : > { %v636_v44 = vmul.f32 %v557_v33, %v1073_v16  ;;  %v786_v20 = vmul.f32 -1.442695, %v1213_v43  ;;  %v397_v50 = vadd.f32 %v389_v41, %v380_v32  ;;  %v399_v51 = vrot.slane %v808_v26, 1 }
  0x4b   : > { %652 = vst.msk [vmem:[%s1182_s30 + $0x4] sm:$0xf] %vm650_vm7, %v643_v12  ;;  %v562_v19 = vmul.f32 %v855_v35, %v561_v1  ;;  %v426_v54 = vmul.f32 %v977_v23, %v364_v15  ;;  %v443_v17 = vmul.f32 %v808_v26, %v979_v24  ;;  %v381_v6 = vadd.f32 %v373_v45, %v360_v28 }
  0x4c   : > { %v644_v52 = vpack.c.bf16 %v636_v44, %v636_v44  ;;  %858 = vpow2.f32 %v786_v20  ;;  %v401_v56 = vsel %vm335_vm1, %v399_v51, 0.0  ;;  %v417_v55 = vadd.f32 %v1152_v48, %v397_v50 }
  0x4d   : > { %v857_v27 = vpop.eup %856  ;;  %v563_v42 = vadd.f32 %v855_v35, %v562_v19  ;;  %vm579_vm4 = vweird.f32 %v1194_v30  ;;  %v585_v57 = vand.u32 2147483648, %v1194_v30  ;;  %v410_v59 = vmul.f32 %v975_v22, %v401_v56 }
  0x4e   : > { %653 = vst.msk [vmem:[%s1182_s30 + $0x8] sm:$0xf] %vm650_vm7, %v644_v52  ;;  %v575_v47 = vmul.f32 %v857_v27, %v1194_v30  ;;  %v434_v62 = vadd.f32 %v426_v54, %v417_v55  ;;  %v460_v63 = vmul.f32 %v981_v25, %v401_v56  ;;  %v390_v0 = vmul.f32 %v808_v26, %v973_v21 }
  0x4f   : > { %v567_v61 = vsel %vm1227_vm0, %v855_v35, %v563_v42  ;;  %vm580_vm1 = vweird.f32 %v857_v27  ;;  %v583_v5 = vand.u32 2147483647, %v1194_v30  ;;  %v427_v13 = vmul.f32 %v977_v23, %v948_v8 }
  0x50   : > { %v572_v48 = vsel %vm1216_vm3, %v571_v46, %v567_v61  ;;  %v576_v2 = vsub.f32 1.0, %v575_v47  ;;  %v451_v9 = vadd.f32 %v443_v17, %v434_v62  ;;  %v398_v22 = vadd.f32 %v390_v0, %v381_v6  ;;  %vm581_vm5 = vmor %vm579_vm4, %vm580_vm1 }
  0x51   : > { %v637_v7 = vmul.f32 %v572_v48, %v1096_v53  ;;  %v586_v14 = vor.u32 1.1754944e-38, %v585_v57  ;;  %v444_v60 = vmul.f32 0.0, %v979_v24  ;;  %vm584_vm6 = vcmp.eq.f32.partialorder %v583_v5, 8.507059e+37 }
  0x52   : > { %v577_v58 = vmul.f32 %v857_v27, %v576_v2  ;;  %v859_v3 = vpop.eup %858  ;;  %v468_v21 = vadd.f32 %v460_v63, %v451_v9  ;;  %v418_v26 = vadd.f32 %v410_v59, %v398_v22  ;;  %v461_v23 = vmul.f32 %v981_v25, %v955_v11 }
  0x53   : > { %v645_v4 = vpack.c.bf16 %v637_v7, %v637_v7  ;;  %v511_v18 = vadd.f32 1.0, %v859_v3 }
  0x54   : > { %v578_v49 = vadd.f32 %v857_v27, %v577_v58  ;;  %v480_v53 = vadd.f32 %v1030_v34, %v468_v21  ;;  %v435_v8 = vadd.f32 %v427_v13, %v418_v26 }
  0x55   : > { %654 = vst.msk [vmem:[%s1182_s30 + $0xc] sm:$0xf] %vm650_vm7, %v645_v4  ;;  %860 = vrcp.f32 %v511_v18  ;;  %vm594_vm8 = vweird.f32 %v511_v18  ;;  %v600_v31 = vand.u32 2147483648, %v511_v18  ;;  %v598_v28 = vand.u32 2147483647, %v511_v18 }
  0x56   : > { %v582_v32 = vsel %vm581_vm5, %v857_v27, %v578_v49  ;;  %v787_v35 = vmul.f32 -1.442695, %v480_v53  ;;  %v452_v36 = vadd.f32 %v444_v60, %v435_v8 }
  0x57   : > { %v587_v30 = vsel %vm584_vm6, %v586_v14, %v582_v32  ;;  %vm599_vm11 = vcmp.eq.f32.partialorder %v598_v28, 8.507059e+37 }
  0x58   : > { %v638_v38 = vmul.f32 %v587_v30, %v1126_v29  ;;  %862 = vpow2.f32 %v787_v35  ;;  %v469_v24 = vadd.f32 %v461_v23, %v452_v36  ;;  %v601_v29 = vor.u32 1.1754944e-38, %v600_v31 }
  0x5a   : > { %v646_v40 = vpack.c.bf16 %v638_v38, %v638_v38  ;;  %v481_v41 = vadd.f32 %v1030_v34, %v469_v24 }
  0x5b   : > { %v861_v10 = vpop.eup %860 }
  0x5c   : > { %655 = vst.msk [vmem:[%s1182_s30 + $0x10] sm:$0xf] %vm650_vm7, %v646_v40  ;;  %v590_v37 = vmul.f32 %v861_v10, %v511_v18  ;;  %v788_v15 = vmul.f32 -1.442695, %v481_v41  ;;  %vm595_vm9 = vweird.f32 %v861_v10 }
  0x5d   : > { %vm596_vm10 = vmor %vm594_vm8, %vm595_vm9 }
  0x5e   : > { %v863_v11 = vpop.eup %862  ;;  %v591_v25 = vsub.f32 1.0, %v590_v37  ;;  %864 = vpow2.f32 %v788_v15 }
  0x5f   : > { %v512_v12 = vadd.f32 1.0, %v863_v11 }
  0x60   : > { %v592_v33 = vmul.f32 %v861_v10, %v591_v25 }
  0x61   : > { %866 = vrcp.f32 %v512_v12  ;;  %v615_v51 = vand.u32 2147483648, %v512_v12  ;;  %vm609_vm12 = vweird.f32 %v512_v12  ;;  %v613_v16 = vand.u32 2147483647, %v512_v12 }
  0x62   : > { %v593_v1 = vadd.f32 %v861_v10, %v592_v33 }
  0x63   : > { %v616_v6 = vor.u32 1.1754944e-38, %v615_v51  ;;  %vm614_vm15 = vcmp.eq.f32.partialorder %v613_v16, 8.507059e+37 }
  0x64   : > { %v865_v34 = vpop.eup %864  ;;  %v597_v44 = vsel %vm596_vm10, %v861_v10, %v593_v1 }
  0x65   : > { %v602_v39 = vsel %vm599_vm11, %v601_v29, %v597_v44  ;;  %v513_v46 = vadd.f32 1.0, %v865_v34 }
  0x66   : > { %v639_v45 = vmul.f32 %v602_v39, %v1213_v43 }
  0x67   : > { %v867_v19 = vpop.eup %866  ;;  %868 = vrcp.f32 %v513_v46  ;;  %vm624_vm2 = vweird.f32 %v513_v46  ;;  %v630_v43 = vand.u32 2147483648, %v513_v46  ;;  %v628_v47 = vand.u32 2147483647, %v513_v46 }
  0x68   : > { %v647_v20 = vpack.c.bf16 %v639_v45, %v639_v45  ;;  %v605_v50 = vmul.f32 %v867_v19, %v512_v12  ;;  %vm610_vm13 = vweird.f32 %v867_v19 }
  0x69   : > { %vm611_vm14 = vmor %vm609_vm12, %vm610_vm13  ;;  %v631_v62 = vor.u32 1.1754944e-38, %v630_v43  ;;  %vm629_vm4 = vcmp.eq.f32.partialorder %v628_v47, 8.507059e+37 }
  0x6a   : > { %656 = vst.msk [vmem:[%s1182_s30 + $0x14] sm:$0xf] %vm650_vm7, %v647_v20  ;;  %v606_v52 = vsub.f32 1.0, %v605_v50 }
  0x6c   : > { %v607_v54 = vmul.f32 %v867_v19, %v606_v52 }
  0x6d   : > { %v869_v17 = vpop.eup %868 }
  0x6e   : > { %v608_v27 = vadd.f32 %v867_v19, %v607_v54  ;;  %v620_v42 = vmul.f32 %v869_v17, %v513_v46  ;;  %vm625_vm3 = vweird.f32 %v869_v17 }
  0x6f   : > { %vm626_vm0 = vmor %vm624_vm2, %vm625_vm3 }
  0x70   : > { %v612_v56 = vsel %vm611_vm14, %v867_v19, %v608_v27  ;;  %v621_v55 = vsub.f32 1.0, %v620_v42 }
  0x71   : > { %v617_v57 = vsel %vm614_vm15, %v616_v6, %v612_v56 }
  0x72   : > { %v640_v59 = vmul.f32 %v617_v57, %v480_v53  ;;  %v622_v61 = vmul.f32 %v869_v17, %v621_v55 }
  0x74   : > { %v648_v63 = vpack.c.bf16 %v640_v59, %v640_v59  ;;  %v623_v0 = vadd.f32 %v869_v17, %v622_v61 }
  0x76   : > { %657 = vst.msk [vmem:[%s1182_s30 + $0x18] sm:$0xf] %vm650_vm7, %v648_v63  ;;  %v627_v48 = vsel %vm626_vm0, %v869_v17, %v623_v0 }
  0x77   : > { %v632_v2 = vsel %vm629_vm4, %v631_v62, %v627_v48 }
  0x78   : > { %v641_v5 = vmul.f32 %v632_v2, %v481_v41 }
  0x7a   : > { %v649_v7 = vpack.c.bf16 %v641_v5, %v641_v5 }
  0x7c   : > { %658 = vst.msk [vmem:[%s1182_s30 + $0x1c] sm:$0xf] %vm650_vm7, %v649_v7 }
  0x7d PF: > { %s13_s14 = sadd.s32 1, %s892_s14   ;;  %s1299_s12 = smov %s888_s13 }
  0x7e   : > { %p10_p5 = scmp.ge.s32.totalorder %s13_s14, 4   ;;  %s1300_s13 = smov %s1302_s15 }
  0x80   :  { %12 = sbr.rel (!%p10_p5) target bundleno = 2 (0x2), region = 68 }

// kernel: vss_block_forward.8
= control target key start
LH: loop header
LB: loop body
LE: loop exit
PB: predicated region body
PF: predicated region fallthrough
CT: control target
= control target key end

     0   :  { %s2086_s21 = smov 0   ;;  %s2088_s22 = smov 0   ;;  %s2749_s0 = inlined_call_operand.vmem [shape: bf16[2,2,64,8], index: 0, kind: input, shape index: {}]   ;;  %s2750_s1 = inlined_call_operand.vmem [shape: bf16[4,8,8], index: 1, kind: input, shape index: {}]   ;;  %s2751_s2 = inlined_call_operand.vmem [shape: bf16[4,8,32], index: 2, kind: input, shape index: {}]   ;;  %s2752_s3 = inlined_call_operand.vmem [shape: f32[4,1,8], index: 3, kind: input, shape index: {}]   ;;  %s2753_s4 = inlined_call_operand.vmem [shape: f32[4,16,8], index: 4, kind: input, shape index: {}]   ;;  %s2754_s5 = inlined_call_operand.vmem [shape: f32[4,1,8], index: 5, kind: input, shape index: {}]   ;;  %s2755_s6 = inlined_call_operand.vmem [shape: bf16[2,2,64,8], index: 6, kind: output, shape index: {}]  }
   0x1   :  { %s2090_s23 = smov 0   ;;  %s2092_s24 = smov 0  }
   0x2   :  { %s2094_s25 = smov 0  }
   0x3 LB: > { %s31_s26 = sadd.s32 1, %s2012_s23  ;;  %s35_s27 = sadd.s32 1, %s2016_s24  ;;  %s2020_s25 = sphi %s2094_s25, %s16_s25   ;;  %s2016_s24 = sphi %s2092_s24, %s2763_s24   ;;  %s2012_s23 = sphi %s2090_s23, %s2762_s23   ;;  %s2008_s22 = sphi %s2088_s22, %s2761_s22   ;;  %s2004_s21 = sphi %s2086_s21, %s2760_s21  }
   0x4   : > { %p33_p0 = scmp.ge.s32.totalorder %s31_s26, 2  ;;  %p1686_p1 = scmp.ge.s32.totalorder %s2020_s25, 1 }
   0x5   : > { %p318_p2 = scmp.lt.s32.totalorder %s2020_s25, 5 }
   0x6   : > { %s2765_s26 = smov (%p33_p0, %s31_s26), 0  ;;  %s2767_s27 = smov (!%p33_p0, %s35_s27), %s2016_s24 }
   0x7   : > { %p319_p3 = pnand %p1686_p1, %p318_p2  ;;  %p37_p4 = scmp.ge.s32.totalorder %s2767_s27, 2 }
   0x8   : > { %s406_s28 = sadd.s32 (!%p319_p3), 2, %s2004_s21  ;;  %p392_p5 = scmp.lt.s32.totalorder (!%p319_p3), %s2008_s22, 1 }
   0x9   : > { %s2769_s27 = smov (%p37_p4, %s2767_s27), 0  ;;  %322 = sbr.rel (%p319_p3) target bundleno = 765 (0x2fd), region = 44 }
   0xa   : > { %p407_p6 = scmp.lt.s32.totalorder (!%p319_p3), %s406_s28, 3  ;;  %p394_p7 = scmp.lt.s32.totalorder (!%p319_p3), %s2004_s21, 1 }
   0xe   : > { %vm456_vm0 = vcmask 64512   ;;  %v2034_v0 = vmov 0.0   ;;  %s2771_s22 = smov (!%p392_p5, %s2008_s22), 1  ;;  %s2773_s28 = smov (!%p407_p6, %s406_s28), 3  ;;  %vm505_vm1 = vcmask 1043456   ;;  %vm691_vm2 = vcmask 261120  }
   0xf   : > { %457 = vst.msk [vmem:[#allocation2] sm:$0xff] %vm456_vm0, %v2034_v0  ;;  %s2775_s21 = smov (!%p394_p7, %s2004_s21), 1  ;;  %s1690_s29 = sshll.u32 %s2773_s28, 2 }
  0x10   : > { %458 = vst.msk [vmem:[#allocation2 + $0x8] sm:$0xff] %vm456_vm0, %v2034_v0  ;;  %s421_s8 = scalar_lea.vmem %s2752_s3, %s2773_s28  ;;  %s410_s11 = scalar_lea.vmem %s2750_s1, %s1690_s29 }
  0x11   : > { %s1726_s12 = sshll.u32 %s2773_s28, 4  ;;  %s433_s18 = scalar_lea.vmem %s2754_s5, %s2773_s28  ;;  %v467_v1 = vld [vmem:[%s410_s11] sm:$0xf] }
  0x12   : > { %s428_s15 = scalar_lea.vmem %s2753_s4, %s1726_s12  ;;  %v507_v2 = vsel %vm505_vm1, %v467_v1, 0  ;;  %v2141_v5 = vld [vmem:[%s433_s18] sm:$0x1]  ;;  %s1687_s19 = sshll.u32 %s2775_s21, 3 }
  0x13   : > { %v2137_v3 = vld [vmem:[%s428_s15] sm:$0xff]  ;;  %v2139_v4 = vld [vmem:[%s428_s15 + $0x8] sm:$0xff]  ;;  %s416_s7 = scalar_lea.vmem %s2751_s2, %s1690_s29  ;;  %516 = vmatpush.bf16.msra.mxu0 %v507_v2  ;;  %1735 = vmatpush.bf16.msra.mxu2 %v507_v2  ;;  %s1688_s9 = sshll.u32 %s2771_s22, 4 }
  0x14   : > { %v658_v8 = vld [vmem:[%s416_s7] sm:$0xf]  ;;  %s401_s10 = sadd.s32 %s1688_s9, %s1687_s19  ;;  %s2252_s28 = smov 0  }
  0x15   : > { %v660_v9 = vsel %vm505_vm1, %v658_v8, 0  ;;  %s1689_s11 = sshll.u32 %s401_s10, 2  ;;  %v2178_v14 = vld [vmem:[%s421_s8] ss:$0 sm:$0xff] }
  0x16   : > { %v2146_v6 = vld [vmem:[#allocation2] sm:$0xff]   ;;  %1736 = vmatpush.bf16.msra.mxu3 %v660_v9  ;;  %669 = vmatpush.bf16.msra.mxu1 %v660_v9  ;;  %s2154_s13 = scalar_lea.vmem %s2749_s0, %s1689_s11  ;;  %s2159_s22 = scalar_lea.vmem %s2755_s6, %s1689_s11 }
  0x17   : > { %v2148_v7 = vld [vmem:[#allocation2 + $0x8] sm:$0xff]   ;;  %v1727_v10 = vld [vmem:[%s2154_s13] sm:$0xff]  ;;  %v1729_v11 = vld [vmem:[%s2154_s13 + $0x10] sm:$0xff] }
  0x18   : > { %1713 = vmatmul.msk.bf16.vlgmr.msra.gmra.mxu0 %vm456_vm0, %v1727_v10  ;;  %1715 = vmatmul.msk.bf16.vlgmr.msra.gmra.mxu2 %vm456_vm0, %v1729_v11  ;;  %v1728_v12 = vld [vmem:[%s2154_s13 + $0x8] sm:$0xff]  ;;  %v1730_v13 = vld [vmem:[%s2154_s13 + $0x18] sm:$0xff] }
  0x19   : > { %1719 = vmatmul.msk.bf16.vlgmr.msra.gmra.mxu3 %vm456_vm0, %v1729_v11  ;;  %1717 = vmatmul.msk.bf16.vlgmr.msra.gmra.mxu1 %vm456_vm0, %v1727_v10 }
  0x28   : > { %1714 = vmatmul.msk.bf16.gmra.mxu0 %vm456_vm0, %v1728_v12  ;;  %1716 = vmatmul.msk.bf16.gmra.mxu2 %vm456_vm0, %v1730_v13 }
  0x29   : > { %1720 = vmatmul.msk.bf16.gmra.mxu3 %vm456_vm0, %v1730_v13  ;;  %1718 = vmatmul.msk.bf16.gmra.mxu1 %vm456_vm0, %v1728_v12 }
  0x95   : > { %v518_v15 = vpop.f32.mrf.mxu0 }
  0x96   : > { %v2181_v16 = vadd.f32 %v2178_v14, %v518_v15  ;;  %v671_v17 = vpop.f32.mrf.mxu1 }
  0x97   : > { %692 = vst.msk [vmem:[#allocation4] sm:$0xff] %vm691_vm2, %v671_v17 }
  0x98   : > { %v546_v18 = vmin.f32 %v2181_v16, 20.0  ;;  %vm538_vm4 = vcmp.gt.f32.partialorder %v2181_v16, 20.0 }
  0x9a   : > { %v554_v19 = vmul.f32 1.442695, %v546_v18 }
  0x9b   : > { %v528_v20 = vpop.f32.mrf.mxu2 }
  0x9c   : > { %1820 = vpow2.f32 %v554_v19  ;;  %v2186_v21 = vadd.f32 %v2178_v14, %v528_v20  ;;  %v681_v22 = vpop.f32.mrf.mxu3 }
  0x9d   : > { %v520_v23 = vpop.f32.mrf.mxu0  ;;  %696 = vst.msk [vmem:[#allocation4 + $0x20] sm:$0xff] %vm691_vm2, %v681_v22 }
  0x9e   : > { %v550_v24 = vmin.f32 %v2186_v21, 20.0  ;;  %v2191_v25 = vadd.f32 %v2178_v14, %v520_v23  ;;  %v673_v26 = vpop.f32.mrf.mxu1  ;;  %vm542_vm5 = vcmp.gt.f32.partialorder %v2186_v21, 20.0 }
  0x9f   : > { %693 = vst.msk [vmem:[#allocation4 + $0x8] sm:$0xff] %vm691_vm2, %v673_v26 }
  0xa0   : > { %v562_v27 = vmul.f32 1.442695, %v550_v24  ;;  %v547_v28 = vmin.f32 %v2191_v25, 20.0  ;;  %vm539_vm8 = vcmp.gt.f32.partialorder %v2191_v25, 20.0 }
  0xa2   : > { %v1821_v29 = vpop.eup %1820  ;;  %1822 = vpow2.f32 %v562_v27  ;;  %v556_v30 = vmul.f32 1.442695, %v547_v28 }
  0xa3   : > { %v570_v31 = vadd.f32 1.0, %v1821_v29  ;;  %v530_v32 = vpop.f32.mrf.mxu2  ;;  %v573_v33 = vmul.f32 -0.5, %v1821_v29  ;;  %v576_v44 = vand.u32 2147483647, %v1821_v29 }
  0xa4   : > { %1824 = vpow2.f32 %v556_v30  ;;  %v2196_v34 = vadd.f32 %v2178_v14, %v530_v32  ;;  %v683_v35 = vpop.f32.mrf.mxu3 }
  0xa5   : > { %1826 = vlog2.f32 %v570_v31  ;;  %v523_v36 = vpop.f32.mrf.mxu0  ;;  %697 = vst.msk [vmem:[#allocation4 + $0x28] sm:$0xff] %vm691_vm2, %v683_v35  ;;  %v574_v41 = vadd.f32 1.0, %v573_v33  ;;  %vm577_vm3 = vcmp.lt.f32.partialorder %v576_v44, 0.0004427343 }
  0xa6   : > { %v551_v37 = vmin.f32 %v2196_v34, 20.0  ;;  %v2201_v38 = vadd.f32 %v2178_v14, %v523_v36  ;;  %v676_v39 = vpop.f32.mrf.mxu1  ;;  %vm543_vm10 = vcmp.gt.f32.partialorder %v2196_v34, 20.0 }
  0xa7   : > { %694 = vst.msk [vmem:[#allocation4 + $0x10] sm:$0xff] %vm691_vm2, %v676_v39  ;;  %v575_v53 = vmul.f32 %v1821_v29, %v574_v41 }
  0xa8   : > { %v1823_v40 = vpop.eup %1822  ;;  %v564_v42 = vmul.f32 1.442695, %v551_v37  ;;  %v548_v43 = vmin.f32 %v2201_v38, 20.0  ;;  %vm540_vm12 = vcmp.gt.f32.partialorder %v2201_v38, 20.0 }
  0xa9   : > { %v606_v45 = vadd.f32 1.0, %v1823_v40  ;;  %v609_v47 = vmul.f32 -0.5, %v1823_v40  ;;  %v612_v63 = vand.u32 2147483647, %v1823_v40 }
  0xaa   : > { %v1825_v46 = vpop.eup %1824  ;;  %1828 = vpow2.f32 %v564_v42  ;;  %v558_v48 = vmul.f32 1.442695, %v548_v43 }
  0xab   : > { %v1827_v49 = vpop.eup %1826  ;;  %1830 = vlog2.f32 %v606_v45  ;;  %v579_v50 = vadd.f32 1.0, %v1825_v46  ;;  %v533_v51 = vpop.f32.mrf.mxu2  ;;  %v582_v54 = vmul.f32 -0.5, %v1825_v46  ;;  %v610_v59 = vadd.f32 1.0, %v609_v47 }
  0xac   : > { %v572_v52 = vmul.f32 0.6931472, %v1827_v49  ;;  %1832 = vpow2.f32 %v558_v48  ;;  %v686_v55 = vpop.f32.mrf.mxu3  ;;  %v2206_v56 = vadd.f32 %v2178_v14, %v533_v51  ;;  %v585_v10 = vand.u32 2147483647, %v1825_v46 }
  0xad   : > { %1834 = vlog2.f32 %v579_v50  ;;  %v525_v57 = vpop.f32.mrf.mxu0  ;;  %698 = vst.msk [vmem:[#allocation4 + $0x30] sm:$0xff] %vm691_vm2, %v686_v55  ;;  %v583_v2 = vadd.f32 1.0, %v582_v54  ;;  %v611_v15 = vmul.f32 %v1823_v40, %v610_v59  ;;  %vm613_vm6 = vcmp.lt.f32.partialorder %v612_v63, 0.0004427343 }
  0xae   : > { %v578_v58 = vsel %vm577_vm3, %v575_v53, %v572_v52  ;;  %v2211_v60 = vadd.f32 %v2178_v14, %v525_v57  ;;  %v678_v61 = vpop.f32.mrf.mxu1  ;;  %v552_v0 = vmin.f32 %v2206_v56, 20.0  ;;  %vm586_vm7 = vcmp.lt.f32.partialorder %v585_v10, 0.0004427343 }
  0xaf   : > { %v642_v62 = vsel %vm538_vm4, %v2181_v16, %v578_v58  ;;  %695 = vst.msk [vmem:[#allocation4 + $0x18] sm:$0xff] %vm691_vm2, %v678_v61  ;;  %v584_v26 = vmul.f32 %v1825_v46, %v583_v2  ;;  %vm544_vm14 = vcmp.gt.f32.partialorder %v2206_v56, 20.0 }
  0xb0   : > { %v1829_v1 = vpop.eup %1828  ;;  %650 = vst.msk [vmem:[#allocation3] sm:$0xff] %vm456_vm0, %v642_v62  ;;  %v549_v8 = vmin.f32 %v2211_v60, 20.0  ;;  %v566_v17 = vmul.f32 1.442695, %v552_v0 }
  0xb1   : > { %v1831_v9 = vpop.eup %1830  ;;  %v615_v11 = vadd.f32 1.0, %v1829_v1  ;;  %v618_v16 = vmul.f32 -0.5, %v1829_v1  ;;  %v621_v35 = vand.u32 2147483647, %v1829_v1 }
  0xb2   : > { %v1833_v12 = vpop.eup %1832  ;;  %v608_v13 = vmul.f32 0.6931472, %v1831_v9  ;;  %v560_v20 = vmul.f32 1.442695, %v549_v8 }
  0xb3   : > { %v1835_v18 = vpop.eup %1834  ;;  %1836 = vlog2.f32 %v615_v11  ;;  %v588_v19 = vadd.f32 1.0, %v1833_v12  ;;  %v535_v22 = vpop.f32.mrf.mxu2  ;;  %v591_v27 = vmul.f32 -0.5, %v1833_v12  ;;  %v619_v32 = vadd.f32 1.0, %v618_v16 }
  0xb4   : > { %v614_v23 = vsel %vm613_vm6, %v611_v15, %v608_v13  ;;  %v581_v24 = vmul.f32 0.6931472, %v1835_v18  ;;  %v688_v28 = vpop.f32.mrf.mxu3  ;;  %v2223_v30 = vadd.f32 %v2178_v14, %v535_v22  ;;  %v594_v37 = vand.u32 2147483647, %v1833_v12 }
  0xb5   : > { %v646_v29 = vsel %vm542_vm5, %v2186_v21, %v614_v23  ;;  %1838 = vlog2.f32 %v588_v19  ;;  %699 = vst.msk [vmem:[#allocation4 + $0x38] sm:$0xff] %vm691_vm2, %v688_v28  ;;  %v592_v36 = vadd.f32 1.0, %v591_v27  ;;  %v620_v41 = vmul.f32 %v1829_v1, %v619_v32 }
  0xb6   : > { %654 = vst.msk [vmem:[#allocation3 + $0x20] sm:$0xff] %vm456_vm0, %v646_v29  ;;  %v587_v31 = vsel %vm586_vm7, %v584_v26, %v581_v24  ;;  %1840 = vpow2.f32 %v566_v17  ;;  %v553_v21 = vmin.f32 %v2223_v30, 20.0  ;;  %vm622_vm9 = vcmp.lt.f32.partialorder %v621_v35, 0.0004427343 }
  0xb7   : > { %v643_v33 = vsel %vm539_vm8, %v2191_v25, %v587_v31  ;;  %1842 = vpow2.f32 %v560_v20  ;;  %v593_v45 = vmul.f32 %v1833_v12, %v592_v36  ;;  %vm595_vm11 = vcmp.lt.f32.partialorder %v594_v37, 0.0004427343 }
  0xb8   : > { %651 = vst.msk [vmem:[#allocation3 + $0x8] sm:$0xff] %vm456_vm0, %v643_v33  ;;  %v568_v39 = vmul.f32 1.442695, %v553_v21  ;;  %vm541_vm2 = vcmp.gt.f32.partialorder %v2211_v60, 20.0  ;;  %vm545_vm4 = vcmp.gt.f32.partialorder %v2223_v30, 20.0 }
  0xb9   : > { %v1837_v14 = vpop.eup %1836 }
  0xba   : > { %v617_v40 = vmul.f32 0.6931472, %v1837_v14  ;;  %1844 = vpow2.f32 %v568_v39 }
  0xbb   : > { %v1839_v42 = vpop.eup %1838 }
  0xbc   : > { %v1841_v43 = vpop.eup %1840  ;;  %v623_v44 = vsel %vm622_vm9, %v620_v41, %v617_v40  ;;  %v590_v25 = vmul.f32 0.6931472, %v1839_v42 }
  0xbd   : > { %v1843_v46 = vpop.eup %1842  ;;  %v647_v47 = vsel %vm543_vm10, %v2196_v34, %v623_v44  ;;  %v624_v48 = vadd.f32 1.0, %v1841_v43  ;;  %v627_v50 = vmul.f32 -0.5, %v1841_v43  ;;  %v630_v34 = vand.u32 2147483647, %v1841_v43 }
  0xbe   : > { %655 = vst.msk [vmem:[#allocation3 + $0x28] sm:$0xff] %vm456_vm0, %v647_v47  ;;  %v596_v49 = vsel %vm595_vm11, %v593_v45, %v590_v25  ;;  %v597_v51 = vadd.f32 1.0, %v1843_v46  ;;  %v600_v53 = vmul.f32 -0.5, %v1843_v46  ;;  %v603_v61 = vand.u32 2147483647, %v1843_v46 }
  0xbf   : > { %v644_v52 = vsel %vm540_vm12, %v2201_v38, %v596_v49  ;;  %1846 = vlog2.f32 %v624_v48  ;;  %v628_v55 = vadd.f32 1.0, %v627_v50  ;;  %vm631_vm13 = vcmp.lt.f32.partialorder %v630_v34, 0.0004427343 }
  0xc0   : > { %652 = vst.msk [vmem:[#allocation3 + $0x10] sm:$0xff] %vm456_vm0, %v644_v52  ;;  %1848 = vlog2.f32 %v597_v51  ;;  %v1845_v54 = vpop.eup %1844  ;;  %v601_v58 = vadd.f32 1.0, %v600_v53  ;;  %vm604_vm15 = vcmp.lt.f32.partialorder %v603_v61, 0.0004427343 }
  0xc1   : > { %v633_v57 = vadd.f32 1.0, %v1845_v54  ;;  %v636_v59 = vmul.f32 -0.5, %v1845_v54  ;;  %v629_v1 = vmul.f32 %v1841_v43, %v628_v55  ;;  %v639_v10 = vand.u32 2147483647, %v1845_v54 }
  0xc2   : > { %v602_v38 = vmul.f32 %v1843_v46, %v601_v58 }
  0xc3   : > { %1850 = vlog2.f32 %v633_v57  ;;  %v637_v8 = vadd.f32 1.0, %v636_v59  ;;  %vm640_vm3 = vcmp.lt.f32.partialorder %v639_v10, 0.0004427343 }
  0xc5   : > { %v1847_v62 = vpop.eup %1846  ;;  %v638_v17 = vmul.f32 %v1845_v54, %v637_v8 }
  0xc6   : > { %v1849_v63 = vpop.eup %1848  ;;  %v626_v0 = vmul.f32 0.6931472, %v1847_v62 }
  0xc7   : > { %v599_v2 = vmul.f32 0.6931472, %v1849_v63 }
  0xc8   : > { %v632_v9 = vsel %vm631_vm13, %v629_v1, %v626_v0 }
  0xc9   : > { %v648_v11 = vsel %vm544_vm14, %v2206_v56, %v632_v9  ;;  %v605_v12 = vsel %vm604_vm15, %v602_v38, %v599_v2  ;;  %v1851_v13 = vpop.eup %1850 }
  0xca   : > { %656 = vst.msk [vmem:[#allocation3 + $0x30] sm:$0xff] %vm456_vm0, %v648_v11  ;;  %v645_v15 = vsel %vm541_vm2, %v2211_v60, %v605_v12  ;;  %v635_v16 = vmul.f32 0.6931472, %v1851_v13 }
  0xcb   : > { %653 = vst.msk [vmem:[#allocation3 + $0x18] sm:$0xff] %vm456_vm0, %v645_v15 }
  0xcc   : > { %v641_v18 = vsel %vm640_vm3, %v638_v17, %v635_v16 }
  0xcd   : > { %v649_v19 = vsel %vm545_vm4, %v2223_v30, %v641_v18 }
  0xce   : > { %657 = vst.msk [vmem:[#allocation3 + $0x38] sm:$0xff] %vm456_vm0, %v649_v19 }
  0xcf LB: >> { %v2035_v56 = vmov 13   ;;  %v2036_v60 = vmov 15   ;;  %s713_s8 = ssub.s32 3, %s2032_s28  ;;  %v1476_v26 = vperm.slane %v2141_v5, 0  ;;  %v2037_v30 = vmov 14   ;;  %s710_s28 = sadd.s32 1, %s2032_s28   ;;  %s2032_s28 = sphi %s2252_s28, %s710_s28   ;;  %v2028_v6 = vphi %v2146_v6, %v2759_v6   ;;  %v2024_v7 = vphi %v2148_v7, %v2758_v7  }
  0xd0   : >> { %1854 = vset.pattern.permute.xlu2 %v2035_v56  ;;  %1852 = vset.pattern.permute.xlu1 %v2036_v60  ;;  %s1721_s17 = sshll.u32 %s713_s8, 4  ;;  %v2038_v33 = vmov 12   ;;  %v2039_v35 = vmov 6   ;;  %v2040_v36 = vmov 11   ;;  %v2041_v14 = vmov 5   ;;  %p707_p8 = scmp.ge.s32.totalorder %s710_s28, 4  }
  0xd1   : >> { %s753_s18 = sshra.s32 %s1721_s17, 3  ;;  %s718_s19 = scalar_lea.vmem [#allocation4], %s1721_s17  ;;  %v2042_v39 = vmov 10   ;;  %v2043_v40 = vmov 4   ;;  %v2044_v41 = vmov 2   ;;  %v2045_v42 = vmov 1  }
  0xd2   : >> { %v719_v20 = vld [vmem:[%s718_s19] sm:$0xff]  ;;  %s2266_s20 = sshll.u32 %s753_s18, 2  ;;  %s2272_s7 = scalar_lea.vmem [#allocation3], %s1721_s17  ;;  %v720_v29 = vld [vmem:[%s718_s19 + $0x8] sm:$0xff]  ;;  %v2046_v54 = vmov 9   ;;  %vm1455_vm5 = vcmask 1040384  }
  0xd3   : >> { %s756_s30 = scalar_lea.vmem %s2154_s13, %s2266_s20  ;;  %721 = vxpose.xlu0.b32.start [1/2] (short) (narrow) %v719_v20, 32  ;;  %vm1457_vm6 = vcmask 1041408   ;;  %vm1459_vm7 = vcmask 1042432   ;;  %vm1462_vm8 = vcmask 1044480   ;;  %vm1464_vm9 = vcmask 1045504   ;;  %s2647_s9 = scalar_lea.vmem %s2159_s22, %s2266_s20 }
  0xd4   : >> { %v2270_v22 = vld [vmem:[%s756_s30] sm:$0xff]   ;;  %vm1466_vm10 = vcmask 1046528   ;;  %vm1486_vm11 = vcmask 60416  }
  0xd5   : >> { %v2275_v23 = vld [vmem:[%s2272_s7] sm:$0xff]  ;;  %v1733_v24 = vunpack.c.l.bf16 %v2270_v22  ;;  %v1734_v43 = vunpack.c.h.bf16 %v2270_v22  ;;  %v2331_v44 = vld [vmem:[%s2272_s7 + $0x8] sm:$0xff] }
  0xd6   : >> { %v778_v46 = vrot.slane %v2331_v44, 7  ;;  %v777_v50 = vrot.slane %v2331_v44, 6  ;;  %v776_v53 = vrot.slane %v2331_v44, 5  ;;  %v775_v61 = vrot.slane %v2331_v44, 4 }
  0xd7   : >> { %v2281_v27 = vmul.f32 %v1733_v24, %v1476_v26  ;;  %v2284_v28 = vmul.f32 %v1733_v24, %v2275_v23  ;;  %v2338_v25 = vmul.f32 %v1734_v43, %v2331_v44  ;;  %v774_v8 = vrot.slane %v2331_v44, 3 }
  0xd8   : >> { %v794_v49 = vperm.slane %v778_v46, 0  ;;  %v793_v57 = vperm.slane %v777_v50, 0  ;;  %v792_v59 = vperm.slane %v776_v53, 0  ;;  %v2364_v2 = vperm.slane %v775_v61, 0 }
  0xd9   : >> { %v989_v45 = vperm.slane %v2338_v25, 5  ;;  %v1023_v51 = vperm.slane %v2338_v25, 4  ;;  %v1057_v0 = vperm.slane %v2338_v25, 3  ;;  %v2376_v17 = vperm.slane %v774_v8, 0 }
  0xda   : >> { %v841_v52 = vmul.f32 %v794_v49, %v2137_v3  ;;  %v839_v62 = vmul.f32 %v793_v57, %v2137_v3  ;;  %v842_v63 = vmul.f32 %v794_v49, %v2139_v4  ;;  %v837_v1 = vmul.f32 %v792_v59, %v2137_v3 }
  0xdb   : >> { %722 = vxpose.xlu0.b32.end [2/2] (short) (narrow) %v720_v29, 32  ;;  %v840_v11 = vmul.f32 %v793_v57, %v2139_v4  ;;  %v835_v15 = vmul.f32 %v2364_v2, %v2137_v3  ;;  %v773_v18 = vrot.slane %v2331_v44, 2  ;;  %v919_v19 = vperm.slane %v2338_v25, 7 }
  0xdc   : >> { %v903_v58 = vmul.f32 1.442695, %v841_v52  ;;  %v899_v38 = vmul.f32 1.442695, %v839_v62  ;;  %v905_v10 = vmul.f32 1.442695, %v842_v63 }
  0xdd   : >> { %v895_v13 = vmul.f32 1.442695, %v837_v1  ;;  %v891_v24 = vmul.f32 1.442695, %v835_v15  ;;  %v955_v46 = vperm.slane %v2338_v25, 6  ;;  %v838_v1 = vmul.f32 %v792_v59, %v2139_v4 }
  0xde   : >> { %1905 = vpow2.f32 %v903_v58 }
  0xdf   : >> { %1907 = vpow2.f32 %v899_v38 }
  0xe0   : >> { %1909 = vpow2.f32 %v905_v10 }
  0xe1   : >> { %1911 = vpow2.f32 %v895_v13 }
  0xe4   : >> { %v1906_v16 = vpop.eup %1905 }
  0xe5   : >> { %v907_v20 = vmul.f32 %v2028_v6, %v1906_v16  ;;  %v1908_v49 = vpop.eup %1907 }
  0xe6   : >> { %v1910_v53 = vpop.eup %1909 }
  0xe7   : >> { %v1912_v61 = vpop.eup %1911  ;;  %v908_v38 = vmul.f32 %v2024_v7, %v1910_v53 }
 0x142   : >> { %1853 = vset.pattern.permute.xlu0 %v2037_v30 }
 0x177   : >> { %v2286_v31 = vpop.trf.xlu0 }
 0x178   : >> { %982 = vperm.xlu2 %1854, %v2286_v31   ;;  %948 = vperm.xlu0 %1853, %v2286_v31  }
 0x179   : >> { %911 = vperm.xlu1 %1852, %v2286_v31  }
 0x17f   : >> { %v2291_v32 = vpop.trf.xlu0 }
 0x180   : >> { %1855 = vset.pattern.permute.xlu2 %v2038_v33  ;;  %1882 = vset.pattern.permute.xlu0 %v2039_v35 }
 0x181   : >> { %916 = vperm.xlu1 %1852, %v2291_v32   ;;  %1016 = vperm.xlu2 %1855, %v2286_v31  }
 0x182   : >> { %1224 = vperm.xlu0 %1882, %v2291_v32  }
 0x187   : >> { %v2297_v21 = vpop.trf.xlu0 }
 0x189   : >> { %1858 = vset.pattern.permute.xlu1 %v2037_v30  ;;  %1856 = vset.pattern.permute.xlu2 %v2040_v36 }
 0x18a   : >> { %1886 = vset.pattern.permute.xlu0 %v2041_v14  ;;  %952 = vperm.xlu1 %1858, %v2291_v32  }
 0x18b   : >> { %1050 = vperm.xlu2 %1856, %v2286_v31   ;;  %1267 = vperm.xlu0 %1886, %v2297_v21  }
 0x18f   : >> { %v2304_v37 = vpop.trf.xlu0 }
 0x192   : >> { %1859 = vset.pattern.permute.xlu1 %v2035_v56 }
 0x193   : >> { %1857 = vset.pattern.permute.xlu2 %v2042_v39  ;;  %986 = vperm.xlu1 %1859, %v2291_v32  }
 0x194   : >> { %1889 = vset.pattern.permute.xlu0 %v2043_v40  ;;  %1084 = vperm.xlu2 %1857, %v2286_v31  }
 0x195   : >> { %1305 = vperm.xlu0 %1889, %v2304_v37  }
 0x19b   : >> { %1860 = vset.pattern.permute.xlu1 %v2038_v33 }
 0x19c   : >> { %1863 = vset.pattern.permute.xlu2 %v2036_v60  ;;  %1020 = vperm.xlu1 %1860, %v2291_v32  }
 0x19d   : >> { %1893 = vset.pattern.permute.xlu0 %v2044_v41  ;;  %926 = vperm.xlu2 %1863, %v2297_v21  }
 0x19e   : >> { %1360 = vperm.xlu0 %1893, %v2291_v32  }
 0x1a4   : >> { %1861 = vset.pattern.permute.xlu1 %v2040_v36 }
 0x1a5   : >> { %1054 = vperm.xlu1 %1861, %v2291_v32   ;;  %1864 = vset.pattern.permute.xlu2 %v2037_v30 }
 0x1a6   : >> { %961 = vperm.xlu2 %1864, %v2297_v21   ;;  %1898 = vset.pattern.permute.xlu0 %v2045_v42 }
 0x1a7   : >> { %1403 = vperm.xlu0 %1898, %v2297_v21  }
 0x1ad   : >> { %1862 = vset.pattern.permute.xlu1 %v2042_v39 }
 0x1ae   : >> { %1088 = vperm.xlu1 %1862, %v2291_v32   ;;  %1865 = vset.pattern.permute.xlu2 %v2035_v56 }
 0x1af   : >> { %995 = vperm.xlu2 %1865, %v2297_v21   ;;  %1902 = vset.pattern.permute.xlu0 %v2044_v41 }
 0x1b0   : >> { %1373 = vperm.xlu0 %1902, %v2304_v37  }
 0x1b6   : >> { %1870 = vset.pattern.permute.xlu1 %v2037_v30  ;;  %v833_v30 = vmul.f32 %v2376_v17, %v2137_v3 }
 0x1b7   : >> { %1866 = vset.pattern.permute.xlu2 %v2038_v33  ;;  %965 = vperm.xlu1 %1870, %v2304_v37  }
 0x1b8   : >> { %1029 = vperm.xlu2 %1866, %v2297_v21  }
 0x1bf   : >> { %1871 = vset.pattern.permute.xlu1 %v2035_v56  ;;  %v901_v56 = vmul.f32 1.442695, %v840_v11 }
 0x1c0   : >> { %1867 = vset.pattern.permute.xlu2 %v2040_v36  ;;  %999 = vperm.xlu1 %1871, %v2304_v37  }
 0x1c1   : >> { %1063 = vperm.xlu2 %1867, %v2297_v21   ;;  %1913 = vpow2.f32 %v901_v56  ;;  %v897_v56 = vmul.f32 1.442695, %v838_v1 }
 0x1c2   : >> { %1915 = vpow2.f32 %v891_v24 }
 0x1c8   : >> { %1872 = vset.pattern.permute.xlu1 %v2038_v33  ;;  %v2384_v33 = vperm.slane %v773_v18, 0 }
 0x1c9   : >> { %1868 = vset.pattern.permute.xlu2 %v2042_v39  ;;  %1033 = vperm.xlu1 %1872, %v2304_v37  }
 0x1ca   : >> { %1097 = vperm.xlu2 %1868, %v2297_v21   ;;  %v831_v57 = vmul.f32 %v2384_v33, %v2137_v3 }
 0x1cc   : >> { %v883_v11 = vmul.f32 1.442695, %v831_v57 }
 0x1d1   : >> { %1873 = vset.pattern.permute.xlu1 %v2040_v36  ;;  %v772_v36 = vrot.slane %v2331_v44, 1 }
 0x1d2   : >> { %1869 = vset.pattern.permute.xlu2 %v2036_v60  ;;  %1067 = vperm.xlu1 %1873, %v2304_v37   ;;  %v983_v47 = vpop.permute.xlu2 %982  ;;  %v1091_v60 = vperm.slane %v2338_v25, 2 }
 0x1d3   : >> { %v2346_v48 = vmul.f32 %v989_v45, %v983_v47  ;;  %931 = vperm.xlu2 %1869, %v2304_v37   ;;  %v2047_v47 = vmov 8   ;;  %v2394_v58 = vperm.slane %v772_v36, 0 }
 0x1d5   : >> { %v829_v13 = vmul.f32 %v2394_v58, %v2137_v3 }
 0x1d7   : >> { %v879_v24 = vmul.f32 1.442695, %v829_v13 }
 0x1da   : >> { %1874 = vset.pattern.permute.xlu1 %v2042_v39 }
 0x1db   : >> { %1101 = vperm.xlu1 %1874, %v2304_v37   ;;  %1875 = vset.pattern.permute.xlu2 %v2046_v54  ;;  %v1017_v55 = vpop.permute.xlu2 %1016 }
 0x1dc   : >> { %v2356_v34 = vmul.f32 %v1023_v51, %v1017_v55  ;;  %1118 = vperm.xlu2 %1875, %v2286_v31   ;;  %v887_v55 = vmul.f32 1.442695, %v833_v30 }
 0x1de   : >> { %1917 = vpow2.f32 %v887_v55 }
 0x1df   : >> { %1919 = vpow2.f32 %v883_v11 }
 0x1e0   : >> { %1921 = vpow2.f32 %v897_v56 }
 0x1e1   : >> { %1923 = vpow2.f32 %v879_v24 }
 0x1e3   : >> { %1876 = vset.pattern.permute.xlu1 %v2046_v54 }
 0x1e4   : >> { %1122 = vperm.xlu1 %1876, %v2291_v32   ;;  %1131 = vperm.xlu2 %1875, %v2297_v21  }
 0x1e5   : >> { %v1051_v9 = vpop.permute.xlu2 %1050 }
 0x1e6   : >> { %v2372_v12 = vmul.f32 %v1057_v0, %v1051_v9  ;;  %v1914_v9 = vpop.eup %1913 }
 0x1e7   : >> { %v1916_v15 = vpop.eup %1915 }
 0x1ea   : >> { %v949_v50 = vpop.permute.xlu0 %948 }
 0x1eb   : >> { %v912_v29 = vpop.permute.xlu1 %911  ;;  %v956_v62 = vmul.f32 %v955_v46, %v949_v50 }
 0x1ec   : >> { %v920_v39 = vmul.f32 %v919_v19, %v912_v29  ;;  %1135 = vperm.xlu1 %1876, %v2304_v37   ;;  %1877 = vset.pattern.permute.xlu2 %v2047_v47 }
 0x1ed   : >> { %1152 = vperm.xlu2 %1877, %v2286_v31  }
 0x1ee   : >> { %v1085_v6 = vpop.permute.xlu2 %1084  ;;  %v922_v52 = vadd.f32 %v920_v39, %v907_v20  ;;  %v836_v39 = vmul.f32 %v2364_v2, %v2139_v4 }
 0x1ef   : >> { %v1092_v54 = vmul.f32 %v1091_v60, %v1085_v6 }
 0x1f0   : >> { %v945_v63 = vmul.f32 %v1908_v49, %v922_v52  ;;  %v893_v53 = vmul.f32 1.442695, %v836_v39 }
 0x1f2   : >> { %v958_v8 = vadd.f32 %v956_v62, %v945_v63  ;;  %1925 = vpow2.f32 %v893_v53 }
 0x1f3   : >> { %v917_v10 = vpop.permute.xlu1 %916 }
 0x1f4   : >> { %v921_v16 = vmul.f32 %v919_v19, %v917_v10  ;;  %1878 = vset.pattern.permute.xlu1 %v2047_v47  ;;  %v979_v18 = vmul.f32 %v1912_v61, %v958_v8  ;;  %v1918_v19 = vpop.eup %1917 }
 0x1f5   : >> { %1156 = vperm.xlu1 %1878, %v2291_v32   ;;  %1165 = vperm.xlu2 %1877, %v2297_v21   ;;  %v1920_v50 = vpop.eup %1919 }
 0x1f6   : >> { %v2402_v59 = vadd.f32 %v921_v16, %v908_v38  ;;  %v992_v7 = vadd.f32 %v2346_v48, %v979_v18  ;;  %v1922_v55 = vpop.eup %1921  ;;  %v834_v38 = vmul.f32 %v2376_v17, %v2139_v4  ;;  %v832_v17 = vmul.f32 %v2384_v33, %v2139_v4 }
 0x1f7   : >> { %v927_v20 = vpop.permute.xlu2 %926  ;;  %v1924_v62 = vpop.eup %1923  ;;  %v830_v33 = vmul.f32 %v2394_v58, %v2139_v4 }
 0x1f8   : >> { %v2405_v29 = vmul.f32 %v927_v20, %v922_v52  ;;  %v1013_v30 = vmul.f32 %v1916_v15, %v992_v7  ;;  %v946_v36 = vmul.f32 %v1914_v9, %v2402_v59  ;;  %v2048_v52 = vmov 7   ;;  %v1926_v11 = vpop.eup %1925 }
 0x1f9   : >> { %v885_v56 = vmul.f32 1.442695, %v832_v17  ;;  %v2049_v17 = vmov 0  }
 0x1fa   : >> { %v2411_v47 = vadd.f32 %v2356_v34, %v1013_v30  ;;  %1904 = vset.pattern.permute.xlu0 %v2049_v17 }
 0x1fc   : >> { %v953_v49 = vpop.permute.xlu1 %952  ;;  %v1047_v48 = vmul.f32 %v1918_v19, %v2411_v47  ;;  %v881_v19 = vmul.f32 1.442695, %v830_v33 }
 0x1fd   : >> { %v957_v6 = vmul.f32 %v955_v46, %v953_v49  ;;  %1169 = vperm.xlu1 %1878, %v2304_v37   ;;  %1879 = vset.pattern.permute.xlu2 %v2048_v52 }
 0x1fe   : >> { %1186 = vperm.xlu2 %1879, %v2286_v31   ;;  %v2417_v57 = vadd.f32 %v2372_v12, %v1047_v48 }
 0x1ff   : >> { %v959_v2 = vadd.f32 %v957_v6, %v946_v36 }
 0x200   : >> { %v962_v34 = vpop.permute.xlu2 %961  ;;  %v1081_v61 = vmul.f32 %v1920_v50, %v2417_v57 }
 0x201   : >> { %v968_v63 = vmul.f32 %v962_v34, %v958_v8  ;;  %v980_v1 = vmul.f32 %v1922_v55, %v959_v2  ;;  %v889_v8 = vmul.f32 1.442695, %v834_v38  ;;  %v787_v55 = vperm.slane %v2331_v44, 0 }
 0x202   : >> { %v2420_v46 = vadd.f32 %v1092_v54, %v1081_v61 }
 0x203   : >> { %1927 = vpow2.f32 %v889_v8  ;;  %v970_v61 = vsel %vm456_vm0, %v968_v63, 0.0  ;;  %v936_v8 = vsel %vm456_vm0, %v2405_v29, 0.0 }
 0x204   : >> { %v2425_v9 = vmul.f32 %v1924_v62, %v2420_v46  ;;  %1929 = vpow2.f32 %v885_v56 }
 0x205   : >> { %v987_v10 = vpop.permute.xlu1 %986  ;;  %1880 = vset.pattern.permute.xlu1 %v2048_v52  ;;  %1931 = vpow2.f32 %v881_v19 }
 0x206   : >> { %v991_v12 = vmul.f32 %v989_v45, %v987_v10  ;;  %1190 = vperm.xlu1 %1880, %v2291_v32   ;;  %1199 = vperm.xlu2 %1879, %v2297_v21  }
 0x208   : >> { %v993_v13 = vadd.f32 %v991_v12, %v980_v1 }
 0x209   : >> { %v996_v54 = vpop.permute.xlu2 %995  ;;  %v1928_v20 = vpop.eup %1927 }
 0x20a   : >> { %v2431_v15 = vmul.f32 %v996_v54, %v992_v7  ;;  %v1014_v16 = vmul.f32 %v1926_v11, %v993_v13  ;;  %v1930_v39 = vpop.eup %1929 }
 0x20b   : >> { %v1932_v58 = vpop.eup %1931 }
 0x20c   : >> { %v1004_v29 = vsel %vm456_vm0, %v2431_v15, 0.0 }
 0x20e   : >> { %v1021_v18 = vpop.permute.xlu1 %1020  ;;  %1203 = vperm.xlu1 %1880, %v2304_v37   ;;  %1881 = vset.pattern.permute.xlu2 %v2039_v35 }
 0x20f   : >> { %v1025_v45 = vmul.f32 %v1023_v51, %v1021_v18  ;;  %1220 = vperm.xlu2 %1881, %v2286_v31  }
 0x211   : >> { %v2440_v24 = vadd.f32 %v1025_v45, %v1014_v16  ;;  %v1125_v16 = vperm.slane %v2338_v25, 1 }
 0x212   : >> { %v1030_v7 = vpop.permute.xlu2 %1029 }
 0x213   : >> { %v1048_v30 = vmul.f32 %v1928_v20, %v2440_v24  ;;  %v1036_v15 = vmul.f32 %v1030_v7, %v2411_v47 }
 0x216   : >> { %1883 = vset.pattern.permute.xlu1 %v2039_v35 }
 0x217   : >> { %v1055_v36 = vpop.permute.xlu1 %1054  ;;  %1233 = vperm.xlu1 %1883, %v2297_v21   ;;  %1237 = vperm.xlu2 %1881, %v2304_v37  }
 0x218   : >> { %v1059_v51 = vmul.f32 %v1057_v0, %v1055_v36 }
 0x21a   : >> { %v2450_v49 = vadd.f32 %v1059_v51, %v1048_v30  ;;  %v2050_v30 = vmov 3  }
 0x21b   : >> { %v2452_v48 = vpop.permute.xlu2 %1063 }
 0x21c   : >> { %v1082_v50 = vmul.f32 %v1930_v39, %v2450_v49  ;;  %v1070_v7 = vmul.f32 %v2452_v48, %v2417_v57 }
 0x21f   : >> { %1884 = vset.pattern.permute.xlu1 %v2041_v14  ;;  %1885 = vset.pattern.permute.xlu2 %v2041_v14 }
 0x220   : >> { %v1089_v35 = vpop.permute.xlu1 %1088  ;;  %1254 = vperm.xlu1 %1884, %v2286_v31   ;;  %1258 = vperm.xlu2 %1885, %v2291_v32  }
 0x221   : >> { %v1093_v0 = vmul.f32 %v1091_v60, %v1089_v35  ;;  %v827_v60 = vmul.f32 %v787_v55, %v2137_v3 }
 0x223   : >> { %v2461_v6 = vadd.f32 %v1093_v0, %v1082_v50  ;;  %v875_v12 = vmul.f32 1.442695, %v827_v60  ;;  %v1038_v50 = vsel %vm456_vm0, %v1036_v15, 0.0  ;;  %v1072_v60 = vsel %vm456_vm0, %v1070_v7, 0.0 }
 0x224   : >> { %v2463_v52 = vpop.permute.xlu2 %1097 }
 0x225   : >> { %v2466_v53 = vmul.f32 %v1932_v58, %v2461_v6  ;;  %1933 = vpow2.f32 %v875_v12 }
 0x228   : >> { %1271 = vperm.xlu1 %1884, %v2304_v37   ;;  %1887 = vset.pattern.permute.xlu2 %v2043_v40 }
 0x229   : >> { %v966_v14 = vpop.permute.xlu1 %965  ;;  %1288 = vperm.xlu2 %1887, %v2286_v31  }
 0x22a   : >> { %v969_v34 = vmul.f32 %v966_v14, %v959_v2  ;;  %v770_v14 = vrot.slane %v2275_v23, 6 }
 0x22c   : >> { %v971_v62 = vsel %vm456_vm0, %v969_v34, 0.0  ;;  %v2530_v48 = vperm.slane %v770_v14, 0 }
 0x22d   : >> { %v2477_v1 = vadd.f32 %v971_v62, %v970_v61  ;;  %v932_v38 = vpop.permute.xlu2 %931 }
 0x22e   : >> { %v935_v10 = vmul.f32 %v932_v38, %v2402_v59  ;;  %v771_v59 = vrot.slane %v2275_v23, 7 }
 0x230   : >> { %v937_v11 = vsel %vm456_vm0, %v935_v10, 0.0  ;;  %1888 = vset.pattern.permute.xlu1 %v2043_v40  ;;  %v2498_v20 = vperm.slane %v771_v59, 0 }
 0x231   : >> { %v2484_v2 = vadd.f32 %v937_v11, %v936_v8  ;;  %1292 = vperm.xlu1 %1888, %v2291_v32   ;;  %1301 = vperm.xlu2 %1887, %v2297_v21   ;;  %v1104_v8 = vmul.f32 %v2463_v52, %v2420_v46  ;;  %v1193_v46 = vperm.slane %v2284_v28, 7 }
 0x232   : >> { %v1000_v63 = vpop.permute.xlu1 %999  ;;  %v825_v19 = vmul.f32 %v2498_v20, %v2137_v3 }
 0x233   : >> { %v1003_v54 = vmul.f32 %v1000_v63, %v993_v13  ;;  %v1934_v13 = vpop.eup %1933  ;;  %v823_v63 = vmul.f32 %v2530_v48, %v2137_v3 }
 0x234   : >> { %v871_v47 = vmul.f32 1.442695, %v825_v19 }
 0x235   : >> { %v1005_v40 = vsel %vm456_vm0, %v1003_v54, 0.0 }
 0x236   : >> { %v2494_v18 = vadd.f32 %v1005_v40, %v1004_v29  ;;  %v1119_v45 = vpop.permute.xlu2 %1118  ;;  %1935 = vpow2.f32 %v871_v47 }
 0x237   : >> { %v1126_v56 = vmul.f32 %v1125_v16, %v1119_v45  ;;  %v867_v45 = vmul.f32 1.442695, %v823_v63 }
 0x239   : >> { %1890 = vset.pattern.permute.xlu1 %v2050_v30  ;;  %1891 = vset.pattern.permute.xlu2 %v2050_v30  ;;  %v2503_v33 = vadd.f32 %v1126_v56, %v2425_v9 }
 0x23a   : >> { %1322 = vperm.xlu1 %1890, %v2286_v31   ;;  %1326 = vperm.xlu2 %1891, %v2291_v32  }
 0x23b   : >> { %v1034_v36 = vpop.permute.xlu1 %1033  ;;  %v1149_v51 = vmul.f32 %v1934_v13, %v2503_v33 }
 0x23c   : >> { %v1037_v39 = vmul.f32 %v1034_v36, %v2440_v24  ;;  %v1159_v24 = vperm.slane %v2338_v25, 0  ;;  %v1936_v10 = vpop.eup %1935  ;;  %v768_v25 = vrot.slane %v2275_v23, 4 }
 0x23e   : >> { %v1039_v35 = vsel %vm456_vm0, %v1037_v39, 0.0  ;;  %v1132_v9 = vpop.permute.xlu2 %1131 }
 0x23f   : >> { %v2514_v0 = vadd.f32 %v1039_v35, %v1038_v50  ;;  %v1138_v47 = vmul.f32 %v1132_v9, %v2503_v33  ;;  %v1227_v9 = vperm.slane %v2284_v28, 6 }
 0x242   : >> { %1335 = vperm.xlu1 %1890, %v2297_v21   ;;  %1892 = vset.pattern.permute.xlu2 %v2044_v41 }
 0x243   : >> { %1356 = vperm.xlu2 %1892, %v2286_v31  }
 0x244   : >> { %v1068_v58 = vpop.permute.xlu1 %1067 }
 0x245   : >> { %v1071_v34 = vmul.f32 %v1068_v58, %v2450_v49  ;;  %v828_v49 = vmul.f32 %v787_v55, %v2139_v4  ;;  %v1106_v55 = vsel %vm456_vm0, %v1104_v8, 0.0 }
 0x247   : >> { %v1073_v61 = vsel %vm456_vm0, %v1071_v34, 0.0  ;;  %v1153_v62 = vpop.permute.xlu2 %1152  ;;  %v877_v29 = vmul.f32 1.442695, %v828_v49 }
 0x248   : >> { %v2526_v38 = vadd.f32 %v1073_v61, %v1072_v60  ;;  %v1160_v57 = vmul.f32 %v1159_v24, %v1153_v62  ;;  %v1140_v60 = vsel %vm456_vm0, %v1138_v47, 0.0 }
 0x249   : >> { %1937 = vpow2.f32 %v877_v29 }
 0x24a   : >> { %1894 = vset.pattern.permute.xlu1 %v2045_v42  ;;  %v2533_v12 = vadd.f32 %v1160_v57, %v1149_v51  ;;  %1939 = vpow2.f32 %v867_v45 }
 0x24b   : >> { %1390 = vperm.xlu1 %1894, %v2286_v31   ;;  %1895 = vset.pattern.permute.xlu2 %v2045_v42 }
 0x24c   : >> { %1394 = vperm.xlu2 %1895, %v2291_v32   ;;  %v1183_v11 = vmul.f32 %v1936_v10, %v2533_v12 }
 0x24d   : >> { %v1102_v54 = vpop.permute.xlu1 %1101 }
 0x24e   : >> { %v1105_v59 = vmul.f32 %v1102_v54, %v2461_v6  ;;  %v769_v6 = vrot.slane %v2275_v23, 5 }
 0x24f   : >> { %v2547_v44 = vpop.permute.xlu2 %1165  ;;  %v1938_v15 = vpop.eup %1937 }
 0x250   : >> { %v1107_v40 = vsel %vm456_vm0, %v1105_v59, 0.0  ;;  %v784_v19 = vperm.slane %v769_v6, 0  ;;  %v1940_v39 = vpop.eup %1939  ;;  %v1172_v45 = vmul.f32 %v2547_v44, %v2533_v12 }
 0x251   : >> { %v2551_v56 = vadd.f32 %v1107_v40, %v1106_v55  ;;  %v1007_v55 = vrot.slane %v2494_v18, 4  ;;  %v1041_v40 = vrot.slane %v2514_v0, 4 }
 0x252   : >> { %v821_v7 = vmul.f32 %v784_v19, %v2137_v3 }
 0x253   : >> { %1896 = vset.pattern.permute.xlu1 %v2049_v17  ;;  %v1109_v63 = vrot.slane %v2551_v56, 4 }
 0x254   : >> { %1424 = vperm.xlu1 %1896, %v2286_v31   ;;  %1897 = vset.pattern.permute.xlu2 %v2049_v17 }
 0x255   : >> { %1428 = vperm.xlu2 %1897, %v2291_v32   ;;  %v826_v32 = vmul.f32 %v2498_v20, %v2139_v4 }
 0x256   : >> { %v1123_v52 = vpop.permute.xlu1 %1122 }
 0x257   : >> { %v1127_v13 = vmul.f32 %v1125_v16, %v1123_v52  ;;  %v873_v14 = vmul.f32 1.442695, %v826_v32  ;;  %v1110_v52 = vadd.f32 %v1109_v63, %v2551_v56  ;;  %v1174_v56 = vsel %vm456_vm0, %v1172_v45, 0.0 }
 0x258   : >> { %v1187_v36 = vpop.permute.xlu2 %1186 }
 0x259   : >> { %v1194_v51 = vmul.f32 %v1193_v46, %v1187_v36  ;;  %v1129_v31 = vadd.f32 %v1127_v13, %v2466_v53  ;;  %1941 = vpow2.f32 %v873_v14 }
 0x25b   : >> { %v1196_v50 = vadd.f32 %v1194_v51, %v1183_v11  ;;  %v1150_v35 = vmul.f32 %v1938_v15, %v1129_v31 }
 0x25c   : >> { %1899 = vset.pattern.permute.xlu1 %v2045_v42  ;;  %v863_v42 = vmul.f32 1.442695, %v821_v7 }
 0x25d   : >> { %1407 = vperm.xlu1 %1899, %v2304_v37   ;;  %1437 = vperm.xlu2 %1897, %v2297_v21   ;;  %v1217_v16 = vmul.f32 %v1940_v39, %v1196_v50  ;;  %v822_v39 = vmul.f32 %v784_v19, %v2139_v4 }
 0x25e   : >> { %v1136_v58 = vpop.permute.xlu1 %1135  ;;  %1943 = vpow2.f32 %v863_v42 }
 0x25f   : >> { %v1139_v53 = vmul.f32 %v1136_v58, %v1129_v31  ;;  %v1942_v10 = vpop.eup %1941  ;;  %v2603_v31 = vperm.slane %v768_v25, 0  ;;  %v865_v7 = vmul.f32 1.442695, %v822_v39 }
 0x260   : >> { %v1200_v34 = vpop.permute.xlu2 %1199 }
 0x261   : >> { %v1141_v61 = vsel %vm456_vm0, %v1139_v53, 0.0  ;;  %v2573_v20 = vmul.f32 %v1200_v34, %v1196_v50  ;;  %v1008_v50 = vadd.f32 %v1007_v55, %v2494_v18  ;;  %v1261_v55 = vperm.slane %v2284_v28, 5 }
 0x262   : >> { %v1142_v62 = vadd.f32 %v1141_v61, %v1140_v60 }
 0x263   : >> { %v1009_v18 = vrot.slane %v1008_v50, 2 }
 0x264   : >> { %v1143_v54 = vrot.slane %v1142_v62, 4 }
 0x265   : >> { %1900 = vset.pattern.permute.xlu1 %v2049_v17  ;;  %1901 = vset.pattern.permute.xlu2 %v2044_v41  ;;  %v1944_v17 = vpop.eup %1943  ;;  %v1075_v41 = vrot.slane %v2526_v38, 4 }
 0x266   : >> { %1441 = vperm.xlu1 %1900, %v2304_v37   ;;  %1369 = vperm.xlu2 %1901, %v2297_v21   ;;  %v824_v21 = vmul.f32 %v2530_v48, %v2139_v4  ;;  %v1144_v13 = vadd.f32 %v1143_v54, %v1142_v62 }
 0x267   : >> { %v1157_v33 = vpop.permute.xlu1 %1156  ;;  %v1076_v48 = vadd.f32 %v1075_v41, %v2526_v38  ;;  %v1042_v38 = vadd.f32 %v1041_v40, %v2514_v0 }
 0x268   : >> { %v1161_v57 = vmul.f32 %v1159_v24, %v1157_v33  ;;  %v973_v24 = vrot.slane %v2477_v1, 4  ;;  %v869_v51 = vmul.f32 1.442695, %v824_v21  ;;  %v1145_v32 = vrot.slane %v1144_v13, 2 }
 0x269   : >> { %v1221_v49 = vpop.permute.xlu2 %1220  ;;  %v1043_v14 = vrot.slane %v1042_v38, 2 }
 0x26a   : >> { %v1228_v8 = vmul.f32 %v1227_v9, %v1221_v49  ;;  %v1163_v11 = vadd.f32 %v1161_v57, %v1150_v35  ;;  %v974_v12 = vadd.f32 %v973_v24, %v2477_v1  ;;  %v1077_v35 = vrot.slane %v1076_v48, 2 }
 0x26b   : >> { %1945 = vpow2.f32 %v869_v51  ;;  %v820_v1 = vmul.f32 %v2603_v31, %v2139_v4  ;;  %v1146_v0 = vadd.f32 %v1145_v32, %v1144_v13  ;;  %v1044_v41 = vadd.f32 %v1043_v14, %v1042_v38 }
 0x26c   : >> { %v1184_v59 = vmul.f32 %v1942_v10, %v1163_v11  ;;  %v2588_v29 = vadd.f32 %v1228_v8, %v1217_v16  ;;  %v1111_v16 = vrot.slane %v1110_v52, 2  ;;  %v975_v19 = vrot.slane %v974_v12, 2  ;;  %v1225_v8 = vpop.permute.xlu0 %1224 }
 0x26d   : >> { %v1078_v60 = vadd.f32 %v1077_v35, %v1076_v48  ;;  %1947 = vpow2.f32 %v865_v7  ;;  %v861_v62 = vmul.f32 1.442695, %v820_v1  ;;  %v1147_v63 = vrot.slane %v1146_v0, 1 }
 0x26e   : >> { %1903 = vset.pattern.permute.xlu1 %v2050_v30  ;;  %v2598_v6 = vmul.f32 %v1944_v17, %v2588_v29  ;;  %v939_v30 = vrot.slane %v2484_v2, 4  ;;  %v1112_v61 = vadd.f32 %v1111_v16, %v1110_v52  ;;  %v976_v33 = vadd.f32 %v975_v19, %v974_v12 }
 0x26f   : >> { %1339 = vperm.xlu1 %1903, %v2304_v37   ;;  %v1170_v15 = vpop.permute.xlu1 %1169  ;;  %v1010_v17 = vadd.f32 %v1009_v18, %v1008_v50  ;;  %v1079_v25 = vrot.slane %v1078_v60, 1  ;;  %1949 = vpow2.f32 %v861_v62  ;;  %v1229_v40 = vmul.f32 %v1227_v9, %v1225_v8 }
 0x270   : >> { %v1173_v36 = vmul.f32 %v1170_v15, %v1163_v11  ;;  %v940_v53 = vadd.f32 %v939_v30, %v2484_v2  ;;  %v1113_v24 = vrot.slane %v1112_v61, 1  ;;  %v977_v45 = vrot.slane %v976_v33, 1 }
 0x271   : >> { %v1238_v44 = vpop.permute.xlu2 %1237  ;;  %v1946_v49 = vpop.eup %1945  ;;  %v1011_v15 = vrot.slane %v1010_v17, 1  ;;  %v1148_v51 = vadd.f32 %v1147_v63, %v1146_v0  ;;  %v1080_v12 = vadd.f32 %v1079_v25, %v1078_v60  ;;  %v767_v1 = vrot.slane %v2275_v23, 3 }
 0x272   : >> { %v1175_v37 = vsel %vm456_vm0, %v1173_v36, 0.0  ;;  %v941_v11 = vrot.slane %v940_v53, 2  ;;  %v1045_v36 = vrot.slane %v1044_v41, 1  ;;  %v1114_v30 = vadd.f32 %v1113_v24, %v1112_v61 }
 0x273   : >> { %v1176_v47 = vadd.f32 %v1175_v37, %v1174_v56  ;;  %v1948_v52 = vpop.eup %1947  ;;  %v1208_v19 = vsel %vm456_vm0, %v2573_v20, 0.0  ;;  %v978_v61 = vadd.f32 %v977_v45, %v976_v33  ;;  %v819_v20 = vmul.f32 %v2603_v31, %v2137_v3 }
 0x274   : >> { %v942_v13 = vadd.f32 %v941_v11, %v940_v53  ;;  %v1046_v16 = vadd.f32 %v1045_v36, %v1044_v41  ;;  %v1479_v62 = vmul.f32 %v1734_v43, %v1476_v26  ;;  %v766_v24 = vrot.slane %v2275_v23, 2 }
 0x275   : >> { %v1177_v58 = vrot.slane %v1176_v47, 4  ;;  %v1950_v32 = vpop.eup %1949 }
 0x277   : >> { %v1178_v34 = vadd.f32 %v1177_v58, %v1176_v47  ;;  %v943_v47 = vrot.slane %v942_v13, 1 }
 0x278   : >> { %v1191_v42 = vpop.permute.xlu1 %1190 }
 0x279   : >> { %v1179_v57 = vrot.slane %v1178_v34, 2  ;;  %v1195_v10 = vmul.f32 %v1193_v46, %v1191_v42  ;;  %v782_v42 = vperm.slane %v767_v1, 0 }
 0x27a   : >> { %v1259_v2 = vpop.permute.xlu2 %1258 }
 0x27b   : >> { %v1180_v54 = vadd.f32 %v1179_v57, %v1178_v34  ;;  %v1197_v21 = vadd.f32 %v1195_v10, %v1184_v59  ;;  %v1263_v50 = vmul.f32 %v1261_v55, %v1259_v2  ;;  %v944_v57 = vadd.f32 %v943_v47, %v942_v13 }
 0x27c   : >> { %v817_v31 = vmul.f32 %v782_v42, %v2137_v3 }
 0x27d   : >> { %v1181_v48 = vrot.slane %v1180_v54, 1  ;;  %v1218_v46 = vmul.f32 %v1946_v49, %v1197_v21 }
 0x27f   : >> { %v1182_v39 = vadd.f32 %v1181_v48, %v1180_v54  ;;  %v1231_v59 = vadd.f32 %v1229_v40, %v1218_v46  ;;  %v855_v54 = vmul.f32 1.442695, %v817_v31  ;;  %v1268_v48 = vpop.permute.xlu0 %1267 }
 0x280   : >> { %v1204_v38 = vpop.permute.xlu1 %1203 }
 0x281   : >> { %v1468_v9 = vsel %vm1455_vm5, %v1182_v39, %v1148_v51  ;;  %v1207_v56 = vmul.f32 %v1204_v38, %v1197_v21  ;;  %v1241_v37 = vmul.f32 %v1238_v44, %v1231_v59  ;;  %v1252_v35 = vmul.f32 %v1948_v52, %v1231_v59  ;;  %v2661_v52 = vld [vmem:[%s2272_s7] sm:$0xff] }
 0x282   : >> { %v1469_v7 = vsel %vm1457_vm6, %v1468_v9, %v1114_v30  ;;  %v1012_v44 = vadd.f32 %v1011_v15, %v1010_v17  ;;  %v859_v17 = vmul.f32 1.442695, %v819_v20  ;;  %v1295_v21 = vperm.slane %v2284_v28, 4 }
 0x283   : >> { %v1209_v58 = vsel %vm456_vm0, %v1207_v56, 0.0  ;;  %v1289_v53 = vpop.permute.xlu2 %1288  ;;  %v1265_v18 = vadd.f32 %v1263_v50, %v1252_v35  ;;  %v1470_v14 = vsel %vm1459_vm7, %v1469_v7, %v1080_v12  ;;  %v1243_v26 = vsel %vm456_vm0, %v1241_v37, 0.0 }
 0x284   : >> { %v2629_v0 = vadd.f32 %v1209_v58, %v1208_v19  ;;  %v1471_v60 = vsel %vm505_vm1, %v1470_v14, %v1046_v16  ;;  %1951 = vpow2.f32 %v859_v17  ;;  %v765_v13 = vrot.slane %v2661_v52, 1 }
 0x285   : >> { %v2631_v34 = vmul.f32 %v1950_v32, %v1265_v18  ;;  %v1472_v10 = vsel %vm1462_vm8, %v1471_v60, %v1012_v44  ;;  %1953 = vpow2.f32 %v855_v54  ;;  %v1296_v15 = vmul.f32 %v1295_v21, %v1289_v53 }
 0x286   : >> { %v1473_v49 = vsel %vm1464_vm9, %v1472_v10, %v978_v61  ;;  %v818_v51 = vmul.f32 %v782_v42, %v2139_v4  ;;  %v781_v39 = vperm.slane %v766_v24, 0  ;;  %v780_v50 = vperm.slane %v765_v13, 0 }
 0x287   : >> { %v1474_v11 = vsel %vm1466_vm10, %v1473_v49, %v944_v57  ;;  %v1306_v16 = vpop.permute.xlu0 %1305  ;;  %v779_v19 = vperm.slane %v2661_v52, 0  ;;  %v1329_v44 = vperm.slane %v2284_v28, 3  ;;  %v1363_v10 = vperm.slane %v2284_v28, 2 }
 0x288   : >> { %v1481_v2 = vadd.f32 %v1479_v62, %v1474_v11  ;;  %v857_v38 = vmul.f32 1.442695, %v818_v51  ;;  %v816_v56 = vmul.f32 %v781_v39, %v2139_v4  ;;  %v814_v47 = vmul.f32 %v780_v50, %v2139_v4 }
 0x289   : >> { %v1234_v8 = vpop.permute.xlu1 %1233  ;;  %v815_v7 = vmul.f32 %v781_v39, %v2137_v3  ;;  %v812_v14 = vmul.f32 %v779_v19, %v2139_v4  ;;  %v813_v61 = vmul.f32 %v780_v50, %v2137_v3  ;;  %v1431_v13 = vperm.slane %v2284_v28, 0 }
 0x28a   : >> { %v1240_v33 = vmul.f32 %v1234_v8, %v2588_v29  ;;  %v1483_v63 = vpack.c.bf16 %v1481_v2, %v1481_v2  ;;  %v1952_v40 = vpop.eup %1951  ;;  %1955 = vpow2.f32 %v857_v38  ;;  %v853_v1 = vmul.f32 1.442695, %v816_v56 }
 0x28b   : >> { %v1302_v41 = vpop.permute.xlu2 %1301  ;;  %v1954_v59 = vpop.eup %1953  ;;  %v849_v58 = vmul.f32 1.442695, %v814_v47  ;;  %v845_v49 = vmul.f32 1.442695, %v812_v14  ;;  %v847_v17 = vmul.f32 1.442695, %v813_v61 }
 0x28c   : >> { %v1242_v22 = vsel %vm456_vm0, %v1240_v33, 0.0  ;;  %1488 = vst.msk [vmem:[%s2647_s9 + $0x4] sm:$0xf] %vm1486_vm11, %v1483_v63  ;;  %1957 = vpow2.f32 %v853_v1 }
 0x28d   : >> { %v2651_v43 = vadd.f32 %v1243_v26, %v1242_v22  ;;  %1959 = vpow2.f32 %v849_v58 }
 0x28f   : >> { %v1361_v2 = vpop.permute.xlu0 %1360 }
 0x290   : >> { %v1956_v20 = vpop.eup %1955  ;;  %v1365_v54 = vmul.f32 %v1363_v10, %v1361_v2 }
 0x292   : >> { %v1255_v29 = vpop.permute.xlu1 %1254  ;;  %v1958_v31 = vpop.eup %1957 }
 0x293   : >> { %v1262_v25 = vmul.f32 %v1261_v55, %v1255_v29  ;;  %v1397_v29 = vperm.slane %v2284_v28, 1 }
 0x294   : >> { %v1327_v45 = vpop.permute.xlu2 %1326 }
 0x295   : >> { %v1264_v46 = vadd.f32 %v1262_v25, %v2598_v6  ;;  %v1331_v8 = vmul.f32 %v1329_v44, %v1327_v45 }
 0x297   : >> { %v1285_v36 = vmul.f32 %v1952_v40, %v1264_v46  ;;  %v1274_v30 = vmul.f32 %v1268_v48, %v1264_v46  ;;  %v1404_v50 = vpop.permute.xlu0 %1403 }
 0x299   : >> { %v1298_v12 = vadd.f32 %v1296_v15, %v1285_v36  ;;  %v1276_v6 = vsel %vm456_vm0, %v1274_v30, 0.0 }
 0x29a   : >> { %v1272_v55 = vpop.permute.xlu1 %1271 }
 0x29b   : >> { %v1275_v23 = vmul.f32 %v1272_v55, %v1265_v18  ;;  %v1319_v9 = vmul.f32 %v1954_v59, %v1298_v12  ;;  %v851_v18 = vmul.f32 1.442695, %v815_v7  ;;  %v1308_v62 = vmul.f32 %v1302_v41, %v1298_v12  ;;  %v1960_v41 = vpop.eup %1959 }
 0x29c   : >> { %v811_v59 = vmul.f32 %v779_v19, %v2137_v3 }
 0x29d   : >> { %v1277_v37 = vsel %vm456_vm0, %v1275_v23, 0.0  ;;  %v1357_v35 = vpop.permute.xlu2 %1356  ;;  %1961 = vpow2.f32 %v851_v18  ;;  %v1310_v22 = vsel %vm456_vm0, %v1308_v62, 0.0 }
 0x29e   : >> { %v2668_v32 = vadd.f32 %v1277_v37, %v1276_v6  ;;  %1963 = vpow2.f32 %v845_v49  ;;  %v1364_v51 = vmul.f32 %v1363_v10, %v1357_v35  ;;  %v843_v37 = vmul.f32 1.442695, %v811_v59 }
 0x29f   : >> { %1965 = vpow2.f32 %v847_v17 }
 0x2a0   : >> { %1967 = vpow2.f32 %v843_v37 }
 0x2a3   : >> { %v1293_v53 = vpop.permute.xlu1 %1292  ;;  %v1962_v24 = vpop.eup %1961 }
 0x2a4   : >> { %v1297_v60 = vmul.f32 %v1295_v21, %v1293_v53  ;;  %v1964_v36 = vpop.eup %1963 }
 0x2a5   : >> { %v1966_v12 = vpop.eup %1965 }
 0x2a6   : >> { %v1299_v42 = vadd.f32 %v1297_v60, %v2631_v34  ;;  %v1395_v57 = vpop.permute.xlu2 %1394  ;;  %v1968_v35 = vpop.eup %1967 }
 0x2a7   : >> { %v1399_v52 = vmul.f32 %v1397_v29, %v1395_v57 }
 0x2a8   : >> { %v1309_v11 = vmul.f32 %v1306_v16, %v1299_v42  ;;  %v1320_v33 = vmul.f32 %v1956_v20, %v1299_v42  ;;  %v1374_v16 = vpop.permute.xlu0 %1373 }
 0x2aa   : >> { %v1311_v26 = vsel %vm456_vm0, %v1309_v11, 0.0  ;;  %v2680_v63 = vadd.f32 %v1331_v8, %v1320_v33 }
 0x2ab   : >> { %v2682_v34 = vadd.f32 %v1311_v26, %v1310_v22 }
 0x2ac   : >> { %v1323_v21 = vpop.permute.xlu1 %1322  ;;  %v1354_v25 = vmul.f32 %v1958_v31, %v2680_v63 }
 0x2ad   : >> { %v1330_v40 = vmul.f32 %v1329_v44, %v1323_v21 }
 0x2ae   : >> { %v1367_v45 = vadd.f32 %v1365_v54, %v1354_v25 }
 0x2af   : >> { %v1429_v48 = vpop.permute.xlu2 %1428  ;;  %v1332_v46 = vadd.f32 %v1330_v40, %v1319_v9  ;;  %v1313_v40 = vrot.slane %v2682_v34, 4 }
 0x2b0   : >> { %v1388_v15 = vmul.f32 %v1960_v41, %v1367_v45  ;;  %v1433_v23 = vmul.f32 %v1431_v13, %v1429_v48  ;;  %v1377_v58 = vmul.f32 %v1374_v16, %v1367_v45  ;;  %v1245_v48 = vrot.slane %v2651_v43, 4 }
 0x2b1   : >> { %v1353_v39 = vmul.f32 %v1962_v24, %v1332_v46 }
 0x2b2   : >> { %v1401_v30 = vadd.f32 %v1399_v52, %v1388_v15  ;;  %v1379_v60 = vsel %vm456_vm0, %v1377_v58, 0.0  ;;  %v1279_v52 = vrot.slane %v2668_v32, 4 }
 0x2b3   : >> { %v1366_v55 = vadd.f32 %v1364_v51, %v1353_v39  ;;  %v1211_v51 = vrot.slane %v2629_v0, 4 }
 0x2b4   : >> { %v1336_v38 = vpop.permute.xlu1 %1335  ;;  %v1422_v56 = vmul.f32 %v1964_v36, %v1401_v30 }
 0x2b5   : >> { %v1387_v6 = vmul.f32 %v1966_v12, %v1366_v55  ;;  %v1314_v12 = vadd.f32 %v1313_v40, %v2682_v34 }
 0x2b6   : >> { %v2688_v7 = vadd.f32 %v1433_v23, %v1422_v56   ;;  %v1280_v23 = vadd.f32 %v1279_v52, %v2668_v32 }
 0x2b7   : >> { %v1438_v47 = vpop.permute.xlu2 %1437  ;;  %v1315_v16 = vrot.slane %v1314_v12, 2 }
 0x2b8   : >> { %v2756_v9 = vmov %v2688_v7  ;;  %v1281_v34 = vrot.slane %v1280_v23, 2 }
 0x2b9   : > { %1490 = vst.msk [vmem:[#allocation2 + $0x8] sm:$0xff] (%p707_p8), %vm456_vm0, %v2756_v9 }
 0x2bd   : >> { %v1391_v28 = vpop.permute.xlu1 %1390 }
 0x2be   : >> { %v1398_v1 = vmul.f32 %v1397_v29, %v1391_v28 }
 0x2c0   : >> { %v1400_v53 = vadd.f32 %v1398_v1, %v1387_v6  ;;  %v1370_v19 = vpop.permute.xlu2 %1369 }
 0x2c1   : >> { %v1376_v18 = vmul.f32 %v1370_v19, %v1366_v55 }
 0x2c2   : >> { %v1421_v14 = vmul.f32 %v1968_v35, %v1400_v53  ;;  %v1410_v7 = vmul.f32 %v1404_v50, %v1400_v53  ;;  %v1246_v50 = vadd.f32 %v1245_v48, %v2651_v43 }
 0x2c3   : >> { %v1378_v44 = vsel %vm456_vm0, %v1376_v18, 0.0  ;;  %v1316_v18 = vadd.f32 %v1315_v16, %v1314_v12 }
 0x2c4   : >> { %v1380_v61 = vadd.f32 %v1379_v60, %v1378_v44  ;;  %v1412_v49 = vsel %vm456_vm0, %v1410_v7, 0.0  ;;  %v1247_v58 = vrot.slane %v1246_v50, 2  ;;  %v1282_v44 = vadd.f32 %v1281_v34, %v1280_v23 }
 0x2c5   : >> { %v1317_v7 = vrot.slane %v1316_v18, 1 }
 0x2c6   : >> { %v1425_v20 = vpop.permute.xlu1 %1424  ;;  %v1381_v33 = vrot.slane %v1380_v61, 4 }
 0x2c7   : >> { %v1432_v42 = vmul.f32 %v1431_v13, %v1425_v20  ;;  %v1342_v13 = vmul.f32 %v1336_v38, %v1332_v46  ;;  %v1212_v38 = vadd.f32 %v1211_v51, %v2629_v0  ;;  %v1248_v0 = vadd.f32 %v1247_v58, %v1246_v50 }
 0x2c8   : >> { %v1382_v26 = vadd.f32 %v1381_v33, %v1380_v61  ;;  %v1318_v33 = vadd.f32 %v1317_v7, %v1316_v18  ;;  %v2758_v7 = vmov %v2756_v9 }
 0x2c9   : >> { %v2692_v6 = vadd.f32 %v1432_v42, %v1421_v14   ;;  %v1344_v56 = vsel %vm456_vm0, %v1342_v13, 0.0  ;;  %v1213_v43 = vrot.slane %v1212_v38, 2 }
 0x2ca   : >> { %v1383_v24 = vrot.slane %v1382_v26, 2 }
 0x2cb   : >> { %v2757_v62 = vmov %v2692_v6  ;;  %v1214_v20 = vadd.f32 %v1213_v43, %v1212_v38 }
 0x2cc   : >> { %v1444_v31 = vmul.f32 %v1438_v47, %v2757_v62  ;;  %v1384_v39 = vadd.f32 %v1383_v24, %v1382_v26  ;;  %1489 = vst.msk [vmem:[#allocation2] sm:$0xff] (%p707_p8), %vm456_vm0, %v2757_v62 }
 0x2ce   : >> { %v1446_v54 = vsel %vm456_vm0, %v1444_v31, 0.0  ;;  %v1385_v47 = vrot.slane %v1384_v39, 1 }
 0x2cf   : >> { %v1408_v57 = vpop.permute.xlu1 %1407 }
 0x2d0   : >> { %v1411_v10 = vmul.f32 %v1408_v57, %v1401_v30  ;;  %v1386_v19 = vadd.f32 %v1385_v47, %v1384_v39  ;;  %v1283_v57 = vrot.slane %v1282_v44, 1 }
 0x2d2   : >> { %v1413_v8 = vsel %vm456_vm0, %v1411_v10, 0.0 }
 0x2d3   : >> { %v1414_v11 = vadd.f32 %v1413_v8, %v1412_v49  ;;  %v1249_v49 = vrot.slane %v1248_v0, 1  ;;  %v1215_v8 = vrot.slane %v1214_v20, 1 }
 0x2d5   : >> { %v1415_v17 = vrot.slane %v1414_v11, 4  ;;  %v1216_v26 = vadd.f32 %v1215_v8, %v1214_v20 }
 0x2d7   : >> { %v1416_v2 = vadd.f32 %v1415_v17, %v1414_v11  ;;  %v1284_v17 = vadd.f32 %v1283_v57, %v1282_v44 }
 0x2d8   : >> { %v1442_v22 = vpop.permute.xlu1 %1441 }
 0x2d9   : >> { %v1445_v41 = vmul.f32 %v1442_v22, %v2756_v9  ;;  %v1417_v21 = vrot.slane %v1416_v2, 2 }
 0x2db   : >> { %v1447_v29 = vsel %vm456_vm0, %v1445_v41, 0.0  ;;  %v1418_v15 = vadd.f32 %v1417_v21, %v1416_v2  ;;  %v1250_v2 = vadd.f32 %v1249_v49, %v1248_v0 }
 0x2dc   : >> { %v1448_v25 = vadd.f32 %v1447_v29, %v1446_v54 }
 0x2dd   : >> { %v1419_v6 = vrot.slane %v1418_v15, 1 }
 0x2de   : >> { %v1449_v45 = vrot.slane %v1448_v25, 4 }
 0x2e0   : >> { %v1450_v36 = vadd.f32 %v1449_v45, %v1448_v25 }
 0x2e1   : >> { %v1340_v59 = vpop.permute.xlu1 %1339 }
 0x2e2   : >> { %v1451_v30 = vrot.slane %v1450_v36, 2  ;;  %v1343_v55 = vmul.f32 %v1340_v59, %v2680_v63  ;;  %v1420_v63 = vadd.f32 %v1419_v6, %v1418_v15  ;;  %v2759_v6 = vmov %v2757_v62 }
 0x2e4   : >> { %v1452_v37 = vadd.f32 %v1451_v30, %v1450_v36  ;;  %v1345_v46 = vsel %vm456_vm0, %v1343_v55, 0.0 }
 0x2e5   : >> { %v1346_v28 = vadd.f32 %v1345_v46, %v1344_v56 }
 0x2e6   : >> { %v1453_v1 = vrot.slane %v1452_v37, 1 }
 0x2e7   : >> { %v1347_v35 = vrot.slane %v1346_v28, 4 }
 0x2e8   : >> { %v1454_v53 = vadd.f32 %v1453_v1, %v1452_v37 }
 0x2e9   : >> { %v1348_v32 = vadd.f32 %v1347_v35, %v1346_v28 }
 0x2ea   : >> { %v1456_v14 = vsel %vm1455_vm5, %v1454_v53, %v1420_v63 }
 0x2eb   : >> { %v1349_v60 = vrot.slane %v1348_v32, 2  ;;  %v1458_v61 = vsel %vm1457_vm6, %v1456_v14, %v1386_v19 }
 0x2ed   : >> { %v1350_v42 = vadd.f32 %v1349_v60, %v1348_v32 }
 0x2ef   : >> { %v1351_v10 = vrot.slane %v1350_v42, 1 }
 0x2f1   : >> { %v1352_v11 = vadd.f32 %v1351_v10, %v1350_v42 }
 0x2f3   : >> { %v1460_v31 = vsel %vm1459_vm7, %v1458_v61, %v1352_v11 }
 0x2f4   : >> { %v1461_v22 = vsel %vm505_vm1, %v1460_v31, %v1318_v33 }
 0x2f5   : >> { %v1463_v41 = vsel %vm1462_vm8, %v1461_v22, %v1284_v17 }
 0x2f6   : >> { %v1465_v54 = vsel %vm1464_vm9, %v1463_v41, %v1250_v2 }
 0x2f7   : >> { %v1467_v29 = vsel %vm1466_vm10, %v1465_v54, %v1216_v26 }
 0x2f8   : >> { %v1480_v21 = vadd.f32 %v2281_v27, %v1467_v29  ;;  %709 = sbr.rel (!%p707_p8) target bundleno = 207 (0xcf), region = 104 }
 0x2fa   : >> { %v1482_v25 = vpack.c.bf16 %v1480_v21, %v1480_v21 }
 0x2fc   : >> { %1487 = vst.msk [vmem:[%s2647_s9] sm:$0xf] %vm1486_vm11, %v1482_v25 }
 0x2fd PF: > { %s16_s25 = sadd.s32 1, %s2020_s25   ;;  %s2760_s21 = smov %s2012_s23 }
 0x2fe   : > { %p13_p9 = scmp.ge.s32.totalorder %s16_s25, 6   ;;  %s2761_s22 = smov %s2016_s24 }
 0x2ff   : > { %s2762_s23 = smov %s2765_s26  ;;  %s2763_s24 = smov %s2769_s27 }
 0x300   :  { %15 = sbr.rel (!%p13_p9) target bundleno = 3 (0x3), region = 115 }

// kernel: vss_block_forward.7
= control target key start
LH: loop header
LB: loop body
LE: loop exit
PB: predicated region body
PF: predicated region fallthrough
CT: control target
= control target key end

     0   :  { %s2033_s21 = smov 0   ;;  %s2035_s22 = smov 0   ;;  %s2650_s0 = inlined_call_operand.vmem [shape: bf16[2,2,64,8], index: 0, kind: input, shape index: {}]   ;;  %s2651_s1 = inlined_call_operand.vmem [shape: bf16[4,8,8], index: 1, kind: input, shape index: {}]   ;;  %s2652_s2 = inlined_call_operand.vmem [shape: bf16[4,8,32], index: 2, kind: input, shape index: {}]   ;;  %s2653_s3 = inlined_call_operand.vmem [shape: f32[4,1,8], index: 3, kind: input, shape index: {}]   ;;  %s2654_s4 = inlined_call_operand.vmem [shape: f32[4,16,8], index: 4, kind: input, shape index: {}]   ;;  %s2655_s5 = inlined_call_operand.vmem [shape: f32[4,1,8], index: 5, kind: input, shape index: {}]   ;;  %s2656_s6 = inlined_call_operand.vmem [shape: bf16[2,2,64,8], index: 6, kind: output, shape index: {}]  }
   0x1   :  { %s2037_s23 = smov 0   ;;  %s2039_s24 = smov 0  }
   0x2   :  { %s2041_s25 = smov 0  }
   0x3 LB: > { %s31_s26 = sadd.s32 1, %s1959_s23  ;;  %s35_s27 = sadd.s32 1, %s1963_s24  ;;  %s1967_s25 = sphi %s2041_s25, %s16_s25   ;;  %s1963_s24 = sphi %s2039_s24, %s2663_s24   ;;  %s1959_s23 = sphi %s2037_s23, %s2662_s23   ;;  %s1955_s22 = sphi %s2035_s22, %s2661_s22   ;;  %s1951_s21 = sphi %s2033_s21, %s2660_s21  }
   0x4   : > { %p33_p0 = scmp.ge.s32.totalorder %s31_s26, 2  ;;  %p1635_p1 = scmp.ge.s32.totalorder %s1967_s25, 1 }
   0x5   : > { %p292_p2 = scmp.lt.s32.totalorder %s1967_s25, 5 }
   0x6   : > { %s2665_s26 = smov (%p33_p0, %s31_s26), 0  ;;  %s2667_s27 = smov (!%p33_p0, %s35_s27), %s1963_s24 }
   0x7   : > { %p293_p3 = pnand %p1635_p1, %p292_p2  ;;  %p37_p4 = scmp.ge.s32.totalorder %s2667_s27, 2 }
   0x8   : > { %p371_p5 = scmp.lt.s32.totalorder (!%p293_p3), %s1951_s21, 3  ;;  %p358_p6 = scmp.lt.s32.totalorder (!%p293_p3), %s1955_s22, 1 }
   0x9   : > { %s2669_s27 = smov (%p37_p4, %s2667_s27), 0  ;;  %296 = sbr.rel (%p293_p3) target bundleno = 761 (0x2f9), region = 44 }
   0xa   : > { %p360_p7 = scmp.lt.s32.totalorder (!%p293_p3), %s1951_s21, 1 }
   0xe   : > { %vm409_vm0 = vcmask 64512   ;;  %v1981_v0 = vmov 0.0   ;;  %s2069_s28 = scalar_select %p371_p5, %s1951_s21, 3  ;;  %vm458_vm1 = vcmask 1043456   ;;  %vm644_vm2 = vcmask 261120  }
   0xf   : > { %410 = vst.msk [vmem:[#allocation2] sm:$0xff] %vm409_vm0, %v1981_v0  ;;  %s2671_s22 = smov (!%p358_p6, %s1955_s22), 1  ;;  %s2673_s21 = smov (!%p360_p7, %s1951_s21), 1 }
  0x10   : > { %411 = vst.msk [vmem:[#allocation2 + $0x8] sm:$0xff] %vm409_vm0, %v1981_v0  ;;  %s1639_s29 = sshll.u32 %s2069_s28, 2  ;;  %s381_s8 = scalar_lea.vmem %s2653_s3, %s2069_s28 }
  0x11   : > { %s374_s11 = scalar_lea.vmem %s2651_s1, %s1639_s29  ;;  %s1675_s12 = sshll.u32 %s2069_s28, 4  ;;  %v2133_v14 = vld [vmem:[%s381_s8] ss:$0 sm:$0xff] }
  0x12   : > { %s386_s15 = scalar_lea.vmem %s2654_s4, %s1675_s12  ;;  %s389_s18 = scalar_lea.vmem %s2655_s5, %s2069_s28  ;;  %v420_v1 = vld [vmem:[%s374_s11] sm:$0xf] }
  0x13   : > { %v460_v2 = vsel %vm458_vm1, %v420_v1, 0  ;;  %v2089_v3 = vld [vmem:[%s386_s15] sm:$0xff]  ;;  %v2091_v4 = vld [vmem:[%s386_s15 + $0x8] sm:$0xff]  ;;  %s1637_s19 = sshll.u32 %s2671_s22, 4  ;;  %s378_s7 = scalar_lea.vmem %s2652_s2, %s1639_s29 }
  0x14   : > { %v2093_v5 = vld [vmem:[%s389_s18] sm:$0x1]  ;;  %469 = vmatpush.bf16.msra.mxu0 %v460_v2  ;;  %1684 = vmatpush.bf16.msra.mxu2 %v460_v2  ;;  %s1636_s9 = sshll.u32 %s2673_s21, 3  ;;  %s2207_s28 = smov 0  }
  0x15   : > { %v611_v8 = vld [vmem:[%s378_s7] sm:$0xf]  ;;  %s367_s10 = sadd.s32 %s1637_s19, %s1636_s9 }
  0x16   : > { %v2098_v6 = vld [vmem:[#allocation2] sm:$0xff]   ;;  %v613_v9 = vsel %vm458_vm1, %v611_v8, 0  ;;  %s1638_s11 = sshll.u32 %s367_s10, 2 }
  0x17   : > { %v2103_v7 = vld [vmem:[#allocation2 + $0x8] sm:$0xff]   ;;  %1685 = vmatpush.bf16.msra.mxu3 %v613_v9  ;;  %622 = vmatpush.bf16.msra.mxu1 %v613_v9  ;;  %s2109_s22 = scalar_lea.vmem %s2650_s0, %s1638_s11  ;;  %s2114_s21 = scalar_lea.vmem %s2656_s6, %s1638_s11 }
  0x18   : > { %v1676_v10 = vld [vmem:[%s2109_s22] sm:$0xff]  ;;  %v1678_v11 = vld [vmem:[%s2109_s22 + $0x10] sm:$0xff]  ;;  %v1677_v12 = vld [vmem:[%s2109_s22 + $0x8] sm:$0xff] }
  0x19   : > { %1662 = vmatmul.msk.bf16.vlgmr.msra.gmra.mxu0 %vm409_vm0, %v1676_v10  ;;  %1664 = vmatmul.msk.bf16.vlgmr.msra.gmra.mxu2 %vm409_vm0, %v1678_v11  ;;  %v1679_v13 = vld [vmem:[%s2109_s22 + $0x18] sm:$0xff] }
  0x1a   : > { %1668 = vmatmul.msk.bf16.vlgmr.msra.gmra.mxu3 %vm409_vm0, %v1678_v11  ;;  %1666 = vmatmul.msk.bf16.vlgmr.msra.gmra.mxu1 %vm409_vm0, %v1676_v10 }
  0x29   : > { %1663 = vmatmul.msk.bf16.gmra.mxu0 %vm409_vm0, %v1677_v12  ;;  %1665 = vmatmul.msk.bf16.gmra.mxu2 %vm409_vm0, %v1679_v13 }
  0x2a   : > { %1669 = vmatmul.msk.bf16.gmra.mxu3 %vm409_vm0, %v1679_v13  ;;  %1667 = vmatmul.msk.bf16.gmra.mxu1 %vm409_vm0, %v1677_v12 }
  0x96   : > { %v471_v15 = vpop.f32.mrf.mxu0 }
  0x97   : > { %v2136_v16 = vadd.f32 %v2133_v14, %v471_v15  ;;  %v624_v17 = vpop.f32.mrf.mxu1 }
  0x98   : > { %645 = vst.msk [vmem:[#allocation4] sm:$0xff] %vm644_vm2, %v624_v17 }
  0x99   : > { %v499_v18 = vmin.f32 %v2136_v16, 20.0  ;;  %vm491_vm4 = vcmp.gt.f32.partialorder %v2136_v16, 20.0 }
  0x9b   : > { %v507_v19 = vmul.f32 1.442695, %v499_v18 }
  0x9c   : > { %v481_v20 = vpop.f32.mrf.mxu2 }
  0x9d   : > { %1769 = vpow2.f32 %v507_v19  ;;  %v2141_v21 = vadd.f32 %v2133_v14, %v481_v20  ;;  %v634_v22 = vpop.f32.mrf.mxu3 }
  0x9e   : > { %v473_v23 = vpop.f32.mrf.mxu0  ;;  %649 = vst.msk [vmem:[#allocation4 + $0x20] sm:$0xff] %vm644_vm2, %v634_v22 }
  0x9f   : > { %v503_v24 = vmin.f32 %v2141_v21, 20.0  ;;  %v2146_v25 = vadd.f32 %v2133_v14, %v473_v23  ;;  %v626_v26 = vpop.f32.mrf.mxu1  ;;  %vm495_vm5 = vcmp.gt.f32.partialorder %v2141_v21, 20.0 }
  0xa0   : > { %646 = vst.msk [vmem:[#allocation4 + $0x8] sm:$0xff] %vm644_vm2, %v626_v26 }
  0xa1   : > { %v515_v27 = vmul.f32 1.442695, %v503_v24  ;;  %v500_v28 = vmin.f32 %v2146_v25, 20.0  ;;  %vm492_vm8 = vcmp.gt.f32.partialorder %v2146_v25, 20.0 }
  0xa3   : > { %v1770_v29 = vpop.eup %1769  ;;  %1771 = vpow2.f32 %v515_v27  ;;  %v509_v30 = vmul.f32 1.442695, %v500_v28 }
  0xa4   : > { %v523_v31 = vadd.f32 1.0, %v1770_v29  ;;  %v483_v32 = vpop.f32.mrf.mxu2  ;;  %v526_v33 = vmul.f32 -0.5, %v1770_v29  ;;  %v529_v44 = vand.u32 2147483647, %v1770_v29 }
  0xa5   : > { %1773 = vpow2.f32 %v509_v30  ;;  %v2151_v34 = vadd.f32 %v2133_v14, %v483_v32  ;;  %v636_v35 = vpop.f32.mrf.mxu3 }
  0xa6   : > { %1775 = vlog2.f32 %v523_v31  ;;  %v476_v36 = vpop.f32.mrf.mxu0  ;;  %650 = vst.msk [vmem:[#allocation4 + $0x28] sm:$0xff] %vm644_vm2, %v636_v35  ;;  %v527_v41 = vadd.f32 1.0, %v526_v33  ;;  %vm530_vm3 = vcmp.lt.f32.partialorder %v529_v44, 0.0004427343 }
  0xa7   : > { %v504_v37 = vmin.f32 %v2151_v34, 20.0  ;;  %v2156_v38 = vadd.f32 %v2133_v14, %v476_v36  ;;  %v629_v39 = vpop.f32.mrf.mxu1  ;;  %vm496_vm10 = vcmp.gt.f32.partialorder %v2151_v34, 20.0 }
  0xa8   : > { %647 = vst.msk [vmem:[#allocation4 + $0x10] sm:$0xff] %vm644_vm2, %v629_v39  ;;  %v528_v53 = vmul.f32 %v1770_v29, %v527_v41 }
  0xa9   : > { %v1772_v40 = vpop.eup %1771  ;;  %v517_v42 = vmul.f32 1.442695, %v504_v37  ;;  %v501_v43 = vmin.f32 %v2156_v38, 20.0  ;;  %vm493_vm12 = vcmp.gt.f32.partialorder %v2156_v38, 20.0 }
  0xaa   : > { %v559_v45 = vadd.f32 1.0, %v1772_v40  ;;  %v562_v47 = vmul.f32 -0.5, %v1772_v40  ;;  %v565_v63 = vand.u32 2147483647, %v1772_v40 }
  0xab   : > { %v1774_v46 = vpop.eup %1773  ;;  %1777 = vpow2.f32 %v517_v42  ;;  %v511_v48 = vmul.f32 1.442695, %v501_v43 }
  0xac   : > { %v1776_v49 = vpop.eup %1775  ;;  %1779 = vlog2.f32 %v559_v45  ;;  %v532_v50 = vadd.f32 1.0, %v1774_v46  ;;  %v486_v51 = vpop.f32.mrf.mxu2  ;;  %v535_v54 = vmul.f32 -0.5, %v1774_v46  ;;  %v563_v59 = vadd.f32 1.0, %v562_v47 }
  0xad   : > { %v525_v52 = vmul.f32 0.6931472, %v1776_v49  ;;  %1781 = vpow2.f32 %v511_v48  ;;  %v639_v55 = vpop.f32.mrf.mxu3  ;;  %v2161_v56 = vadd.f32 %v2133_v14, %v486_v51  ;;  %v538_v10 = vand.u32 2147483647, %v1774_v46 }
  0xae   : > { %1783 = vlog2.f32 %v532_v50  ;;  %v478_v57 = vpop.f32.mrf.mxu0  ;;  %651 = vst.msk [vmem:[#allocation4 + $0x30] sm:$0xff] %vm644_vm2, %v639_v55  ;;  %v536_v2 = vadd.f32 1.0, %v535_v54  ;;  %v564_v15 = vmul.f32 %v1772_v40, %v563_v59  ;;  %vm566_vm6 = vcmp.lt.f32.partialorder %v565_v63, 0.0004427343 }
  0xaf   : > { %v531_v58 = vsel %vm530_vm3, %v528_v53, %v525_v52  ;;  %v2166_v60 = vadd.f32 %v2133_v14, %v478_v57  ;;  %v631_v61 = vpop.f32.mrf.mxu1  ;;  %v505_v0 = vmin.f32 %v2161_v56, 20.0  ;;  %vm539_vm7 = vcmp.lt.f32.partialorder %v538_v10, 0.0004427343 }
  0xb0   : > { %v595_v62 = vsel %vm491_vm4, %v2136_v16, %v531_v58  ;;  %648 = vst.msk [vmem:[#allocation4 + $0x18] sm:$0xff] %vm644_vm2, %v631_v61  ;;  %v537_v26 = vmul.f32 %v1774_v46, %v536_v2  ;;  %vm497_vm14 = vcmp.gt.f32.partialorder %v2161_v56, 20.0 }
  0xb1   : > { %v1778_v1 = vpop.eup %1777  ;;  %603 = vst.msk [vmem:[#allocation3] sm:$0xff] %vm409_vm0, %v595_v62  ;;  %v502_v8 = vmin.f32 %v2166_v60, 20.0  ;;  %v519_v17 = vmul.f32 1.442695, %v505_v0 }
  0xb2   : > { %v1780_v9 = vpop.eup %1779  ;;  %v568_v11 = vadd.f32 1.0, %v1778_v1  ;;  %v571_v16 = vmul.f32 -0.5, %v1778_v1  ;;  %v574_v35 = vand.u32 2147483647, %v1778_v1 }
  0xb3   : > { %v1782_v12 = vpop.eup %1781  ;;  %v561_v13 = vmul.f32 0.6931472, %v1780_v9  ;;  %v513_v20 = vmul.f32 1.442695, %v502_v8 }
  0xb4   : > { %v1784_v18 = vpop.eup %1783  ;;  %1785 = vlog2.f32 %v568_v11  ;;  %v541_v19 = vadd.f32 1.0, %v1782_v12  ;;  %v488_v22 = vpop.f32.mrf.mxu2  ;;  %v544_v27 = vmul.f32 -0.5, %v1782_v12  ;;  %v572_v32 = vadd.f32 1.0, %v571_v16 }
  0xb5   : > { %v567_v23 = vsel %vm566_vm6, %v564_v15, %v561_v13  ;;  %v534_v24 = vmul.f32 0.6931472, %v1784_v18  ;;  %v641_v28 = vpop.f32.mrf.mxu3  ;;  %v2178_v30 = vadd.f32 %v2133_v14, %v488_v22  ;;  %v547_v37 = vand.u32 2147483647, %v1782_v12 }
  0xb6   : > { %v599_v29 = vsel %vm495_vm5, %v2141_v21, %v567_v23  ;;  %1787 = vlog2.f32 %v541_v19  ;;  %652 = vst.msk [vmem:[#allocation4 + $0x38] sm:$0xff] %vm644_vm2, %v641_v28  ;;  %v545_v36 = vadd.f32 1.0, %v544_v27  ;;  %v573_v41 = vmul.f32 %v1778_v1, %v572_v32 }
  0xb7   : > { %607 = vst.msk [vmem:[#allocation3 + $0x20] sm:$0xff] %vm409_vm0, %v599_v29  ;;  %v540_v31 = vsel %vm539_vm7, %v537_v26, %v534_v24  ;;  %1789 = vpow2.f32 %v519_v17  ;;  %v506_v21 = vmin.f32 %v2178_v30, 20.0  ;;  %vm575_vm9 = vcmp.lt.f32.partialorder %v574_v35, 0.0004427343 }
  0xb8   : > { %v596_v33 = vsel %vm492_vm8, %v2146_v25, %v540_v31  ;;  %1791 = vpow2.f32 %v513_v20  ;;  %v546_v45 = vmul.f32 %v1782_v12, %v545_v36  ;;  %vm548_vm11 = vcmp.lt.f32.partialorder %v547_v37, 0.0004427343 }
  0xb9   : > { %604 = vst.msk [vmem:[#allocation3 + $0x8] sm:$0xff] %vm409_vm0, %v596_v33  ;;  %v521_v39 = vmul.f32 1.442695, %v506_v21  ;;  %vm494_vm2 = vcmp.gt.f32.partialorder %v2166_v60, 20.0  ;;  %vm498_vm4 = vcmp.gt.f32.partialorder %v2178_v30, 20.0 }
  0xba   : > { %v1786_v14 = vpop.eup %1785 }
  0xbb   : > { %v570_v40 = vmul.f32 0.6931472, %v1786_v14  ;;  %1793 = vpow2.f32 %v521_v39 }
  0xbc   : > { %v1788_v42 = vpop.eup %1787 }
  0xbd   : > { %v1790_v43 = vpop.eup %1789  ;;  %v576_v44 = vsel %vm575_vm9, %v573_v41, %v570_v40  ;;  %v543_v25 = vmul.f32 0.6931472, %v1788_v42 }
  0xbe   : > { %v1792_v46 = vpop.eup %1791  ;;  %v600_v47 = vsel %vm496_vm10, %v2151_v34, %v576_v44  ;;  %v577_v48 = vadd.f32 1.0, %v1790_v43  ;;  %v580_v50 = vmul.f32 -0.5, %v1790_v43  ;;  %v583_v34 = vand.u32 2147483647, %v1790_v43 }
  0xbf   : > { %608 = vst.msk [vmem:[#allocation3 + $0x28] sm:$0xff] %vm409_vm0, %v600_v47  ;;  %v549_v49 = vsel %vm548_vm11, %v546_v45, %v543_v25  ;;  %v550_v51 = vadd.f32 1.0, %v1792_v46  ;;  %v553_v53 = vmul.f32 -0.5, %v1792_v46  ;;  %v556_v61 = vand.u32 2147483647, %v1792_v46 }
  0xc0   : > { %v597_v52 = vsel %vm493_vm12, %v2156_v38, %v549_v49  ;;  %1795 = vlog2.f32 %v577_v48  ;;  %v581_v55 = vadd.f32 1.0, %v580_v50  ;;  %vm584_vm13 = vcmp.lt.f32.partialorder %v583_v34, 0.0004427343 }
  0xc1   : > { %605 = vst.msk [vmem:[#allocation3 + $0x10] sm:$0xff] %vm409_vm0, %v597_v52  ;;  %1797 = vlog2.f32 %v550_v51  ;;  %v1794_v54 = vpop.eup %1793  ;;  %v554_v58 = vadd.f32 1.0, %v553_v53  ;;  %vm557_vm15 = vcmp.lt.f32.partialorder %v556_v61, 0.0004427343 }
  0xc2   : > { %v586_v57 = vadd.f32 1.0, %v1794_v54  ;;  %v589_v59 = vmul.f32 -0.5, %v1794_v54  ;;  %v582_v1 = vmul.f32 %v1790_v43, %v581_v55  ;;  %v592_v10 = vand.u32 2147483647, %v1794_v54 }
  0xc3   : > { %v555_v38 = vmul.f32 %v1792_v46, %v554_v58 }
  0xc4   : > { %1799 = vlog2.f32 %v586_v57  ;;  %v590_v8 = vadd.f32 1.0, %v589_v59  ;;  %vm593_vm3 = vcmp.lt.f32.partialorder %v592_v10, 0.0004427343 }
  0xc6   : > { %v1796_v62 = vpop.eup %1795  ;;  %v591_v17 = vmul.f32 %v1794_v54, %v590_v8 }
  0xc7   : > { %v1798_v63 = vpop.eup %1797  ;;  %v579_v0 = vmul.f32 0.6931472, %v1796_v62 }
  0xc8   : > { %v552_v2 = vmul.f32 0.6931472, %v1798_v63 }
  0xc9   : > { %v585_v9 = vsel %vm584_vm13, %v582_v1, %v579_v0 }
  0xca   : > { %v601_v11 = vsel %vm497_vm14, %v2161_v56, %v585_v9  ;;  %v558_v12 = vsel %vm557_vm15, %v555_v38, %v552_v2  ;;  %v1800_v13 = vpop.eup %1799 }
  0xcb   : > { %609 = vst.msk [vmem:[#allocation3 + $0x30] sm:$0xff] %vm409_vm0, %v601_v11  ;;  %v598_v15 = vsel %vm494_vm2, %v2166_v60, %v558_v12  ;;  %v588_v16 = vmul.f32 0.6931472, %v1800_v13 }
  0xcc   : > { %606 = vst.msk [vmem:[#allocation3 + $0x18] sm:$0xff] %vm409_vm0, %v598_v15 }
  0xcd   : > { %v594_v18 = vsel %vm593_vm3, %v591_v17, %v588_v16 }
  0xce   : > { %v602_v19 = vsel %vm498_vm4, %v2178_v30, %v594_v18 }
  0xcf   : > { %610 = vst.msk [vmem:[#allocation3 + $0x38] sm:$0xff] %vm409_vm0, %v602_v19 }
  0xd0 LB: >> { %v1982_v56 = vmov 2   ;;  %v1983_v60 = vmov 0   ;;  %s1670_s8 = sshll.u32 %s1979_s28, 4  ;;  %v1428_v26 = vperm.slane %v2093_v5, 0  ;;  %v1984_v30 = vmov 1   ;;  %s663_s28 = sadd.s32 1, %s1979_s28   ;;  %s1979_s28 = sphi %s2207_s28, %s663_s28   ;;  %v1975_v6 = vphi %v2098_v6, %v2659_v6   ;;  %v1971_v7 = vphi %v2103_v7, %v2658_v7  }
  0xd1   : >> { %1803 = vset.pattern.permute.xlu2 %v1982_v56  ;;  %1801 = vset.pattern.permute.xlu1 %v1983_v60  ;;  %s705_s17 = sshra.s32 %s1670_s8, 3  ;;  %s670_s18 = scalar_lea.vmem [#allocation4], %s1670_s8  ;;  %v1985_v33 = vmov 3   ;;  %v1986_v35 = vmov 9   ;;  %v1987_v36 = vmov 4   ;;  %v1988_v14 = vmov 10  }
  0xd2   : >> { %v671_v20 = vld [vmem:[%s670_s18] sm:$0xff]  ;;  %s2221_s19 = sshll.u32 %s705_s17, 2  ;;  %s2227_s30 = scalar_lea.vmem [#allocation3], %s1670_s8  ;;  %v672_v29 = vld [vmem:[%s670_s18 + $0x8] sm:$0xff]  ;;  %v1989_v39 = vmov 5   ;;  %v1990_v40 = vmov 11  }
  0xd3   : >> { %s708_s20 = scalar_lea.vmem %s2109_s22, %s2221_s19  ;;  %673 = vxpose.xlu0.b32.start [1/2] (short) (narrow) %v671_v20, 32  ;;  %v1991_v41 = vmov 13   ;;  %v1992_v42 = vmov 15   ;;  %v1993_v53 = vmov 6   ;;  %vm1407_vm5 = vcmask 1040384   ;;  %s2565_s7 = scalar_lea.vmem %s2114_s21, %s2221_s19 }
  0xd4   : >> { %v2225_v22 = vld [vmem:[%s708_s20] sm:$0xff]   ;;  %vm1409_vm6 = vcmask 1041408   ;;  %vm1411_vm7 = vcmask 1042432   ;;  %vm1414_vm8 = vcmask 1044480   ;;  %vm1416_vm9 = vcmask 1045504   ;;  %p660_p8 = scmp.ge.s32.totalorder %s663_s28, 4  }
  0xd5   : >> { %v1683_v24 = vunpack.c.h.bf16 %v2225_v22  ;;  %v1682_v43 = vunpack.c.l.bf16 %v2225_v22  ;;  %vm1418_vm10 = vcmask 1046528   ;;  %vm1438_vm11 = vcmask 60416  }
  0xd6   : >> { %v2230_v23 = vld [vmem:[%s2227_s30 + $0x8] sm:$0xff]  ;;  %v2285_v44 = vld [vmem:[%s2227_s30] sm:$0xff] }
  0xd7   : >> { %v2236_v27 = vmul.f32 %v1683_v24, %v1428_v26  ;;  %v2239_v28 = vmul.f32 %v1683_v24, %v2230_v23  ;;  %v2292_v25 = vmul.f32 %v1682_v43, %v2285_v44  ;;  %v731_v48 = vperm.slane %v2285_v44, 0 }
  0xd8   : >> { %v717_v49 = vrot.slane %v2285_v44, 1  ;;  %v718_v52 = vrot.slane %v2285_v44, 2  ;;  %v719_v59 = vrot.slane %v2285_v44, 3  ;;  %v720_v38 = vrot.slane %v2285_v44, 4 }
  0xd9   : >> { %v941_v45 = vperm.slane %v2292_v25, 2  ;;  %v975_v50 = vperm.slane %v2292_v25, 3  ;;  %v763_v51 = vmul.f32 %v731_v48, %v2089_v3  ;;  %v764_v62 = vmul.f32 %v731_v48, %v2091_v4 }
  0xda   : >> { %v732_v55 = vperm.slane %v717_v49, 0  ;;  %v733_v58 = vperm.slane %v718_v52, 0  ;;  %v1009_v63 = vperm.slane %v2292_v25, 4  ;;  %v2318_v1 = vperm.slane %v719_v59, 0 }
  0xdb   : >> { %674 = vxpose.xlu0.b32.end [2/2] (short) (narrow) %v672_v29, 32  ;;  %v795_v34 = vmul.f32 1.442695, %v763_v51  ;;  %v797_v9 = vmul.f32 1.442695, %v764_v62  ;;  %v2330_v16 = vperm.slane %v720_v38, 0 }
  0xdc   : >> { %v765_v61 = vmul.f32 %v732_v55, %v2089_v3  ;;  %v767_v0 = vmul.f32 %v733_v58, %v2089_v3  ;;  %v766_v10 = vmul.f32 %v732_v55, %v2091_v4  ;;  %v769_v13 = vmul.f32 %v2318_v1, %v2089_v3 }
  0xdd   : >> { %1852 = vpow2.f32 %v795_v34  ;;  %v721_v17 = vrot.slane %v2285_v44, 5  ;;  %v871_v18 = vperm.slane %v2292_v25, 0  ;;  %v771_v29 = vmul.f32 %v2330_v16, %v2089_v3 }
  0xde   : >> { %v799_v2 = vmul.f32 1.442695, %v765_v61  ;;  %v803_v12 = vmul.f32 1.442695, %v767_v0  ;;  %v801_v19 = vmul.f32 1.442695, %v766_v10  ;;  %v768_v0 = vmul.f32 %v733_v58, %v2091_v4 }
  0xdf   : >> { %v807_v20 = vmul.f32 1.442695, %v769_v13 }
  0xe0   : >> { %1854 = vpow2.f32 %v799_v2 }
  0xe1   : >> { %1856 = vpow2.f32 %v797_v9 }
  0xe2   : >> { %1858 = vpow2.f32 %v803_v12 }
  0xe3   : >> { %v1853_v15 = vpop.eup %1852  ;;  %1860 = vpow2.f32 %v801_v19  ;;  %v805_v19 = vmul.f32 1.442695, %v768_v0 }
  0xe4   : >> { %1862 = vpow2.f32 %v807_v20 }
  0xe6   : >> { %v1855_v48 = vpop.eup %1854 }
  0xe7   : >> { %v1857_v52 = vpop.eup %1856 }
  0xe8   : >> { %v1859_v59 = vpop.eup %1858  ;;  %v860_v2 = vmul.f32 %v1971_v7, %v1857_v52 }
 0x142   : >> { %1802 = vset.pattern.permute.xlu0 %v1984_v30 }
 0x177   : >> { %v2241_v31 = vpop.trf.xlu0 }
 0x178   : >> { %934 = vperm.xlu2 %1803, %v2241_v31   ;;  %900 = vperm.xlu0 %1802, %v2241_v31  }
 0x179   : >> { %863 = vperm.xlu1 %1801, %v2241_v31  }
 0x17f   : >> { %v2246_v32 = vpop.trf.xlu0 }
 0x180   : >> { %1804 = vset.pattern.permute.xlu2 %v1985_v33  ;;  %1831 = vset.pattern.permute.xlu0 %v1986_v35 }
 0x181   : >> { %868 = vperm.xlu1 %1801, %v2246_v32   ;;  %968 = vperm.xlu2 %1804, %v2241_v31  }
 0x182   : >> { %1176 = vperm.xlu0 %1831, %v2246_v32  }
 0x187   : >> { %v2252_v21 = vpop.trf.xlu0 }
 0x189   : >> { %1807 = vset.pattern.permute.xlu1 %v1984_v30  ;;  %1805 = vset.pattern.permute.xlu2 %v1987_v36 }
 0x18a   : >> { %1835 = vset.pattern.permute.xlu0 %v1988_v14  ;;  %904 = vperm.xlu1 %1807, %v2246_v32  }
 0x18b   : >> { %1002 = vperm.xlu2 %1805, %v2241_v31   ;;  %1219 = vperm.xlu0 %1835, %v2252_v21  }
 0x18f   : >> { %v2259_v37 = vpop.trf.xlu0 }
 0x192   : >> { %1808 = vset.pattern.permute.xlu1 %v1982_v56 }
 0x193   : >> { %1806 = vset.pattern.permute.xlu2 %v1989_v39  ;;  %938 = vperm.xlu1 %1808, %v2246_v32  }
 0x194   : >> { %1838 = vset.pattern.permute.xlu0 %v1990_v40  ;;  %1036 = vperm.xlu2 %1806, %v2241_v31  }
 0x195   : >> { %1257 = vperm.xlu0 %1838, %v2259_v37  }
 0x19b   : >> { %1809 = vset.pattern.permute.xlu1 %v1985_v33 }
 0x19c   : >> { %1812 = vset.pattern.permute.xlu2 %v1983_v60  ;;  %972 = vperm.xlu1 %1809, %v2246_v32  }
 0x19d   : >> { %1841 = vset.pattern.permute.xlu0 %v1991_v41  ;;  %878 = vperm.xlu2 %1812, %v2252_v21  }
 0x19e   : >> { %1308 = vperm.xlu0 %1841, %v2241_v31  }
 0x1a4   : >> { %1810 = vset.pattern.permute.xlu1 %v1987_v36 }
 0x1a5   : >> { %1006 = vperm.xlu1 %1810, %v2246_v32   ;;  %1813 = vset.pattern.permute.xlu2 %v1984_v30 }
 0x1a6   : >> { %1846 = vset.pattern.permute.xlu0 %v1992_v42  ;;  %913 = vperm.xlu2 %1813, %v2252_v21  }
 0x1a7   : >> { %1380 = vperm.xlu0 %1846, %v2246_v32  }
 0x1ad   : >> { %1811 = vset.pattern.permute.xlu1 %v1989_v39 }
 0x1ae   : >> { %1040 = vperm.xlu1 %1811, %v2246_v32   ;;  %1814 = vset.pattern.permute.xlu2 %v1982_v56 }
 0x1af   : >> { %947 = vperm.xlu2 %1814, %v2252_v21   ;;  %1389 = vperm.xlu0 %1846, %v2252_v21  }
 0x1b6   : >> { %1819 = vset.pattern.permute.xlu1 %v1984_v30  ;;  %v2338_v30 = vperm.slane %v721_v17, 0 }
 0x1b7   : >> { %1815 = vset.pattern.permute.xlu2 %v1985_v33  ;;  %917 = vperm.xlu1 %1819, %v2259_v37  }
 0x1b8   : >> { %981 = vperm.xlu2 %1815, %v2252_v21   ;;  %v773_v55 = vmul.f32 %v2338_v30, %v2089_v3 }
 0x1ba   : >> { %v815_v10 = vmul.f32 1.442695, %v773_v55 }
 0x1bf   : >> { %1820 = vset.pattern.permute.xlu1 %v1982_v56  ;;  %v1043_v56 = vperm.slane %v2292_v25, 5 }
 0x1c0   : >> { %1816 = vset.pattern.permute.xlu2 %v1987_v36  ;;  %951 = vperm.xlu1 %1820, %v2259_v37  }
 0x1c1   : >> { %1015 = vperm.xlu2 %1816, %v2252_v21  }
 0x1c8   : >> { %1821 = vset.pattern.permute.xlu1 %v1985_v33  ;;  %v722_v33 = vrot.slane %v2285_v44, 6 }
 0x1c9   : >> { %1817 = vset.pattern.permute.xlu2 %v1989_v39  ;;  %985 = vperm.xlu1 %1821, %v2259_v37  }
 0x1ca   : >> { %1049 = vperm.xlu2 %1817, %v2252_v21   ;;  %v2348_v34 = vperm.slane %v722_v33, 0 }
 0x1cc   : >> { %v775_v12 = vmul.f32 %v2348_v34, %v2089_v3 }
 0x1ce   : >> { %v819_v20 = vmul.f32 1.442695, %v775_v12 }
 0x1d1   : >> { %1822 = vset.pattern.permute.xlu1 %v1987_v36 }
 0x1d2   : >> { %1818 = vset.pattern.permute.xlu2 %v1983_v60  ;;  %1019 = vperm.xlu1 %1822, %v2259_v37   ;;  %v935_v46 = vpop.permute.xlu2 %934  ;;  %v859_v60 = vmul.f32 %v1975_v6, %v1853_v15 }
 0x1d3   : >> { %v2299_v47 = vmul.f32 %v941_v45, %v935_v46  ;;  %883 = vperm.xlu2 %1818, %v2259_v37   ;;  %v1994_v46 = vmov 7  }
 0x1da   : >> { %1823 = vset.pattern.permute.xlu1 %v1989_v39  ;;  %v907_v39 = vperm.slane %v2292_v25, 1 }
 0x1db   : >> { %1053 = vperm.xlu1 %1823, %v2259_v37   ;;  %1824 = vset.pattern.permute.xlu2 %v1993_v53  ;;  %v969_v54 = vpop.permute.xlu2 %968 }
 0x1dc   : >> { %v2310_v57 = vmul.f32 %v975_v50, %v969_v54  ;;  %1070 = vperm.xlu2 %1824, %v2241_v31   ;;  %v811_v54 = vmul.f32 1.442695, %v771_v29 }
 0x1de   : >> { %1864 = vpow2.f32 %v811_v54 }
 0x1df   : >> { %1866 = vpow2.f32 %v815_v10 }
 0x1e0   : >> { %1868 = vpow2.f32 %v805_v19 }
 0x1e1   : >> { %1870 = vpow2.f32 %v819_v20 }
 0x1e3   : >> { %1825 = vset.pattern.permute.xlu1 %v1993_v53 }
 0x1e4   : >> { %1074 = vperm.xlu1 %1825, %v2246_v32   ;;  %1083 = vperm.xlu2 %1824, %v2252_v21  }
 0x1e5   : >> { %v1003_v8 = vpop.permute.xlu2 %1002 }
 0x1e6   : >> { %v2326_v11 = vmul.f32 %v1009_v63, %v1003_v8  ;;  %v1861_v8 = vpop.eup %1860 }
 0x1e7   : >> { %v1863_v13 = vpop.eup %1862 }
 0x1e8   : >> { %v1865_v33 = vpop.eup %1864 }
 0x1ea   : >> { %v901_v49 = vpop.permute.xlu0 %900 }
 0x1eb   : >> { %v864_v24 = vpop.permute.xlu1 %863  ;;  %v908_v61 = vmul.f32 %v907_v39, %v901_v49  ;;  %v1867_v49 = vpop.eup %1866 }
 0x1ec   : >> { %v872_v36 = vmul.f32 %v871_v18, %v864_v24  ;;  %1087 = vperm.xlu1 %1825, %v2259_v37   ;;  %1826 = vset.pattern.permute.xlu2 %v1994_v46  ;;  %v1869_v54 = vpop.eup %1868 }
 0x1ed   : >> { %1104 = vperm.xlu2 %1826, %v2241_v31  }
 0x1ee   : >> { %v1037_v6 = vpop.permute.xlu2 %1036  ;;  %v874_v51 = vadd.f32 %v872_v36, %v859_v60  ;;  %v770_v36 = vmul.f32 %v2318_v1, %v2091_v4 }
 0x1ef   : >> { %v1044_v53 = vmul.f32 %v1043_v56, %v1037_v6 }
 0x1f0   : >> { %v897_v62 = vmul.f32 %v1855_v48, %v874_v51  ;;  %v809_v52 = vmul.f32 1.442695, %v770_v36 }
 0x1f2   : >> { %v910_v38 = vadd.f32 %v908_v61, %v897_v62  ;;  %v1871_v61 = vpop.eup %1870  ;;  %1872 = vpow2.f32 %v809_v52 }
 0x1f3   : >> { %v869_v9 = vpop.permute.xlu1 %868 }
 0x1f4   : >> { %v873_v15 = vmul.f32 %v871_v18, %v869_v9  ;;  %1827 = vset.pattern.permute.xlu1 %v1994_v46  ;;  %v931_v17 = vmul.f32 %v1859_v59, %v910_v38 }
 0x1f5   : >> { %1108 = vperm.xlu1 %1827, %v2246_v32   ;;  %1117 = vperm.xlu2 %1826, %v2252_v21  }
 0x1f6   : >> { %v2356_v58 = vadd.f32 %v873_v15, %v860_v2  ;;  %v2359_v7 = vadd.f32 %v2299_v47, %v931_v17  ;;  %v772_v2 = vmul.f32 %v2330_v16, %v2091_v4  ;;  %v774_v16 = vmul.f32 %v2338_v30, %v2091_v4 }
 0x1f7   : >> { %v879_v60 = vpop.permute.xlu2 %878  ;;  %v776_v30 = vmul.f32 %v2348_v34, %v2091_v4 }
 0x1f8   : >> { %v2361_v24 = vmul.f32 %v879_v60, %v874_v51  ;;  %v965_v29 = vmul.f32 %v1863_v13, %v2359_v7  ;;  %v898_v18 = vmul.f32 %v1861_v8, %v2356_v58  ;;  %v1995_v51 = vmov 8   ;;  %v1873_v10 = vpop.eup %1872 }
 0x1f9   : >> { %v817_v17 = vmul.f32 1.442695, %v774_v16 }
 0x1fa   : >> { %v2368_v46 = vadd.f32 %v2310_v57, %v965_v29 }
 0x1fc   : >> { %v905_v47 = vpop.permute.xlu1 %904  ;;  %v999_v48 = vmul.f32 %v1865_v33, %v2368_v46  ;;  %v821_v33 = vmul.f32 1.442695, %v776_v30 }
 0x1fd   : >> { %v909_v6 = vmul.f32 %v907_v39, %v905_v47  ;;  %1121 = vperm.xlu1 %1827, %v2259_v37   ;;  %1828 = vset.pattern.permute.xlu2 %v1995_v51 }
 0x1fe   : >> { %1138 = vperm.xlu2 %1828, %v2241_v31   ;;  %v2374_v55 = vadd.f32 %v2326_v11, %v999_v48 }
 0x1ff   : >> { %v911_v1 = vadd.f32 %v909_v6, %v898_v18  ;;  %v723_v6 = vrot.slane %v2285_v44, 7 }
 0x200   : >> { %v914_v57 = vpop.permute.xlu2 %913  ;;  %v1033_v59 = vmul.f32 %v1867_v49, %v2374_v55 }
 0x201   : >> { %v920_v62 = vmul.f32 %v914_v57, %v910_v38  ;;  %v932_v0 = vmul.f32 %v1869_v54, %v911_v1  ;;  %v813_v38 = vmul.f32 1.442695, %v772_v2  ;;  %v2429_v57 = vperm.slane %v723_v6, 0 }
 0x202   : >> { %v2377_v39 = vadd.f32 %v1044_v53, %v1033_v59 }
 0x203   : >> { %1874 = vpow2.f32 %v813_v38  ;;  %v777_v44 = vmul.f32 %v2429_v57, %v2089_v3  ;;  %v922_v59 = vsel %vm409_vm0, %v920_v62, 0.0 }
 0x204   : >> { %v2382_v8 = vmul.f32 %v1871_v61, %v2377_v39  ;;  %1876 = vpow2.f32 %v817_v17 }
 0x205   : >> { %v939_v9 = vpop.permute.xlu1 %938  ;;  %1829 = vset.pattern.permute.xlu1 %v1995_v51  ;;  %1878 = vpow2.f32 %v821_v33  ;;  %v739_v33 = vperm.slane %v2230_v23, 0 }
 0x206   : >> { %v943_v11 = vmul.f32 %v941_v45, %v939_v9  ;;  %1142 = vperm.xlu1 %1829, %v2246_v32   ;;  %1151 = vperm.xlu2 %1828, %v2252_v21  }
 0x208   : >> { %v2388_v12 = vadd.f32 %v943_v11, %v932_v0  ;;  %v823_v11 = vmul.f32 1.442695, %v777_v44 }
 0x209   : >> { %v948_v53 = vpop.permute.xlu2 %947  ;;  %v1875_v19 = vpop.eup %1874 }
 0x20a   : >> { %v966_v13 = vmul.f32 %v1873_v10, %v2388_v12  ;;  %v1877_v36 = vpop.eup %1876  ;;  %v888_v10 = vsel %vm409_vm0, %v2361_v24, 0.0  ;;  %1880 = vpow2.f32 %v823_v11  ;;  %v1077_v24 = vperm.slane %v2292_v25, 6 }
 0x20b   : >> { %v1879_v34 = vpop.eup %1878 }
 0x20e   : >> { %v973_v15 = vpop.permute.xlu1 %972  ;;  %1155 = vperm.xlu1 %1829, %v2259_v37   ;;  %1830 = vset.pattern.permute.xlu2 %v1986_v35 }
 0x20f   : >> { %v977_v45 = vmul.f32 %v975_v50, %v973_v15  ;;  %1172 = vperm.xlu2 %1830, %v2241_v31  }
 0x211   : >> { %v2398_v60 = vadd.f32 %v977_v45, %v966_v13 }
 0x212   : >> { %v2400_v20 = vpop.permute.xlu2 %981 }
 0x213   : >> { %v1000_v29 = vmul.f32 %v1875_v19, %v2398_v60  ;;  %v988_v6 = vmul.f32 %v2400_v20, %v2368_v46 }
 0x215   : >> { %v990_v46 = vsel %vm409_vm0, %v988_v6, 0.0  ;;  %v778_v6 = vmul.f32 %v2429_v57, %v2091_v4 }
 0x216   : >> { %1832 = vset.pattern.permute.xlu1 %v1986_v35 }
 0x217   : >> { %v1007_v18 = vpop.permute.xlu1 %1006  ;;  %1185 = vperm.xlu1 %1832, %v2252_v21   ;;  %1189 = vperm.xlu2 %1830, %v2259_v37  }
 0x218   : >> { %v1011_v50 = vmul.f32 %v1009_v63, %v1007_v18 }
 0x21a   : >> { %v2410_v47 = vadd.f32 %v1011_v50, %v1000_v29 }
 0x21b   : >> { %v2412_v48 = vpop.permute.xlu2 %1015 }
 0x21c   : >> { %v1034_v49 = vmul.f32 %v1877_v36, %v2410_v47  ;;  %v1881_v36 = vpop.eup %1880 }
 0x21f   : >> { %1833 = vset.pattern.permute.xlu1 %v1988_v14  ;;  %1834 = vset.pattern.permute.xlu2 %v1988_v14 }
 0x220   : >> { %v1041_v35 = vpop.permute.xlu1 %1040  ;;  %1206 = vperm.xlu1 %1833, %v2241_v31   ;;  %1210 = vperm.xlu2 %1834, %v2246_v32  }
 0x221   : >> { %v1045_v63 = vmul.f32 %v1043_v56, %v1041_v35 }
 0x223   : >> { %v2422_v51 = vadd.f32 %v1045_v63, %v1034_v49  ;;  %v1996_v63 = vmov 12  }
 0x224   : >> { %v2424_v52 = vpop.permute.xlu2 %1049 }
 0x225   : >> { %v2427_v54 = vmul.f32 %v1879_v34, %v2422_v51 }
 0x228   : >> { %1223 = vperm.xlu1 %1833, %v2259_v37   ;;  %1836 = vset.pattern.permute.xlu2 %v1990_v40 }
 0x229   : >> { %v918_v14 = vpop.permute.xlu1 %917  ;;  %1240 = vperm.xlu2 %1836, %v2241_v31  }
 0x22a   : >> { %v921_v56 = vmul.f32 %v918_v14, %v911_v1  ;;  %v954_v1 = vmul.f32 %v948_v53, %v2359_v7 }
 0x22c   : >> { %v923_v61 = vsel %vm409_vm0, %v921_v56, 0.0  ;;  %v956_v19 = vsel %vm409_vm0, %v954_v1, 0.0 }
 0x22d   : >> { %v924_v0 = vadd.f32 %v923_v61, %v922_v59  ;;  %v884_v2 = vpop.permute.xlu2 %883  ;;  %v779_v61 = vmul.f32 %v739_v33, %v2089_v3 }
 0x22e   : >> { %v887_v9 = vmul.f32 %v884_v2, %v2356_v58 }
 0x22f   : >> { %v925_v38 = vrot.slane %v924_v0, 4  ;;  %v827_v1 = vmul.f32 1.442695, %v779_v61 }
 0x230   : >> { %v889_v13 = vsel %vm409_vm0, %v887_v9, 0.0  ;;  %1837 = vset.pattern.permute.xlu1 %v1990_v40 }
 0x231   : >> { %v926_v16 = vadd.f32 %v925_v38, %v924_v0  ;;  %v890_v15 = vadd.f32 %v889_v13, %v888_v10  ;;  %1244 = vperm.xlu1 %1837, %v2246_v32   ;;  %1253 = vperm.xlu2 %1836, %v2252_v21   ;;  %1882 = vpow2.f32 %v827_v1 }
 0x232   : >> { %v952_v62 = vpop.permute.xlu1 %951 }
 0x233   : >> { %v927_v58 = vrot.slane %v926_v16, 2  ;;  %v891_v45 = vrot.slane %v890_v15, 4  ;;  %v955_v17 = vmul.f32 %v952_v62, %v2388_v12 }
 0x235   : >> { %v928_v29 = vadd.f32 %v927_v58, %v926_v16  ;;  %v892_v40 = vadd.f32 %v891_v45, %v890_v15  ;;  %v957_v7 = vsel %vm409_vm0, %v955_v17, 0.0 }
 0x236   : >> { %v958_v53 = vadd.f32 %v957_v7, %v956_v19  ;;  %v1071_v30 = vpop.permute.xlu2 %1070  ;;  %v1111_v19 = vperm.slane %v2292_v25, 7 }
 0x237   : >> { %v893_v18 = vrot.slane %v892_v40, 2  ;;  %v1078_v50 = vmul.f32 %v1077_v24, %v1071_v30  ;;  %v929_v35 = vrot.slane %v928_v29, 1 }
 0x238   : >> { %v959_v49 = vrot.slane %v958_v53, 4 }
 0x239   : >> { %v894_v12 = vadd.f32 %v893_v18, %v892_v40  ;;  %1839 = vset.pattern.permute.xlu1 %v1996_v63  ;;  %1840 = vset.pattern.permute.xlu2 %v1996_v63  ;;  %v2454_v34 = vadd.f32 %v1078_v50, %v2382_v8  ;;  %v930_v2 = vadd.f32 %v929_v35, %v928_v29  ;;  %v724_v29 = vrot.slane %v2230_v23, 1 }
 0x23a   : >> { %v960_v14 = vadd.f32 %v959_v49, %v958_v53  ;;  %1274 = vperm.xlu1 %1839, %v2241_v31   ;;  %1278 = vperm.xlu2 %1840, %v2246_v32   ;;  %v1883_v49 = vpop.eup %1882  ;;  %v1997_v63 = vmov 14  }
 0x23b   : >> { %v895_v56 = vrot.slane %v894_v12, 1  ;;  %v986_v44 = vpop.permute.xlu1 %985  ;;  %v1101_v59 = vmul.f32 %v1881_v36, %v2454_v34 }
 0x23c   : >> { %v961_v0 = vrot.slane %v960_v14, 2  ;;  %v989_v8 = vmul.f32 %v986_v44, %v2398_v60  ;;  %v1022_v60 = vmul.f32 %v2412_v48, %v2374_v55  ;;  %v2482_v48 = vperm.slane %v724_v29, 0 }
 0x23d   : >> { %v896_v9 = vadd.f32 %v895_v56, %v894_v12  ;;  %v1056_v56 = vmul.f32 %v2424_v52, %v2377_v39 }
 0x23e   : >> { %v962_v20 = vadd.f32 %v961_v0, %v960_v14  ;;  %v991_v11 = vsel %vm409_vm0, %v989_v8, 0.0  ;;  %v2467_v38 = vpop.permute.xlu2 %1083  ;;  %v1024_v53 = vsel %vm409_vm0, %v1022_v60, 0.0  ;;  %v781_v0 = vmul.f32 %v2482_v48, %v2089_v3 }
 0x23f   : >> { %v1408_v10 = vsel %vm1407_vm5, %v896_v9, %v930_v2  ;;  %v992_v13 = vadd.f32 %v991_v11, %v990_v46  ;;  %v825_v9 = vmul.f32 1.442695, %v778_v6 }
 0x240   : >> { %v963_v16 = vrot.slane %v962_v20, 1  ;;  %v831_v52 = vmul.f32 1.442695, %v781_v0 }
 0x241   : >> { %v993_v15 = vrot.slane %v992_v13, 4  ;;  %1884 = vpow2.f32 %v825_v9 }
 0x242   : >> { %v964_v62 = vadd.f32 %v963_v16, %v962_v20  ;;  %1287 = vperm.xlu1 %1839, %v2252_v21   ;;  %1291 = vperm.xlu2 %1840, %v2259_v37   ;;  %v1058_v20 = vsel %vm409_vm0, %v1056_v56, 0.0  ;;  %1886 = vpow2.f32 %v831_v52 }
 0x243   : >> { %v994_v58 = vadd.f32 %v993_v15, %v992_v13  ;;  %v1145_v15 = vperm.slane %v2239_v28, 0 }
 0x244   : >> { %v1410_v45 = vsel %vm1409_vm6, %v1408_v10, %v964_v62  ;;  %v1020_v17 = vpop.permute.xlu1 %1019  ;;  %v725_v62 = vrot.slane %v2230_v23, 2 }
 0x245   : >> { %v995_v40 = vrot.slane %v994_v58, 2  ;;  %v1023_v7 = vmul.f32 %v1020_v17, %v2410_v47 }
 0x247   : >> { %v996_v30 = vadd.f32 %v995_v40, %v994_v58  ;;  %v1025_v18 = vsel %vm409_vm0, %v1023_v7, 0.0  ;;  %v1105_v50 = vpop.permute.xlu2 %1104  ;;  %v1885_v29 = vpop.eup %1884 }
 0x248   : >> { %v1026_v36 = vadd.f32 %v1025_v18, %v1024_v53  ;;  %v1112_v55 = vmul.f32 %v1111_v19, %v1105_v50  ;;  %v741_v53 = vperm.slane %v725_v62, 0 }
 0x249   : >> { %v997_v35 = vrot.slane %v996_v30, 1 }
 0x24a   : >> { %v1027_v12 = vrot.slane %v1026_v36, 4  ;;  %1842 = vset.pattern.permute.xlu1 %v1991_v41  ;;  %1843 = vset.pattern.permute.xlu2 %v1997_v63  ;;  %v2486_v47 = vadd.f32 %v1112_v55, %v1101_v59  ;;  %v780_v55 = vmul.f32 %v739_v33, %v2091_v4 }
 0x24b   : >> { %v998_v14 = vadd.f32 %v997_v35, %v996_v30  ;;  %1312 = vperm.xlu1 %1842, %v2246_v32   ;;  %1342 = vperm.xlu2 %1843, %v2241_v31   ;;  %v1887_v30 = vpop.eup %1886  ;;  %v783_v35 = vmul.f32 %v741_v53, %v2089_v3 }
 0x24c   : >> { %v1028_v44 = vadd.f32 %v1027_v12, %v1026_v36  ;;  %v1135_v61 = vmul.f32 %v1883_v49, %v2486_v47 }
 0x24d   : >> { %v1412_v59 = vsel %vm1411_vm7, %v1410_v45, %v998_v14  ;;  %v1054_v8 = vpop.permute.xlu1 %1053  ;;  %v829_v14 = vmul.f32 1.442695, %v780_v55  ;;  %v1177_v55 = vpop.permute.xlu0 %1176 }
 0x24e   : >> { %v1029_v2 = vrot.slane %v1028_v44, 2  ;;  %v1057_v57 = vmul.f32 %v1054_v8, %v2422_v51 }
 0x24f   : >> { %v2499_v46 = vpop.permute.xlu2 %1117  ;;  %1888 = vpow2.f32 %v829_v14 }
 0x250   : >> { %v1030_v11 = vadd.f32 %v1029_v2, %v1028_v44  ;;  %v1059_v39 = vsel %vm409_vm0, %v1057_v57, 0.0  ;;  %v1179_v2 = vperm.slane %v2239_v28, 1  ;;  %v1124_v25 = vmul.f32 %v2499_v46, %v2486_v47 }
 0x251   : >> { %v1060_v10 = vadd.f32 %v1059_v39, %v1058_v20 }
 0x252   : >> { %v1031_v13 = vrot.slane %v1030_v11, 1 }
 0x253   : >> { %v1061_v1 = vrot.slane %v1060_v10, 4  ;;  %1844 = vset.pattern.permute.xlu1 %v1997_v63  ;;  %1845 = vset.pattern.permute.xlu2 %v1992_v42 }
 0x254   : >> { %v1032_v16 = vadd.f32 %v1031_v13, %v1030_v11  ;;  %1346 = vperm.xlu1 %1844, %v2246_v32   ;;  %1376 = vperm.xlu2 %1845, %v2241_v31  }
 0x255   : >> { %v1062_v51 = vadd.f32 %v1061_v1, %v1060_v10  ;;  %v1889_v20 = vpop.eup %1888 }
 0x256   : >> { %v1413_v60 = vsel %vm458_vm1, %v1412_v59, %v1032_v16  ;;  %v1075_v58 = vpop.permute.xlu1 %1074 }
 0x257   : >> { %v1063_v45 = vrot.slane %v1062_v51, 2  ;;  %v1079_v17 = vmul.f32 %v1077_v24, %v1075_v58  ;;  %v1090_v24 = vmul.f32 %v2467_v38, %v2454_v34 }
 0x258   : >> { %v1139_v40 = vpop.permute.xlu2 %1138 }
 0x259   : >> { %v1064_v7 = vadd.f32 %v1063_v45, %v1062_v51  ;;  %v1146_v32 = vmul.f32 %v1145_v15, %v1139_v40  ;;  %v1081_v31 = vadd.f32 %v1079_v17, %v2427_v54  ;;  %v1092_v34 = vsel %vm409_vm0, %v1090_v24, 0.0 }
 0x25a   : >> { %v726_v51 = vrot.slane %v2230_v23, 3 }
 0x25b   : >> { %v1065_v18 = vrot.slane %v1064_v7, 1  ;;  %v1148_v50 = vadd.f32 %v1146_v32, %v1135_v61  ;;  %v1102_v36 = vmul.f32 %v1885_v29, %v1081_v31  ;;  %v784_v29 = vmul.f32 %v741_v53, %v2091_v4 }
 0x25c   : >> { %1847 = vset.pattern.permute.xlu1 %v1991_v41  ;;  %1848 = vset.pattern.permute.xlu2 %v1991_v41  ;;  %v835_v41 = vmul.f32 1.442695, %v783_v35  ;;  %v742_v17 = vperm.slane %v726_v51, 0  ;;  %v1213_v35 = vperm.slane %v2239_v28, 2 }
 0x25d   : >> { %v1066_v49 = vadd.f32 %v1065_v18, %v1064_v7  ;;  %1321 = vperm.xlu1 %1847, %v2252_v21   ;;  %1325 = vperm.xlu2 %1848, %v2259_v37   ;;  %v1169_v54 = vmul.f32 %v1887_v30, %v1148_v50  ;;  %v1126_v7 = vsel %vm409_vm0, %v1124_v25, 0.0 }
 0x25e   : >> { %v1088_v12 = vpop.permute.xlu1 %1087  ;;  %1890 = vpow2.f32 %v835_v41  ;;  %v786_v32 = vmul.f32 %v742_v17, %v2091_v4 }
 0x25f   : >> { %v1415_v6 = vsel %vm1414_vm8, %v1413_v60, %v1066_v49  ;;  %v1091_v33 = vmul.f32 %v1088_v12, %v1081_v31  ;;  %v1181_v12 = vmul.f32 %v1179_v2, %v1177_v55 }
 0x260   : >> { %v1152_v56 = vpop.permute.xlu2 %1151  ;;  %v841_v18 = vmul.f32 1.442695, %v786_v32 }
 0x261   : >> { %v1093_v38 = vsel %vm409_vm0, %v1091_v33, 0.0  ;;  %v2528_v44 = vmul.f32 %v1152_v56, %v1148_v50  ;;  %v1430_v56 = vmul.f32 %v1682_v43, %v1428_v26 }
 0x262   : >> { %v1094_v61 = vadd.f32 %v1093_v38, %v1092_v34 }
 0x263   : >> { %v1160_v22 = vsel %vm409_vm0, %v2528_v44, 0.0 }
 0x264   : >> { %v1095_v0 = vrot.slane %v1094_v61, 4  ;;  %v1891_v13 = vpop.eup %1890 }
 0x265   : >> { %1849 = vset.pattern.permute.xlu1 %v1997_v63  ;;  %1850 = vset.pattern.permute.xlu2 %v1997_v63  ;;  %v782_v63 = vmul.f32 %v2482_v48, %v2091_v4 }
 0x266   : >> { %v1096_v59 = vadd.f32 %v1095_v0, %v1094_v61  ;;  %1355 = vperm.xlu1 %1849, %v2252_v21   ;;  %1359 = vperm.xlu2 %1850, %v2259_v37  }
 0x267   : >> { %v1109_v8 = vpop.permute.xlu1 %1108  ;;  %v833_v48 = vmul.f32 1.442695, %v782_v63 }
 0x268   : >> { %v1097_v57 = vrot.slane %v1096_v59, 2  ;;  %v1113_v9 = vmul.f32 %v1111_v19, %v1109_v8 }
 0x269   : >> { %v1173_v11 = vpop.permute.xlu2 %1172  ;;  %1892 = vpow2.f32 %v833_v48 }
 0x26a   : >> { %v1098_v39 = vadd.f32 %v1097_v57, %v1096_v59  ;;  %v1180_v52 = vmul.f32 %v1179_v2, %v1173_v11  ;;  %v1115_v10 = vadd.f32 %v1113_v9, %v1102_v36  ;;  %v727_v9 = vrot.slane %v2230_v23, 4 }
 0x26c   : >> { %v1099_v1 = vrot.slane %v1098_v39, 1  ;;  %v1136_v21 = vmul.f32 %v1889_v20, %v1115_v10  ;;  %v2539_v16 = vadd.f32 %v1180_v52, %v1169_v54  ;;  %v743_v63 = vperm.slane %v727_v9, 0 }
 0x26e   : >> { %v1100_v19 = vadd.f32 %v1099_v1, %v1098_v39  ;;  %1851 = vset.pattern.permute.xlu1 %v1992_v42  ;;  %v2546_v62 = vmul.f32 %v1891_v13, %v2539_v16  ;;  %v837_v42 = vmul.f32 1.442695, %v784_v29  ;;  %v785_v13 = vmul.f32 %v742_v17, %v2089_v3 }
 0x26f   : >> { %1393 = vperm.xlu1 %1851, %v2259_v37   ;;  %v1122_v60 = vpop.permute.xlu1 %1121  ;;  %v1893_v53 = vpop.eup %1892  ;;  %v787_v25 = vmul.f32 %v743_v63, %v2089_v3 }
 0x270   : >> { %v1417_v58 = vsel %vm1416_vm9, %v1415_v6, %v1100_v19  ;;  %v1125_v45 = vmul.f32 %v1122_v60, %v1115_v10  ;;  %1894 = vpow2.f32 %v837_v42  ;;  %v839_v44 = vmul.f32 1.442695, %v785_v13 }
 0x271   : >> { %v1190_v40 = vpop.permute.xlu2 %1189  ;;  %1896 = vpow2.f32 %v841_v18  ;;  %v843_v29 = vmul.f32 1.442695, %v787_v25 }
 0x272   : >> { %v1127_v47 = vsel %vm409_vm0, %v1125_v45, 0.0  ;;  %1898 = vpow2.f32 %v839_v44 }
 0x273   : >> { %v1128_v46 = vadd.f32 %v1127_v47, %v1126_v7  ;;  %1900 = vpow2.f32 %v843_v29 }
 0x275   : >> { %v1129_v31 = vrot.slane %v1128_v46, 4 }
 0x276   : >> { %v1895_v14 = vpop.eup %1894 }
 0x277   : >> { %v1130_v37 = vadd.f32 %v1129_v31, %v1128_v46  ;;  %v1897_v2 = vpop.eup %1896  ;;  %v728_v46 = vrot.slane %v2230_v23, 5 }
 0x278   : >> { %v1143_v30 = vpop.permute.xlu1 %1142  ;;  %v1899_v31 = vpop.eup %1898 }
 0x279   : >> { %v1131_v50 = vrot.slane %v1130_v37, 2  ;;  %v1147_v36 = vmul.f32 %v1145_v15, %v1143_v30 }
 0x27a   : >> { %v1211_v24 = vpop.permute.xlu2 %1210 }
 0x27b   : >> { %v1132_v49 = vadd.f32 %v1131_v50, %v1130_v37  ;;  %v1149_v54 = vadd.f32 %v1147_v36, %v1136_v21  ;;  %v1215_v38 = vmul.f32 %v1213_v35, %v1211_v24  ;;  %v788_v50 = vmul.f32 %v743_v63, %v2091_v4 }
 0x27c   : >> { %v744_v36 = vperm.slane %v728_v46, 0 }
 0x27d   : >> { %v1133_v6 = vrot.slane %v1132_v49, 1  ;;  %v1170_v33 = vmul.f32 %v1893_v53, %v1149_v54 }
 0x27f   : >> { %v1134_v15 = vadd.f32 %v1133_v6, %v1132_v49  ;;  %v1183_v34 = vadd.f32 %v1181_v12, %v1170_v33  ;;  %v1901_v49 = vpop.eup %1900 }
 0x280   : >> { %v1156_v41 = vpop.permute.xlu1 %1155 }
 0x281   : >> { %v1419_v61 = vsel %vm1418_vm10, %v1417_v58, %v1134_v15  ;;  %v1159_v0 = vmul.f32 %v1156_v41, %v1149_v54  ;;  %v1193_v59 = vmul.f32 %v1190_v40, %v1183_v34  ;;  %v1204_v8 = vmul.f32 %v1895_v14, %v1183_v34  ;;  %v1220_v54 = vpop.permute.xlu0 %1219  ;;  %v1916_v41 = vld [vmem:[%s2227_s30 + $0x8] sm:$0xff] }
 0x282   : >> { %v1432_v57 = vadd.f32 %v1430_v56, %v1419_v61  ;;  %v845_v56 = vmul.f32 1.442695, %v788_v50  ;;  %v790_v15 = vmul.f32 %v744_v36, %v2091_v4  ;;  %v729_v61 = vrot.slane %v1916_v41, 6 }
 0x283   : >> { %v1161_v26 = vsel %vm409_vm0, %v1159_v0, 0.0  ;;  %v1217_v43 = vadd.f32 %v1215_v38, %v1204_v8  ;;  %v1241_v39 = vpop.permute.xlu2 %1240  ;;  %v1195_v60 = vsel %vm409_vm0, %v1193_v59, 0.0 }
 0x284   : >> { %v1434_v20 = vpack.c.bf16 %v1432_v57, %v1432_v57  ;;  %v1162_v11 = vadd.f32 %v1161_v26, %v1160_v22  ;;  %1902 = vpow2.f32 %v845_v56  ;;  %v730_v57 = vrot.slane %v1916_v41, 7 }
 0x285   : >> { %v2570_v52 = vmul.f32 %v1897_v2, %v1217_v43  ;;  %v789_v2 = vmul.f32 %v744_v36, %v2089_v3  ;;  %v745_v9 = vperm.slane %v729_v61, 0  ;;  %v849_v22 = vmul.f32 1.442695, %v790_v15 }
 0x286   : >> { %1439 = vst.msk [vmem:[%s2565_s7] sm:$0xf] %vm1438_vm11, %v1434_v20  ;;  %v1163_v10 = vrot.slane %v1162_v11, 4  ;;  %v1315_v36 = vperm.slane %v2239_v28, 5 }
 0x287   : >> { %v791_v13 = vmul.f32 %v745_v9, %v2089_v3  ;;  %1904 = vpow2.f32 %v849_v22 }
 0x288   : >> { %v1164_v1 = vadd.f32 %v1163_v10, %v1162_v11  ;;  %v847_v10 = vmul.f32 1.442695, %v789_v2 }
 0x289   : >> { %v1186_v21 = vpop.permute.xlu1 %1185 }
 0x28a   : >> { %v1192_v51 = vmul.f32 %v1186_v21, %v2539_v16  ;;  %v1165_v48 = vrot.slane %v1164_v1, 2  ;;  %v1247_v16 = vperm.slane %v2239_v28, 3  ;;  %v1903_v63 = vpop.eup %1902  ;;  %v1281_v21 = vperm.slane %v2239_v28, 4 }
 0x28b   : >> { %v1254_v45 = vpop.permute.xlu2 %1253  ;;  %1906 = vpow2.f32 %v847_v10 }
 0x28c   : >> { %v1194_v19 = vsel %vm409_vm0, %v1192_v51, 0.0  ;;  %v1166_v7 = vadd.f32 %v1165_v48, %v1164_v1  ;;  %v1248_v53 = vmul.f32 %v1247_v16, %v1241_v39  ;;  %v1258_v1 = vpop.permute.xlu0 %1257 }
 0x28d   : >> { %v1196_v58 = vadd.f32 %v1195_v60, %v1194_v19 }
 0x28e   : >> { %v1167_v37 = vrot.slane %v1166_v7, 1 }
 0x28f   : >> { %v1197_v40 = vrot.slane %v1196_v58, 4 }
 0x290   : >> { %v1168_v12 = vadd.f32 %v1167_v37, %v1166_v7 }
 0x291   : >> { %v1198_v17 = vadd.f32 %v1197_v40, %v1196_v58  ;;  %v851_v58 = vmul.f32 1.442695, %v791_v13 }
 0x292   : >> { %v1207_v47 = vpop.permute.xlu1 %1206 }
 0x293   : >> { %v1199_v42 = vrot.slane %v1198_v17, 2  ;;  %v1214_v32 = vmul.f32 %v1213_v35, %v1207_v47  ;;  %v1905_v47 = vpop.eup %1904  ;;  %1908 = vpow2.f32 %v851_v58 }
 0x294   : >> { %v1279_v23 = vpop.permute.xlu2 %1278  ;;  %v1907_v50 = vpop.eup %1906 }
 0x295   : >> { %v1200_v30 = vadd.f32 %v1199_v42, %v1198_v17  ;;  %v1216_v18 = vadd.f32 %v1214_v32, %v2546_v62  ;;  %v1283_v29 = vmul.f32 %v1281_v21, %v1279_v23  ;;  %v792_v23 = vmul.f32 %v745_v9, %v2091_v4 }
 0x297   : >> { %v1201_v55 = vrot.slane %v1200_v30, 1  ;;  %v1237_v24 = vmul.f32 %v1899_v31, %v1216_v18  ;;  %v1226_v14 = vmul.f32 %v1220_v54, %v1216_v18  ;;  %v853_v41 = vmul.f32 1.442695, %v792_v23 }
 0x299   : >> { %v1202_v6 = vadd.f32 %v1201_v55, %v1200_v30  ;;  %v1250_v33 = vadd.f32 %v1248_v53, %v1237_v24  ;;  %v1228_v0 = vsel %vm409_vm0, %v1226_v14, 0.0  ;;  %v1309_v24 = vpop.permute.xlu0 %1308 }
 0x29a   : >> { %v1224_v35 = vpop.permute.xlu1 %1223 }
 0x29b   : >> { %v1420_v62 = vsel %vm1407_vm5, %v1168_v12, %v1202_v6  ;;  %v1227_v34 = vmul.f32 %v1224_v35, %v1217_v43  ;;  %v1271_v38 = vmul.f32 %v1901_v49, %v1250_v33  ;;  %v2589_v43 = vperm.slane %v730_v57, 0  ;;  %v1909_v35 = vpop.eup %1908 }
 0x29c   : >> { %v1292_v11 = vpop.permute.xlu2 %1291  ;;  %v1260_v60 = vmul.f32 %v1254_v45, %v1250_v33  ;;  %v1316_v12 = vmul.f32 %v1315_v36, %v1309_v24  ;;  %v1349_v33 = vperm.slane %v2239_v28, 6 }
 0x29d   : >> { %v1229_v59 = vsel %vm409_vm0, %v1227_v34, 0.0  ;;  %v793_v48 = vmul.f32 %v2589_v43, %v2089_v3 }
 0x29e   : >> { %v1230_v8 = vadd.f32 %v1229_v59, %v1228_v0  ;;  %v1262_v42 = vsel %vm409_vm0, %v1260_v60, 0.0 }
 0x29f   : >> { %v855_v30 = vmul.f32 1.442695, %v793_v48 }
 0x2a0   : >> { %v1231_v26 = vrot.slane %v1230_v8, 4 }
 0x2a1   : >> { %1910 = vpow2.f32 %v855_v30 }
 0x2a2   : >> { %v1232_v20 = vadd.f32 %v1231_v26, %v1230_v8  ;;  %1912 = vpow2.f32 %v853_v41 }
 0x2a3   : >> { %v1245_v39 = vpop.permute.xlu1 %1244 }
 0x2a4   : >> { %v1233_v51 = vrot.slane %v1232_v20, 2  ;;  %v1249_v44 = vmul.f32 %v1247_v16, %v1245_v39 }
 0x2a5   : >> { %v1343_v45 = vpop.permute.xlu2 %1342 }
 0x2a6   : >> { %v1234_v25 = vadd.f32 %v1233_v51, %v1232_v20  ;;  %v1251_v19 = vadd.f32 %v1249_v44, %v2570_v52  ;;  %v1350_v0 = vmul.f32 %v1349_v33, %v1343_v45 }
 0x2a7   : >> { %v1911_v2 = vpop.eup %1910 }
 0x2a8   : >> { %v1235_v40 = vrot.slane %v1234_v25, 1  ;;  %v1261_v7 = vmul.f32 %v1258_v1, %v1251_v19  ;;  %v1272_v17 = vmul.f32 %v1903_v63, %v1251_v19  ;;  %v794_v1 = vmul.f32 %v2589_v43, %v2091_v4  ;;  %v1913_v60 = vpop.eup %1912  ;;  %v1381_v43 = vpop.permute.xlu0 %1380 }
 0x2aa   : >> { %v1236_v46 = vadd.f32 %v1235_v40, %v1234_v25  ;;  %v1263_v32 = vsel %vm409_vm0, %v1261_v7, 0.0  ;;  %v1285_v16 = vadd.f32 %v1283_v29, %v1272_v17  ;;  %v857_v19 = vmul.f32 1.442695, %v794_v1 }
 0x2ab   : >> { %v1264_v31 = vadd.f32 %v1263_v32, %v1262_v42 }
 0x2ac   : >> { %v1421_v52 = vsel %vm1409_vm6, %v1420_v62, %v1236_v46  ;;  %v1275_v37 = vpop.permute.xlu1 %1274  ;;  %v1306_v18 = vmul.f32 %v1905_v47, %v1285_v16  ;;  %v1295_v62 = vmul.f32 %v1292_v11, %v1285_v16  ;;  %1914 = vpow2.f32 %v857_v19 }
 0x2ad   : >> { %v1265_v53 = vrot.slane %v1264_v31, 4  ;;  %v1282_v55 = vmul.f32 %v1281_v21, %v1275_v37 }
 0x2ae   : >> { %v1377_v57 = vpop.permute.xlu2 %1376  ;;  %v1297_v20 = vsel %vm409_vm0, %v1295_v62, 0.0 }
 0x2af   : >> { %v1266_v49 = vadd.f32 %v1265_v53, %v1264_v31  ;;  %v1284_v54 = vadd.f32 %v1282_v55, %v1271_v38  ;;  %v1383_v38 = vperm.slane %v2239_v28, 7 }
 0x2b1   : >> { %v1267_v6 = vrot.slane %v1266_v49, 2  ;;  %v1305_v14 = vmul.f32 %v1907_v50, %v1284_v54  ;;  %v1384_v13 = vmul.f32 %v1383_v38, %v1377_v57  ;;  %v1385_v16 = vmul.f32 %v1383_v38, %v1381_v43 }
 0x2b2   : >> { %v1915_v42 = vpop.eup %1914 }
 0x2b3   : >> { %v1268_v56 = vadd.f32 %v1267_v6, %v1266_v49  ;;  %v1318_v15 = vadd.f32 %v1316_v12, %v1305_v14 }
 0x2b4   : >> { %v1288_v34 = vpop.permute.xlu1 %1287 }
 0x2b5   : >> { %v1269_v61 = vrot.slane %v1268_v56, 1  ;;  %v1339_v59 = vmul.f32 %v1909_v35, %v1318_v15  ;;  %v1294_v8 = vmul.f32 %v1288_v34, %v1284_v54  ;;  %v1390_v34 = vpop.permute.xlu0 %1389 }
 0x2b7   : >> { %v1270_v9 = vadd.f32 %v1269_v61, %v1268_v56  ;;  %v1352_v22 = vadd.f32 %v1350_v0, %v1339_v59  ;;  %v1296_v26 = vsel %vm409_vm0, %v1294_v8, 0.0 }
 0x2b8   : >> { %v1298_v39 = vadd.f32 %v1297_v20, %v1296_v26 }
 0x2b9   : >> { %v1373_v10 = vmul.f32 %v1911_v2, %v1352_v22  ;;  %v1422_v11 = vsel %vm1411_vm7, %v1421_v52, %v1270_v9  ;;  %v1326_v52 = vpop.permute.xlu2 %1325 }
 0x2ba   : >> { %v1299_v63 = vrot.slane %v1298_v39, 4 }
 0x2bb   : >> { %v2608_v6 = vadd.f32 %v1384_v13, %v1373_v10  }
 0x2bc   : >> { %v1300_v28 = vadd.f32 %v1299_v63, %v1298_v39 }
 0x2bd   : >> { %v2657_v21 = vmov %v2608_v6  ;;  %v1313_v51 = vpop.permute.xlu1 %1312 }
 0x2be   : >> { %v1301_v44 = vrot.slane %v1300_v28, 2  ;;  %v1317_v25 = vmul.f32 %v1315_v36, %v1313_v51  ;;  %v1396_v0 = vmul.f32 %v1390_v34, %v2657_v21  ;;  %1441 = vst.msk [vmem:[#allocation2] sm:$0xff] (%p660_p8), %vm409_vm0, %v2657_v21 }
 0x2c0   : >> { %v1302_v48 = vadd.f32 %v1301_v44, %v1300_v28  ;;  %v1319_v58 = vadd.f32 %v1317_v25, %v1306_v18  ;;  %v1398_v9 = vsel %vm409_vm0, %v1396_v0, 0.0 }
 0x2c1   : >> { %v1360_v24 = vpop.permute.xlu2 %1359 }
 0x2c2   : >> { %v1303_v29 = vrot.slane %v1302_v48, 1  ;;  %v1340_v40 = vmul.f32 %v1913_v60, %v1319_v58  ;;  %v1329_v37 = vmul.f32 %v1326_v52, %v1319_v58 }
 0x2c4   : >> { %v1304_v7 = vadd.f32 %v1303_v29, %v1302_v48  ;;  %v1331_v36 = vsel %vm409_vm0, %v1329_v37, 0.0 }
 0x2c6   : >> { %v1423_v17 = vsel %vm458_vm1, %v1422_v11, %v1304_v7  ;;  %v1347_v47 = vpop.permute.xlu1 %1346 }
 0x2c7   : >> { %v1351_v46 = vmul.f32 %v1349_v33, %v1347_v47 }
 0x2c9   : >> { %v1353_v32 = vadd.f32 %v1351_v46, %v1340_v40 }
 0x2cb   : >> { %v1374_v31 = vmul.f32 %v1915_v42, %v1353_v32  ;;  %v1363_v54 = vmul.f32 %v1360_v24, %v1353_v32 }
 0x2cd   : >> { %v1387_v45 = vadd.f32 %v1385_v16, %v1374_v31   ;;  %v1365_v35 = vsel %vm409_vm0, %v1363_v54, 0.0 }
 0x2cf   : >> { %v1322_v30 = vpop.permute.xlu1 %1321  ;;  %v2658_v7 = vmov %v1387_v45  ;;  %1442 = vst.msk [vmem:[#allocation2 + $0x8] sm:$0xff] (%p660_p8), %vm409_vm0, %v1387_v45 }
 0x2d0   : >> { %v1328_v50 = vmul.f32 %v1322_v30, %v1318_v15 }
 0x2d2   : >> { %v1330_v18 = vsel %vm409_vm0, %v1328_v50, 0.0 }
 0x2d3   : >> { %v1332_v53 = vadd.f32 %v1331_v36, %v1330_v18 }
 0x2d5   : >> { %v1333_v55 = vrot.slane %v1332_v53, 4 }
 0x2d7   : >> { %v1334_v49 = vadd.f32 %v1333_v55, %v1332_v53 }
 0x2d8   : >> { %v1356_v23 = vpop.permute.xlu1 %1355 }
 0x2d9   : >> { %v1335_v12 = vrot.slane %v1334_v49, 2  ;;  %v1362_v6 = vmul.f32 %v1356_v23, %v1352_v22 }
 0x2db   : >> { %v1336_v33 = vadd.f32 %v1335_v12, %v1334_v49  ;;  %v1364_v14 = vsel %vm409_vm0, %v1362_v6, 0.0  ;;  %v2659_v6 = vmov %v2657_v21 }
 0x2dc   : >> { %v1366_v56 = vadd.f32 %v1365_v35, %v1364_v14 }
 0x2dd   : >> { %v1337_v62 = vrot.slane %v1336_v33, 1 }
 0x2de   : >> { %v1367_v15 = vrot.slane %v1366_v56, 4 }
 0x2df   : >> { %v1338_v41 = vadd.f32 %v1337_v62, %v1336_v33 }
 0x2e0   : >> { %v1368_v61 = vadd.f32 %v1367_v15, %v1366_v56 }
 0x2e1   : >> { %v1424_v59 = vsel %vm1414_vm8, %v1423_v17, %v1338_v41  ;;  %v1394_v8 = vpop.permute.xlu1 %1393 }
 0x2e2   : >> { %v1369_v2 = vrot.slane %v1368_v61, 2  ;;  %v1397_v38 = vmul.f32 %v1394_v8, %v1387_v45 }
 0x2e4   : >> { %v1370_v57 = vadd.f32 %v1369_v2, %v1368_v61  ;;  %v1399_v22 = vsel %vm409_vm0, %v1397_v38, 0.0 }
 0x2e5   : >> { %v1400_v26 = vadd.f32 %v1399_v22, %v1398_v9 }
 0x2e6   : >> { %v1371_v20 = vrot.slane %v1370_v57, 1 }
 0x2e7   : >> { %v1401_v39 = vrot.slane %v1400_v26, 4 }
 0x2e8   : >> { %v1372_v10 = vadd.f32 %v1371_v20, %v1370_v57 }
 0x2e9   : >> { %v1402_v13 = vadd.f32 %v1401_v39, %v1400_v26 }
 0x2ea   : >> { %v1425_v11 = vsel %vm1416_vm9, %v1424_v59, %v1372_v10 }
 0x2eb   : >> { %v1403_v63 = vrot.slane %v1402_v13, 2 }
 0x2ed   : >> { %v1404_v1 = vadd.f32 %v1403_v63, %v1402_v13 }
 0x2ef   : >> { %v1405_v28 = vrot.slane %v1404_v1, 1 }
 0x2f1   : >> { %v1406_v51 = vadd.f32 %v1405_v28, %v1404_v1 }
 0x2f3   : >> { %v1426_v44 = vsel %vm1418_vm10, %v1425_v11, %v1406_v51 }
 0x2f4   : >> { %v1433_v25 = vadd.f32 %v2236_v27, %v1426_v44  ;;  %662 = sbr.rel (!%p660_p8) target bundleno = 208 (0xd0), region = 104 }
 0x2f6   : >> { %v1435_v19 = vpack.c.bf16 %v1433_v25, %v1433_v25 }
 0x2f8   : >> { %1440 = vst.msk [vmem:[%s2565_s7 + $0x4] sm:$0xf] %vm1438_vm11, %v1435_v19 }
 0x2f9 PF: > { %s16_s25 = sadd.s32 1, %s1967_s25   ;;  %s2660_s21 = smov %s1959_s23 }
 0x2fa   : > { %p13_p9 = scmp.ge.s32.totalorder %s16_s25, 6   ;;  %s2661_s22 = smov %s1963_s24 }
 0x2fb   : > { %s2662_s23 = smov %s2665_s26  ;;  %s2663_s24 = smov %s2669_s27 }
 0x2fc   :  { %15 = sbr.rel (!%p13_p9) target bundleno = 3 (0x3), region = 115 }

// kernel: vss_block_forward.9
= control target key start
LH: loop header
LB: loop body
LE: loop exit
PB: predicated region body
PF: predicated region fallthrough
CT: control target
= control target key end

     0   :  { %s1575_s30 = smov 0   ;;  %s1577_s10 = smov 0   ;;  %s2144_s0 = inlined_call_operand.vmem [shape: bf16[2,2,64,8], index: 0, kind: input, shape index: {}]   ;;  %s2145_s1 = inlined_call_operand.vmem [shape: bf16[2,2,64,8], index: 1, kind: input, shape index: {}]   ;;  %s2146_s2 = inlined_call_operand.vmem [shape: bf16[2,64,8], index: 2, kind: input, shape index: {}]   ;;  %s2147_s3 = inlined_call_operand.vmem [shape: bf16[2,64,8], index: 3, kind: input, shape index: {}]   ;;  %s2148_s4 = inlined_call_operand.vmem [shape: bf16[2,64,8], index: 4, kind: input, shape index: {}]   ;;  %s2149_s5 = inlined_call_operand.vmem [shape: f32[1,8], index: 5, kind: input, shape index: {}]   ;;  %s2150_s6 = inlined_call_operand.vmem [shape: f32[1,8], index: 6, kind: input, shape index: {}]   ;;  %s2151_s7 = inlined_call_operand.vmem [shape: bf16[8,4], index: 7, kind: input, shape index: {}]   ;;  %s2152_s8 = inlined_call_operand.vmem [shape: f32[2,64,4], index: 8, kind: input, shape index: {}]   ;;  %s2153_s9 = inlined_call_operand.vmem [shape: f32[2,64,4], index: 9, kind: output, shape index: {}]  }
   0x1   :  { %s1579_s11 = smov 0  }
   0x2 LB: > { %s31_s12 = sadd.s32 1, %s1518_s10  ;;  %p1289_p0 = scmp.ge.s32.totalorder %s1522_s11, 1  ;;  %s1522_s11 = sphi %s1579_s11, %s19_s11   ;;  %s1518_s10 = sphi %s1577_s10, %s2183_s10   ;;  %s1514_s30 = sphi %s1575_s30, %s2182_s30  }
   0x3   : > { %p33_p1 = scmp.ge.s32.totalorder %s31_s12, 2  ;;  %p393_p2 = scmp.lt.s32.totalorder %s1522_s11, 3 }
   0x5   : > { %s2185_s12 = smov (%p33_p1, %s31_s12), 0  ;;  %p394_p3 = pnand %p1289_p0, %p393_p2 }
   0x6   : > { %p483_p4 = scmp.lt.s32.totalorder (!%p394_p3), %s1514_s30, 1 }
   0x7   : > { %397 = sbr.rel (%p394_p3) target bundleno = 465 (0x1d1), region = 56 }
   0xc   : > { %s2187_s30 = smov (!%p483_p4, %s1514_s30), 1  ;;  %vm641_vm0 = vcmask 64512   ;;  %vm1058_vm15 = vcmask 1043456  }
   0xd   : > { %s1593_s13 = sshll.u32 %s2187_s30, 6  ;;  %s1595_s14 = sshll.u32 %s2187_s30, 5 }
   0xe   : > { %s1601_s17 = scalar_lea.vmem %s2144_s0, %s1593_s13  ;;  %s1607_s20 = scalar_lea.vmem %s2145_s1, %s1593_s13 }
   0xf   : > { %s1613_s23 = scalar_lea.vmem %s2146_s2, %s1595_s14  ;;  %s1619_s26 = scalar_lea.vmem %s2147_s3, %s1595_s14  ;;  %v1407_v0 = vld [vmem:[%s1601_s17 + $0x18] sm:$0xff]   ;;  %v1406_v2 = vld [vmem:[%s1601_s17 + $0x10] sm:$0xff]   ;;  %v1326_v15 = vld [vmem:[%s1601_s17] sm:$0xff]  }
  0x10   : > { %v1410_v1 = vld [vmem:[%s1607_s20 + $0x18] sm:$0xff]   ;;  %v1339_v3 = vunpack.c.l.bf16 %v1407_v0  ;;  %v1335_v7 = vunpack.c.l.bf16 %v1406_v2  ;;  %v1409_v8 = vld [vmem:[%s1607_s20 + $0x10] sm:$0xff]   ;;  %v1340_v9 = vunpack.c.h.bf16 %v1407_v0  ;;  %v1327_v20 = vunpack.c.l.bf16 %v1326_v15  ;;  %v1342_v21 = vld [vmem:[%s1607_s20] sm:$0xff]   ;;  %s530_s29 = scalar_lea.vmem %s2148_s4, %s1595_s14  ;;  %s2103_s21 = scalar_lea.vmem %s2152_s8, %s1593_s13 }
  0x11   : > { %v1355_v4 = vunpack.c.l.bf16 %v1410_v1  ;;  %v1413_v5 = vld [vmem:[%s1613_s23 + $0x18] sm:$0xff]   ;;  %v1351_v12 = vunpack.c.l.bf16 %v1409_v8  ;;  %v1412_v13 = vld [vmem:[%s1613_s23 + $0x10] sm:$0xff]   ;;  %v1356_v16 = vunpack.c.h.bf16 %v1410_v1  ;;  %v1358_v22 = vld [vmem:[%s1613_s23] sm:$0xff]   ;;  %v1343_v25 = vunpack.c.l.bf16 %v1342_v21  ;;  %s2111_s24 = scalar_lea.vmem %s2153_s9, %s1593_s13 }
  0x12   : > { %v1416_v6 = vld [vmem:[%s1619_s26 + $0x18] sm:$0xff]   ;;  %v1371_v10 = vunpack.c.l.bf16 %v1413_v5  ;;  %v1415_v14 = vld [vmem:[%s1619_s26 + $0x10] sm:$0xff]   ;;  %v1367_v18 = vunpack.c.l.bf16 %v1412_v13  ;;  %v1374_v23 = vld [vmem:[%s1619_s26] sm:$0xff]   ;;  %v1359_v26 = vunpack.c.l.bf16 %v1358_v22  ;;  %v1372_v30 = vunpack.c.h.bf16 %v1413_v5 }
  0x13   : > { %v1387_v11 = vunpack.c.l.bf16 %v1416_v6  ;;  %v591_v17 = vadd.f32 %v1355_v4, %v1339_v3  ;;  %v1383_v19 = vunpack.c.l.bf16 %v1415_v14  ;;  %v589_v24 = vadd.f32 %v1351_v12, %v1335_v7  ;;  %v1405_v44 = vld [vmem:[%s1601_s17 + $0x8] sm:$0xff]  }
  0x14   : > { %v1375_v27 = vunpack.c.l.bf16 %v1374_v23  ;;  %v592_v29 = vadd.f32 %v1356_v16, %v1340_v9  ;;  %v1388_v31 = vunpack.c.h.bf16 %v1416_v6  ;;  %v585_v33 = vadd.f32 %v1343_v25, %v1327_v20  ;;  %v1408_v45 = vld [vmem:[%s1607_s20 + $0x8] sm:$0xff]  }
  0x15   : > { %v615_v28 = vadd.f32 %v1371_v10, %v591_v17  ;;  %v613_v32 = vadd.f32 %v1367_v18, %v589_v24  ;;  %v1336_v34 = vunpack.c.h.bf16 %v1406_v2  ;;  %v1352_v35 = vunpack.c.h.bf16 %v1409_v8  ;;  %v1411_v49 = vld [vmem:[%s1613_s23 + $0x8] sm:$0xff]  }
  0x16   : > { %v616_v37 = vadd.f32 %v1372_v30, %v592_v29  ;;  %v1368_v38 = vunpack.c.h.bf16 %v1412_v13  ;;  %v1384_v39 = vunpack.c.h.bf16 %v1415_v14  ;;  %v609_v41 = vadd.f32 %v1359_v26, %v585_v33  ;;  %v1414_v63 = vld [vmem:[%s1619_s26 + $0x8] sm:$0xff]  }
  0x17   : > { %v1633_v36 = vadd.f32 %v1387_v11, %v615_v28  ;;  %v1635_v40 = vadd.f32 %v1383_v19, %v613_v32  ;;  %v590_v42 = vadd.f32 %v1352_v35, %v1336_v34  ;;  %v1328_v43 = vunpack.c.h.bf16 %v1326_v15 }
  0x18   : > { %v1344_v47 = vunpack.c.h.bf16 %v1342_v21  ;;  %v1360_v48 = vunpack.c.h.bf16 %v1358_v22  ;;  %v1644_v51 = vadd.f32 %v1375_v27, %v609_v41  ;;  %v640_v52 = vadd.f32 %v1388_v31, %v616_v37 }
  0x19   : > { %v660_v46 = vsel %vm641_vm0, %v1633_v36, 0.0  ;;  %v654_v50 = vsel %vm641_vm0, %v1635_v40, 0.0  ;;  %v614_v53 = vadd.f32 %v1368_v38, %v590_v42  ;;  %v1376_v55 = vunpack.c.h.bf16 %v1374_v23 }
  0x1a   : > { %661 = vadd.xlane.f32.xlu1 %v660_v46  ;;  %655 = vadd.xlane.f32.xlu0 %v654_v50  ;;  %v586_v54 = vadd.f32 %v1344_v47, %v1328_v43  ;;  %v1331_v56 = vunpack.c.l.bf16 %v1405_v44  ;;  %v1347_v57 = vunpack.c.l.bf16 %v1408_v45  ;;  %v642_v58 = vsel %vm641_vm0, %v1644_v51, 0.0 }
  0x1b   : > { %v638_v59 = vadd.f32 %v1384_v39, %v614_v53  ;;  %v1363_v60 = vunpack.c.l.bf16 %v1411_v49  ;;  %643 = vadd.xlane.f32.xlu2 %v642_v58  ;;  %v1332_v0 = vunpack.c.h.bf16 %v1405_v44  ;;  %v1348_v1 = vunpack.c.h.bf16 %v1408_v45 }
  0x1c   : > { %v610_v61 = vadd.f32 %v1360_v48, %v586_v54  ;;  %v587_v62 = vadd.f32 %v1347_v57, %v1331_v56  ;;  %v1364_v2 = vunpack.c.h.bf16 %v1411_v49  ;;  %v663_v3 = vsel %vm641_vm0, %v640_v52, 0.0 }
  0x1d   : > { %v588_v5 = vadd.f32 %v1348_v1, %v1332_v0  ;;  %v1380_v6 = vunpack.c.h.bf16 %v1414_v63  ;;  %v657_v7 = vsel %vm641_vm0, %v638_v59, 0.0  ;;  %v1379_v9 = vunpack.c.l.bf16 %v1414_v63  ;;  %v1711_v63 = vld [vmem:[%s530_s29 + $0x10] sm:$0xff]   ;;  %v1713_v0 = vld [vmem:[%s530_s29 + $0x18] sm:$0xff]  }
  0x1e   : > { %v634_v4 = vadd.f32 %v1376_v55, %v610_v61  ;;  %v611_v8 = vadd.f32 %v1363_v60, %v587_v62  ;;  %v1524_v16 = vmov 8.0   ;;  %v1399_v1 = vunpack.c.l.bf16 %v1711_v63 }
  0x1f   : > { %v612_v10 = vadd.f32 %v1364_v2, %v588_v5  ;;  %1450 = vrcp.f32 %v1524_v16  ;;  %v1403_v2 = vunpack.c.l.bf16 %v1713_v0  ;;  %v1400_v5 = vunpack.c.h.bf16 %v1711_v63 }
  0x20   : > { %v645_v11 = vsel %vm641_vm0, %v634_v4, 0.0  ;;  %v635_v13 = vadd.f32 %v1379_v9, %v611_v8 }
  0x21   : > { %v636_v12 = vadd.f32 %v1380_v6, %v612_v10  ;;  %v1404_v6 = vunpack.c.h.bf16 %v1713_v0  ;;  %v1309_v8 = vmul.f32 -1.442695, %v1400_v5 }
  0x22   : > { %664 = vadd.xlane.f32.xlu1 %v663_v3  ;;  %658 = vadd.xlane.f32.xlu0 %v657_v7  ;;  %v648_v15 = vsel %vm641_vm0, %v635_v13, 0.0  ;;  %v1308_v3 = vmul.f32 -1.442695, %v1399_v1 }
  0x23   : > { %646 = vadd.xlane.f32.xlu2 %v645_v11  ;;  %v651_v14 = vsel %vm641_vm0, %v636_v12, 0.0  ;;  %v1311_v9 = vmul.f32 -1.442695, %v1404_v6 }
  0x24   : > { %1452 = vpow2.f32 %v1308_v3 }
  0x25   : > { %v1451_v17 = vpop.eup %1450 }
  0x26   : > { %v667_v18 = vmul.f32 8.0, %v1451_v17  ;;  %vm671_vm1 = vweird.f32 %v1451_v17 }
  0x28   : > { %v668_v19 = vsub.f32 1.0, %v667_v18 }
  0x2a   : > { %652 = vadd.xlane.f32.xlu1 %v651_v14  ;;  %649 = vadd.xlane.f32.xlu0 %v648_v15  ;;  %v669_v20 = vmul.f32 %v1451_v17, %v668_v19  ;;  %v1453_v7 = vpop.eup %1452 }
  0x2b   : > { %v893_v11 = vadd.f32 1.0, %v1453_v7 }
  0x2c   : > { %v670_v21 = vadd.f32 %v1451_v17, %v669_v20 }
  0x2d   : > { %vm962_vm2 = vweird.f32 %v893_v11 }
  0x2e   : > { %v1654_v22 = vsel %vm671_vm1, %v1451_v17, %v670_v21  ;;  %v1742_v21 = vld [vmem:[%s530_s29 + $0x8] sm:$0xff]  }
  0x8d   : > { %v662_v23 = vpop.xlane.xlu1 %661  ;;  %v656_v25 = vpop.xlane.xlu0 %655 }
  0x8e   : > { %v679_v24 = vmul.f32 %v1654_v22, %v662_v23  ;;  %v677_v26 = vmul.f32 %v1654_v22, %v656_v25  ;;  %v644_v28 = vpop.xlane.xlu2 %643 }
  0x8f   : > { %v673_v37 = vmul.f32 %v1654_v22, %v644_v28 }
  0x90   : > { %v1659_v27 = vsub.f32 %v1633_v36, %v679_v24  ;;  %v1662_v29 = vsub.f32 %v1635_v40, %v677_v26 }
  0x91   : > { %v1681_v44 = vsub.f32 %v1644_v51, %v673_v37 }
  0x92   : > { %v695_v30 = vmul.f32 %v1659_v27, %v1659_v27  ;;  %v693_v31 = vmul.f32 %v1662_v29, %v1662_v29 }
  0x93   : > { %v689_v55 = vmul.f32 %v1681_v44, %v1681_v44 }
  0x94   : > { %v715_v32 = vsel %vm641_vm0, %v695_v30, 0.0  ;;  %v709_v34 = vsel %vm641_vm0, %v693_v31, 0.0  ;;  %v1395_v31 = vunpack.c.l.bf16 %v1742_v21 }
  0x95   : > { %v665_v33 = vpop.xlane.xlu1 %664  ;;  %716 = vadd.xlane.f32.xlu1 %v715_v32  ;;  %v659_v36 = vpop.xlane.xlu0 %658  ;;  %710 = vadd.xlane.f32.xlu2 %v709_v34 }
  0x96   : > { %v680_v35 = vmul.f32 %v1654_v22, %v665_v33  ;;  %v678_v38 = vmul.f32 %v1654_v22, %v659_v36  ;;  %v647_v40 = vpop.xlane.xlu2 %646 }
  0x97   : > { %v674_v42 = vmul.f32 %v1654_v22, %v647_v40 }
  0x98   : > { %v1673_v39 = vsub.f32 %v640_v52, %v680_v35  ;;  %v1675_v41 = vsub.f32 %v638_v59, %v678_v38  ;;  %v697_v59 = vsel %vm641_vm0, %v689_v55, 0.0  ;;  %v1306_v35 = vmul.f32 -1.442695, %v1395_v31 }
  0x99   : > { %v1683_v45 = vsub.f32 %v634_v4, %v674_v42  ;;  %v1310_v4 = vmul.f32 -1.442695, %v1403_v2  ;;  %v968_v42 = vand.u32 2147483648, %v893_v11 }
  0x9a   : > { %v696_v43 = vmul.f32 %v1673_v39, %v1673_v39  ;;  %v694_v46 = vmul.f32 %v1675_v41, %v1675_v41 }
  0x9b   : > { %v690_v49 = vmul.f32 %v1683_v45, %v1683_v45  ;;  %1454 = vpow2.f32 %v1310_v4 }
  0x9c   : > { %v718_v47 = vsel %vm641_vm0, %v696_v43, 0.0  ;;  %v712_v48 = vsel %vm641_vm0, %v694_v46, 0.0  ;;  %1456 = vpow2.f32 %v1309_v8 }
  0x9d   : > { %v653_v50 = vpop.xlane.xlu1 %652  ;;  %713 = vadd.xlane.f32.xlu0 %v712_v48  ;;  %v650_v52 = vpop.xlane.xlu0 %649  ;;  %719 = vadd.xlane.f32.xlu2 %v718_v47  ;;  %v700_v53 = vsel %vm641_vm0, %v690_v49, 0.0  ;;  %1458 = vrcp.f32 %v893_v11  ;;  %v966_v47 = vand.u32 2147483647, %v893_v11 }
  0x9e   : > { %v675_v51 = vmul.f32 %v1654_v22, %v650_v52  ;;  %v676_v54 = vmul.f32 %v1654_v22, %v653_v50  ;;  %701 = vadd.xlane.f32.xlu1 %v700_v53  ;;  %1460 = vpow2.f32 %v1311_v9  ;;  %v969_v9 = vor.u32 1.1754944e-38, %v968_v42 }
  0x9f   : > { %vm1794_vm8 = vcmp.eq.f32.partialorder %v966_v47, 8.507059e+37 }
  0xa0   : > { %v1696_v56 = vsub.f32 %v635_v13, %v675_v51  ;;  %v1698_v57 = vsub.f32 %v636_v12, %v676_v54  ;;  %v1727_v12 = vld [vmem:[%s530_s29] sm:$0xff]  }
  0xa1   : > { %v1455_v10 = vpop.eup %1454  ;;  %v1392_v14 = vunpack.c.h.bf16 %v1727_v12  ;;  %v1391_v15 = vunpack.c.l.bf16 %v1727_v12 }
  0xa2   : > { %v691_v58 = vmul.f32 %v1696_v56, %v1696_v56  ;;  %v692_v61 = vmul.f32 %v1698_v57, %v1698_v57  ;;  %v1729_v13 = vadd.f32 1.0, %v1455_v10  ;;  %v1457_v16 = vpop.eup %1456 }
  0xa3   : > { %v1304_v17 = vmul.f32 -1.442695, %v1391_v15  ;;  %v1305_v18 = vmul.f32 -1.442695, %v1392_v14  ;;  %v1738_v19 = vpop.eup %1458  ;;  %v1740_v20 = vadd.f32 1.0, %v1457_v16 }
  0xa4   : > { %v703_v60 = vsel %vm641_vm0, %v691_v58, 0.0  ;;  %v706_v62 = vsel %vm641_vm0, %v692_v61, 0.0  ;;  %1462 = vrcp.f32 %v1729_v13  ;;  %v1461_v23 = vpop.eup %1460  ;;  %v958_v24 = vmul.f32 %v1738_v19, %v893_v11 }
  0xa5   : > { %704 = vadd.xlane.f32.xlu2 %v703_v60  ;;  %698 = vadd.xlane.f32.xlu0 %v697_v59  ;;  %1464 = vpow2.f32 %v1304_v17  ;;  %v1748_v26 = vadd.f32 1.0, %v1461_v23  ;;  %vm963_vm3 = vweird.f32 %v1738_v19  ;;  %vm992_vm4 = vweird.f32 %v1729_v13 }
  0xa6   : > { %1466 = vrcp.f32 %v1740_v20  ;;  %v959_v28 = vsub.f32 1.0, %v958_v24  ;;  %vm1770_vm6 = vmor %vm962_vm2, %vm963_vm3  ;;  %v998_v52 = vand.u32 2147483648, %v1729_v13  ;;  %v996_v55 = vand.u32 2147483647, %v1729_v13 }
  0xa7   : > { %1468 = vpow2.f32 %v1305_v18  ;;  %vm977_vm9 = vweird.f32 %v1740_v20  ;;  %v983_v24 = vand.u32 2147483648, %v1740_v20  ;;  %vm1007_vm12 = vweird.f32 %v1748_v26 }
  0xa8   : > { %1470 = vrcp.f32 %v1748_v26  ;;  %v960_v32 = vmul.f32 %v1738_v19, %v959_v28  ;;  %v999_v11 = vor.u32 1.1754944e-38, %v998_v52  ;;  %vm1807_vm11 = vcmp.eq.f32.partialorder %v996_v55, 8.507059e+37 }
  0xa9   : > { %1472 = vpow2.f32 %v1306_v35  ;;  %v1013_v35 = vand.u32 2147483648, %v1748_v26  ;;  %v984_v52 = vor.u32 1.1754944e-38, %v983_v24 }
  0xaa   : > { %v1745_v25 = vpop.eup %1462  ;;  %v961_v40 = vadd.f32 %v1738_v19, %v960_v32  ;;  %v981_v32 = vand.u32 2147483647, %v1740_v20 }
  0xab   : > { %v988_v30 = vmul.f32 %v1745_v25, %v1729_v13  ;;  %v1465_v34 = vpop.eup %1464  ;;  %vm993_vm5 = vweird.f32 %v1745_v25 }
  0xac   : > { %v1757_v36 = vpop.eup %1466  ;;  %v1768_v48 = vadd.f32 1.0, %v1465_v34  ;;  %vm1784_vm7 = vmor %vm992_vm4, %vm993_vm5  ;;  %v965_v7 = vsel %vm1770_vm6, %v1738_v19, %v961_v40  ;;  %v1011_v40 = vand.u32 2147483647, %v1748_v26  ;;  %vm1856_vm2 = vcmp.eq.f32.partialorder %v981_v32, 8.507059e+37 }
  0xad   : > { %707 = vadd.xlane.f32.xlu0 %v706_v62  ;;  %v989_v33 = vsub.f32 1.0, %v988_v30  ;;  %v1469_v38 = vpop.eup %1468  ;;  %v973_v43 = vmul.f32 %v1757_v36, %v1740_v20  ;;  %vm978_vm10 = vweird.f32 %v1757_v36 }
  0xae   : > { %v1764_v46 = vpop.eup %1470  ;;  %1474 = vrcp.f32 %v1768_v48  ;;  %v1788_v3 = vadd.f32 1.0, %v1469_v38  ;;  %vm1825_vm13 = vmor %vm977_vm9, %vm978_vm10  ;;  %vm1012_vm3 = vcmp.eq.f32.partialorder %v1011_v40, 8.507059e+37  ;;  %vm902_vm6 = vweird.f32 %v1768_v48 }
  0xaf   : > { %v990_v37 = vmul.f32 %v1745_v25, %v989_v33  ;;  %v974_v50 = vsub.f32 1.0, %v973_v43  ;;  %v1003_v51 = vmul.f32 %v1764_v46, %v1748_v26  ;;  %v1812_v19 = vpop.eup %1472  ;;  %v1396_v33 = vunpack.c.h.bf16 %v1742_v21 }
  0xb0   : > { %vm1008_vm14 = vweird.f32 %v1764_v46 }
  0xb1   : > { %v991_v54 = vadd.f32 %v1745_v25, %v990_v37  ;;  %v975_v60 = vmul.f32 %v1757_v36, %v974_v50  ;;  %v1004_v62 = vsub.f32 1.0, %v1003_v51  ;;  %v1045_v37 = vld [vmem:[%s2151_s7] sm:$0xf]  ;;  %vm1840_vm1 = vmor %vm1007_vm12, %vm1008_vm14  ;;  %v1871_v61 = vmul.f32 -1.442695, %v1396_v33 }
  0xb2   : > { %v1060_v49 = vsel %vm1058_vm15, %v1045_v37, 0  ;;  %vm917_vm15 = vweird.f32 %v1788_v3 }
  0xb3   : > { %v995_v16 = vsel %vm1784_vm7, %v1745_v25, %v991_v54  ;;  %v1005_v18 = vmul.f32 %v1764_v46, %v1004_v62  ;;  %v976_v23 = vadd.f32 %v1757_v36, %v975_v60  ;;  %v970_v25 = vsel %vm1794_vm8, %v969_v9, %v965_v7  ;;  %1421 = vmatpush.bf16.msra.mxu2 %v1060_v49 }
  0xb4   : > { %v1818_v28 = vpop.eup %1474  ;;  %v1000_v38 = vsel %vm1807_vm11, %v999_v11, %v995_v16  ;;  %v1852_v51 = vmul.f32 %v1399_v1, %v970_v25  ;;  %1422 = vmatpush.bf16.msra.mxu3 %v1060_v49  ;;  %v1014_v1 = vor.u32 1.1754944e-38, %v1013_v35  ;;  %1069 = vmatpush.bf16.msra.mxu0 %v1060_v49 }
  0xb5   : > { %v1006_v34 = vadd.f32 %v1764_v46, %v1005_v18  ;;  %v898_v42 = vmul.f32 %v1818_v28, %v1768_v48  ;;  %v980_v50 = vsel %vm1825_vm13, %v1757_v36, %v976_v23  ;;  %v1867_v60 = vmul.f32 %v1403_v2, %v1000_v38  ;;  %1420 = vmatpush.bf16.msra.mxu1 %v1060_v49 }
  0xb6   : > { %v985_v11 = vsel %vm1856_vm2, %v984_v52, %v980_v50  ;;  %vm903_vm7 = vweird.f32 %v1818_v28 }
  0xb7   : > { %v899_v55 = vsub.f32 1.0, %v898_v42  ;;  %v1010_v36 = vsel %vm1840_vm1, %v1764_v46, %v1006_v34  ;;  %v1903_v35 = vmul.f32 %v1400_v5, %v985_v11  ;;  %vm1919_vm10 = vmor %vm902_vm6, %vm903_vm7  ;;  %v906_v5 = vand.u32 2147483647, %v1768_v48 }
  0xb8   : > { %v1015_v24 = vsel %vm1012_vm3, %v1014_v1, %v1010_v36 }
  0xb9   : > { %v900_v18 = vmul.f32 %v1818_v28, %v899_v55  ;;  %vm1976_vm3 = vcmp.eq.f32.partialorder %v906_v5, 8.507059e+37 }
  0xbb   : > { %v1910_v42 = vadd.f32 %v1818_v28, %v900_v18 }
  0xbd   : > { %v905_v1 = vsel %vm1919_vm10, %v1818_v28, %v1910_v42 }
 0x108   : > { %v717_v53 = vpop.xlane.xlu1 %716  ;;  %v711_v59 = vpop.xlane.xlu2 %710 }
 0x109   : > { %v727_v58 = vmul.f32 %v717_v53, %v1654_v22  ;;  %v725_v4 = vmul.f32 %v711_v59, %v1654_v22 }
 0x10b   : > { %v1798_v10 = vadd.f32 1e-05, %v727_v58  ;;  %v1802_v13 = vadd.f32 1e-05, %v725_v4 }
 0x10d   : > { %1476 = vrsqrt.f32 %v1798_v10  ;;  %vm803_vm4 = vweird.f32 %v1798_v10  ;;  %vm783_vm5 = vweird.f32 %v1802_v13 }
 0x10e   : > { %1478 = vrsqrt.f32 %v1802_v13 }
 0x10f   : > { %1480 = vrcp.f32 %v1788_v3 }
 0x110   : > { %v714_v43 = vpop.xlane.xlu0 %713  ;;  %v720_v47 = vpop.xlane.xlu2 %719 }
 0x111   : > { %v726_v53 = vmul.f32 %v714_v43, %v1654_v22  ;;  %v728_v54 = vmul.f32 %v720_v47, %v1654_v22  ;;  %v702_v59 = vpop.xlane.xlu1 %701  ;;  %v1915_v47 = vmul.f32 %v1404_v6, %v1015_v24  ;;  %v908_v6 = vand.u32 2147483648, %v1768_v48 }
 0x112   : > { %v722_v46 = vmul.f32 %v702_v59, %v1654_v22 }
 0x113   : > { %v1860_v58 = vpop.eup %1476  ;;  %v1877_v7 = vadd.f32 1e-05, %v726_v53  ;;  %v1885_v9 = vadd.f32 1e-05, %v728_v54  ;;  %v909_v18 = vor.u32 1.1754944e-38, %v908_v6 }
 0x114   : > { %v1873_v62 = vpop.eup %1478  ;;  %v798_v4 = vmul.f32 %v1860_v58, %v1798_v10  ;;  %v1891_v17 = vadd.f32 1e-05, %v722_v46  ;;  %vm804_vm8 = vweird.f32 %v1860_v58 }
 0x115   : > { %v1880_v8 = vpop.eup %1480  ;;  %v778_v2 = vmul.f32 %v1873_v62, %v1802_v13  ;;  %1482 = vrsqrt.f32 %v1877_v7  ;;  %vm784_vm9 = vweird.f32 %v1873_v62  ;;  %vm793_vm11 = vweird.f32 %v1877_v7  ;;  %vm1939_vm14 = vmor %vm803_vm4, %vm804_vm8  ;;  %v1969_v13 = vld [vmem:[%s2149_s5] ss:$0 sm:$0xff] }
 0x116   : > { %v799_v16 = vmul.f32 %v1860_v58, %v798_v4  ;;  %1484 = vrsqrt.f32 %v1885_v9  ;;  %v913_v37 = vmul.f32 %v1880_v8, %v1788_v3  ;;  %vm753_vm12 = vweird.f32 %v1891_v17  ;;  %vm785_vm1 = vmor %vm783_vm5, %vm784_vm9 }
 0x117   : > { %v779_v23 = vmul.f32 %v1873_v62, %v778_v2  ;;  %1486 = vrsqrt.f32 %v1891_v17  ;;  %vm813_vm13 = vweird.f32 %v1885_v9  ;;  %vm918_vm2 = vweird.f32 %v1880_v8 }
 0x118   : > { %v800_v25 = vmul.f32 0.5, %v799_v16  ;;  %v699_v32 = vpop.xlane.xlu0 %698  ;;  %v705_v34 = vpop.xlane.xlu2 %704  ;;  %v914_v59 = vsub.f32 1.0, %v913_v37 }
 0x119   : > { %v780_v30 = vmul.f32 0.5, %v779_v23  ;;  %v721_v20 = vmul.f32 %v699_v32, %v1654_v22  ;;  %v723_v40 = vmul.f32 %v705_v34, %v1654_v22 }
 0x11a   : > { %v801_v38 = vsub.f32 1.5, %v800_v25  ;;  %v891_v25 = vadd.f32 1.0, %v1812_v19 }
 0x11b   : > { %v781_v43 = vsub.f32 1.5, %v780_v30  ;;  %v1924_v49 = vpop.eup %1482  ;;  %v1930_v0 = vadd.f32 1e-05, %v721_v20  ;;  %v1946_v55 = vadd.f32 1e-05, %v723_v40  ;;  %v915_v30 = vmul.f32 %v1880_v8, %v914_v59 }
 0x11c   : > { %v802_v50 = vmul.f32 %v1860_v58, %v801_v38  ;;  %v1933_v52 = vpop.eup %1484  ;;  %v788_v26 = vmul.f32 %v1924_v49, %v1877_v7  ;;  %vm794_vm4 = vweird.f32 %v1924_v49  ;;  %v1988_v20 = vld [vmem:[%s2150_s6] ss:$0 sm:$0xff] }
 0x11d   : > { %v782_v54 = vmul.f32 %v1873_v62, %v781_v43  ;;  %v1487_v48 = vpop.eup %1486  ;;  %v808_v10 = vmul.f32 %v1933_v52, %v1885_v9  ;;  %1488 = vrsqrt.f32 %v1930_v0  ;;  %vm814_vm6 = vweird.f32 %v1933_v52  ;;  %vm795_vm7 = vmor %vm793_vm11, %vm794_vm4 }
 0x11e   : > { %v806_v36 = vsel %vm1939_vm14, %v1860_v58, %v802_v50  ;;  %v789_v46 = vmul.f32 %v1924_v49, %v788_v26  ;;  %v748_v58 = vmul.f32 %v1487_v48, %v1891_v17  ;;  %1490 = vrsqrt.f32 %v1946_v55  ;;  %vm815_vm11 = vmor %vm813_vm13, %vm814_vm6 }
 0x11f   : > { %v786_v4 = vsel %vm785_vm1, %v1873_v62, %v782_v54  ;;  %v823_v2 = vmul.f32 %v806_v36, %v1659_v27  ;;  %v809_v16 = vmul.f32 %v1933_v52, %v808_v10  ;;  %vm754_vm5 = vweird.f32 %v1487_v48 }
 0x120   : > { %v821_v11 = vmul.f32 %v786_v4, %v1662_v29  ;;  %v790_v23 = vmul.f32 0.5, %v789_v46  ;;  %v749_v62 = vmul.f32 %v1487_v48, %v748_v58  ;;  %v708_v24 = vpop.xlane.xlu0 %707  ;;  %v921_v29 = vand.u32 2147483647, %v1788_v3  ;;  %vm2003_vm8 = vmor %vm753_vm12, %vm754_vm5 }
 0x121   : > { %v810_v32 = vmul.f32 0.5, %v809_v16  ;;  %v724_v27 = vmul.f32 %v708_v24, %v1654_v22  ;;  %v835_v22 = vmul.f32 %v1969_v13, %v823_v2  ;;  %v923_v54 = vand.u32 2147483648, %v1788_v3  ;;  %vm2031_vm12 = vmor %vm917_vm15, %vm918_vm2 }
 0x122   : > { %v791_v34 = vsub.f32 1.5, %v790_v23  ;;  %v750_v37 = vmul.f32 0.5, %v749_v62  ;;  %v833_v38 = vmul.f32 %v1969_v13, %v821_v11  ;;  %v916_v36 = vadd.f32 %v1880_v8, %v915_v30 }
 0x123   : > { %v1489_v40 = vpop.eup %1488  ;;  %v811_v43 = vsub.f32 1.5, %v810_v32  ;;  %v1991_v5 = vadd.f32 1e-05, %v724_v27  ;;  %vm2010_vm9 = vcmp.eq.f32.partialorder %v921_v29, 8.507059e+37  ;;  %v847_v23 = vadd.f32 %v1988_v20, %v835_v22 }
 0x124   : > { %v792_v50 = vmul.f32 %v1924_v49, %v791_v34  ;;  %v751_v6 = vsub.f32 1.5, %v750_v37  ;;  %v738_v53 = vmul.f32 %v1489_v40, %v1930_v0  ;;  %v2014_v10 = vpop.eup %1490  ;;  %v845_v58 = vadd.f32 %v1988_v20, %v833_v38 }
 0x125   : > { %v812_v59 = vmul.f32 %v1933_v52, %v811_v43  ;;  %1492 = vrsqrt.f32 %v1991_v5  ;;  %v758_v16 = vmul.f32 %v2014_v10, %v1946_v55  ;;  %vm744_vm13 = vweird.f32 %v1489_v40 }
 0x126   : > { %v796_v4 = vsel %vm795_vm7, %v1924_v49, %v792_v50  ;;  %v752_v46 = vmul.f32 %v1487_v48, %v751_v6  ;;  %v739_v17 = vmul.f32 %v1489_v40, %v738_v53  ;;  %v924_v32 = vor.u32 1.1754944e-38, %v923_v54 }
 0x127   : > { %v822_v2 = vmul.f32 %v796_v4, %v1675_v41  ;;  %v816_v11 = vsel %vm815_vm11, %v1933_v52, %v812_v59  ;;  %v759_v24 = vmul.f32 %v2014_v10, %v758_v16  ;;  %v920_v29 = vsel %vm2031_vm12, %v1880_v8, %v916_v36 }
 0x128   : > { %v756_v9 = vsel %vm2003_vm8, %v1487_v48, %v752_v46  ;;  %v824_v41 = vmul.f32 %v816_v11, %v1673_v39  ;;  %v740_v62 = vmul.f32 0.5, %v739_v17  ;;  %1494 = vpow2.f32 %v1871_v61 }
 0x129   : > { %v818_v52 = vmul.f32 %v756_v9, %v1683_v45  ;;  %v834_v30 = vmul.f32 %v1969_v13, %v822_v2  ;;  %vm743_vm14 = vweird.f32 %v1930_v0  ;;  %v760_v39 = vmul.f32 0.5, %v759_v24 }
 0x12a   : > { %v741_v27 = vsub.f32 1.5, %v740_v62  ;;  %v836_v3 = vmul.f32 %v1969_v13, %v824_v41  ;;  %v910_v34 = vsel %vm1976_vm3, %v909_v18, %v905_v1  ;;  %v1029_v8 = vmul.f32 %v1852_v51, %v845_v58  ;;  %vm745_vm15 = vmor %vm743_vm14, %vm744_vm13 }
 0x12b   : > { %v1493_v48 = vpop.eup %1492  ;;  %v846_v45 = vadd.f32 %v1988_v20, %v834_v30  ;;  %v1031_v43 = vmul.f32 %v1867_v60, %v847_v23  ;;  %v830_v63 = vmul.f32 %v1969_v13, %v818_v52  ;;  %v925_v28 = vsel %vm2010_vm9, %v924_v32, %v920_v29 }
 0x12c   : > { %v742_v37 = vmul.f32 %v1489_v40, %v741_v27  ;;  %v768_v38 = vmul.f32 %v1493_v48, %v1991_v5  ;;  %v848_v61 = vadd.f32 %v1988_v20, %v836_v3  ;;  %v761_v22 = vsub.f32 1.5, %v760_v39 }
 0x12d   : > { %v1030_v0 = vmul.f32 %v1903_v35, %v846_v45  ;;  %v1017_v60 = vmul.f32 %v1391_v15, %v910_v34  ;;  %1496 = vrcp.f32 %v891_v25  ;;  %v842_v54 = vadd.f32 %v1988_v20, %v830_v63 }
 0x12e   : > { %v746_v42 = vsel %vm745_vm15, %v1489_v40, %v742_v37  ;;  %v769_v1 = vmul.f32 %v1493_v48, %v768_v38  ;;  %v1032_v18 = vmul.f32 %v1915_v47, %v848_v61  ;;  %v1495_v6 = vpop.eup %1494  ;;  %v1018_v19 = vmul.f32 %v1392_v14, %v925_v28 }
 0x12f   : > { %v817_v51 = vmul.f32 %v746_v42, %v1681_v44  ;;  %v1043_v50 = vpack.c.bf16 %v1030_v0, %v1029_v8  ;;  %v892_v47 = vadd.f32 1.0, %v1495_v6  ;;  %vm763_vm10 = vweird.f32 %v1946_v55 }
 0x130   : > { %v770_v53 = vmul.f32 0.5, %v769_v1  ;;  %v1044_v35 = vpack.c.bf16 %v1032_v18, %v1031_v43  ;;  %vm764_vm1 = vweird.f32 %v2014_v10  ;;  %v762_v15 = vmul.f32 %v2014_v10, %v761_v22  ;;  %v1038_v1 = vld [vmem:[%s2103_s21 + $0x28] sm:$0xff]  ;;  %v1040_v18 = vld [vmem:[%s2103_s21 + $0x38] sm:$0xff] }
 0x131   : > { %1314 = vmatmul.msk.bf16.vlgmr.msra.gmra.mxu2 %vm641_vm0, %v1043_v50  ;;  %v829_v40 = vmul.f32 %v1969_v13, %v817_v51  ;;  %vm774_vm2 = vweird.f32 %v1493_v48  ;;  %1498 = vrcp.f32 %v892_v47  ;;  %vm2079_vm3 = vmor %vm763_vm10, %vm764_vm1  ;;  %vm773_vm4 = vweird.f32 %v1991_v5  ;;  %v1034_v51 = vld [vmem:[%s2103_s21 + $0x8] sm:$0xff] }
 0x132   : > { %v771_v44 = vsub.f32 1.5, %v770_v53  ;;  %1315 = vmatmul.msk.bf16.vlgmr.msra.gmra.mxu3 %vm641_vm0, %v1044_v35  ;;  %v1026_v14 = vmul.f32 %v1018_v19, %v842_v54  ;;  %vm775_vm5 = vmor %vm773_vm4, %vm774_vm2  ;;  %v766_v7 = vsel %vm2079_vm3, %v2014_v10, %v762_v15  ;;  %v938_v58 = vand.u32 2147483648, %v891_v25  ;;  %v1036_v19 = vld [vmem:[%s2103_s21 + $0x18] sm:$0xff] }
 0x133   : > { %v841_v26 = vadd.f32 %v1988_v20, %v829_v40  ;;  %v1497_v55 = vpop.eup %1496  ;;  %vm932_vm6 = vweird.f32 %v891_v25  ;;  %v936_v16 = vand.u32 2147483647, %v891_v25  ;;  %v819_v5 = vmul.f32 %v766_v7, %v1696_v56 }
 0x134   : > { %v772_v59 = vmul.f32 %v1493_v48, %v771_v44  ;;  %v928_v17 = vmul.f32 %v1497_v55, %v891_v25  ;;  %vm933_vm7 = vweird.f32 %v1497_v55  ;;  %vm947_vm8 = vweird.f32 %v892_v47 }
 0x135   : > { %v1025_v12 = vmul.f32 %v1017_v60, %v841_v26  ;;  %v953_v41 = vand.u32 2147483648, %v892_v47  ;;  %vm934_vm9 = vmor %vm932_vm6, %vm933_vm7  ;;  %v939_v10 = vor.u32 1.1754944e-38, %v938_v58  ;;  %v951_v52 = vand.u32 2147483647, %v892_v47  ;;  %v1035_v60 = vld [vmem:[%s2103_s21 + $0x10] sm:$0xff] }
 0x136   : > { %v776_v4 = vsel %vm775_vm5, %v1493_v48, %v772_v59  ;;  %v929_v11 = vsub.f32 1.0, %v928_v17  ;;  %vm937_vm12 = vcmp.eq.f32.partialorder %v936_v16, 8.507059e+37  ;;  %v831_v30 = vmul.f32 %v1969_v13, %v819_v5 }
 0x137   : > { %v1041_v46 = vpack.c.bf16 %v1026_v14, %v1025_v12  ;;  %v1499_v2 = vpop.eup %1498  ;;  %v820_v23 = vmul.f32 %v776_v4, %v1698_v57  ;;  %v954_v56 = vor.u32 1.1754944e-38, %v953_v41  ;;  %vm952_vm14 = vcmp.eq.f32.partialorder %v951_v52, 8.507059e+37 }
 0x138   : > { %v943_v49 = vmul.f32 %v1499_v2, %v892_v47  ;;  %v930_v9 = vmul.f32 %v1497_v55, %v929_v11  ;;  %vm948_vm11 = vweird.f32 %v1499_v2  ;;  %v843_v48 = vadd.f32 %v1988_v20, %v831_v30 }
 0x139   : > { %1312 = vmatmul.msk.bf16.vlgmr.msra.gmra.mxu0 %vm641_vm0, %v1041_v46  ;;  %v832_v32 = vmul.f32 %v1969_v13, %v820_v23  ;;  %vm949_vm13 = vmor %vm947_vm8, %vm948_vm11 }
 0x13a   : > { %v944_v62 = vsub.f32 1.0, %v943_v49  ;;  %v931_v24 = vadd.f32 %v1497_v55, %v930_v9 }
 0x13b   : > { %v844_v39 = vadd.f32 %v1988_v20, %v832_v32  ;;  %v1039_v20 = vld [vmem:[%s2103_s21 + $0x30] sm:$0xff] }
 0x13c   : > { %v945_v27 = vmul.f32 %v1499_v2, %v944_v62  ;;  %v935_v3 = vsel %vm934_vm9, %v1497_v55, %v931_v24 }
 0x13d   : > { %v940_v57 = vsel %vm937_vm12, %v939_v10, %v935_v3 }
 0x13e   : > { %v946_v29 = vadd.f32 %v1499_v2, %v945_v27  ;;  %v1019_v34 = vmul.f32 %v1395_v31, %v940_v57  ;;  %v1037_v31 = vld [vmem:[%s2103_s21 + $0x20] sm:$0xff] }
 0x140   : > { %v950_v45 = vsel %vm949_vm13, %v1499_v2, %v946_v29  ;;  %v1027_v38 = vmul.f32 %v1019_v34, %v843_v48 }
 0x141   : > { %v955_v37 = vsel %vm952_vm14, %v954_v56, %v950_v45 }
 0x142   : > { %v1020_v13 = vmul.f32 %v1396_v33, %v955_v37  ;;  %v1033_v33 = vld [vmem:[%s2103_s21] sm:$0xff] }
 0x144   : > { %v1028_v8 = vmul.f32 %v1020_v13, %v844_v39 }
 0x146   : > { %v1042_v61 = vpack.c.bf16 %v1028_v8, %v1027_v38 }
 0x148   : > { %1313 = vmatmul.msk.bf16.vlgmr.msra.gmra.mxu1 %vm641_vm0, %v1042_v61  ;;  %vm1099_vm0 = vcmask 31744  }
 0x1b4   : > { %v1081_v21 = vpop.f32.mrf.mxu2 }
 0x1b5   : > { %v1095_v0 = vadd.f32 %v1081_v21, %v1037_v31  ;;  %v1086_v43 = vpop.f32.mrf.mxu3 }
 0x1b6   : > { %v1097_v63 = vadd.f32 %v1086_v43, %v1039_v20  ;;  %v1071_v28 = vpop.f32.mrf.mxu0 }
 0x1b7   : > { %1104 = vst.msk [vmem:[%s2111_s24 + $0x20] sm:$0xff] %vm1099_vm0, %v1095_v0  ;;  %v1091_v42 = vadd.f32 %v1071_v28, %v1033_v33 }
 0x1b8   : > { %1106 = vst.msk [vmem:[%s2111_s24 + $0x30] sm:$0xff] %vm1099_vm0, %v1097_v63 }
 0x1b9   : > { %1100 = vst.msk [vmem:[%s2111_s24] sm:$0xff] %vm1099_vm0, %v1091_v42 }
 0x1bc   : > { %v1083_v25 = vpop.f32.mrf.mxu2 }
 0x1bd   : > { %v1096_v22 = vadd.f32 %v1083_v25, %v1038_v1  ;;  %v1088_v50 = vpop.f32.mrf.mxu3 }
 0x1be   : > { %v1098_v6 = vadd.f32 %v1088_v50, %v1040_v18  ;;  %v1073_v53 = vpop.f32.mrf.mxu0 }
 0x1bf   : > { %1105 = vst.msk [vmem:[%s2111_s24 + $0x28] sm:$0xff] %vm1099_vm0, %v1096_v22  ;;  %v1092_v35 = vadd.f32 %v1073_v53, %v1034_v51 }
 0x1c0   : > { %1107 = vst.msk [vmem:[%s2111_s24 + $0x38] sm:$0xff] %vm1099_vm0, %v1098_v6 }
 0x1c1   : > { %1101 = vst.msk [vmem:[%s2111_s24 + $0x8] sm:$0xff] %vm1099_vm0, %v1092_v35 }
 0x1c5   : > { %v1076_v40 = vpop.f32.mrf.mxu1 }
 0x1c6   : > { %v1093_v54 = vadd.f32 %v1076_v40, %v1035_v60 }
 0x1c8   : > { %1102 = vst.msk [vmem:[%s2111_s24 + $0x10] sm:$0xff] %vm1099_vm0, %v1093_v54 }
 0x1cd   : > { %v1078_v47 = vpop.f32.mrf.mxu1 }
 0x1ce   : > { %v1094_v44 = vadd.f32 %v1078_v47, %v1036_v19 }
 0x1d0   : > { %1103 = vst.msk [vmem:[%s2111_s24 + $0x18] sm:$0xff] %vm1099_vm0, %v1094_v44 }
 0x1d1 PF: > { %s19_s11 = sadd.s32 1, %s1522_s11   ;;  %s2182_s30 = smov %s1518_s10 }
 0x1d2   : > { %p16_p5 = scmp.ge.s32.totalorder %s19_s11, 4   ;;  %s2183_s10 = smov %s2185_s12 }
 0x1d4   :  { %18 = sbr.rel (!%p16_p5) target bundleno = 2 (0x2), region = 101 }

</bundles_post_ra>
